<compile_context>
chip_gen: v5e
topology: v5e:2x2
jax: 0.10.0
libtpu: 0.0.40
codegen_flags: <defaults>
</compile_context>

<pallas_src>
import functools

import jax
import jax.numpy as jnp
from jax import lax
from jax.experimental import pallas as pl
from jax.experimental.pallas import tpu as pltpu

EPS = 1e-5


def _round_up(x, m):
    return (x + m - 1) // m * m


def _fused_block_kernel(x_ref, w1_ref, b1_ref, w2_ref, b2_ref, o_ref,
                        *, tr, wo_p, stride, row_slabs):
    """One (batch, row-block) grid step.

    x_ref : (1, slab_h or Hs, Ws, s*s*Cin_p) bf16  phase-split padded input
    w1_ref: (9*Cin_p, Cin_p) bf16  3x3 conv weights, tap-major, BN folded
    b1_ref: (1, Cin_p)       f32   folded conv1+BN1 bias
    w2_ref: (Cin_p, Cout_p)  bf16  1x1 conv weights, BN folded
    b2_ref: (1, Cout_p)      f32   folded conv2+BN2 bias
    o_ref : (1, tr, wo_p, Cout_p) bf16
    """
    s = stride
    cin_p = x_ref.shape[-1] // (s * s)
    m = tr * wo_p

    if row_slabs:
        row0 = 0                         # slab already starts at this block's rows
    else:
        row0 = pl.program_id(1) * tr     # whole image resident (fallback path)
        if tr % 8 == 0:
            row0 = pl.multiple_of(row0, 8)

    # conv1 (3x3, pad=1, stride=s) as ONE K-fused MXU matmul: the nine taps are
    # concatenated along the contraction axis (K = 9*Cin_p), so accumulation
    # happens inside the MXU instead of nine chained VPU adds.
    taps = []
    for kh in range(3):
        for kw in range(3):
            ph = (kh % s) * s + (kw % s)         # space-to-depth phase plane
            xa = x_ref[0,
                       pl.ds(row0 + kh // s, tr),
                       pl.ds(kw // s, wo_p),
                       pl.ds(ph * cin_p, cin_p)]
            taps.append(xa.reshape(m, cin_p))    # wo_p%8==0, cin_p%128==0 -> free
    xcat = jnp.concatenate(taps, axis=-1)        # (m, 9*Cin_p) bf16

    h = jnp.dot(xcat, w1_ref[...], preferred_element_type=jnp.float32)
    h = jnp.maximum(h + b1_ref[...], 0.0).astype(jnp.bfloat16)
    y = jnp.dot(h, w2_ref[...], preferred_element_type=jnp.float32)
    y = jnp.maximum(y + b2_ref[...], 0.0)
    o_ref[...] = y.reshape(1, tr, wo_p, -1).astype(o_ref.dtype)


def depthwise_block_forward(x_nchw, params, stride=1, tr=None):
    """Pallas implementation of depthwise_block.forward (eval-mode BN, groups=1)."""
    n, cin, h, w = x_nchw.shape
    cout = params["w2"].shape[0]
    s = int(stride)
    cin_p = _round_up(cin, 128)
    cout_p = _round_up(cout, 128)

    ho = (h + 2 - 3) // s + 1
    wo = (w + 2 - 3) // s + 1
    wo_p = _round_up(wo, 8)                 # sublane-dense output columns

    # Rows per grid step: keep m = tr*wo_p >= ~256 so the MXU and the ~0.35us
    # per-step grid overhead stay amortised; small images run in one step.
    if tr is None:
        tr = min(ho, max(8, pl.cdiv(256, wo_p)))
    tr = max(1, min(int(tr), ho))
    ho_pad = pl.cdiv(ho, tr) * tr
    n_row_blocks = ho_pad // tr

    halo = 2 // s                           # extra phase rows/cols a 3x3 tap needs
    hs = ho_pad + halo                      # phase-space rows the kernel touches
    ws = wo_p + halo
    slab_h = tr + halo
    c_tot = s * s * cin_p

    # NCHW -> NHWC in bf16, conv zero padding (+ alignment padding), then a
    # space-to-depth split by the stride so every tap becomes a dense,
    # lane-aligned window inside the kernel.
    x_nhwc = jnp.transpose(x_nchw, (0, 2, 3, 1)).astype(jnp.bfloat16)
    pad_b = max(0, hs * s - (h + 1))
    pad_r = max(0, ws * s - (w + 1))
    x_pad = jnp.pad(x_nhwc, ((0, 0), (1, pad_b), (1, pad_r), (0, cin_p - cin)))
    x_pad = x_pad[:, :hs * s, :ws * s, :]
    x_ph = x_pad.reshape(n, hs, s, ws, s, cin_p)
    x_ph = x_ph.transpose(0, 1, 3, 2, 4, 5).reshape(n, hs, ws, c_tot)

    # Fold eval-mode BN into the conv weights (scale) and per-channel biases.
    s1 = params["gamma1"] / jnp.sqrt(params["var1"] + EPS)
    b1 = params["beta1"] + (params["b1"] - params["mean1"]) * s1
    s2 = params["gamma2"] / jnp.sqrt(params["var2"] + EPS)
    b2 = params["beta2"] + (params["b2"] - params["mean2"]) * s2

    # conv1 (O=cin, I=cin, 3, 3) -> tap-major (9*Cin_p, Cin_p) matrix, BN-scaled.
    w1_t = jnp.transpose(params["w1"], (2, 3, 1, 0)) * s1[None, None, None, :]
    w1_t = w1_t.reshape(9, cin, cin)
    w1_p = jnp.zeros((9, cin_p, cin_p), jnp.float32).at[:, :cin, :cin].set(w1_t)
    w1_p = w1_p.reshape(9 * cin_p, cin_p).astype(jnp.bfloat16)

    # conv2 (cout, cin, 1, 1) -> (Cin_p, Cout_p), BN-scaled.
    w2_m = params["w2"][:, :, 0, 0].T * s2[None, :]
    w2_p = jnp.zeros((cin_p, cout_p), jnp.float32).at[:cin, :cout].set(w2_m)
    w2_p = w2_p.astype(jnp.bfloat16)

    b1_p = jnp.zeros((1, cin_p), jnp.float32).at[0, :cin].set(b1)
    b2_p = jnp.zeros((1, cout_p), jnp.float32).at[0, :cout].set(b2)

    def call(row_slabs, single_buffer):
        kernel = functools.partial(_fused_block_kernel, tr=tr, wo_p=wo_p,
                                   stride=s, row_slabs=row_slabs)

        if row_slabs:
            # Overlapping row slab with halo (element-offset indexing on the
            # row dim): per-step DMA ~ tr rows instead of the whole image.
            x_spec = pl.BlockSpec((1, pl.Element(slab_h), ws, c_tot),
                                  lambda b, r: (b, r * tr, 0, 0))
        else:
            # Fallback: whole padded image resident per batch element.
            x_spec = pl.BlockSpec((1, hs, ws, c_tot), lambda b, r: (b, 0, 0, 0))

        def invariant(shape):
            # Grid-invariant operands: single-buffer to halve their VMEM use.
            if single_buffer:
                return pl.BlockSpec(shape, lambda b, r: (0,) * len(shape),
                                    pipeline_mode=pl.Buffered(1))
            return pl.BlockSpec(shape, lambda b, r: (0,) * len(shape))

        # Explicit scoped-VMEM budget from the actual block sizes (+ headroom
        # for the K-fused conv1 operand and the f32 epilogue intermediates).
        m = tr * wo_p
        x_blk = (slab_h if row_slabs else hs) * ws * c_tot * 2
        w_blk = (9 * cin_p * cin_p + cin_p * cout_p) * 2 + (cin_p + cout_p) * 4
        o_blk = tr * wo_p * cout_p * 2
        inter = m * (9 * cin_p * 2 + cin_p * 6 + cout_p * 4)
        need = 2 * x_blk + (1 if single_buffer else 2) * w_blk + 2 * o_blk + inter
        vmem_limit = int(min(64 << 20, max(32 << 20, 2 * need)))

        out = pl.pallas_call(
            kernel,
            out_shape=jax.ShapeDtypeStruct((n, ho_pad, wo_p, cout_p), jnp.bfloat16),
            grid_spec=pltpu.PrefetchScalarGridSpec(
                num_scalar_prefetch=0,
                grid=(n, n_row_blocks),
                in_specs=[
                    x_spec,
                    invariant((9 * cin_p, cin_p)),
                    invariant((1, cin_p)),
                    invariant((cin_p, cout_p)),
                    invariant((1, cout_p)),
                ],
                out_specs=pl.BlockSpec((1, tr, wo_p, cout_p),
                                       lambda b, r: (b, r, 0, 0)),
            ),
            compiler_params=pltpu.CompilerParams(
                dimension_semantics=("parallel", "parallel"),
                vmem_limit_bytes=vmem_limit),
        )(x_ph, w1_p, b1_p, w2_p, b2_p)
        return jax.block_until_ready(out)

    # Preferred config first; degrade gracefully if this jax/Mosaic build lacks
    # element-offset row slabs or single-buffered pipeline_mode.
    last_err = None
    out = None
    for row_slabs, single_buffer in ((True, True), (True, False),
                                     (False, True), (False, False)):
        try:
            out = call(row_slabs, single_buffer)
            break
        except Exception as err:   # compiler-compatibility fallback only
            last_err = err
    if out is None:
        raise last_err

    out = out[:, :ho, :wo, :cout]                # strip row/col/channel padding
    out = jnp.transpose(out, (0, 3, 1, 2))       # back to NCHW
    # TODO(synk): keep bf16 here if the consuming layer accepts it (halves the
    # downstream HBM traffic); f32 kept to match the PyTorch module's dtype.
    return out.astype(jnp.float32)


def _ref_forward(x, p, stride):
    """Pure-JAX f32 reference mirroring the PyTorch module (eval-mode BN)."""
    def bn(y, g, b, mu, var):
        return (y - mu[None, :, None, None]) / jnp.sqrt(var + EPS)[None, :, None, None] \
               * g[None, :, None, None] + b[None, :, None, None]

    y = lax.conv_general_dilated(x, p["w1"], (stride, stride), ((1, 1), (1, 1)),
                                 dimension_numbers=("NCHW", "OIHW", "NCHW"))
    y = y + p["b1"][None, :, None, None]
    y = jnp.maximum(bn(y, p["gamma1"], p["beta1"], p["mean1"], p["var1"]), 0.0)
    y = lax.conv_general_dilated(y, p["w2"], (1, 1), ((0, 0), (0, 0)),
                                 dimension_numbers=("NCHW", "OIHW", "NCHW"))
    y = y + p["b2"][None, :, None, None]
    y = jnp.maximum(bn(y, p["gamma2"], p["beta2"], p["mean2"], p["var2"]), 0.0)
    return y


def _make_params(key, in_channels, out_channels):
    ks = jax.random.split(key, 8)
    f32 = jnp.float32
    return {
        # conv1: (in, in, 3, 3), groups=1 (module default)
        "w1": 0.1 * jax.random.normal(ks[0], (in_channels, in_channels, 3, 3), f32),
        "b1": 0.05 * jax.random.normal(ks[1], (in_channels,), f32),
        "gamma1": 1.0 + 0.1 * jax.random.normal(ks[2], (in_channels,), f32),
        "beta1": 0.1 * jax.random.normal(ks[3], (in_channels,), f32),
        "mean1": 0.1 * jax.random.normal(ks[4], (in_channels,), f32),
        "var1": 0.5 + jnp.abs(0.2 * jax.random.normal(ks[5], (in_channels,), f32)),
        # conv2: (out, in, 1, 1)
        "w2": 0.1 * jax.random.normal(ks[6], (out_channels, in_channels, 1, 1), f32),
        "b2": 0.05 * jax.random.normal(ks[7], (out_channels,), f32),
        "gamma2": 1.0 + 0.1 * jax.random.normal(ks[2], (out_channels,), f32),
        "beta2": 0.1 * jax.random.normal(ks[3], (out_channels,), f32),
        "mean2": 0.1 * jax.random.normal(ks[4], (out_channels,), f32),
        "var2": 0.5 + jnp.abs(0.2 * jax.random.normal(ks[5], (out_channels,), f32)),
    }


if __name__ == "__main__":
    key = jax.random.PRNGKey(0)
    k_x, k_p = jax.random.split(key)

    batch, in_channels, out_channels, spatial = 2, 4, 8, 16
    x = jax.random.normal(k_x, (batch, in_channels, spatial, spatial), jnp.float32)
    params = _make_params(k_p, in_channels, out_channels)

    test_cases = [
        dict(stride=1, tr=None),   # whole image per grid step
        dict(stride=1, tr=4),      # multiple overlapping row slabs (r > 0)
        dict(stride=2, tr=None),   # strided conv via space-to-depth phases
        dict(stride=2, tr=3),      # row blocks + row padding (ho % tr != 0)
    ]
    for case in test_cases:
        out = depthwise_block_forward(x, params, stride=case["stride"], tr=case["tr"])
        out = jax.block_until_ready(out)
        ref = _ref_forward(x, params, case["stride"])
        assert out.shape == ref.shape, (case, out.shape, ref.shape)
        # bf16 activations/weights/output (f32 accumulation) -> loose tolerance.
        assert jnp.allclose(out, ref, rtol=3e-2, atol=3e-2), \
            (case, float(jnp.max(jnp.abs(out - ref))))

    print("KERNEL_OK")
</pallas_src>

<mosaic_0001>
module attributes {stable_mosaic.version = 11 : i64} {
  func.func @_fused_block_kernel(%arg0: i32, %arg1: i32, %arg2: memref<1x18x18x128xbf16, #tpu.memory_space<vmem>>, %arg3: memref<1152x128xbf16, #tpu.memory_space<vmem>>, %arg4: memref<1x128xf32, #tpu.memory_space<vmem>>, %arg5: memref<128x128xbf16, #tpu.memory_space<vmem>>, %arg6: memref<1x128xf32, #tpu.memory_space<vmem>>, %arg7: memref<1x16x16x128xbf16, #tpu.memory_space<vmem>>) attributes {dimension_semantics = [#tpu.dimension_semantics<parallel>, #tpu.dimension_semantics<parallel>], iteration_bounds = array<i64: 2, 1>, scalar_prefetch = 0 : i64, scratch_operands = 0 : i64, tpu.core_type = #tpu.core_type<tc>, window_params = [{transform_indices = @transform_0, window_bounds = array<i64: 1, 18, 18, 128>}, {pipeline_mode = #tpu.pipeline_mode<synchronous>, transform_indices = @transform_1, window_bounds = array<i64: 1152, 128>}, {pipeline_mode = #tpu.pipeline_mode<synchronous>, transform_indices = @transform_2, window_bounds = array<i64: 1, 128>}, {pipeline_mode = #tpu.pipeline_mode<synchronous>, transform_indices = @transform_3, window_bounds = array<i64: 128, 128>}, {pipeline_mode = #tpu.pipeline_mode<synchronous>, transform_indices = @transform_4, window_bounds = array<i64: 1, 128>}, {transform_indices = @transform_5, window_bounds = array<i64: 1, 16, 16, 128>}]} {
    %c16_i32 = arith.constant 16 : i32
    %0 = arith.muli %arg1, %c16_i32 : i32
    %1 = tpu.assume_multiple %0, 8 : i32
    %c0_i32 = arith.constant 0 : i32
    %2 = arith.addi %1, %c0_i32 : i32
    %c0 = arith.constant 0 : index
    %3 = arith.index_cast %2 : i32 to index
    %c0_0 = arith.constant 0 : index
    %c0_1 = arith.constant 0 : index
    %4 = vector.load %arg2[%c0, %3, %c0_0, %c0_1] : memref<1x18x18x128xbf16, #tpu.memory_space<vmem>>, vector<1x16x16x128xbf16>
    %5 = vector.shape_cast %4 : vector<1x16x16x128xbf16> to vector<16x16x128xbf16>
    %6 = vector.shape_cast %5 : vector<16x16x128xbf16> to vector<256x128xbf16>
    %c0_i32_2 = arith.constant 0 : i32
    %7 = arith.addi %1, %c0_i32_2 : i32
    %c0_3 = arith.constant 0 : index
    %8 = arith.index_cast %7 : i32 to index
    %c1 = arith.constant 1 : index
    %c0_4 = arith.constant 0 : index
    %9 = vector.load %arg2[%c0_3, %8, %c1, %c0_4] : memref<1x18x18x128xbf16, #tpu.memory_space<vmem>>, vector<1x16x16x128xbf16>
    %10 = vector.shape_cast %9 : vector<1x16x16x128xbf16> to vector<16x16x128xbf16>
    %11 = vector.shape_cast %10 : vector<16x16x128xbf16> to vector<256x128xbf16>
    %c0_i32_5 = arith.constant 0 : i32
    %12 = arith.addi %1, %c0_i32_5 : i32
    %c0_6 = arith.constant 0 : index
    %13 = arith.index_cast %12 : i32 to index
    %c2 = arith.constant 2 : index
    %c0_7 = arith.constant 0 : index
    %14 = vector.load %arg2[%c0_6, %13, %c2, %c0_7] : memref<1x18x18x128xbf16, #tpu.memory_space<vmem>>, vector<1x16x16x128xbf16>
    %15 = vector.shape_cast %14 : vector<1x16x16x128xbf16> to vector<16x16x128xbf16>
    %16 = vector.shape_cast %15 : vector<16x16x128xbf16> to vector<256x128xbf16>
    %c1_i32 = arith.constant 1 : i32
    %17 = arith.addi %1, %c1_i32 : i32
    %c0_8 = arith.constant 0 : index
    %18 = arith.index_cast %17 : i32 to index
    %c0_9 = arith.constant 0 : index
    %c0_10 = arith.constant 0 : index
    %19 = vector.load %arg2[%c0_8, %18, %c0_9, %c0_10] : memref<1x18x18x128xbf16, #tpu.memory_space<vmem>>, vector<1x16x16x128xbf16>
    %20 = vector.shape_cast %19 : vector<1x16x16x128xbf16> to vector<16x16x128xbf16>
    %21 = vector.shape_cast %20 : vector<16x16x128xbf16> to vector<256x128xbf16>
    %c1_i32_11 = arith.constant 1 : i32
    %22 = arith.addi %1, %c1_i32_11 : i32
    %c0_12 = arith.constant 0 : index
    %23 = arith.index_cast %22 : i32 to index
    %c1_13 = arith.constant 1 : index
    %c0_14 = arith.constant 0 : index
    %24 = vector.load %arg2[%c0_12, %23, %c1_13, %c0_14] : memref<1x18x18x128xbf16, #tpu.memory_space<vmem>>, vector<1x16x16x128xbf16>
    %25 = vector.shape_cast %24 : vector<1x16x16x128xbf16> to vector<16x16x128xbf16>
    %26 = vector.shape_cast %25 : vector<16x16x128xbf16> to vector<256x128xbf16>
    %c1_i32_15 = arith.constant 1 : i32
    %27 = arith.addi %1, %c1_i32_15 : i32
    %c0_16 = arith.constant 0 : index
    %28 = arith.index_cast %27 : i32 to index
    %c2_17 = arith.constant 2 : index
    %c0_18 = arith.constant 0 : index
    %29 = vector.load %arg2[%c0_16, %28, %c2_17, %c0_18] : memref<1x18x18x128xbf16, #tpu.memory_space<vmem>>, vector<1x16x16x128xbf16>
    %30 = vector.shape_cast %29 : vector<1x16x16x128xbf16> to vector<16x16x128xbf16>
    %31 = vector.shape_cast %30 : vector<16x16x128xbf16> to vector<256x128xbf16>
    %c2_i32 = arith.constant 2 : i32
    %32 = arith.addi %1, %c2_i32 : i32
    %c0_19 = arith.constant 0 : index
    %33 = arith.index_cast %32 : i32 to index
    %c0_20 = arith.constant 0 : index
    %c0_21 = arith.constant 0 : index
    %34 = vector.load %arg2[%c0_19, %33, %c0_20, %c0_21] : memref<1x18x18x128xbf16, #tpu.memory_space<vmem>>, vector<1x16x16x128xbf16>
    %35 = vector.shape_cast %34 : vector<1x16x16x128xbf16> to vector<16x16x128xbf16>
    %36 = vector.shape_cast %35 : vector<16x16x128xbf16> to vector<256x128xbf16>
    %c2_i32_22 = arith.constant 2 : i32
    %37 = arith.addi %1, %c2_i32_22 : i32
    %c0_23 = arith.constant 0 : index
    %38 = arith.index_cast %37 : i32 to index
    %c1_24 = arith.constant 1 : index
    %c0_25 = arith.constant 0 : index
    %39 = vector.load %arg2[%c0_23, %38, %c1_24, %c0_25] : memref<1x18x18x128xbf16, #tpu.memory_space<vmem>>, vector<1x16x16x128xbf16>
    %40 = vector.shape_cast %39 : vector<1x16x16x128xbf16> to vector<16x16x128xbf16>
    %41 = vector.shape_cast %40 : vector<16x16x128xbf16> to vector<256x128xbf16>
    %c2_i32_26 = arith.constant 2 : i32
    %42 = arith.addi %1, %c2_i32_26 : i32
    %c0_27 = arith.constant 0 : index
    %43 = arith.index_cast %42 : i32 to index
    %c2_28 = arith.constant 2 : index
    %c0_29 = arith.constant 0 : index
    %44 = vector.load %arg2[%c0_27, %43, %c2_28, %c0_29] : memref<1x18x18x128xbf16, #tpu.memory_space<vmem>>, vector<1x16x16x128xbf16>
    %45 = vector.shape_cast %44 : vector<1x16x16x128xbf16> to vector<16x16x128xbf16>
    %46 = vector.shape_cast %45 : vector<16x16x128xbf16> to vector<256x128xbf16>
    %47 = tpu.concatenate %6, %11, %16, %21, %26, %31, %36, %41, %46 in 1 : vector<256x128xbf16>, vector<256x128xbf16>, vector<256x128xbf16>, vector<256x128xbf16>, vector<256x128xbf16>, vector<256x128xbf16>, vector<256x128xbf16>, vector<256x128xbf16>, vector<256x128xbf16> -> vector<256x1152xbf16>
    %c0_30 = arith.constant 0 : index
    %c0_31 = arith.constant 0 : index
    %48 = vector.load %arg3[%c0_30, %c0_31] : memref<1152x128xbf16, #tpu.memory_space<vmem>>, vector<1152x128xbf16>
    %cst = arith.constant dense<0.000000e+00> : vector<256x128xf32>
    %49 = tpu.matmul %47, %48, %cst {dimension_numbers = #tpu.dot_dimension_numbers<[1], [0], [0], [1], [0, 0, 1, 1], [], []>} : vector<256x1152xbf16>, vector<1152x128xbf16>, vector<256x128xf32> -> vector<256x128xf32>
    %c0_32 = arith.constant 0 : index
    %c0_33 = arith.constant 0 : index
    %50 = vector.load %arg4[%c0_32, %c0_33] : memref<1x128xf32, #tpu.memory_space<vmem>>, vector<1x128xf32>
    %51 = vector.broadcast %50 : vector<1x128xf32> to vector<256x128xf32>
    %52 = arith.addf %49, %51 : vector<256x128xf32>
    %cst_34 = arith.constant 0.000000e+00 : f32
    %53 = vector.broadcast %cst_34 : f32 to vector<256x128xf32>
    %54 = arith.maximumf %52, %53 : vector<256x128xf32>
    %55 = arith.truncf %54 : vector<256x128xf32> to vector<256x128xbf16>
    %c0_35 = arith.constant 0 : index
    %c0_36 = arith.constant 0 : index
    %56 = vector.load %arg5[%c0_35, %c0_36] : memref<128x128xbf16, #tpu.memory_space<vmem>>, vector<128x128xbf16>
    %cst_37 = arith.constant dense<0.000000e+00> : vector<256x128xf32>
    %57 = tpu.matmul %55, %56, %cst_37 {dimension_numbers = #tpu.dot_dimension_numbers<[1], [0], [0], [1], [0, 0, 1, 1], [], []>} : vector<256x128xbf16>, vector<128x128xbf16>, vector<256x128xf32> -> vector<256x128xf32>
    %c0_38 = arith.constant 0 : index
    %c0_39 = arith.constant 0 : index
    %58 = vector.load %arg6[%c0_38, %c0_39] : memref<1x128xf32, #tpu.memory_space<vmem>>, vector<1x128xf32>
    %59 = vector.broadcast %58 : vector<1x128xf32> to vector<256x128xf32>
    %60 = arith.addf %57, %59 : vector<256x128xf32>
    %cst_40 = arith.constant 0.000000e+00 : f32
    %61 = vector.broadcast %cst_40 : f32 to vector<256x128xf32>
    %62 = arith.maximumf %60, %61 : vector<256x128xf32>
    %63 = vector.shape_cast %62 : vector<256x128xf32> to vector<1x16x16x128xf32>
    %64 = arith.truncf %63 : vector<1x16x16x128xf32> to vector<1x16x16x128xbf16>
    %c0_41 = arith.constant 0 : index
    %c0_42 = arith.constant 0 : index
    %c0_43 = arith.constant 0 : index
    %c0_44 = arith.constant 0 : index
    %65 = vector.load %arg7[%c0_41, %c0_42, %c0_43, %c0_44] : memref<1x16x16x128xbf16, #tpu.memory_space<vmem>>, vector<1x16x16x128xbf16>
    tpu.vector_store %arg7[%c0_41, %c0_42, %c0_43, %c0_44], %64 {strides = array<i32>} : memref<1x16x16x128xbf16, #tpu.memory_space<vmem>>, vector<1x16x16x128xbf16>,
    return
  }
  func.func @transform_0(%arg0: i32, %arg1: i32) -> (i32, i32, i32, i32) {
    %c0_i32 = arith.constant 0 : i32
    %c0_i32_0 = arith.constant 0 : i32
    %c0_i32_1 = arith.constant 0 : i32
    %c0_i32_2 = arith.constant 0 : i32
    return %arg0, %c0_i32, %c0_i32_0, %c0_i32_1 : i32, i32, i32, i32
  }
  func.func @transform_1(%arg0: i32, %arg1: i32) -> (i32, i32) {
    %c0_i32 = arith.constant 0 : i32
    %c0_i32_0 = arith.constant 0 : i32
    %c0_i32_1 = arith.constant 0 : i32
    return %c0_i32, %c0_i32_0 : i32, i32
  }
  func.func @transform_2(%arg0: i32, %arg1: i32) -> (i32, i32) {
    %c0_i32 = arith.constant 0 : i32
    %c0_i32_0 = arith.constant 0 : i32
    %c0_i32_1 = arith.constant 0 : i32
    return %c0_i32, %c0_i32_0 : i32, i32
  }
  func.func @transform_3(%arg0: i32, %arg1: i32) -> (i32, i32) {
    %c0_i32 = arith.constant 0 : i32
    %c0_i32_0 = arith.constant 0 : i32
    %c0_i32_1 = arith.constant 0 : i32
    return %c0_i32, %c0_i32_0 : i32, i32
  }
  func.func @transform_4(%arg0: i32, %arg1: i32) -> (i32, i32) {
    %c0_i32 = arith.constant 0 : i32
    %c0_i32_0 = arith.constant 0 : i32
    %c0_i32_1 = arith.constant 0 : i32
    return %c0_i32, %c0_i32_0 : i32, i32
  }
  func.func @transform_5(%arg0: i32, %arg1: i32) -> (i32, i32, i32, i32) {
    %c0_i32 = arith.constant 0 : i32
    %c0_i32_0 = arith.constant 0 : i32
    %c0_i32_1 = arith.constant 0 : i32
    return %arg0, %arg1, %c0_i32, %c0_i32_0 : i32, i32, i32, i32
  }
}

module attributes {stable_mosaic.version = 11 : i64} {
  func.func @_fused_block_kernel(%arg0: i32, %arg1: i32, %arg2: memref<1x18x18x128xbf16, #tpu.memory_space<vmem>>, %arg3: memref<1152x128xbf16, #tpu.memory_space<vmem>>, %arg4: memref<1x128xf32, #tpu.memory_space<vmem>>, %arg5: memref<128x128xbf16, #tpu.memory_space<vmem>>, %arg6: memref<1x128xf32, #tpu.memory_space<vmem>>, %arg7: memref<1x16x16x128xbf16, #tpu.memory_space<vmem>>) attributes {dimension_semantics = [#tpu.dimension_semantics<parallel>, #tpu.dimension_semantics<parallel>], iteration_bounds = array<i64: 2, 1>, scalar_prefetch = 0 : i64, scratch_operands = 0 : i64, tpu.core_type = #tpu.core_type<tc>, window_params = [{transform_indices = @transform_0, window_bounds = array<i64: 1, 18, 18, 128>}, {pipeline_mode = #tpu.pipeline_mode<synchronous>, transform_indices = @transform_1, window_bounds = array<i64: 1152, 128>}, {pipeline_mode = #tpu.pipeline_mode<synchronous>, transform_indices = @transform_2, window_bounds = array<i64: 1, 128>}, {pipeline_mode = #tpu.pipeline_mode<synchronous>, transform_indices = @transform_3, window_bounds = array<i64: 128, 128>}, {pipeline_mode = #tpu.pipeline_mode<synchronous>, transform_indices = @transform_4, window_bounds = array<i64: 1, 128>}, {transform_indices = @transform_5, window_bounds = array<i64: 1, 16, 16, 128>}]} {
    %c16_i32 = arith.constant 16 : i32
    %0 = arith.muli %arg1, %c16_i32 : i32
    %1 = tpu.assume_multiple %0, 8 : i32
    %c0_i32 = arith.constant 0 : i32
    %2 = arith.addi %1, %c0_i32 : i32
    %c0 = arith.constant 0 : index
    %3 = arith.index_cast %2 : i32 to index
    %c0_0 = arith.constant 0 : index
    %c0_1 = arith.constant 0 : index
    %4 = vector.load %arg2[%c0, %3, %c0_0, %c0_1] : memref<1x18x18x128xbf16, #tpu.memory_space<vmem>>, vector<1x16x16x128xbf16>
    %5 = vector.shape_cast %4 : vector<1x16x16x128xbf16> to vector<16x16x128xbf16>
    %6 = vector.shape_cast %5 : vector<16x16x128xbf16> to vector<256x128xbf16>
    %c0_i32_2 = arith.constant 0 : i32
    %7 = arith.addi %1, %c0_i32_2 : i32
    %c0_3 = arith.constant 0 : index
    %8 = arith.index_cast %7 : i32 to index
    %c1 = arith.constant 1 : index
    %c0_4 = arith.constant 0 : index
    %9 = vector.load %arg2[%c0_3, %8, %c1, %c0_4] : memref<1x18x18x128xbf16, #tpu.memory_space<vmem>>, vector<1x16x16x128xbf16>
    %10 = vector.shape_cast %9 : vector<1x16x16x128xbf16> to vector<16x16x128xbf16>
    %11 = vector.shape_cast %10 : vector<16x16x128xbf16> to vector<256x128xbf16>
    %c0_i32_5 = arith.constant 0 : i32
    %12 = arith.addi %1, %c0_i32_5 : i32
    %c0_6 = arith.constant 0 : index
    %13 = arith.index_cast %12 : i32 to index
    %c2 = arith.constant 2 : index
    %c0_7 = arith.constant 0 : index
    %14 = vector.load %arg2[%c0_6, %13, %c2, %c0_7] : memref<1x18x18x128xbf16, #tpu.memory_space<vmem>>, vector<1x16x16x128xbf16>
    %15 = vector.shape_cast %14 : vector<1x16x16x128xbf16> to vector<16x16x128xbf16>
    %16 = vector.shape_cast %15 : vector<16x16x128xbf16> to vector<256x128xbf16>
    %c1_i32 = arith.constant 1 : i32
    %17 = arith.addi %1, %c1_i32 : i32
    %c0_8 = arith.constant 0 : index
    %18 = arith.index_cast %17 : i32 to index
    %c0_9 = arith.constant 0 : index
    %c0_10 = arith.constant 0 : index
    %19 = vector.load %arg2[%c0_8, %18, %c0_9, %c0_10] : memref<1x18x18x128xbf16, #tpu.memory_space<vmem>>, vector<1x16x16x128xbf16>
    %20 = vector.shape_cast %19 : vector<1x16x16x128xbf16> to vector<16x16x128xbf16>
    %21 = vector.shape_cast %20 : vector<16x16x128xbf16> to vector<256x128xbf16>
    %c1_i32_11 = arith.constant 1 : i32
    %22 = arith.addi %1, %c1_i32_11 : i32
    %c0_12 = arith.constant 0 : index
    %23 = arith.index_cast %22 : i32 to index
    %c1_13 = arith.constant 1 : index
    %c0_14 = arith.constant 0 : index
    %24 = vector.load %arg2[%c0_12, %23, %c1_13, %c0_14] : memref<1x18x18x128xbf16, #tpu.memory_space<vmem>>, vector<1x16x16x128xbf16>
    %25 = vector.shape_cast %24 : vector<1x16x16x128xbf16> to vector<16x16x128xbf16>
    %26 = vector.shape_cast %25 : vector<16x16x128xbf16> to vector<256x128xbf16>
    %c1_i32_15 = arith.constant 1 : i32
    %27 = arith.addi %1, %c1_i32_15 : i32
    %c0_16 = arith.constant 0 : index
    %28 = arith.index_cast %27 : i32 to index
    %c2_17 = arith.constant 2 : index
    %c0_18 = arith.constant 0 : index
    %29 = vector.load %arg2[%c0_16, %28, %c2_17, %c0_18] : memref<1x18x18x128xbf16, #tpu.memory_space<vmem>>, vector<1x16x16x128xbf16>
    %30 = vector.shape_cast %29 : vector<1x16x16x128xbf16> to vector<16x16x128xbf16>
    %31 = vector.shape_cast %30 : vector<16x16x128xbf16> to vector<256x128xbf16>
    %c2_i32 = arith.constant 2 : i32
    %32 = arith.addi %1, %c2_i32 : i32
    %c0_19 = arith.constant 0 : index
    %33 = arith.index_cast %32 : i32 to index
    %c0_20 = arith.constant 0 : index
    %c0_21 = arith.constant 0 : index
    %34 = vector.load %arg2[%c0_19, %33, %c0_20, %c0_21] : memref<1x18x18x128xbf16, #tpu.memory_space<vmem>>, vector<1x16x16x128xbf16>
    %35 = vector.shape_cast %34 : vector<1x16x16x128xbf16> to vector<16x16x128xbf16>
    %36 = vector.shape_cast %35 : vector<16x16x128xbf16> to vector<256x128xbf16>
    %c2_i32_22 = arith.constant 2 : i32
    %37 = arith.addi %1, %c2_i32_22 : i32
    %c0_23 = arith.constant 0 : index
    %38 = arith.index_cast %37 : i32 to index
    %c1_24 = arith.constant 1 : index
    %c0_25 = arith.constant 0 : index
    %39 = vector.load %arg2[%c0_23, %38, %c1_24, %c0_25] : memref<1x18x18x128xbf16, #tpu.memory_space<vmem>>, vector<1x16x16x128xbf16>
    %40 = vector.shape_cast %39 : vector<1x16x16x128xbf16> to vector<16x16x128xbf16>
    %41 = vector.shape_cast %40 : vector<16x16x128xbf16> to vector<256x128xbf16>
    %c2_i32_26 = arith.constant 2 : i32
    %42 = arith.addi %1, %c2_i32_26 : i32
    %c0_27 = arith.constant 0 : index
    %43 = arith.index_cast %42 : i32 to index
    %c2_28 = arith.constant 2 : index
    %c0_29 = arith.constant 0 : index
    %44 = vector.load %arg2[%c0_27, %43, %c2_28, %c0_29] : memref<1x18x18x128xbf16, #tpu.memory_space<vmem>>, vector<1x16x16x128xbf16>
    %45 = vector.shape_cast %44 : vector<1x16x16x128xbf16> to vector<16x16x128xbf16>
    %46 = vector.shape_cast %45 : vector<16x16x128xbf16> to vector<256x128xbf16>
    %47 = tpu.concatenate %6, %11, %16, %21, %26, %31, %36, %41, %46 in 1 : vector<256x128xbf16>, vector<256x128xbf16>, vector<256x128xbf16>, vector<256x128xbf16>, vector<256x128xbf16>, vector<256x128xbf16>, vector<256x128xbf16>, vector<256x128xbf16>, vector<256x128xbf16> -> vector<256x1152xbf16>
    %c0_30 = arith.constant 0 : index
    %c0_31 = arith.constant 0 : index
    %48 = vector.load %arg3[%c0_30, %c0_31] : memref<1152x128xbf16, #tpu.memory_space<vmem>>, vector<1152x128xbf16>
    %cst = arith.constant dense<0.000000e+00> : vector<256x128xf32>
    %49 = tpu.matmul %47, %48, %cst {dimension_numbers = #tpu.dot_dimension_numbers<[1], [0], [0], [1], [0, 0, 1, 1], [], []>} : vector<256x1152xbf16>, vector<1152x128xbf16>, vector<256x128xf32> -> vector<256x128xf32>
    %c0_32 = arith.constant 0 : index
    %c0_33 = arith.constant 0 : index
    %50 = vector.load %arg4[%c0_32, %c0_33] : memref<1x128xf32, #tpu.memory_space<vmem>>, vector<1x128xf32>
    %51 = vector.broadcast %50 : vector<1x128xf32> to vector<256x128xf32>
    %52 = arith.addf %49, %51 : vector<256x128xf32>
    %cst_34 = arith.constant 0.000000e+00 : f32
    %53 = vector.broadcast %cst_34 : f32 to vector<256x128xf32>
    %54 = arith.maximumf %52, %53 : vector<256x128xf32>
    %55 = arith.truncf %54 : vector<256x128xf32> to vector<256x128xbf16>
    %c0_35 = arith.constant 0 : index
    %c0_36 = arith.constant 0 : index
    %56 = vector.load %arg5[%c0_35, %c0_36] : memref<128x128xbf16, #tpu.memory_space<vmem>>, vector<128x128xbf16>
    %cst_37 = arith.constant dense<0.000000e+00> : vector<256x128xf32>
    %57 = tpu.matmul %55, %56, %cst_37 {dimension_numbers = #tpu.dot_dimension_numbers<[1], [0], [0], [1], [0, 0, 1, 1], [], []>} : vector<256x128xbf16>, vector<128x128xbf16>, vector<256x128xf32> -> vector<256x128xf32>
    %c0_38 = arith.constant 0 : index
    %c0_39 = arith.constant 0 : index
    %58 = vector.load %arg6[%c0_38, %c0_39] : memref<1x128xf32, #tpu.memory_space<vmem>>, vector<1x128xf32>
    %59 = vector.broadcast %58 : vector<1x128xf32> to vector<256x128xf32>
    %60 = arith.addf %57, %59 : vector<256x128xf32>
    %cst_40 = arith.constant 0.000000e+00 : f32
    %61 = vector.broadcast %cst_40 : f32 to vector<256x128xf32>
    %62 = arith.maximumf %60, %61 : vector<256x128xf32>
    %63 = vector.shape_cast %62 : vector<256x128xf32> to vector<1x16x16x128xf32>
    %64 = arith.truncf %63 : vector<1x16x16x128xf32> to vector<1x16x16x128xbf16>
    %c0_41 = arith.constant 0 : index
    %c0_42 = arith.constant 0 : index
    %c0_43 = arith.constant 0 : index
    %c0_44 = arith.constant 0 : index
    %65 = vector.load %arg7[%c0_41, %c0_42, %c0_43, %c0_44] : memref<1x16x16x128xbf16, #tpu.memory_space<vmem>>, vector<1x16x16x128xbf16>
    tpu.vector_store %arg7[%c0_41, %c0_42, %c0_43, %c0_44], %64 {strides = array<i32>} : memref<1x16x16x128xbf16, #tpu.memory_space<vmem>>, vector<1x16x16x128xbf16>,
    return
  }
  func.func @transform_0(%arg0: i32, %arg1: i32) -> (i32, i32, i32, i32) {
    %c0_i32 = arith.constant 0 : i32
    %c0_i32_0 = arith.constant 0 : i32
    %c0_i32_1 = arith.constant 0 : i32
    %c0_i32_2 = arith.constant 0 : i32
    return %arg0, %c0_i32, %c0_i32_0, %c0_i32_1 : i32, i32, i32, i32
  }
  func.func @transform_1(%arg0: i32, %arg1: i32) -> (i32, i32) {
    %c0_i32 = arith.constant 0 : i32
    %c0_i32_0 = arith.constant 0 : i32
    %c0_i32_1 = arith.constant 0 : i32
    return %c0_i32, %c0_i32_0 : i32, i32
  }
  func.func @transform_2(%arg0: i32, %arg1: i32) -> (i32, i32) {
    %c0_i32 = arith.constant 0 : i32
    %c0_i32_0 = arith.constant 0 : i32
    %c0_i32_1 = arith.constant 0 : i32
    return %c0_i32, %c0_i32_0 : i32, i32
  }
  func.func @transform_3(%arg0: i32, %arg1: i32) -> (i32, i32) {
    %c0_i32 = arith.constant 0 : i32
    %c0_i32_0 = arith.constant 0 : i32
    %c0_i32_1 = arith.constant 0 : i32
    return %c0_i32, %c0_i32_0 : i32, i32
  }
  func.func @transform_4(%arg0: i32, %arg1: i32) -> (i32, i32) {
    %c0_i32 = arith.constant 0 : i32
    %c0_i32_0 = arith.constant 0 : i32
    %c0_i32_1 = arith.constant 0 : i32
    return %c0_i32, %c0_i32_0 : i32, i32
  }
  func.func @transform_5(%arg0: i32, %arg1: i32) -> (i32, i32, i32, i32) {
    %c0_i32 = arith.constant 0 : i32
    %c0_i32_0 = arith.constant 0 : i32
    %c0_i32_1 = arith.constant 0 : i32
    return %arg0, %arg1, %c0_i32, %c0_i32_0 : i32, i32, i32, i32
  }
}

</mosaic_0001>

<bundles_post_ra>
// kernel: tpu_custom_call.1
= control target key start
LH: loop header
LB: loop body
LE: loop exit
PB: predicated region body
PF: predicated region fallthrough
CT: control target
= control target key end

     0   :  { %10 = vsyncpa [#allocation3], 0  ;;  %s7186_s0 = inlined_call_operand.vmem [shape: bf16[2,18,18,128], index: 0, kind: input, shape index: {}]   ;;  %s7187_s1 = inlined_call_operand.vmem [shape: bf16[1152,128], index: 1, kind: input, shape index: {}]   ;;  %s7188_s2 = inlined_call_operand.vmem [shape: f32[1,128], index: 2, kind: input, shape index: {}]   ;;  %s7189_s3 = inlined_call_operand.vmem [shape: bf16[128,128], index: 3, kind: input, shape index: {}]   ;;  %s7190_s4 = inlined_call_operand.vmem [shape: f32[1,128], index: 4, kind: input, shape index: {}]   ;;  %s7191_s5 = inlined_call_operand.hbm [shape: bf16[2,16,16,128], index: 5, kind: output, shape index: {}]  }
   0x1   :  { %12 = vsyncpa [#allocation3 + $0x1], 0  ;;  %s5622_s18 = smov 0   ;;  %s5624_s19 = smov 0  }
   0x2   :  { %s5626_s20 = smov 0   ;;  %s5628_s21 = smov 0  }
   0x3   :  { %s5630_s22 = smov 0   ;;  %s5632_s23 = smov 0  }
   0x4 LB: > { %s4488_s24 = sadd.s32 4294967295, %s5588_s23   ;;  %s4489_s25 = sadd.s32 4294967294, %s5588_s23   ;;  %s5588_s23 = sphi %s5632_s23, %s18_s23   ;;  %s5584_s22 = sphi %s5630_s22, %s7226_s22   ;;  %s5580_s21 = sphi %s5628_s21, %s7225_s21   ;;  %s5576_s20 = sphi %s5626_s20, %s7224_s20   ;;  %s5572_s19 = sphi %s5624_s19, %s7223_s19   ;;  %s5568_s18 = sphi %s5622_s18, %s7222_s18  }
   0x5   : > { %s30_s26 = sadd.s32 1, %s5584_s22  ;;  %s149_s27 = sadd.s32 1, %s5576_s20 }
   0x6   : > { %p32_p0 = scmp.ge.s32.totalorder %s30_s26, 2  ;;  %p159_p1 = scmp.ne.s32.totalorder %s5576_s20, %s5572_s19 }
   0x7   : > { %p160_p2 = scmp.eq.s32.totalorder %s4488_s24, 1  ;;  %p165_p3 = scmp.ne.s32.totalorder %s5572_s19, %s5568_s18 }
   0x8   : > { %s7228_s26 = smov (%p32_p0, %s30_s26), 0  ;;  %p166_p5 = scmp.eq.s32.totalorder %s4489_s25, 1 }
   0x9   : > { %p5662_p4 = por %p160_p2, %p159_p1  ;;  %s144_s29 = ssub.s32 %s5584_s22, %s7228_s26 }
   0xa   : > { %p4492_p6 = scmp.ge.s32.totalorder %s5588_s23, 1  ;;  %p147_p7 = scmp.eq.s32.totalorder %s144_s29, 0 }
   0xb   : > { %p5669_p8 = por %p166_p5, %p165_p3  ;;  %p204_p9 = scmp.lt.s32.totalorder %s5588_s23, 3 }
   0xc   : > { %s5675_s6 = scalar_select %p147_p7, %s5576_s20, %s149_s27  }
   0xd   : > { %p205_p10 = pnand %p4492_p6, %p204_p9 }
   0xf   : > { %208 = sbr.rel (%p205_p10) target bundleno = 970 (0x3ca), region = 40 }
  0x14   : > { %v5243_v0 = vld [vmem:[%s7187_s1 + $0x38] sm:$0xff]  ;;  %p232_p11 = scmp.lt.s32.totalorder %s5580_s21, 1  ;;  %v5242_v2 = vld [vmem:[%s7187_s1 + $0x30] sm:$0xff]  ;;  %v5241_v4 = vld [vmem:[%s7187_s1 + $0x28] sm:$0xff]  ;;  %vm290_vm0 = vsmask.f32 3328 }
  0x15   : > { %v5251_v1 = vld [vmem:[%s7187_s1 + $0x78] sm:$0xff]  ;;  %5412 = vmatpush.bf16.msra.mxu2 %v5243_v0  ;;  %v5250_v3 = vld [vmem:[%s7187_s1 + $0x70] sm:$0xff]  ;;  %3284 = vmatpush.bf16.msra.mxu0 %v5243_v0  ;;  %v5249_v5 = vld [vmem:[%s7187_s1 + $0x68] sm:$0xff]  ;;  %vm291_vm1 = vsmask.f32 7440  ;;  %vm741_vm3 = vcmask 1042432  }
  0x16   : > { %5420 = vmatpush.bf16.msra.mxu3 %v5251_v1  ;;  %s233_s15 = scalar_select %p232_p11, %s5580_s21, 1  ;;  %3373 = vmatpush.bf16.msra.mxu1 %v5251_v1  ;;  %v5240_v14 = vld [vmem:[%s7187_s1 + $0x20] sm:$0xff]  ;;  %v5239_v29 = vld [vmem:[%s7187_s1 + $0x18] sm:$0xff]  ;;  %v5238_v38 = vld [vmem:[%s7187_s1 + $0x10] sm:$0xff]  ;;  %vm742_vm4 = vcmask 1046532  }
  0x17   : > { %v5248_v15 = vld [vmem:[%s7187_s1 + $0x60] sm:$0xff]  ;;  %v5247_v30 = vld [vmem:[%s7187_s1 + $0x58] sm:$0xff]  ;;  %v5246_v39 = vld [vmem:[%s7187_s1 + $0x50] sm:$0xff]  ;;  %s229_s7 = sand.u32 1, %s5572_s19   ;;  %s5316_s11 = sshll.u32 %s5580_s21, 7 }
  0x18   : > { %s5428_s16 = smul.u32 216, %s233_s15  ;;  %vm5741_vm2 = vmor %vm290_vm0, %vm291_vm1  ;;  %v5237_v53 = vld [vmem:[%s7187_s1 + $0x8] sm:$0xff]  ;;  %s4493_s9 = sshll.u32 %s229_s7, 7 }
  0x19   : > { %5413 = vmatpush.bf16.msra.mxu2 %v5242_v2  ;;  %3285 = vmatpush.bf16.msra.mxu0 %v5242_v2  ;;  %v5245_v54 = vld [vmem:[%s7187_s1 + $0x48] sm:$0xff]  ;;  %vm6036_vm5 = vmor %vm741_vm3, %vm742_vm4  ;;  %s7081_s10 = scalar_lea.vmem [#allocation2], %s4493_s9  ;;  %s4401_s14 = scalar_lea.hbm %s7191_s5, %s5316_s11 }
  0x1a   : > { %5421 = vmatpush.bf16.msra.mxu3 %v5250_v3  ;;  %s5700_s8 = scalar_lea.vmem %s7186_s0, %s5428_s16  ;;  %3374 = vmatpush.bf16.msra.mxu1 %v5250_v3  ;;  %v5236_v3 = vld [vmem:[%s7187_s1] sm:$0xff]  ;;  %s4402_s15 = sshll.u32 %s7081_s10, 4  ;;  %s4403_s15 = int_to_ptr.vmem [resolvable:$true] %s4402_s15 }
  0x1b   : > { %v258_v6 = vld [vmem:[%s5700_s8 + $0x60] sm:$0xf]  ;;  %v259_v7 = vld [vmem:[%s5700_s8 + $0x64] sm:$0xf]  ;;  %v282_v20 = vld [vmem:[%s5700_s8 + $0x68] sm:$0x1] }
  0x1c   : > { %v486_v8 = vshrl.u32 %v258_v6, 16  ;;  %v489_v9 = vshll.u32 %v258_v6, 16  ;;  %v495_v10 = vshll.u32 %v259_v7, 16  ;;  %v499_v11 = vshrl.u32 %v259_v7, 16  ;;  %v242_v12 = vld [vmem:[%s5700_s8] sm:$0xf] }
  0x1d   : > { %v5706_v13 = vld [vmem:[%s5700_s8 + $0x4] sm:$0xf]  ;;  %5414 = vmatpush.bf16.msra.mxu2 %v5241_v4  ;;  %3286 = vmatpush.bf16.msra.mxu0 %v5241_v4  ;;  %v294_v21 = vshrl.u32 %v242_v12, 16  ;;  %v297_v22 = vshll.u32 %v242_v12, 16  ;;  %v5720_v25 = vld [vmem:[%s5700_s8 + $0x8] sm:$0x1] }
  0x1e   : > { %5422 = vmatpush.bf16.msra.mxu3 %v5249_v5  ;;  %v488_v16 = vrot.slane %v486_v8, 4  ;;  %v491_v17 = vrot.slane %v489_v9, 5  ;;  %v5714_v18 = vrot.slane %v495_v10, 5  ;;  %v501_v19 = vrot.slane %v499_v11, 4  ;;  %3375 = vmatpush.bf16.msra.mxu1 %v5249_v5  ;;  %v260_v43 = vld [vmem:[%s5700_s8 + $0x6c] sm:$0xf] }
  0x1f   : > { %v303_v23 = vshll.u32 %v5706_v13, 16  ;;  %v307_v24 = vshrl.u32 %v5706_v13, 16  ;;  %v296_v26 = vrot.slane %v294_v21, 4  ;;  %v299_v27 = vrot.slane %v297_v22, 5  ;;  %v261_v45 = vld [vmem:[%s5700_s8 + $0x70] sm:$0xf] }
  0x20   : > { %v492_v31 = vor.u32 %v491_v17, %v488_v16  ;;  %v502_v32 = vor.u32 %v501_v19, %v5714_v18  ;;  %v505_v33 = vshll.u32 %v282_v20, 16  ;;  %v313_v37 = vshll.u32 %v5720_v25, 16  ;;  %v244_v49 = vld [vmem:[%s5700_s8 + $0xc] sm:$0xf]  ;;  %v5748_v52 = vld [vmem:[%s5700_s8 + $0x10] sm:$0xf] }
  0x21   : > { %v5722_v28 = vrot.slane %v303_v23, 5  ;;  %5415 = vmatpush.bf16.msra.mxu2 %v5240_v14  ;;  %v309_v34 = vrot.slane %v307_v24, 4  ;;  %3287 = vmatpush.bf16.msra.mxu0 %v5240_v14  ;;  %v300_v35 = vor.u32 %v299_v27, %v296_v26  ;;  %v510_v50 = vshrl.u32 %v260_v43, 16  ;;  %v5244_v4 = vld [vmem:[%s7187_s1 + $0x40] sm:$0xff]  ;;  %v5259_v9 = vld [vmem:[%s7187_s1 + $0xb8] sm:$0xff]  ;;  %s4404_s16 = sshll.u32 %s4401_s14, 4  ;;  %s4405_s16 = int_to_ptr.hbm [resolvable:$true] %s4404_s16 }
  0x22   : > { %5423 = vmatpush.bf16.msra.mxu3 %v5248_v15  ;;  %3376 = vmatpush.bf16.msra.mxu1 %v5248_v15  ;;  %v493_v40 = vrot.slane %v492_v31, 4  ;;  %v503_v41 = vrot.slane %v502_v32, 4  ;;  %v507_v42 = vrot.slane %v505_v33, 5  ;;  %v315_v48 = vrot.slane %v313_v37, 5  ;;  %v283_v12 = vld [vmem:[%s5700_s8 + $0x74] sm:$0x1] }
  0x23   : > { %v310_v36 = vor.u32 %v309_v34, %v5722_v28  ;;  %v301_v46 = vrot.slane %v300_v35, 4  ;;  %v513_v51 = vshll.u32 %v260_v43, 16  ;;  %v519_v57 = vshll.u32 %v261_v45, 16  ;;  %v5267_v16 = vld [vmem:[%s7187_s1 + $0xf8] sm:$0xff]  ;;  %v5196_v19 = vld [vmem:[%s5700_s8 + $0x60] sm:$0xff]  ;;  %v5258_v31 = vld [vmem:[%s7187_s1 + $0xb0] sm:$0xff] }
  0x24   : > { %v498_v55 = vsel %vm5741_vm2, %v493_v40, %v5714_v18  ;;  %v508_v56 = vsel %vm5741_vm2, %v503_v41, %v507_v42  ;;  %v523_v58 = vshrl.u32 %v261_v45, 16  ;;  %v318_v59 = vshrl.u32 %v244_v49, 16  ;;  %v5787_v21 = vld [vmem:[%s5700_s8 + $0x14] sm:$0x1]  ;;  %v5188_v22 = vld [vmem:[%s5700_s8] sm:$0xff]  ;;  %s4387_s21 = scalar_lea.sflag [#allocation3], %s229_s7 }
  0x25   : > { %5416 = vmatpush.bf16.msra.mxu2 %v5239_v29  ;;  %3288 = vmatpush.bf16.msra.mxu0 %v5239_v29  ;;  %v311_v47 = vrot.slane %v310_v36, 4  ;;  %v321_v60 = vshll.u32 %v244_v49, 16  ;;  %v306_v61 = vsel %vm5741_vm2, %v301_v46, %v5722_v28  ;;  %v327_v63 = vshll.u32 %v5748_v52, 16  ;;  %v5275_v28 = vld [vmem:[%s7187_s1 + $0x138] sm:$0xff]  ;;  %v5266_v32 = vld [vmem:[%s7187_s1 + $0xf0] sm:$0xff]  ;;  %v5257_v49 = vld [vmem:[%s7187_s1 + $0xa8] sm:$0xff] }
  0x26   : > { %5424 = vmatpush.bf16.msra.mxu3 %v5247_v30  ;;  %3377 = vmatpush.bf16.msra.mxu1 %v5247_v30  ;;  %v331_v0 = vshrl.u32 %v5748_v52, 16  ;;  %v2176_v1 = vunpack.c.l.b16 %v498_v55  ;;  %v2177_v2 = vunpack.c.l.b16 %v508_v56  ;;  %v512_v5 = vrot.slane %v510_v50, 4  ;;  %v262_v30 = vld [vmem:[%s5700_s8 + $0x78] sm:$0xf]  ;;  %v263_v35 = vld [vmem:[%s5700_s8 + $0x7c] sm:$0xf] }
  0x27   : > { %v316_v62 = vsel %vm5741_vm2, %v311_v47, %v315_v48  ;;  %v515_v6 = vrot.slane %v513_v51, 5  ;;  %v5774_v7 = vrot.slane %v519_v57, 5  ;;  %v525_v8 = vrot.slane %v523_v58, 4  ;;  %v246_v46 = vld [vmem:[%s5700_s8 + $0x18] sm:$0xf]  ;;  %v5265_v50 = vld [vmem:[%s7187_s1 + $0xe8] sm:$0xff] }
  0x28   : > { %v2160_v10 = vunpack.c.l.b16 %v306_v61  ;;  %v2161_v11 = vunpack.c.l.b16 %v316_v62  ;;  %v320_v14 = vrot.slane %v318_v59, 4  ;;  %v323_v15 = vrot.slane %v321_v60, 5  ;;  %v5815_v51 = vld [vmem:[%s5700_s8 + $0x1c] sm:$0xf]  ;;  %v284_v58 = vld [vmem:[%s5700_s8 + $0x80] sm:$0x1] }
  0x29   : > { %5417 = vmatpush.bf16.msra.mxu2 %v5238_v38  ;;  %3289 = vmatpush.bf16.msra.mxu0 %v5238_v38  ;;  %v5783_v17 = vrot.slane %v327_v63, 5  ;;  %v333_v18 = vrot.slane %v331_v0, 4  ;;  %v2200_v20 = vpack.c.b16 %v2177_v2, %v2176_v1  ;;  %v516_v23 = vor.u32 %v515_v6, %v512_v5  ;;  %v5273_v62 = vld [vmem:[%s7187_s1 + $0x128] sm:$0xff]  ;;  %s5524_s17 = sshra.s32 %s4405_s16, 4  ;;  %s5525_s17 = int_to_ptr.hbm [resolvable:$true] %s5524_s17 }
  0x2a   : > { %5425 = vmatpush.bf16.msra.mxu3 %v5246_v39  ;;  %3378 = vmatpush.bf16.msra.mxu1 %v5246_v39  ;;  %v526_v24 = vor.u32 %v525_v8, %v5774_v7  ;;  %v529_v26 = vshll.u32 %v283_v12, 16  ;;  %v2192_v27 = vpack.c.b16 %v2161_v11, %v2160_v10  ;;  %v324_v29 = vor.u32 %v323_v15, %v320_v14  ;;  %v5274_v39 = vld [vmem:[%s7187_s1 + $0x130] sm:$0xff]  ;;  %s5526_s24 = scalar_lea.hbm %s5525_s17, 128  ;;  %p5531_p1 = scmp.lt.s32.totalorder %s5525_s17, %s7191_s5 }
  0x2b   : > { %v334_v33 = vor.u32 %v333_v18, %v5783_v17  ;;  %v337_v34 = vshll.u32 %v5787_v21, 16  ;;  %v517_v36 = vrot.slane %v516_v23, 4  ;;  %v534_v40 = vshrl.u32 %v262_v30, 16  ;;  %v5197_v15 = vld [vmem:[%s5700_s8 + $0x6c] sm:$0xff]  ;;  %p5527_p12 = scmp.ne.s32.totalorder %s5525_s17, %s5526_s24 }
  0x2c   : > { %v527_v37 = vrot.slane %v526_v24, 4  ;;  %v531_v38 = vrot.slane %v529_v26, 5  ;;  %v325_v41 = vrot.slane %v324_v29, 4  ;;  %v537_v42 = vshll.u32 %v262_v30, 16  ;;  %v5189_v18 = vld [vmem:[%s5700_s8 + $0xc] sm:$0xff] }
  0x2d   : > { %5418 = vmatpush.bf16.msra.mxu2 %v5237_v53  ;;  %3290 = vmatpush.bf16.msra.mxu0 %v5237_v53  ;;  %v543_v43 = vshll.u32 %v263_v35, 16  ;;  %v547_v45 = vshrl.u32 %v263_v35, 16  ;;  %v335_v47 = vrot.slane %v334_v33, 4  ;;  %v339_v48 = vrot.slane %v337_v34, 5  ;;  %v264_v29 = vld [vmem:[%s5700_s8 + $0x84] sm:$0xf]  ;;  %p5528_p13 = pnand %p5527_p12, %p5662_p4 }
  0x2e   : > { %5426 = vmatpush.bf16.msra.mxu3 %v5245_v54  ;;  %3379 = vmatpush.bf16.msra.mxu1 %v5245_v54  ;;  %v522_v53 = vsel %vm5741_vm2, %v517_v36, %v5774_v7  ;;  %v532_v54 = vsel %vm5741_vm2, %v527_v37, %v531_v38  ;;  %v536_v55 = vrot.slane %v534_v40, 4  ;;  %v342_v56 = vshrl.u32 %v246_v46, 16  ;;  %v265_v30 = vld [vmem:[%s5700_s8 + $0x88] sm:$0xf]  ;;  %v248_v33 = vld [vmem:[%s5700_s8 + $0x24] sm:$0xf] }
  0x2f   : > { %v330_v57 = vsel %vm5741_vm2, %v325_v41, %v5783_v17  ;;  %v539_v59 = vrot.slane %v537_v42, 5  ;;  %v545_v60 = vrot.slane %v543_v43, 5  ;;  %v549_v61 = vrot.slane %v547_v45, 4  ;;  %v5835_v17 = vld [vmem:[%s5700_s8 + $0x20] sm:$0x1]  ;;  %p5529_p0 = pneg %p5528_p13 }
  0x30   : > { %v340_v63 = vsel %vm5741_vm2, %v335_v47, %v339_v48  ;;  %v345_v0 = vshll.u32 %v246_v46, 16  ;;  %v351_v1 = vshll.u32 %v5815_v51, 16  ;;  %v355_v2 = vshrl.u32 %v5815_v51, 16  ;;  %v5851_v34 = vld [vmem:[%s5700_s8 + $0x28] sm:$0xf]  ;;  %v5272_v35 = vld [vmem:[%s7187_s1 + $0x120] sm:$0xff] }
  0x31   : > { %5419 = vmatpush.bf16.msra.mxu2 %v5236_v3  ;;  %3291 = vmatpush.bf16.msra.mxu0 %v5236_v3  ;;  %v2178_v3 = vunpack.c.l.b16 %v522_v53  ;;  %v553_v5 = vshll.u32 %v284_v58, 16  ;;  %v2162_v6 = vunpack.c.l.b16 %v330_v57  ;;  %v2163_v7 = vunpack.c.l.b16 %v340_v63 }
  0x32   : > { %5427 = vmatpush.bf16.msra.mxu3 %v5244_v4  ;;  %3380 = vmatpush.bf16.msra.mxu1 %v5244_v4  ;;  %v2179_v4 = vunpack.c.l.b16 %v532_v54  ;;  %v540_v8 = vor.u32 %v539_v59, %v536_v55  ;;  %v550_v10 = vor.u32 %v549_v61, %v545_v60  ;;  %v347_v11 = vrot.slane %v345_v0, 5  ;;  %v285_v59 = vld [vmem:[%s5700_s8 + $0x8c] sm:$0x1] }
  0x33   : > { %v353_v12 = vrot.slane %v351_v1, 5  ;;  %v357_v14 = vrot.slane %v355_v2, 4  ;;  %v558_v40 = vshrl.u32 %v264_v29, 16  ;;  %v561_v41 = vshll.u32 %v264_v29, 16  ;;  %v5866_v2 = vld [vmem:[%s5700_s8 + $0x2c] sm:$0x1] }
  0x34   : > { %3332 = vmatmul.bf16.vlgmr.msra.gmra.mxu2 %v5196_v19  ;;  %3292 = vmatmul.bf16.vlgmr.msra.gmra.mxu0 %v5188_v22  ;;  %v2193_v19 = vpack.c.b16 %v2163_v7, %v2162_v6  ;;  %v555_v22 = vrot.slane %v553_v5, 5  ;;  %v551_v23 = vrot.slane %v550_v10, 4  ;;  %v567_v42 = vshll.u32 %v265_v30, 16  ;;  %v5190_v7 = vld [vmem:[%s5700_s8 + $0x18] sm:$0xff] }
  0x35   : > { %3462 = vmatpush.bf16.msrb.mxu2 %v5259_v9  ;;  %3421 = vmatmul.bf16.vlgmr.msra.gmra.mxu3 %v2200_v20  ;;  %v344_v9 = vrot.slane %v342_v56, 4  ;;  %v541_v20 = vrot.slane %v540_v8, 4  ;;  %v358_v26 = vor.u32 %v357_v14, %v353_v12  ;;  %v571_v43 = vshrl.u32 %v265_v30, 16  ;;  %v266_v14 = vld [vmem:[%s5700_s8 + $0x90] sm:$0xf] }
  0x36   : > { %3551 = vmatpush.bf16.msrb.mxu3 %v5267_v16  ;;  %3381 = vmatmul.bf16.vlgmr.msra.gmra.mxu1 %v2192_v27  ;;  %v2201_v16 = vpack.c.b16 %v2179_v4, %v2178_v3  ;;  %v361_v27 = vshll.u32 %v5835_v17, 16  ;;  %v556_v36 = vsel %vm5741_vm2, %v551_v23, %v555_v22  ;;  %v366_v45 = vshrl.u32 %v248_v33, 16  ;;  %v5198_v3 = vld [vmem:[%s5700_s8 + $0x78] sm:$0xff] }
  0x37   : > { %3640 = vmatpush.bf16.msrb.mxu0 %v5275_v28  ;;  %v348_v24 = vor.u32 %v347_v11, %v344_v9  ;;  %v5256_v28 = vld [vmem:[%s7187_s1 + $0xa0] sm:$0xff]  ;;  %v359_v38 = vrot.slane %v358_v26, 4  ;;  %v369_v46 = vshll.u32 %v248_v33, 16  ;;  %v375_v47 = vshll.u32 %v5851_v34, 16  ;;  %v5263_v26 = vld [vmem:[%s7187_s1 + $0xd8] sm:$0xff] }
  0x38   : > { %v379_v48 = vshrl.u32 %v5851_v34, 16  ;;  %v560_v55 = vrot.slane %v558_v40, 4  ;;  %v563_v56 = vrot.slane %v561_v41, 5  ;;  %v569_v57 = vrot.slane %v567_v42, 5  ;;  %v5884_v33 = vld [vmem:[%s5700_s8 + $0x34] sm:$0xf] }
  0x39   : > { %3463 = vmatpush.bf16.msrb.mxu2 %v5258_v31  ;;  %v5264_v31 = vld [vmem:[%s7187_s1 + $0xe0] sm:$0xff]  ;;  %v349_v37 = vrot.slane %v348_v24, 4  ;;  %v573_v58 = vrot.slane %v571_v43, 4  ;;  %v371_v61 = vrot.slane %v369_v46, 5  ;;  %v577_v6 = vshll.u32 %v285_v59, 16 }
  0x3a   : > { %3552 = vmatpush.bf16.msrb.mxu3 %v5266_v32  ;;  %v546_v32 = vsel %vm5741_vm2, %v541_v20, %v545_v60  ;;  %v368_v60 = vrot.slane %v366_v45, 4  ;;  %v381_v63 = vrot.slane %v379_v48, 4  ;;  %v564_v5 = vor.u32 %v563_v56, %v560_v55  ;;  %v286_v43 = vld [vmem:[%s5700_s8 + $0x98] sm:$0x1] }
  0x3b   : > { %3641 = vmatpush.bf16.msrb.mxu0 %v5274_v39  ;;  %v363_v39 = vrot.slane %v361_v27, 5  ;;  %v354_v53 = vsel %vm5741_vm2, %v349_v37, %v353_v12  ;;  %v574_v8 = vor.u32 %v573_v58, %v569_v57  ;;  %v385_v11 = vshll.u32 %v5866_v2, 16 }
  0x3c   : > { %v2164_v0 = vunpack.c.l.b16 %v354_v53  ;;  %v372_v9 = vor.u32 %v371_v61, %v368_v60  ;;  %v582_v27 = vshrl.u32 %v266_v14, 16  ;;  %v403_v48 = vshrl.u32 %v5884_v33, 16 }
  0x3d   : > { %3464 = vmatpush.bf16.msrb.mxu2 %v5257_v49  ;;  %v2180_v49 = vunpack.c.l.b16 %v546_v32  ;;  %v364_v54 = vsel %vm5741_vm2, %v359_v38, %v363_v39  ;;  %v575_v20 = vrot.slane %v574_v8, 4  ;;  %v387_v24 = vrot.slane %v385_v11, 5  ;;  %v250_v32 = vld [vmem:[%s5700_s8 + $0x30] sm:$0xf]  ;;  %v268_v11 = vld [vmem:[%s5700_s8 + $0x9c] sm:$0xf] }
  0x3e   : > { %3553 = vmatpush.bf16.msrb.mxu3 %v5265_v50  ;;  %v2181_v50 = vunpack.c.l.b16 %v556_v36  ;;  %v2165_v1 = vunpack.c.l.b16 %v364_v54  ;;  %v373_v22 = vrot.slane %v372_v9, 4  ;;  %v584_v39 = vrot.slane %v582_v27, 4 }
  0x3f   : > { %3642 = vmatpush.bf16.msrb.mxu0 %v5273_v62  ;;  %v377_v62 = vrot.slane %v375_v47, 5  ;;  %v390_v45 = vshrl.u32 %v250_v32, 16  ;;  %v393_v46 = vshll.u32 %v250_v32, 16  ;;  %v399_v47 = vshll.u32 %v5884_v33, 16 }
  0x40   : > { %v2202_v4 = vpack.c.b16 %v2181_v50, %v2180_v49  ;;  %v2194_v12 = vpack.c.b16 %v2165_v1, %v2164_v0  ;;  %v405_v61 = vrot.slane %v403_v48, 4  ;;  %v5899_v0 = vld [vmem:[%s5700_s8 + $0x38] sm:$0x1]  ;;  %v5191_v1 = vld [vmem:[%s5700_s8 + $0x24] sm:$0xff]  ;;  %v609_v27 = vshll.u32 %v268_v11, 16 }
  0x41   : > { %3465 = vmatpush.bf16.msrb.mxu2 %v5256_v28  ;;  %v382_v10 = vor.u32 %v381_v63, %v377_v62  ;;  %v585_v28 = vshll.u32 %v266_v14, 16  ;;  %v378_v37 = vsel %vm5741_vm2, %v373_v22, %v377_v62  ;;  %v392_v58 = vrot.slane %v390_v45, 4  ;;  %v5199_v62 = vld [vmem:[%s5700_s8 + $0x84] sm:$0xff]  ;;  %v5262_v14 = vld [vmem:[%s7187_s1 + $0xd0] sm:$0xff] }
  0x42   : > { %3554 = vmatpush.bf16.msrb.mxu3 %v5264_v31  ;;  %v5271_v31 = vld [vmem:[%s7187_s1 + $0x118] sm:$0xff]  ;;  %v2166_v53 = vunpack.c.l.b16 %v378_v37  ;;  %v395_v59 = vrot.slane %v393_v46, 5  ;;  %v401_v60 = vrot.slane %v399_v47, 5  ;;  %v409_v9 = vshll.u32 %v5899_v0, 16  ;;  %v287_v45 = vld [vmem:[%s5700_s8 + $0xa4] sm:$0x1] }
  0x43   : > { %3643 = vmatpush.bf16.msrb.mxu0 %v5272_v35  ;;  %v383_v23 = vrot.slane %v382_v10, 4  ;;  %v587_v40 = vrot.slane %v585_v28, 5  ;;  %v5254_v10 = vld [vmem:[%s7187_s1 + $0x90] sm:$0xff] }
  0x44   : > { %3337 = vmatmul.bf16.gmra.mxu2 %v5197_v15  ;;  %3297 = vmatmul.bf16.gmra.mxu0 %v5189_v18  ;;  %v267_v15 = vld [vmem:[%s5700_s8 + $0x94] sm:$0xf]  ;;  %v579_v18 = vrot.slane %v577_v6, 5  ;;  %v406_v8 = vor.u32 %v405_v61, %v401_v60 }
  0x45   : > { %3426 = vmatmul.bf16.gmra.mxu3 %v2201_v16  ;;  %v565_v16 = vrot.slane %v564_v5, 4  ;;  %v591_v29 = vshll.u32 %v267_v15, 16  ;;  %v595_v30 = vshrl.u32 %v267_v15, 16  ;;  %v388_v38 = vsel %vm5741_vm2, %v383_v23, %v387_v24 }
  0x46   : > { %3386 = vmatmul.bf16.gmra.mxu1 %v2193_v19  ;;  %v5255_v19 = vld [vmem:[%s7187_s1 + $0x98] sm:$0xff]  ;;  %3555 = vmatpush.bf16.msrb.mxu3 %v5263_v26  ;;  %v580_v36 = vsel %vm5741_vm2, %v575_v20, %v579_v18  ;;  %v2167_v54 = vunpack.c.l.b16 %v388_v38  ;;  %v588_v55 = vor.u32 %v587_v40, %v584_v39  ;;  %v253_v18 = vld [vmem:[%s5700_s8 + $0x40] sm:$0xf]  ;;  %v407_v23 = vrot.slane %v406_v8, 4 }
  0x47   : > { %3466 = vmatpush.bf16.msrb.mxu2 %v5255_v19  ;;  %3644 = vmatpush.bf16.msrb.mxu0 %v5271_v31  ;;  %v570_v35 = vsel %vm5741_vm2, %v565_v16, %v569_v57  ;;  %v593_v41 = vrot.slane %v591_v29, 5  ;;  %v597_v42 = vrot.slane %v595_v30, 4  ;;  %v2183_v50 = vunpack.c.l.b16 %v580_v36  ;;  %v252_v16 = vld [vmem:[%s5700_s8 + $0x3c] sm:$0xf]  ;;  %v5270_v19 = vld [vmem:[%s7187_s1 + $0x110] sm:$0xff] }
  0x48   : > { %v2182_v49 = vunpack.c.l.b16 %v570_v35  ;;  %v601_v57 = vshll.u32 %v286_v43, 16  ;;  %v411_v24 = vrot.slane %v409_v9, 5  ;;  %v606_v26 = vshrl.u32 %v268_v11, 16 }
  0x49   : > { %v598_v56 = vor.u32 %v597_v42, %v593_v41  ;;  %v414_v30 = vshrl.u32 %v252_v16, 16  ;;  %v417_v31 = vshll.u32 %v252_v16, 16  ;;  %v423_v32 = vshll.u32 %v253_v18, 16 }
  0x4a   : > { %v2203_v63 = vpack.c.b16 %v2183_v50, %v2182_v49  ;;  %v603_v5 = vrot.slane %v601_v57, 5  ;;  %3556 = vmatpush.bf16.msrb.mxu3 %v5262_v14  ;;  %v427_v35 = vshrl.u32 %v253_v18, 16  ;;  %v412_v39 = vsel %vm5741_vm2, %v407_v23, %v411_v24  ;;  %v255_v23 = vld [vmem:[%s5700_s8 + $0x4c] sm:$0xf] }
  0x4b   : > { %v599_v6 = vrot.slane %v598_v56, 4  ;;  %3467 = vmatpush.bf16.msrb.mxu2 %v5254_v10  ;;  %3645 = vmatpush.bf16.msrb.mxu0 %v5270_v19  ;;  %v608_v40 = vrot.slane %v606_v26, 4  ;;  %v416_v46 = vrot.slane %v414_v30, 4  ;;  %v419_v47 = vrot.slane %v417_v31, 5  ;;  %v5269_v19 = vld [vmem:[%s7187_s1 + $0x108] sm:$0xff] }
  0x4c   : > { %v425_v48 = vrot.slane %v423_v32, 5  ;;  %v429_v49 = vrot.slane %v427_v35, 4  ;;  %v288_v35 = vld [vmem:[%s5700_s8 + $0xb0] sm:$0x1] }
  0x4d   : > { %v604_v20 = vsel %vm5741_vm2, %v599_v6, %v603_v5  ;;  %v420_v61 = vor.u32 %v419_v47, %v416_v46  ;;  %v649_v47 = vshll.u32 %v288_v35, 16 }
  0x4e   : > { %v2185_v37 = vunpack.c.l.b16 %v604_v20  ;;  %v5283_v20 = vld [vmem:[%s7187_s1 + $0x178] sm:$0xff] }
  0x4f   : > { %v421_v9 = vrot.slane %v420_v61, 4  ;;  %3646 = vmatpush.bf16.msrb.mxu0 %v5269_v19  ;;  %3729 = vmatpush.bf16.msrb.mxu1 %v5283_v20  ;;  %v651_v61 = vrot.slane %v649_v47, 5  ;;  %v5279_v47 = vld [vmem:[%s7187_s1 + $0x158] sm:$0xff] }
  0x54   : > { %3342 = vmatmul.bf16.gmra.mxu2 %v5198_v3  ;;  %3302 = vmatmul.bf16.gmra.mxu0 %v5190_v7  ;;  %v2195_v3 = vpack.c.b16 %v2167_v54, %v2166_v53  ;;  %v396_v7 = vor.u32 %v395_v59, %v392_v58  ;;  %v2169_v53 = vunpack.c.l.b16 %v412_v39  ;;  %v5926_v54 = vld [vmem:[%s5700_s8 + $0x44] sm:$0x1]  ;;  %v625_v58 = vshll.u32 %v287_v45, 16  ;;  %v5192_v59 = vld [vmem:[%s5700_s8 + $0x30] sm:$0xff] }
  0x55   : > { %3431 = vmatmul.bf16.gmra.mxu3 %v2202_v4  ;;  %v589_v4 = vrot.slane %v588_v55, 4  ;;  %v5200_v55 = vld [vmem:[%s5700_s8 + $0x90] sm:$0xff]  ;;  %v451_v39 = vshrl.u32 %v255_v23, 16 }
  0x56   : > { %3391 = vmatmul.bf16.gmra.mxu1 %v2194_v12  ;;  %v269_v12 = vld [vmem:[%s5700_s8 + $0xa0] sm:$0xf]  ;;  %v397_v22 = vrot.slane %v396_v7, 4  ;;  %v627_v6 = vrot.slane %v625_v58, 5  ;;  %v5253_v7 = vld [vmem:[%s7187_s1 + $0x88] sm:$0xff] }
  0x57   : > { %v594_v15 = vsel %vm5741_vm2, %v589_v4, %v593_v41  ;;  %v615_v28 = vshll.u32 %v269_v12, 16  ;;  %v619_v29 = vshrl.u32 %v269_v12, 16  ;;  %v611_v41 = vrot.slane %v609_v27, 5  ;;  %v271_v4 = vld [vmem:[%s5700_s8 + $0xac] sm:$0xf]  ;;  %3468 = vmatpush.bf16.msrb.mxu2 %v5253_v7  ;;  %v5193_v58 = vld [vmem:[%s5700_s8 + $0x3c] sm:$0xff] }
  0x58   : > { %v2184_v36 = vunpack.c.l.b16 %v594_v15  ;;  %v402_v38 = vsel %vm5741_vm2, %v397_v22, %v401_v60  ;;  %v5261_v12 = vld [vmem:[%s7187_s1 + $0xc8] sm:$0xff]  ;;  %v639_v16 = vshll.u32 %v271_v4, 16  ;;  %v643_v18 = vshrl.u32 %v271_v4, 16  ;;  %v5282_v4 = vld [vmem:[%s7187_s1 + $0x170] sm:$0xff]  ;;  %v273_v7 = vld [vmem:[%s5700_s8 + $0xb8] sm:$0xf] }
  0x59   : > { %v617_v42 = vrot.slane %v615_v28, 5  ;;  %v621_v43 = vrot.slane %v619_v29, 4  ;;  %v2168_v50 = vunpack.c.l.b16 %v402_v38  ;;  %v612_v57 = vor.u32 %v611_v41, %v608_v40  ;;  %3557 = vmatpush.bf16.msrb.mxu3 %v5261_v12  ;;  %v254_v22 = vld [vmem:[%s5700_s8 + $0x48] sm:$0xf]  ;;  %3730 = vmatpush.bf16.msrb.mxu1 %v5282_v4 }
  0x5a   : > { %v2204_v56 = vpack.c.b16 %v2185_v37, %v2184_v36  ;;  %v426_v27 = vsel %vm5741_vm2, %v421_v9, %v425_v48  ;;  %v641_v31 = vrot.slane %v639_v16, 5  ;;  %v645_v32 = vrot.slane %v643_v18, 4  ;;  %v256_v9 = vld [vmem:[%s5700_s8 + $0x54] sm:$0xf]  ;;  %v5281_v12 = vld [vmem:[%s7187_s1 + $0x168] sm:$0xff] }
  0x5b   : > { %v622_v60 = vor.u32 %v621_v43, %v617_v42  ;;  %v613_v5 = vrot.slane %v612_v57, 4  ;;  %v438_v36 = vshrl.u32 %v254_v22, 16  ;;  %v441_v37 = vshll.u32 %v254_v22, 16  ;;  %v280_v57 = vld [vmem:[%s5700_s8 + $0x50] sm:$0x1] }
  0x5c   : > { %v447_v38 = vshll.u32 %v255_v23, 16  ;;  %v646_v46 = vor.u32 %v645_v32, %v641_v31  ;;  %v663_v23 = vshll.u32 %v273_v7, 16 }
  0x5d   : > { %v623_v8 = vrot.slane %v622_v60, 4  ;;  %v618_v24 = vsel %vm5741_vm2, %v613_v5, %v617_v42  ;;  %v2170_v42 = vunpack.c.l.b16 %v426_v27  ;;  %v272_v5 = vld [vmem:[%s5700_s8 + $0xb4] sm:$0xf]  ;;  %v465_v27 = vshll.u32 %v256_v9, 16  ;;  %3731 = vmatpush.bf16.msrb.mxu1 %v5281_v12  ;;  %v6007_v12 = vld [vmem:[%s5700_s8 + $0x10] sm:$0xf] }
  0x5e   : > { %v2186_v40 = vunpack.c.l.b16 %v618_v24  ;;  %v654_v20 = vshrl.u32 %v272_v5, 16  ;;  %v657_v22 = vshll.u32 %v272_v5, 16  ;;  %v667_v24 = vshrl.u32 %v273_v7, 16  ;;  %v5291_v5 = vld [vmem:[%s7187_s1 + $0x1b8] sm:$0xff] }
  0x5f   : > { %v628_v26 = vsel %vm5741_vm2, %v623_v8, %v627_v6  ;;  %v5252_v6 = vld [vmem:[%s7187_s1 + $0x80] sm:$0xff] }
  0x60   : > { %v2187_v41 = vunpack.c.l.b16 %v628_v26  ;;  %v5260_v8 = vld [vmem:[%s7187_s1 + $0xc0] sm:$0xff]  ;;  %3469 = vmatpush.bf16.msrb.mxu2 %v5252_v6  ;;  %v462_v26 = vshrl.u32 %v256_v9, 16 }
  0x61   : > { %3558 = vmatpush.bf16.msrb.mxu3 %v5260_v8 }
  0x64   : > { %3347 = vmatmul.bf16.gmra.mxu2 %v5199_v62  ;;  %3307 = vmatmul.bf16.gmra.mxu0 %v5191_v1  ;;  %v430_v62 = vor.u32 %v429_v49, %v425_v48  ;;  %v2196_v1 = vpack.c.b16 %v2169_v53, %v2168_v50  ;;  %v440_v48 = vrot.slane %v438_v36, 4  ;;  %v443_v49 = vrot.slane %v441_v37, 5  ;;  %v289_v37 = vld [vmem:[%s5700_s8 + $0xbc] sm:$0x1] }
  0x65   : > { %3436 = vmatmul.bf16.gmra.mxu3 %v2203_v63  ;;  %v433_v63 = vshll.u32 %v5926_v54, 16  ;;  %v449_v50 = vrot.slane %v447_v38, 5  ;;  %v453_v53 = vrot.slane %v451_v39, 4  ;;  %v656_v38 = vrot.slane %v654_v20, 4  ;;  %3818 = vmatpush.bf16.msra.mxu2 %v5291_v5 }
  0x66   : > { %3396 = vmatmul.bf16.gmra.mxu1 %v2195_v3  ;;  %v270_v3 = vld [vmem:[%s5700_s8 + $0xa8] sm:$0xf]  ;;  %v431_v10 = vrot.slane %v430_v62, 4  ;;  %v647_v62 = vrot.slane %v646_v46, 4  ;;  %v659_v39 = vrot.slane %v657_v22, 5 }
  0x67   : > { %v435_v11 = vrot.slane %v433_v63, 5  ;;  %v630_v14 = vshrl.u32 %v270_v3, 16  ;;  %v633_v15 = vshll.u32 %v270_v3, 16  ;;  %v444_v63 = vor.u32 %v443_v49, %v440_v48 }
  0x68   : > { %v457_v3 = vshll.u32 %v280_v57, 16  ;;  %v673_v57 = vshll.u32 %v289_v37, 16 }
  0x69   : > { %v436_v28 = vsel %vm5741_vm2, %v431_v10, %v435_v11  ;;  %v632_v29 = vrot.slane %v630_v14, 4  ;;  %v635_v30 = vrot.slane %v633_v15, 5  ;;  %v257_v11 = vld [vmem:[%s5700_s8 + $0x58] sm:$0xf]  ;;  %v5268_v14 = vld [vmem:[%s7187_s1 + $0x100] sm:$0xff]  ;;  %v652_v15 = vsel %vm5741_vm2, %v647_v62, %v651_v61 }
  0x6a   : > { %v2171_v43 = vunpack.c.l.b16 %v436_v28  ;;  %v445_v16 = vrot.slane %v444_v63, 4  ;;  %v459_v19 = vrot.slane %v457_v3, 5  ;;  %3647 = vmatpush.bf16.msrb.mxu0 %v5268_v14  ;;  %v471_v28 = vshll.u32 %v257_v11, 16  ;;  %v5277_v14 = vld [vmem:[%s7187_s1 + $0x148] sm:$0xff] }
  0x6b   : > { %v636_v45 = vor.u32 %v635_v30, %v632_v29  ;;  %v475_v29 = vshrl.u32 %v257_v11, 16  ;;  %v5280_v30 = vld [vmem:[%s7187_s1 + $0x160] sm:$0xff]  ;;  %v2189_v32 = vunpack.c.l.b16 %v652_v15  ;;  %v675_v4 = vrot.slane %v673_v57, 5  ;;  %v4511_v11 = vld [vmem:[%s5700_s8 + $0xc] sm:$0xf] }
  0x6c   : > { %v450_v35 = vsel %vm5741_vm2, %v445_v16, %v449_v50  ;;  %3732 = vmatpush.bf16.msrb.mxu1 %v5280_v30  ;;  %v909_v20 = vshrl.u32 %v4511_v11, 16  ;;  %v912_v22 = vshll.u32 %v4511_v11, 16 }
  0x6d   : > { %v637_v60 = vrot.slane %v636_v45, 4  ;;  %v473_v45 = vrot.slane %v471_v28, 5  ;;  %v477_v46 = vrot.slane %v475_v29, 4  ;;  %v2172_v48 = vunpack.c.l.b16 %v450_v35 }
  0x6e   : > { %v914_v35 = vrot.slane %v912_v22, 5 }
  0x6f   : > { %v642_v10 = vsel %vm5741_vm2, %v637_v60, %v641_v31  ;;  %v478_v61 = vor.u32 %v477_v46, %v473_v45 }
  0x70   : > { %v2188_v31 = vunpack.c.l.b16 %v642_v10  ;;  %3733 = vmatpush.bf16.msrb.mxu1 %v5279_v47  ;;  %v5299_v10 = vld [vmem:[%s7187_s1 + $0x1f8] sm:$0xff] }
  0x71   : > { %v479_v8 = vrot.slane %v478_v61, 4  ;;  %3907 = vmatpush.bf16.msra.mxu3 %v5299_v10 }
  0x74   : > { %3352 = vmatmul.bf16.gmra.mxu2 %v5200_v55  ;;  %3312 = vmatmul.bf16.gmra.mxu0 %v5192_v59  ;;  %v5201_v55 = vld [vmem:[%s5700_s8 + $0x9c] sm:$0xff]  ;;  %v2197_v59 = vpack.c.b16 %v2171_v43, %v2170_v42  ;;  %v464_v42 = vrot.slane %v462_v26, 4  ;;  %v467_v43 = vrot.slane %v465_v27, 5 }
  0x75   : > { %3441 = vmatmul.bf16.gmra.mxu3 %v2204_v56  ;;  %v2205_v56 = vpack.c.b16 %v2187_v41, %v2186_v40  ;;  %v665_v40 = vrot.slane %v663_v23, 5  ;;  %v669_v41 = vrot.slane %v667_v24, 4  ;;  %v918_v23 = vshll.u32 %v6007_v12, 16  ;;  %v5276_v26 = vld [vmem:[%s7187_s1 + $0x140] sm:$0xff] }
  0x76   : > { %3401 = vmatmul.bf16.gmra.mxu1 %v2196_v1  ;;  %v454_v1 = vor.u32 %v453_v53, %v449_v50  ;;  %v281_v50 = vld [vmem:[%s5700_s8 + $0x5c] sm:$0x1]  ;;  %v5202_v53 = vld [vmem:[%s5700_s8 + $0xa8] sm:$0xff]  ;;  %v468_v60 = vor.u32 %v467_v43, %v464_v42  ;;  %v922_v24 = vshrl.u32 %v6007_v12, 16  ;;  %v746_v42 = vrot.slane %v5706_v13, 5 }
  0x77   : > { %v481_v62 = vshll.u32 %v281_v50, 16  ;;  %v4559_v50 = vld [vmem:[%s5700_s8 + $0xc] sm:$0xe] }
  0x78   : > { %v455_v18 = vrot.slane %v454_v1, 4  ;;  %v5278_v1 = vld [vmem:[%s7187_s1 + $0x150] sm:$0xff]  ;;  %v469_v7 = vrot.slane %v468_v60, 4  ;;  %v924_v37 = vrot.slane %v922_v24, 4  ;;  %v4513_v60 = vld [vmem:[%s5700_s8 + $0x18] sm:$0xf] }
  0x79   : > { %v483_v9 = vrot.slane %v481_v62, 5  ;;  %3734 = vmatpush.bf16.msrb.mxu1 %v5278_v1  ;;  %v4575_v61 = vrot.slane %v4559_v50, 9  ;;  %v6042_v1 = vld [vmem:[%s5700_s8 + $0x1c] sm:$0xf]  ;;  %v936_v5 = vshll.u32 %v4513_v60, 16  ;;  %v5298_v50 = vld [vmem:[%s7187_s1 + $0x1f0] sm:$0xff] }
  0x7a   : > { %v460_v36 = vsel %vm5741_vm2, %v455_v18, %v459_v19  ;;  %v474_v18 = vsel %vm5741_vm2, %v469_v7, %v473_v45  ;;  %v677_v45 = vld [vmem:[%s5700_s8] sm:$0xe]  ;;  %3908 = vmatpush.bf16.msra.mxu3 %v5298_v50 }
  0x7b   : > { %v2173_v49 = vunpack.c.l.b16 %v460_v36  ;;  %v484_v19 = vsel %vm5741_vm2, %v479_v8, %v483_v9  ;;  %v2174_v29 = vunpack.c.l.b16 %v474_v18  ;;  %v920_v36 = vrot.slane %v918_v23, 5 }
  0x7c   : > { %v2175_v30 = vunpack.c.l.b16 %v484_v19  ;;  %v942_v8 = vshll.u32 %v6042_v1, 16  ;;  %v946_v9 = vshrl.u32 %v6042_v1, 16  ;;  %v938_v19 = vrot.slane %v936_v5, 5 }
  0x7d   : > { %v2198_v63 = vpack.c.b16 %v2173_v49, %v2172_v48  ;;  %3735 = vmatpush.bf16.msrb.mxu1 %v5277_v14  ;;  %v925_v47 = vor.u32 %v924_v37, %v920_v36  ;;  %v1358_v49 = vrot.slane %v6007_v12, 5 }
  0x7e   : > { %v2199_v43 = vpack.c.b16 %v2175_v30, %v2174_v29  ;;  %v944_v23 = vrot.slane %v942_v8, 5  ;;  %v948_v24 = vrot.slane %v946_v9, 4  ;;  %v6063_v29 = vld [vmem:[%s7188_s2] ss:$0 sm:$0xff] }
  0x7f   : > { %v1360_v62 = vrot.slane %v1358_v49, 4  ;;  %v1359_v10 = vsel %vm6036_vm5, %v4575_v61, %v1358_v49 }
  0x81   : > { %3736 = vmatpush.bf16.msrb.mxu1 %v5276_v26  ;;  %v4544_v26 = vld [vmem:[%s5700_s8 + $0x20] sm:$0x1] }
  0x82   : > { %v1368_v61 = vrot.slane %v4544_v26, 5 }
  0x84   : > { %3357 = vmatmul.bf16.gmra.mxu2 %v5201_v55  ;;  %3317 = vmatmul.bf16.gmra.mxu0 %v5193_v58  ;;  %v2206_v55 = vpack.c.b16 %v2189_v32, %v2188_v31  ;;  %v5194_v58 = vld [vmem:[%s5700_s8 + $0x48] sm:$0xff]  ;;  %v5307_v31 = vld [vmem:[%s7187_s1 + $0x238] sm:$0xff]  ;;  %v911_v32 = vrot.slane %v909_v20, 4  ;;  %v2432_v20 = vunpack.c.l.b16 %v1359_v10 }
  0x85   : > { %3446 = vmatmul.bf16.gmra.mxu3 %v2205_v56  ;;  %v660_v56 = vor.u32 %v659_v39, %v656_v38  ;;  %v4543_v38 = vld [vmem:[%s5700_s8 + $0x14] sm:$0x1]  ;;  %3996 = vmatpush.bf16.msra.mxu0 %v5307_v31  ;;  %v678_v31 = vld [vmem:[%s5700_s8 + $0xc] sm:$0xe] }
  0x86   : > { %3406 = vmatmul.bf16.gmra.mxu1 %v2197_v59  ;;  %v670_v59 = vor.u32 %v669_v41, %v665_v40  ;;  %v5203_v39 = vld [vmem:[%s5700_s8 + $0xb4] sm:$0xff]  ;;  %v915_v46 = vor.u32 %v914_v35, %v911_v32  ;;  %v928_v48 = vshll.u32 %v4543_v38, 16  ;;  %v753_v32 = vrot.slane %v5748_v52, 5 }
  0x87   : > { %v661_v3 = vrot.slane %v660_v56, 4  ;;  %v5195_v41 = vld [vmem:[%s5700_s8 + $0x54] sm:$0xff]  ;;  %v749_v56 = vrot.slane %v5720_v25, 5 }
  0x88   : > { %v671_v6 = vrot.slane %v670_v59, 4  ;;  %v916_v57 = vrot.slane %v915_v46, 4  ;;  %v930_v59 = vrot.slane %v928_v48, 5  ;;  %v5290_v46 = vld [vmem:[%s7187_s1 + $0x1b0] sm:$0xff]  ;;  %v756_v48 = vrot.slane %v5787_v21, 5 }
  0x89   : > { %v666_v15 = vsel %vm5741_vm2, %v661_v3, %v665_v40  ;;  %3819 = vmatpush.bf16.msra.mxu2 %v5290_v46 }
  0x8a   : > { %v676_v16 = vsel %vm5741_vm2, %v671_v6, %v675_v4  ;;  %v2190_v27 = vunpack.c.l.b16 %v666_v15  ;;  %v933_v4 = vshrl.u32 %v4513_v60, 16  ;;  %v921_v6 = vsel %vm5741_vm2, %v916_v57, %v920_v36 }
  0x8b   : > { %v2191_v28 = vunpack.c.l.b16 %v676_v16  ;;  %v2368_v15 = vunpack.c.l.b16 %v921_v6 }
  0x8c   : > { %v935_v18 = vrot.slane %v933_v4, 4 }
  0x8d   : > { %v2207_v40 = vpack.c.b16 %v2191_v28, %v2190_v27  ;;  %v5204_v28 = vld [vmem:[%s5700_s8 + $0xc] sm:$0xff] }
  0x8e   : > { %v939_v35 = vor.u32 %v938_v19, %v935_v18 }
  0x90   : > { %v940_v49 = vrot.slane %v939_v35, 4  ;;  %v4545_v35 = vld [vmem:[%s5700_s8 + $0x2c] sm:$0x1] }
  0x94   : > { %3362 = vmatmul.bf16.gmra.mxu2 %v5202_v53  ;;  %3322 = vmatmul.bf16.gmra.mxu0 %v5194_v58  ;;  %v4495_v53 = vrot.slane %v677_v45, 9  ;;  %v926_v58 = vrot.slane %v925_v47, 4  ;;  %v4560_v45 = vld [vmem:[%s5700_s8 + $0x18] sm:$0xe]  ;;  %v755_v47 = vrot.slane %v753_v32, 4 }
  0x95   : > { %3451 = vmatmul.bf16.gmra.mxu3 %v2206_v55  ;;  %v748_v55 = vrot.slane %v746_v42, 4 }
  0x96   : > { %3411 = vmatmul.bf16.gmra.mxu1 %v2198_v63  ;;  %v1361_v63 = vrot.slane %v4543_v38, 5  ;;  %v747_v3 = vsel %vm6036_vm5, %v4495_v53, %v746_v42  ;;  %v931_v7 = vsel %vm5741_vm2, %v926_v58, %v930_v59  ;;  %v949_v38 = vor.u32 %v948_v24, %v944_v23  ;;  %v5306_v24 = vld [vmem:[%s7187_s1 + $0x230] sm:$0xff] }
  0x97   : > { %v750_v25 = vsel %vm6036_vm5, %v748_v55, %v749_v56  ;;  %v2224_v12 = vunpack.c.l.b16 %v747_v3  ;;  %v2369_v16 = vunpack.c.l.b16 %v931_v7  ;;  %v1365_v42 = vrot.slane %v6042_v1, 5  ;;  %v4515_v56 = vld [vmem:[%s5700_s8 + $0x24] sm:$0xf]  ;;  %3997 = vmatpush.bf16.msra.mxu0 %v5306_v24 }
  0x98   : > { %v1362_v11 = vsel %vm6036_vm5, %v1360_v62, %v1361_v63  ;;  %v2225_v14 = vunpack.c.l.b16 %v750_v25  ;;  %v950_v53 = vrot.slane %v949_v38, 4  ;;  %v4576_v59 = vrot.slane %v4560_v45, 9  ;;  %v6081_v62 = vld [vmem:[%s5700_s8 + $0x28] sm:$0xf]  ;;  %v5205_v38 = vld [vmem:[%s5700_s8 + $0x18] sm:$0xff] }
  0x99   : > { %v2433_v22 = vunpack.c.l.b16 %v1362_v11  ;;  %v2400_v30 = vpack.c.b16 %v2369_v16, %v2368_v15  ;;  %v1367_v60 = vrot.slane %v1365_v42, 4  ;;  %v757_v1 = vsel %vm6036_vm5, %v755_v47, %v756_v48 }
  0x9a   : > { %v2256_v27 = vpack.c.b16 %v2225_v14, %v2224_v12  ;;  %v945_v3 = vsel %vm5741_vm2, %v940_v49, %v944_v23  ;;  %v957_v25 = vshrl.u32 %v4515_v56, 16  ;;  %v960_v4 = vshll.u32 %v4515_v56, 16  ;;  %v4561_v56 = vld [vmem:[%s5700_s8 + $0x24] sm:$0xe] }
  0x9b   : > { %v2464_v37 = vpack.c.b16 %v2433_v22, %v2432_v20  ;;  %v966_v8 = vshll.u32 %v6081_v62, 16  ;;  %v970_v9 = vshrl.u32 %v6081_v62, 16  ;;  %v1366_v12 = vsel %vm6036_vm5, %v4576_v59, %v1365_v42 }
  0x9c   : > { %v1369_v14 = vsel %vm6036_vm5, %v1367_v60, %v1368_v61  ;;  %v2227_v16 = vunpack.c.l.b16 %v757_v1  ;;  %v2370_v18 = vunpack.c.l.b16 %v945_v3  ;;  %v959_v22 = vrot.slane %v957_v25, 4 }
  0x9d   : > { %v962_v23 = vrot.slane %v960_v4, 5  ;;  %v976_v48 = vshll.u32 %v4545_v35, 16  ;;  %v4577_v3 = vrot.slane %v4561_v56, 9  ;;  %v1375_v25 = vrot.slane %v4545_v35, 5  ;;  %v6121_v4 = vld [vmem:[%s5700_s8 + $0x34] sm:$0xf] }
  0x9f   : > { %v963_v42 = vor.u32 %v962_v23, %v959_v22  ;;  %v978_v61 = vrot.slane %v976_v48, 5  ;;  %v680_v48 = vld [vmem:[%s5700_s8 + $0x24] sm:$0xe] }
  0xa1   : > { %v964_v59 = vrot.slane %v963_v42, 4 }
  0xa4   : > { %3367 = vmatmul.bf16.gmra.mxu2 %v5203_v39  ;;  %3327 = vmatmul.bf16.gmra.mxu0 %v5195_v41  ;;  %v952_v39 = vshll.u32 %v4544_v26, 16  ;;  %v2434_v26 = vunpack.c.l.b16 %v1366_v12 }
  0xa5   : > { %3456 = vmatmul.bf16.gmra.mxu3 %v2207_v40 }
  0xa6   : > { %3416 = vmatmul.bf16.gmra.mxu1 %v2199_v43  ;;  %v4496_v43 = vrot.slane %v678_v31, 9  ;;  %v954_v55 = vrot.slane %v952_v39, 5 }
  0xa8   : > { %v754_v63 = vsel %vm6036_vm5, %v4496_v43, %v753_v32  ;;  %v955_v7 = vsel %vm5741_vm2, %v950_v53, %v954_v55  ;;  %v1372_v53 = vrot.slane %v6081_v62, 5 }
  0xa9   : > { %v2226_v15 = vunpack.c.l.b16 %v754_v63  ;;  %v2371_v20 = vunpack.c.l.b16 %v955_v7 }
  0xaa   : > { %v1374_v62 = vrot.slane %v1372_v53, 4  ;;  %v1373_v22 = vsel %vm6036_vm5, %v4577_v3, %v1372_v53 }
  0xab   : > { %v2401_v39 = vpack.c.b16 %v2371_v20, %v2370_v18  ;;  %v2436_v35 = vunpack.c.l.b16 %v1373_v22 }
  0xac   : > { %v1376_v23 = vsel %vm6036_vm5, %v1374_v62, %v1375_v25  ;;  %v770_v62 = vrot.slane %v5866_v2, 5 }
  0xb1   : > { %v3293_v36 = vpop.f32.mrf.mxu0 }
  0xb2   : > { %v3294_v40 = vadd.f32 %v6063_v29, %v3293_v36 }
  0xb3   : > { %v3382_v41 = vpop.f32.mrf.mxu1 }
  0xb4   : > { %3470 = vmatmul.bf16.vlgmr.msrb.gmra.mxu2 %v2256_v27  ;;  %v6073_v52 = vadd.f32 %v3382_v41, %v3294_v40  ;;  %3648 = vmatmul.bf16.vlgmr.msrb.gmra.mxu0 %v2400_v30  ;;  %v2435_v27 = vunpack.c.l.b16 %v1369_v14  ;;  %v972_v30 = vrot.slane %v970_v9, 4  ;;  %v679_v40 = vld [vmem:[%s5700_s8 + $0x18] sm:$0xe]  ;;  %v760_v41 = vrot.slane %v5815_v51, 5 }
  0xb5   : > { %3559 = vmatmul.bf16.vlgmr.msrb.gmra.mxu3 %v5204_v28  ;;  %v968_v28 = vrot.slane %v966_v8, 5  ;;  %v4497_v55 = vrot.slane %v679_v40, 9 }
  0xb6   : > { %3737 = vmatmul.bf16.vlgmr.msrb.gmra.mxu1 %v2464_v37  ;;  %v2257_v37 = vpack.c.b16 %v2227_v16, %v2226_v15  ;;  %v2465_v46 = vpack.c.b16 %v2435_v27, %v2434_v26  ;;  %v762_v51 = vrot.slane %v760_v41, 4  ;;  %v990_v15 = vshll.u32 %v6121_v4, 16 }
  0xb7   : > { %v3333_v57 = vpop.f32.mrf.mxu2  ;;  %v973_v47 = vor.u32 %v972_v30, %v968_v28  ;;  %v761_v7 = vsel %vm6036_vm5, %v4497_v55, %v760_v41  ;;  %v969_v8 = vsel %vm5741_vm2, %v964_v59, %v968_v28  ;;  %v994_v16 = vshrl.u32 %v6121_v4, 16  ;;  %v4546_v41 = vld [vmem:[%s5700_s8 + $0x38] sm:$0x1] }
  0xb8   : > { %v3422_v58 = vpop.f32.mrf.mxu3  ;;  %v3334_v21 = vadd.f32 %v6063_v29, %v3333_v57  ;;  %v2228_v24 = vunpack.c.l.b16 %v761_v7  ;;  %v2372_v27 = vunpack.c.l.b16 %v969_v8 }
  0xb9   : > { %v3295_v6 = vpop.f32.mrf.mxu0  ;;  %v974_v60 = vrot.slane %v973_v47, 4 }
  0xba   : > { %v6090_v5 = vadd.f32 %v3422_v58, %v3334_v21  ;;  %v3296_v10 = vadd.f32 %v6063_v29, %v3295_v6  ;;  %v763_v58 = vrot.slane %v5835_v17, 5  ;;  %v4517_v21 = vld [vmem:[%s5700_s8 + $0x30] sm:$0xf] }
  0xbb   : > { %v3384_v11 = vpop.f32.mrf.mxu1  ;;  %v981_v9 = vshrl.u32 %v4517_v21, 16  ;;  %v979_v14 = vsel %vm5741_vm2, %v974_v60, %v978_v61  ;;  %v1379_v61 = vrot.slane %v6121_v4, 5  ;;  %v5297_v4 = vld [vmem:[%s7187_s1 + $0x1e8] sm:$0xff] }
  0xbc   : > { %v6101_v19 = vadd.f32 %v3384_v11, %v3296_v10  ;;  %v764_v17 = vsel %vm6036_vm5, %v762_v51, %v763_v58  ;;  %v984_v10 = vshll.u32 %v4517_v21, 16  ;;  %v2373_v30 = vunpack.c.l.b16 %v979_v14  ;;  %3909 = vmatpush.bf16.msra.mxu3 %v5297_v4 }
  0xbd   : > { %v2229_v26 = vunpack.c.l.b16 %v764_v17  ;;  %v1000_v58 = vshll.u32 %v4546_v41, 16  ;;  %v4498_v21 = vrot.slane %v680_v48, 9  ;;  %v4519_v17 = vld [vmem:[%s5700_s8 + $0x3c] sm:$0xf]  ;;  %v1382_v14 = vrot.slane %v4546_v41, 5 }
  0xbe   : > { %v2402_v47 = vpack.c.b16 %v2373_v30, %v2372_v27  ;;  %v1005_v22 = vshrl.u32 %v4519_v17, 16 }
  0xbf   : > { %v3335_v31 = vpop.f32.mrf.mxu2  ;;  %v1002_v7 = vrot.slane %v1000_v58, 5  ;;  %v4547_v58 = vld [vmem:[%s5700_s8 + $0x44] sm:$0x1] }
  0xc0   : > { %v3424_v32 = vpop.f32.mrf.mxu3  ;;  %v3336_v36 = vadd.f32 %v6063_v29, %v3335_v31  ;;  %v983_v31 = vrot.slane %v981_v9, 4 }
  0xc1   : > { %v3298_v45 = vpop.f32.mrf.mxu0 }
  0xc2   : > { %v6111_v43 = vadd.f32 %v3424_v32, %v3336_v36  ;;  %v3299_v49 = vadd.f32 %v6063_v29, %v3298_v45  ;;  %v986_v32 = vrot.slane %v984_v10, 5  ;;  %v2437_v36 = vunpack.c.l.b16 %v1376_v23 }
  0xc3   : > { %v3387_v50 = vpop.f32.mrf.mxu1  ;;  %v2258_v45 = vpack.c.b16 %v2229_v26, %v2228_v24  ;;  %v1008_v23 = vshll.u32 %v4519_v17, 16 }
  0xc4   : > { %3475 = vmatmul.bf16.gmra.mxu2 %v2257_v37  ;;  %v6116_v57 = vadd.f32 %v3387_v50, %v3299_v49  ;;  %3653 = vmatmul.bf16.gmra.mxu0 %v2401_v39  ;;  %v992_v37 = vrot.slane %v990_v15, 5  ;;  %v767_v49 = vrot.slane %v5851_v34, 5  ;;  %v987_v50 = vor.u32 %v986_v32, %v983_v31  ;;  %v5289_v34 = vld [vmem:[%s7187_s1 + $0x1a8] sm:$0xff]  ;;  %v6164_v15 = vld [vmem:[%s5700_s8 + $0x40] sm:$0xf] }
  0xc5   : > { %3564 = vmatmul.bf16.gmra.mxu3 %v5205_v38  ;;  %v996_v38 = vrot.slane %v994_v16, 4  ;;  %v2466_v56 = vpack.c.b16 %v2437_v36, %v2436_v35  ;;  %3820 = vmatpush.bf16.msra.mxu2 %v5289_v34  ;;  %v1014_v30 = vshll.u32 %v6164_v15, 16  ;;  %v1018_v31 = vshrl.u32 %v6164_v15, 16 }
  0xc6   : > { %3742 = vmatmul.bf16.gmra.mxu1 %v2465_v46  ;;  %v5206_v46 = vld [vmem:[%s5700_s8 + $0x24] sm:$0xff]  ;;  %v769_v3 = vrot.slane %v767_v49, 4  ;;  %v988_v25 = vrot.slane %v987_v50, 4  ;;  %v768_v16 = vsel %vm6036_vm5, %v4498_v21, %v767_v49  ;;  %v774_v34 = vrot.slane %v5884_v33, 5 }
  0xc7   : > { %v3338_v63 = vpop.f32.mrf.mxu2  ;;  %v997_v51 = vor.u32 %v996_v38, %v992_v37  ;;  %v2230_v38 = vunpack.c.l.b16 %v768_v16  ;;  %v1016_v50 = vrot.slane %v1014_v30, 5  ;;  %v1389_v30 = vrot.slane %v4547_v58, 5 }
  0xc8   : > { %v3427_v1 = vpop.f32.mrf.mxu3  ;;  %v3339_v6 = vadd.f32 %v6063_v29, %v3338_v63  ;;  %v4562_v63 = vld [vmem:[%s5700_s8 + $0x30] sm:$0xe]  ;;  %v776_v33 = vrot.slane %v774_v34, 4 }
  0xc9   : > { %v3300_v12 = vpop.f32.mrf.mxu0  ;;  %v4578_v10 = vrot.slane %v4562_v63, 9  ;;  %v681_v63 = vld [vmem:[%s5700_s8 + $0x30] sm:$0xe] }
  0xca   : > { %v6130_v11 = vadd.f32 %v3427_v1, %v3339_v6  ;;  %v3301_v18 = vadd.f32 %v6063_v29, %v3300_v12  ;;  %v998_v6 = vrot.slane %v997_v51, 4  ;;  %v1381_v12 = vrot.slane %v1379_v61, 4 }
  0xcb   : > { %v3389_v20 = vpop.f32.mrf.mxu1  ;;  %v1380_v36 = vsel %vm6036_vm5, %v4578_v10, %v1379_v61  ;;  %v5207_v61 = vld [vmem:[%s5700_s8 + $0x30] sm:$0xff]  ;;  %v4499_v10 = vrot.slane %v681_v63, 9 }
  0xcc   : > { %v6141_v28 = vadd.f32 %v3389_v20, %v3301_v18  ;;  %v771_v18 = vsel %vm6036_vm5, %v769_v3, %v770_v62  ;;  %v993_v20 = vsel %vm5741_vm2, %v988_v25, %v992_v37  ;;  %v1003_v27 = vsel %vm5741_vm2, %v998_v6, %v1002_v7 }
  0xcd   : > { %v1383_v37 = vsel %vm6036_vm5, %v1381_v12, %v1382_v14  ;;  %v2438_v48 = vunpack.c.l.b16 %v1380_v36  ;;  %v1024_v7 = vshll.u32 %v4547_v58, 16  ;;  %v4563_v12 = vld [vmem:[%s5700_s8 + $0x3c] sm:$0xe] }
  0xce   : > { %v2439_v49 = vunpack.c.l.b16 %v1383_v37 }
  0xcf   : > { %v3340_v39 = vpop.f32.mrf.mxu2 }
  0xd0   : > { %v3429_v40 = vpop.f32.mrf.mxu3  ;;  %v3341_v42 = vadd.f32 %v6063_v29, %v3340_v39  ;;  %v2231_v39 = vunpack.c.l.b16 %v771_v18  ;;  %v2467_v4 = vpack.c.b16 %v2439_v49, %v2438_v48 }
  0xd1   : > { %v3303_v55 = vpop.f32.mrf.mxu0 }
  0xd2   : > { %v6148_v53 = vadd.f32 %v3429_v40, %v3341_v42  ;;  %v3304_v59 = vadd.f32 %v6063_v29, %v3303_v55  ;;  %v2374_v40 = vunpack.c.l.b16 %v993_v20  ;;  %v2375_v42 = vunpack.c.l.b16 %v1003_v27 }
  0xd3   : > { %v3392_v60 = vpop.f32.mrf.mxu1  ;;  %v1020_v55 = vrot.slane %v1018_v31, 4  ;;  %v1026_v20 = vrot.slane %v1024_v7, 5  ;;  %v4579_v27 = vrot.slane %v4563_v12, 9  ;;  %v6204_v31 = vld [vmem:[%s5700_s8 + $0x4c] sm:$0xf] }
  0xd4   : > { %3480 = vmatmul.bf16.gmra.mxu2 %v2258_v45  ;;  %v6156_v1 = vadd.f32 %v3392_v60, %v3304_v59  ;;  %3658 = vmatmul.bf16.gmra.mxu0 %v2402_v47  ;;  %v1007_v45 = vrot.slane %v1005_v22, 4  ;;  %v5305_v47 = vld [vmem:[%s7187_s1 + $0x228] sm:$0xff]  ;;  %v2259_v60 = vpack.c.b16 %v2231_v39, %v2230_v38  ;;  %v2403_v21 = vpack.c.b16 %v2375_v42, %v2374_v40  ;;  %v5488_v12 = vld [vmem:[%s5700_s8 + $0x40] sm:$0xf] }
  0xd5   : > { %3569 = vmatmul.bf16.gmra.mxu3 %v5206_v46  ;;  %v1010_v46 = vrot.slane %v1008_v23, 5  ;;  %3998 = vmatpush.bf16.msra.mxu0 %v5305_v47  ;;  %v1021_v6 = vor.u32 %v1020_v55, %v1016_v50  ;;  %v4521_v22 = vld [vmem:[%s5700_s8 + $0x48] sm:$0xf] }
  0xd6   : > { %3747 = vmatmul.bf16.gmra.mxu1 %v2466_v56  ;;  %v1029_v37 = vshrl.u32 %v4521_v22, 16  ;;  %v1032_v38 = vshll.u32 %v4521_v22, 16 }
  0xd7   : > { %v3343_v8 = vpop.f32.mrf.mxu2  ;;  %v1011_v3 = vor.u32 %v1010_v46, %v1007_v45  ;;  %v1022_v18 = vrot.slane %v1021_v6, 4  ;;  %v1038_v45 = vshll.u32 %v6204_v31, 16  ;;  %v1042_v46 = vshrl.u32 %v6204_v31, 16  ;;  %v4548_v6 = vld [vmem:[%s5700_s8 + $0x50] sm:$0x1] }
  0xd8   : > { %v3432_v9 = vpop.f32.mrf.mxu3  ;;  %v3344_v2 = vadd.f32 %v6063_v29, %v3343_v8 }
  0xd9   : > { %v3305_v26 = vpop.f32.mrf.mxu0  ;;  %v1012_v16 = vrot.slane %v1011_v3, 4  ;;  %v1027_v42 = vsel %vm5741_vm2, %v1022_v18, %v1026_v20  ;;  %v1044_v3 = vrot.slane %v1042_v46, 4 }
  0xda   : > { %v6173_v24 = vadd.f32 %v3432_v9, %v3344_v2  ;;  %v3306_v32 = vadd.f32 %v6063_v29, %v3305_v26  ;;  %v1386_v9 = vrot.slane %v6164_v15, 5  ;;  %v777_v2 = vrot.slane %v5899_v0, 5 }
  0xdb   : > { %v3394_v35 = vpop.f32.mrf.mxu1  ;;  %v1017_v36 = vsel %vm5741_vm2, %v1012_v16, %v1016_v50 }
  0xdc   : > { %v6184_v41 = vadd.f32 %v3394_v35, %v3306_v32  ;;  %v1388_v15 = vrot.slane %v1386_v9, 4  ;;  %v775_v35 = vsel %vm6036_vm5, %v4499_v10, %v774_v34  ;;  %v778_v0 = vsel %vm6036_vm5, %v776_v33, %v777_v2  ;;  %v682_v10 = vld [vmem:[%s5700_s8 + $0x3c] sm:$0xe] }
  0xdd   : > { %v1387_v49 = vsel %vm6036_vm5, %v4579_v27, %v1386_v9  ;;  %v2232_v55 = vunpack.c.l.b16 %v775_v35  ;;  %v1040_v34 = vrot.slane %v1038_v45, 5  ;;  %v781_v33 = vrot.slane %v5488_v12, 5  ;;  %v5288_v35 = vld [vmem:[%s7187_s1 + $0x1a0] sm:$0xff]  ;;  %v4523_v45 = vld [vmem:[%s5700_s8 + $0x54] sm:$0xf] }
  0xde   : > { %v1390_v50 = vsel %vm6036_vm5, %v1388_v15, %v1389_v30  ;;  %v1393_v15 = vrot.slane %v6204_v31, 5  ;;  %v4500_v30 = vrot.slane %v682_v10, 9  ;;  %v5296_v31 = vld [vmem:[%s7187_s1 + $0x1e0] sm:$0xff]  ;;  %3821 = vmatpush.bf16.msra.mxu2 %v5288_v35 }
  0xdf   : > { %v3345_v56 = vpop.f32.mrf.mxu2  ;;  %v2441_v63 = vunpack.c.l.b16 %v1390_v50  ;;  %v1045_v22 = vor.u32 %v1044_v3, %v1040_v34  ;;  %v1396_v50 = vrot.slane %v4548_v6, 5  ;;  %3910 = vmatpush.bf16.msra.mxu3 %v5296_v31  ;;  %v683_v31 = vld [vmem:[%s5700_s8 + $0x48] sm:$0xe] }
  0xe0   : > { %v3434_v51 = vpop.f32.mrf.mxu3  ;;  %v3346_v59 = vadd.f32 %v6063_v29, %v3345_v56  ;;  %v2233_v56 = vunpack.c.l.b16 %v778_v0 }
  0xe1   : > { %v3308_v25 = vpop.f32.mrf.mxu0 }
  0xe2   : > { %v6194_v62 = vadd.f32 %v3434_v51, %v3346_v59  ;;  %v3309_v17 = vadd.f32 %v6063_v29, %v3308_v25  ;;  %v2376_v51 = vunpack.c.l.b16 %v1017_v36  ;;  %v2377_v59 = vunpack.c.l.b16 %v1027_v42 }
  0xe3   : > { %v3397_v8 = vpop.f32.mrf.mxu1  ;;  %v783_v36 = vrot.slane %v781_v33, 4 }
  0xe4   : > { %3485 = vmatmul.bf16.gmra.mxu2 %v2259_v60  ;;  %v6199_v14 = vadd.f32 %v3397_v8, %v3309_v17  ;;  %3663 = vmatmul.bf16.gmra.mxu0 %v2403_v21  ;;  %v1031_v60 = vrot.slane %v1029_v37, 4  ;;  %v2440_v21 = vunpack.c.l.b16 %v1387_v49  ;;  %v2260_v17 = vpack.c.b16 %v2233_v56, %v2232_v55  ;;  %v5208_v8 = vld [vmem:[%s5700_s8 + $0x3c] sm:$0xff]  ;;  %v6247_v55 = vld [vmem:[%s5700_s8 + $0x58] sm:$0xf] }
  0xe5   : > { %3574 = vmatmul.bf16.gmra.mxu3 %v5207_v61  ;;  %v1034_v61 = vrot.slane %v1032_v38, 5  ;;  %v2404_v9 = vpack.c.b16 %v2377_v59, %v2376_v51  ;;  %v784_v37 = vrot.slane %v5926_v54, 5  ;;  %v1395_v49 = vrot.slane %v1393_v15, 4 }
  0xe6   : > { %3752 = vmatmul.bf16.gmra.mxu1 %v2467_v4  ;;  %v2468_v20 = vpack.c.b16 %v2441_v63, %v2440_v21  ;;  %v782_v56 = vsel %vm6036_vm5, %v4500_v30, %v781_v33 }
  0xe7   : > { %v3348_v23 = vpop.f32.mrf.mxu2  ;;  %v1035_v2 = vor.u32 %v1034_v61, %v1031_v60  ;;  %v785_v51 = vsel %vm6036_vm5, %v783_v36, %v784_v37  ;;  %v1053_v60 = vshrl.u32 %v4523_v45, 16  ;;  %v1056_v61 = vshll.u32 %v4523_v45, 16  ;;  %v5209_v37 = vld [vmem:[%s5700_s8 + $0x48] sm:$0xff] }
  0xe8   : > { %v3437_v26 = vpop.f32.mrf.mxu3  ;;  %v3349_v32 = vadd.f32 %v6063_v29, %v3348_v23  ;;  %v1048_v23 = vshll.u32 %v4548_v6, 16 }
  0xe9   : > { %v3310_v40 = vpop.f32.mrf.mxu0  ;;  %v1036_v38 = vrot.slane %v1035_v2, 4  ;;  %v1055_v2 = vrot.slane %v1053_v60, 4  ;;  %v4565_v60 = vld [vmem:[%s5700_s8 + $0x54] sm:$0xe] }
  0xea   : > { %v6213_v39 = vadd.f32 %v3437_v26, %v3349_v32  ;;  %v3311_v47 = vadd.f32 %v6063_v29, %v3310_v40  ;;  %v4564_v32 = vld [vmem:[%s5700_s8 + $0x48] sm:$0xe]  ;;  %v1046_v40 = vrot.slane %v1045_v22, 4  ;;  %v1050_v42 = vrot.slane %v1048_v23, 5 }
  0xeb   : > { %v3399_v48 = vpop.f32.mrf.mxu1  ;;  %v1041_v59 = vsel %vm5741_vm2, %v1036_v38, %v1040_v34  ;;  %v1397_v34 = vsel %vm6036_vm5, %v1395_v49, %v1396_v50 }
  0xec   : > { %v6224_v58 = vadd.f32 %v3399_v48, %v3311_v47  ;;  %v4580_v48 = vrot.slane %v4564_v32, 9  ;;  %v1051_v3 = vsel %vm5741_vm2, %v1046_v40, %v1050_v42  ;;  %v2378_v10 = vunpack.c.l.b16 %v1041_v59  ;;  %v4549_v32 = vld [vmem:[%s5700_s8 + $0x5c] sm:$0x1]  ;;  %v5489_v40 = vld [vmem:[%s5700_s8 + $0x4c] sm:$0xf] }
  0xed   : > { %v2379_v33 = vunpack.c.l.b16 %v1051_v3  ;;  %v2443_v23 = vunpack.c.l.b16 %v1397_v34  ;;  %v788_v42 = vrot.slane %v5489_v40, 5  ;;  %v1072_v50 = vshll.u32 %v4549_v32, 16  ;;  %v5490_v3 = vld [vmem:[%s5700_s8 + $0x50] sm:$0x1] }
  0xee   : > { %v4501_v59 = vrot.slane %v683_v31, 9 }
  0xef   : > { %v3350_v25 = vpop.f32.mrf.mxu2  ;;  %v2405_v38 = vpack.c.b16 %v2379_v33, %v2378_v10  ;;  %v1403_v10 = vrot.slane %v4549_v32, 5  ;;  %v6287_v33 = vld [vmem:[%s5700_s8 + $0x64] sm:$0xf] }
  0xf0   : > { %v3439_v4 = vpop.f32.mrf.mxu3  ;;  %v3351_v7 = vadd.f32 %v6063_v29, %v3350_v25  ;;  %v1062_v25 = vshll.u32 %v6247_v55, 16 }
  0xf1   : > { %v3313_v18 = vpop.f32.mrf.mxu0 }
  0xf2   : > { %v6231_v16 = vadd.f32 %v3439_v4, %v3351_v7  ;;  %v3314_v26 = vadd.f32 %v6063_v29, %v3313_v18  ;;  %v1066_v4 = vshrl.u32 %v6247_v55, 16  ;;  %v1058_v18 = vrot.slane %v1056_v61, 5 }
  0xf3   : > { %v3402_v27 = vpop.f32.mrf.mxu1 }
  0xf4   : > { %3490 = vmatmul.bf16.gmra.mxu2 %v2260_v17  ;;  %v6239_v0 = vadd.f32 %v3402_v27, %v3314_v26  ;;  %3668 = vmatmul.bf16.gmra.mxu0 %v2404_v9  ;;  %v1394_v17 = vsel %vm6036_vm5, %v4580_v48, %v1393_v15  ;;  %v2235_v9 = vunpack.c.l.b16 %v785_v51  ;;  %v1064_v26 = vrot.slane %v1062_v25, 5 }
  0xf5   : > { %3579 = vmatmul.bf16.gmra.mxu3 %v5208_v8  ;;  %v2234_v8 = vunpack.c.l.b16 %v782_v56  ;;  %v2442_v22 = vunpack.c.l.b16 %v1394_v17  ;;  %v1068_v27 = vrot.slane %v1066_v4, 4  ;;  %v1059_v45 = vor.u32 %v1058_v18, %v1055_v2  ;;  %v4525_v17 = vld [vmem:[%s5700_s8 + $0x60] sm:$0xf] }
  0xf6   : > { %3757 = vmatmul.bf16.gmra.mxu1 %v2468_v20  ;;  %v5304_v20 = vld [vmem:[%s7187_s1 + $0x220] sm:$0xff]  ;;  %v1400_v51 = vrot.slane %v6247_v55, 5  ;;  %v791_v25 = vrot.slane %v5490_v3, 5  ;;  %v789_v18 = vsel %vm6036_vm5, %v4501_v59, %v788_v42  ;;  %v4550_v3 = vld [vmem:[%s5700_s8 + $0x68] sm:$0x1] }
  0xf7   : > { %v3353_v46 = vpop.f32.mrf.mxu2  ;;  %3999 = vmatpush.bf16.msra.mxu0 %v5304_v20  ;;  %v2261_v36 = vpack.c.b16 %v2235_v9, %v2234_v8  ;;  %v2469_v48 = vpack.c.b16 %v2443_v23, %v2442_v22  ;;  %v1069_v49 = vor.u32 %v1068_v27, %v1064_v26  ;;  %v1060_v4 = vrot.slane %v1059_v45, 4 }
  0xf8   : > { %v3442_v47 = vpop.f32.mrf.mxu3  ;;  %v3354_v54 = vadd.f32 %v6063_v29, %v3353_v46  ;;  %v4581_v9 = vrot.slane %v4565_v60, 9  ;;  %v1402_v55 = vrot.slane %v1400_v51, 4  ;;  %v1077_v23 = vshrl.u32 %v4525_v17, 16 }
  0xf9   : > { %v3315_v63 = vpop.f32.mrf.mxu0  ;;  %v1065_v22 = vsel %vm5741_vm2, %v1060_v4, %v1064_v26  ;;  %v1080_v27 = vshll.u32 %v4525_v17, 16  ;;  %v2236_v40 = vunpack.c.l.b16 %v789_v18  ;;  %v684_v17 = vld [vmem:[%s5700_s8 + $0x54] sm:$0xe] }
  0xfa   : > { %v6256_v21 = vadd.f32 %v3442_v47, %v3354_v54  ;;  %v3316_v6 = vadd.f32 %v6063_v29, %v3315_v63  ;;  %v790_v63 = vrot.slane %v788_v42, 4  ;;  %v1401_v31 = vsel %vm6036_vm5, %v4581_v9, %v1400_v51 }
  0xfb   : > { %v3404_v7 = vpop.f32.mrf.mxu1  ;;  %v1404_v26 = vsel %vm6036_vm5, %v1402_v55, %v1403_v10  ;;  %v2380_v45 = vunpack.c.l.b16 %v1065_v22 }
  0xfc   : > { %v6267_v12 = vadd.f32 %v3404_v7, %v3316_v6  ;;  %v1070_v6 = vrot.slane %v1069_v49, 4  ;;  %v1074_v7 = vrot.slane %v1072_v50, 5  ;;  %v792_v20 = vsel %vm6036_vm5, %v790_v63, %v791_v25 }
  0xfd   : > { %v2237_v42 = vunpack.c.l.b16 %v792_v20  ;;  %v1079_v49 = vrot.slane %v1077_v23, 4  ;;  %v1082_v50 = vrot.slane %v1080_v27, 5  ;;  %v1096_v20 = vshll.u32 %v4550_v3, 16 }
  0xfe   : > { %v1075_v32 = vsel %vm5741_vm2, %v1070_v6, %v1074_v7  ;;  %v5210_v6 = vld [vmem:[%s5700_s8 + $0x54] sm:$0xff]  ;;  %v1407_v27 = vrot.slane %v6287_v33, 5 }
  0xff   : > { %v3355_v15 = vpop.f32.mrf.mxu2  ;;  %v2262_v4 = vpack.c.b16 %v2237_v42, %v2236_v40  ;;  %v1083_v9 = vor.u32 %v1082_v50, %v1079_v49  ;;  %v1098_v42 = vrot.slane %v1096_v20, 5 }
 0x100   : > { %v3444_v30 = vpop.f32.mrf.mxu3  ;;  %v3356_v35 = vadd.f32 %v6063_v29, %v3355_v15 }
 0x101   : > { %v3318_v47 = vpop.f32.mrf.mxu0 }
 0x102   : > { %v6277_v46 = vadd.f32 %v3444_v30, %v3356_v35  ;;  %v3319_v54 = vadd.f32 %v6063_v29, %v3318_v47  ;;  %v1086_v35 = vshll.u32 %v6287_v33, 16 }
 0x103   : > { %v3407_v56 = vpop.f32.mrf.mxu1 }
 0x104   : > { %3495 = vmatmul.bf16.gmra.mxu2 %v2261_v36  ;;  %v6282_v61 = vadd.f32 %v3407_v56, %v3319_v54  ;;  %3673 = vmatmul.bf16.gmra.mxu0 %v2405_v38  ;;  %v1090_v36 = vshrl.u32 %v6287_v33, 16  ;;  %v2444_v54 = vunpack.c.l.b16 %v1401_v31  ;;  %v2445_v56 = vunpack.c.l.b16 %v1404_v26  ;;  %v5295_v33 = vld [vmem:[%s7187_s1 + $0x1d8] sm:$0xff] }
 0x105   : > { %3584 = vmatmul.bf16.gmra.mxu3 %v5209_v37  ;;  %v1088_v59 = vrot.slane %v1086_v35, 5  ;;  %v5287_v35 = vld [vmem:[%s7187_s1 + $0x198] sm:$0xff]  ;;  %v1084_v26 = vrot.slane %v1083_v9, 4 }
 0x106   : > { %3762 = vmatmul.bf16.gmra.mxu1 %v2469_v48  ;;  %v2381_v48 = vunpack.c.l.b16 %v1075_v32  ;;  %v1092_v60 = vrot.slane %v1090_v36, 4  ;;  %v4566_v32 = vld [vmem:[%s5700_s8 + $0x60] sm:$0xe]  ;;  %3822 = vmatpush.bf16.msra.mxu2 %v5287_v35 }
 0x107   : > { %v3358_v34 = vpop.f32.mrf.mxu2  ;;  %v4582_v50 = vrot.slane %v4566_v32, 9  ;;  %3911 = vmatpush.bf16.msra.mxu3 %v5295_v33 }
 0x108   : > { %v3447_v8 = vpop.f32.mrf.mxu3  ;;  %v3359_v2 = vadd.f32 %v6063_v29, %v3358_v34  ;;  %v2406_v7 = vpack.c.b16 %v2381_v48, %v2380_v45  ;;  %v5491_v34 = vld [vmem:[%s5700_s8 + $0x58] sm:$0xf]  ;;  %v1093_v18 = vor.u32 %v1092_v60, %v1088_v59  ;;  %v4527_v45 = vld [vmem:[%s5700_s8 + $0x6c] sm:$0xf]  ;;  %v6330_v60 = vld [vmem:[%s5700_s8 + $0x70] sm:$0xf] }
 0x109   : > { %v3320_v30 = vpop.f32.mrf.mxu0  ;;  %v1110_v9 = vshll.u32 %v6330_v60, 16 }
 0x10a   : > { %v6296_v15 = vadd.f32 %v3447_v8, %v3359_v2  ;;  %v3321_v37 = vadd.f32 %v6063_v29, %v3320_v30  ;;  %v795_v8 = vrot.slane %v5491_v34, 5  ;;  %v2470_v2 = vpack.c.b16 %v2445_v56, %v2444_v54 }
 0x10b   : > { %v3409_v38 = vpop.f32.mrf.mxu1  ;;  %v4502_v30 = vrot.slane %v684_v17, 9  ;;  %v1094_v40 = vrot.slane %v1093_v18, 4  ;;  %v1409_v54 = vrot.slane %v1407_v27, 4  ;;  %v1410_v56 = vrot.slane %v4550_v3, 5 }
 0x10c   : > { %v6307_v47 = vadd.f32 %v3409_v38, %v3321_v37  ;;  %v797_v37 = vrot.slane %v795_v8, 4  ;;  %v5492_v38 = vld [vmem:[%s5700_s8 + $0x5c] sm:$0x1]  ;;  %v1408_v18 = vsel %vm6036_vm5, %v4582_v50, %v1407_v27  ;;  %v5211_v50 = vld [vmem:[%s5700_s8 + $0x60] sm:$0xff] }
 0x10d   : > { %v798_v31 = vrot.slane %v5492_v38, 5  ;;  %v1099_v3 = vsel %vm5741_vm2, %v1094_v40, %v1098_v42  ;;  %v2446_v38 = vunpack.c.l.b16 %v1408_v18  ;;  %v5303_v27 = vld [vmem:[%s7187_s1 + $0x218] sm:$0xff]  ;;  %v4567_v18 = vld [vmem:[%s5700_s8 + $0x6c] sm:$0xe] }
 0x10e   : > { %v2383_v32 = vunpack.c.l.b16 %v1099_v3  ;;  %4000 = vmatpush.bf16.msra.mxu0 %v5303_v27 }
 0x10f   : > { %v3360_v63 = vpop.f32.mrf.mxu2 }
 0x110   : > { %v3449_v51 = vpop.f32.mrf.mxu3  ;;  %v3361_v25 = vadd.f32 %v6063_v29, %v3360_v63 }
 0x111   : > { %v3323_v10 = vpop.f32.mrf.mxu0 }
 0x112   : > { %v6314_v55 = vadd.f32 %v3449_v51, %v3361_v25  ;;  %v3324_v22 = vadd.f32 %v6063_v29, %v3323_v10  ;;  %v796_v51 = vsel %vm6036_vm5, %v4502_v30, %v795_v8  ;;  %v799_v25 = vsel %vm6036_vm5, %v797_v37, %v798_v31 }
 0x113   : > { %v3412_v23 = vpop.f32.mrf.mxu1  ;;  %v1114_v10 = vshrl.u32 %v6330_v60, 16  ;;  %v2238_v20 = vunpack.c.l.b16 %v796_v51 }
 0x114   : > { %3500 = vmatmul.bf16.gmra.mxu2 %v2262_v4  ;;  %v6322_v36 = vadd.f32 %v3412_v23, %v3324_v22  ;;  %3678 = vmatmul.bf16.gmra.mxu0 %v2406_v7  ;;  %v1089_v4 = vsel %vm5741_vm2, %v1084_v26, %v1088_v59  ;;  %v1104_v7 = vshll.u32 %v4527_v45, 16  ;;  %v1411_v59 = vsel %vm6036_vm5, %v1409_v54, %v1410_v56  ;;  %v685_v56 = vld [vmem:[%s5700_s8 + $0x60] sm:$0xe] }
 0x115   : > { %3589 = vmatmul.bf16.gmra.mxu3 %v5210_v6  ;;  %v1101_v6 = vshrl.u32 %v4527_v45, 16  ;;  %v2239_v22 = vunpack.c.l.b16 %v799_v25  ;;  %v2382_v23 = vunpack.c.l.b16 %v1089_v4  ;;  %v2447_v31 = vunpack.c.l.b16 %v1411_v59  ;;  %v4551_v45 = vld [vmem:[%s5700_s8 + $0x74] sm:$0x1] }
 0x116   : > { %3767 = vmatmul.bf16.gmra.mxu1 %v2470_v2  ;;  %v1106_v37 = vrot.slane %v1104_v7, 5  ;;  %v1112_v26 = vrot.slane %v1110_v9, 5  ;;  %v1116_v33 = vrot.slane %v1114_v10, 4  ;;  %v1120_v3 = vshll.u32 %v4551_v45, 16 }
 0x117   : > { %v3363_v48 = vpop.f32.mrf.mxu2  ;;  %v1103_v35 = vrot.slane %v1101_v6, 4  ;;  %v2407_v54 = vpack.c.b16 %v2383_v32, %v2382_v23  ;;  %v2471_v7 = vpack.c.b16 %v2447_v31, %v2446_v38  ;;  %v6370_v31 = vld [vmem:[%s5700_s8 + $0x7c] sm:$0xf] }
 0x118   : > { %v3452_v49 = vpop.f32.mrf.mxu3  ;;  %v3364_v63 = vadd.f32 %v6063_v29, %v3363_v48  ;;  %v1122_v38 = vrot.slane %v1120_v3, 5 }
 0x119   : > { %v3325_v34 = vpop.f32.mrf.mxu0  ;;  %v1107_v25 = vor.u32 %v1106_v37, %v1103_v35  ;;  %v4529_v35 = vld [vmem:[%s5700_s8 + $0x78] sm:$0xf] }
 0x11a   : > { %v6339_v17 = vadd.f32 %v3452_v49, %v3364_v63  ;;  %v3326_v8 = vadd.f32 %v6063_v29, %v3325_v34  ;;  %v2263_v49 = vpack.c.b16 %v2239_v22, %v2238_v20  ;;  %v5493_v63 = vld [vmem:[%s5700_s8 + $0x64] sm:$0xf]  ;;  %v1117_v34 = vor.u32 %v1116_v33, %v1112_v26  ;;  %v5494_v22 = vld [vmem:[%s5700_s8 + $0x68] sm:$0x1] }
 0x11b   : > { %v3414_v2 = vpop.f32.mrf.mxu1  ;;  %v802_v51 = vrot.slane %v5493_v63, 5  ;;  %v805_v23 = vrot.slane %v5494_v22, 5  ;;  %v1108_v32 = vrot.slane %v1107_v25, 4  ;;  %v1134_v25 = vshll.u32 %v6370_v31, 16 }
 0x11c   : > { %v6350_v30 = vadd.f32 %v3414_v2, %v3326_v8  ;;  %v1414_v8 = vrot.slane %v6330_v60, 5  ;;  %v4503_v2 = vrot.slane %v685_v56, 9  ;;  %v1118_v37 = vrot.slane %v1117_v34, 4 }
 0x11d   : > { %v804_v20 = vrot.slane %v802_v51, 4  ;;  %v4583_v60 = vrot.slane %v4567_v18, 9  ;;  %v1113_v63 = vsel %vm5741_vm2, %v1108_v32, %v1112_v26 }
 0x11e   : > { %v1123_v34 = vsel %vm5741_vm2, %v1118_v37, %v1122_v38 }
 0x11f   : > { %v3365_v40 = vpop.f32.mrf.mxu2  ;;  %v806_v56 = vsel %vm6036_vm5, %v804_v20, %v805_v23  ;;  %v1415_v26 = vsel %vm6036_vm5, %v4583_v60, %v1414_v8  ;;  %v2384_v20 = vunpack.c.l.b16 %v1113_v63 }
 0x120   : > { %v3454_v42 = vpop.f32.mrf.mxu3  ;;  %v3366_v48 = vadd.f32 %v6063_v29, %v3365_v40  ;;  %v1416_v40 = vrot.slane %v1414_v8, 4  ;;  %v2241_v18 = vunpack.c.l.b16 %v806_v56  ;;  %v2448_v38 = vunpack.c.l.b16 %v1415_v26  ;;  %v4552_v8 = vld [vmem:[%s5700_s8 + $0x80] sm:$0x1] }
 0x121   : > { %v3328_v6 = vpop.f32.mrf.mxu0 }
 0x122   : > { %v6360_v4 = vadd.f32 %v3454_v42, %v3366_v48  ;;  %v3329_v9 = vadd.f32 %v6063_v29, %v3328_v6  ;;  %v1417_v42 = vrot.slane %v4551_v45, 5  ;;  %v1138_v6 = vshrl.u32 %v6370_v31, 16 }
 0x123   : > { %v3417_v10 = vpop.f32.mrf.mxu1 }
 0x124   : > { %3505 = vmatmul.bf16.gmra.mxu2 %v2263_v49  ;;  %v6365_v59 = vadd.f32 %v3417_v10, %v3329_v9  ;;  %3683 = vmatmul.bf16.gmra.mxu0 %v2407_v54  ;;  %v803_v49 = vsel %vm6036_vm5, %v4503_v2, %v802_v51  ;;  %v1128_v54 = vshll.u32 %v4529_v35, 16  ;;  %v5315_v51 = vld [vmem:[%s7189_s3 + $0x38] sm:$0xff]  ;;  %v1418_v2 = vsel %vm6036_vm5, %v1416_v40, %v1417_v42  ;;  %v5495_v40 = vld [vmem:[%s7188_s2] ss:$0 sm:$0xff] }
 0x125   : > { %3594 = vmatmul.bf16.gmra.mxu3 %v5211_v50  ;;  %v1125_v50 = vshrl.u32 %v4529_v35, 16  ;;  %v2240_v10 = vunpack.c.l.b16 %v803_v49  ;;  %4201 = vmatpush.bf16.msra.mxu1 %v5315_v51  ;;  %v2385_v35 = vunpack.c.l.b16 %v1123_v34  ;;  %v1140_v37 = vrot.slane %v1138_v6, 4  ;;  %v5212_v49 = vld [vmem:[%s5700_s8 + $0x6c] sm:$0xff] }
 0x126   : > { %3772 = vmatmul.bf16.gmra.mxu1 %v2471_v7  ;;  %v1130_v23 = vrot.slane %v1128_v54, 5 }
 0x127   : > { %v3368_v33 = vpop.f32.mrf.mxu2  ;;  %v1127_v22 = vrot.slane %v1125_v50, 4  ;;  %v5496_v50 = vld [vmem:[%s5700_s8 + $0x70] sm:$0xf]  ;;  %v2408_v63 = vpack.c.b16 %v2385_v35, %v2384_v20 }
 0x128   : > { %v3457_v27 = vpop.f32.mrf.mxu3  ;;  %v3369_v48 = vadd.f32 %v6063_v29, %v3368_v33  ;;  %v2449_v33 = vunpack.c.l.b16 %v1418_v2  ;;  %v809_v54 = vrot.slane %v5496_v50, 5  ;;  %v4568_v2 = vld [vmem:[%s5700_s8 + $0x78] sm:$0xe]  ;;  %v5286_v35 = vld [vmem:[%s7187_s1 + $0x190] sm:$0xff] }
 0x129   : > { %v3330_v45 = vpop.f32.mrf.mxu0  ;;  %v1131_v56 = vor.u32 %v1130_v23, %v1127_v22  ;;  %v5497_v22 = vld [vmem:[%s5700_s8 + $0x74] sm:$0x1]  ;;  %3823 = vmatpush.bf16.msra.mxu2 %v5286_v35 }
 0x12a   : > { %v6381_v7 = vadd.f32 %v3457_v27, %v3369_v48  ;;  %v3331_v3 = vadd.f32 %v6063_v29, %v3330_v45  ;;  %v6395_v29 = vrot.slane %v1134_v25, 5  ;;  %v2264_v48 = vpack.c.b16 %v2241_v18, %v2240_v10  ;;  %v686_v25 = vld [vmem:[%s5700_s8 + $0x6c] sm:$0xe] }
 0x12b   : > { %v3419_v9 = vpop.f32.mrf.mxu1  ;;  %v1144_v45 = vshll.u32 %v4552_v8, 16  ;;  %v4504_v10 = vrot.slane %v686_v25, 9  ;;  %v811_v18 = vrot.slane %v809_v54, 4  ;;  %v812_v20 = vrot.slane %v5497_v22, 5 }
 0x12c   : > { %v6393_v32 = vadd.f32 %v3419_v9, %v3331_v3  ;;  %v1141_v6 = vor.u32 %v1140_v37, %v6395_v29  ;;  %v2472_v3 = vpack.c.b16 %v2449_v33, %v2448_v38  ;;  %v1421_v9 = vrot.slane %v6370_v31, 5  ;;  %v4531_v38 = vld [vmem:[%s5700_s8 + $0x84] sm:$0xf] }
 0x12d   : > { %v1132_v23 = vrot.slane %v1131_v56, 4  ;;  %v4584_v31 = vrot.slane %v4568_v2, 9  ;;  %v810_v56 = vsel %vm6036_vm5, %v4504_v10, %v809_v54 }
 0x12e   : > { %v1142_v37 = vrot.slane %v1141_v6, 4  ;;  %v1423_v33 = vrot.slane %v1421_v9, 4  ;;  %v1149_v6 = vshrl.u32 %v4531_v38, 16 }
 0x12f   : > { %v3370_v27 = vpop.f32.mrf.mxu2  ;;  %v1422_v54 = vsel %vm6036_vm5, %v4584_v31, %v1421_v9 }
 0x130   : > { %v3459_v60 = vpop.f32.mrf.mxu3  ;;  %v3371_v42 = vadd.f32 %v5495_v40, %v3370_v27  ;;  %v1146_v27 = vrot.slane %v1144_v45, 5  ;;  %v6415_v40 = vld [vmem:[%s5700_s8 + $0x88] sm:$0xf]  ;;  %v1152_v45 = vshll.u32 %v4531_v38, 16 }
 0x131   : > { %v3649_v51 = vpop.f32.mrf.mxu0 }
 0x132   : > { %v6405_v34 = vadd.f32 %v3459_v60, %v3371_v42  ;;  %v1424_v60 = vrot.slane %v4552_v8, 5  ;;  %v5294_v42 = vld [vmem:[%s7187_s1 + $0x1d0] sm:$0xff]  ;;  %v1137_v8 = vsel %vm5741_vm2, %v1132_v23, %v6395_v29  ;;  %v1147_v25 = vsel %vm5741_vm2, %v1142_v37, %v1146_v27 }
 0x133   : > { %v3738_v26 = vpop.f32.mrf.mxu1  ;;  %3912 = vmatpush.bf16.msra.mxu3 %v5294_v42  ;;  %v2386_v35 = vunpack.c.l.b16 %v1137_v8  ;;  %v2387_v37 = vunpack.c.l.b16 %v1147_v25  ;;  %v2450_v27 = vunpack.c.l.b16 %v1422_v54  ;;  %v1151_v42 = vrot.slane %v1149_v6, 4  ;;  %v5213_v8 = vld [vmem:[%s5700_s8 + $0x78] sm:$0xff] }
 0x134   : > { %3510 = vmatmul.bf16.gmra.mxu2 %v2264_v48  ;;  %3688 = vmatmul.bf16.gmra.mxu0 %v2408_v63  ;;  %v813_v63 = vsel %vm6036_vm5, %v811_v18, %v812_v20  ;;  %v1425_v10 = vsel %vm6036_vm5, %v1423_v33, %v1424_v60  ;;  %v1162_v18 = vshrl.u32 %v6415_v40, 16  ;;  %v2242_v20 = vunpack.c.l.b16 %v810_v56  ;;  %v687_v6 = vld [vmem:[%s5700_s8 + $0x78] sm:$0xe] }
 0x135   : > { %3599 = vmatmul.bf16.gmra.mxu3 %v5212_v49  ;;  %v2243_v23 = vunpack.c.l.b16 %v813_v63  ;;  %v2451_v38 = vunpack.c.l.b16 %v1425_v10  ;;  %v1154_v9 = vrot.slane %v1152_v45, 5  ;;  %v2409_v25 = vpack.c.b16 %v2387_v37, %v2386_v35  ;;  %v5498_v45 = vld [vmem:[%s5700_s8 + $0x7c] sm:$0xf]  ;;  %v4569_v35 = vld [vmem:[%s5700_s8 + $0x84] sm:$0xe] }
 0x136   : > { %3777 = vmatmul.bf16.gmra.mxu1 %v2472_v3  ;;  %v1158_v3 = vshll.u32 %v6415_v40, 16  ;;  %v1164_v33 = vrot.slane %v1162_v18, 4 }
 0x137   : > { %v3471_v48 = vpop.f32.mrf.mxu2  ;;  %v2265_v63 = vpack.c.b16 %v2243_v23, %v2242_v20  ;;  %v1155_v10 = vor.u32 %v1154_v9, %v1151_v42  ;;  %v4505_v23 = vrot.slane %v687_v6, 9 }
 0x138   : > { %v3560_v49 = vpop.f32.mrf.mxu3  ;;  %v3472_v50 = vadd.f32 %v3471_v48, %v6073_v52  ;;  %v6438_v31 = vrot.slane %v1158_v3, 5  ;;  %v816_v3 = vrot.slane %v5498_v45, 5 }
 0x139   : > { %v3651_v52 = vpop.f32.mrf.mxu0  ;;  %v1156_v42 = vrot.slane %v1155_v10, 4 }
 0x13a   : > { %v3561_v2 = vadd.f32 %v3560_v49, %v3472_v50  ;;  %v4553_v50 = vld [vmem:[%s5700_s8 + $0x8c] sm:$0x1]  ;;  %v1165_v18 = vor.u32 %v1164_v33, %v6438_v31  ;;  %v818_v37 = vrot.slane %v816_v3, 4 }
 0x13b   : > { %v3740_v22 = vpop.f32.mrf.mxu1 }
 0x13c   : > { %v3650_v29 = vadd.f32 %v3649_v51, %v3561_v2  ;;  %v5302_v51 = vld [vmem:[%s7187_s1 + $0x210] sm:$0xff]  ;;  %v1166_v9 = vrot.slane %v1165_v18, 4 }
 0x13d   : > { %4001 = vmatpush.bf16.msra.mxu0 %v5302_v51  ;;  %v4533_v51 = vld [vmem:[%s5700_s8 + $0x90] sm:$0xf] }
 0x13e   : > { %v6436_v48 = vadd.f32 %v3738_v26, %v3650_v29  ;;  %v2473_v26 = vpack.c.b16 %v2451_v38, %v2450_v27  ;;  %v1168_v29 = vshll.u32 %v4553_v50, 16  ;;  %v5499_v27 = vld [vmem:[%s5700_s8 + $0x80] sm:$0x1]  ;;  %v1173_v45 = vshrl.u32 %v4533_v51, 16 }
 0x13f   : > { %v3473_v60 = vpop.f32.mrf.mxu2  ;;  %v819_v38 = vrot.slane %v5499_v27, 5 }
 0x140   : > { %7198 = vst [vmem:[#allocation5_spill] sm:$0xff] %v6436_v48  ;;  %v3562_v49 = vpop.f32.mrf.mxu3  ;;  %v3474_v56 = vadd.f32 %v3473_v60, %v6101_v19  ;;  %v1428_v19 = vrot.slane %v6415_v40, 5  ;;  %v1170_v33 = vrot.slane %v1168_v29, 5 }
 0x141   : > { %v3654_v54 = vpop.f32.mrf.mxu0 }
 0x142   : > { %v3563_v2 = vadd.f32 %v3562_v49, %v3474_v56  ;;  %v6456_v49 = vld [vmem:[%s5700_s8 + $0x94] sm:$0xf] }
 0x143   : > { %v3743_v48 = vpop.f32.mrf.mxu1  ;;  %v1186_v10 = vshrl.u32 %v6456_v49, 16 }
 0x144   : > { %3515 = vmatmul.bf16.gmra.mxu2 %v2265_v63  ;;  %v3652_v20 = vadd.f32 %v3651_v52, %v3563_v2  ;;  %3693 = vmatmul.bf16.gmra.mxu0 %v2409_v25  ;;  %v4585_v63 = vrot.slane %v4569_v35, 9  ;;  %v1431_v52 = vrot.slane %v4553_v50, 5  ;;  %v817_v25 = vsel %vm6036_vm5, %v4505_v23, %v816_v3  ;;  %v5314_v3 = vld [vmem:[%s7189_s3 + $0x30] sm:$0xff] }
 0x145   : > { %3604 = vmatmul.bf16.gmra.mxu3 %v5213_v8  ;;  %v1430_v8 = vrot.slane %v1428_v19, 4  ;;  %v1176_v2 = vshll.u32 %v4533_v51, 16  ;;  %v1161_v50 = vsel %vm5741_vm2, %v1156_v42, %v6438_v31  ;;  %v1175_v31 = vrot.slane %v1173_v45, 4  ;;  %4202 = vmatpush.bf16.msra.mxu1 %v5314_v3  ;;  %v5214_v45 = vld [vmem:[%s5700_s8 + $0x84] sm:$0xff] }
 0x146   : > { %v6453_v60 = vadd.f32 %v3740_v22, %v3652_v20  ;;  %3782 = vmatmul.bf16.gmra.mxu1 %v2473_v26  ;;  %v820_v22 = vsel %vm6036_vm5, %v818_v37, %v819_v38  ;;  %v1182_v26 = vshll.u32 %v6456_v49, 16  ;;  %v2244_v20 = vunpack.c.l.b16 %v817_v25 }
 0x147   : > { %v3476_v40 = vpop.f32.mrf.mxu2  ;;  %v1429_v35 = vsel %vm6036_vm5, %v4585_v63, %v1428_v19  ;;  %v1432_v37 = vsel %vm6036_vm5, %v1430_v8, %v1431_v52  ;;  %v2245_v38 = vunpack.c.l.b16 %v820_v22  ;;  %v1178_v51 = vrot.slane %v1176_v2, 5  ;;  %v4554_v63 = vld [vmem:[%s5700_s8 + $0x98] sm:$0x1]  ;;  %v688_v2 = vld [vmem:[%s5700_s8 + $0x84] sm:$0xe] }
 0x148   : > { %v3565_v56 = vpop.f32.mrf.mxu3  ;;  %v3477_v6 = vadd.f32 %v3476_v40, %v6116_v57  ;;  %v1171_v57 = vsel %vm5741_vm2, %v1166_v9, %v1170_v33  ;;  %v2388_v42 = vunpack.c.l.b16 %v1161_v50  ;;  %v6477_v33 = vrot.slane %v1182_v26, 5  ;;  %v5500_v22 = vld [vmem:[%s5700_s8 + $0x88] sm:$0xf] }
 0x149   : > { %v3656_v29 = vpop.f32.mrf.mxu0  ;;  %v2389_v9 = vunpack.c.l.b16 %v1171_v57  ;;  %v1188_v40 = vrot.slane %v1186_v10, 4  ;;  %v2453_v19 = vunpack.c.l.b16 %v1432_v37  ;;  %v2266_v52 = vpack.c.b16 %v2245_v38, %v2244_v20 }
 0x14a   : > { %v3566_v18 = vadd.f32 %v3565_v56, %v3477_v6  ;;  %v2452_v6 = vunpack.c.l.b16 %v1429_v35  ;;  %v1179_v50 = vor.u32 %v1178_v51, %v1175_v31  ;;  %v1435_v37 = vrot.slane %v6456_v49, 5 }
 0x14b   : > { %v3745_v23 = vpop.f32.mrf.mxu1  ;;  %v2410_v26 = vpack.c.b16 %v2389_v9, %v2388_v42  ;;  %v1189_v10 = vor.u32 %v1188_v40, %v6477_v33  ;;  %v5285_v42 = vld [vmem:[%s7187_s1 + $0x188] sm:$0xff] }
 0x14c   : > { %v3655_v27 = vadd.f32 %v3654_v54, %v3566_v18  ;;  %v823_v18 = vrot.slane %v5500_v22, 5  ;;  %v2474_v35 = vpack.c.b16 %v2453_v19, %v2452_v6  ;;  %v5501_v22 = vld [vmem:[%s5700_s8 + $0x8c] sm:$0x1]  ;;  %v1180_v51 = vrot.slane %v1179_v50, 4  ;;  %v4535_v6 = vld [vmem:[%s5700_s8 + $0x9c] sm:$0xf]  ;;  %3824 = vmatpush.bf16.msra.mxu2 %v5285_v42 }
 0x14d   : > { %v826_v31 = vrot.slane %v5501_v22, 5  ;;  %v1190_v9 = vrot.slane %v1189_v10, 4 }
 0x14e   : > { %v6479_v56 = vadd.f32 %v3743_v48, %v3655_v27  ;;  %v1192_v48 = vshll.u32 %v4554_v63, 16  ;;  %v825_v38 = vrot.slane %v823_v18, 4 }
 0x14f   : > { %v3478_v25 = vpop.f32.mrf.mxu2 }
 0x150   : > { %7199 = vst [vmem:[#allocation6_spill] sm:$0xff] %v6479_v56  ;;  %v3567_v8 = vpop.f32.mrf.mxu3  ;;  %v3479_v54 = vadd.f32 %v3478_v25, %v6141_v28  ;;  %v4506_v28 = vrot.slane %v688_v2, 9  ;;  %v4570_v25 = vld [vmem:[%s5700_s8 + $0x90] sm:$0xe]  ;;  %v1194_v40 = vrot.slane %v1192_v48, 5  ;;  %v1197_v48 = vshrl.u32 %v4535_v6, 16 }
 0x151   : > { %v3659_v3 = vpop.f32.mrf.mxu0  ;;  %v4586_v19 = vrot.slane %v4570_v25, 9 }
 0x152   : > { %v3568_v57 = vadd.f32 %v3567_v8, %v3479_v54  ;;  %v1437_v8 = vrot.slane %v1435_v37, 4  ;;  %v1438_v54 = vrot.slane %v4554_v63, 5  ;;  %v1185_v63 = vsel %vm5741_vm2, %v1180_v51, %v6477_v33 }
 0x153   : > { %v3748_v27 = vpop.f32.mrf.mxu1  ;;  %v1195_v10 = vsel %vm5741_vm2, %v1190_v9, %v1194_v40  ;;  %v2390_v51 = vunpack.c.l.b16 %v1185_v63 }
 0x154   : > { %3520 = vmatmul.bf16.gmra.mxu2 %v2266_v52  ;;  %v3657_v20 = vadd.f32 %v3656_v29, %v3568_v57  ;;  %3698 = vmatmul.bf16.gmra.mxu0 %v2410_v26  ;;  %v6497_v29 = vld [vmem:[%s5700_s8 + $0xa0] sm:$0xf]  ;;  %v5293_v52 = vld [vmem:[%s7187_s1 + $0x1c8] sm:$0xff]  ;;  %v824_v26 = vsel %vm6036_vm5, %v4506_v28, %v823_v18  ;;  %v1200_v57 = vshll.u32 %v4535_v6, 16  ;;  %v1436_v18 = vsel %vm6036_vm5, %v4586_v19, %v1435_v37  ;;  %v5502_v6 = vld [vmem:[%s5700_s8 + $0x94] sm:$0xf] }
 0x155   : > { %3609 = vmatmul.bf16.gmra.mxu3 %v5214_v45  ;;  %v1439_v28 = vsel %vm6036_vm5, %v1437_v8, %v1438_v54  ;;  %v1210_v33 = vshrl.u32 %v6497_v29, 16  ;;  %v2391_v42 = vunpack.c.l.b16 %v1195_v10  ;;  %v2454_v9 = vunpack.c.l.b16 %v1436_v18  ;;  %v689_v37 = vld [vmem:[%s5700_s8 + $0x90] sm:$0xe]  ;;  %v5503_v18 = vld [vmem:[%s5700_s8 + $0x98] sm:$0x1] }
 0x156   : > { %v6494_v49 = vadd.f32 %v3745_v23, %v3657_v20  ;;  %3787 = vmatmul.bf16.gmra.mxu1 %v2474_v35  ;;  %v827_v23 = vsel %vm6036_vm5, %v825_v38, %v826_v31  ;;  %3913 = vmatpush.bf16.msra.mxu3 %v5293_v52  ;;  %v1206_v35 = vshll.u32 %v6497_v29, 16  ;;  %v2246_v20 = vunpack.c.l.b16 %v824_v26 }
 0x157   : > { %v3481_v45 = vpop.f32.mrf.mxu2  ;;  %v2247_v31 = vunpack.c.l.b16 %v827_v23  ;;  %v2455_v40 = vunpack.c.l.b16 %v1439_v28  ;;  %v830_v52 = vrot.slane %v5502_v6, 5  ;;  %v1202_v19 = vrot.slane %v1200_v57, 5  ;;  %v4555_v23 = vld [vmem:[%s5700_s8 + $0xa4] sm:$0x1] }
 0x158   : > { %7200 = vst [vmem:[#allocation7_spill] sm:$0xff] %v6494_v49  ;;  %v3570_v2 = vpop.f32.mrf.mxu3  ;;  %v3482_v50 = vadd.f32 %v3481_v45, %v6156_v1  ;;  %v1199_v45 = vrot.slane %v1197_v48, 4  ;;  %v6522_v8 = vrot.slane %v1206_v35, 5  ;;  %v1212_v54 = vrot.slane %v1210_v33, 4 }
 0x159   : > { %v3661_v25 = vpop.f32.mrf.mxu0  ;;  %v2267_v10 = vpack.c.b16 %v2247_v31, %v2246_v20  ;;  %v2411_v48 = vpack.c.b16 %v2391_v42, %v2390_v51  ;;  %v4507_v57 = vrot.slane %v689_v37, 9  ;;  %v832_v35 = vrot.slane %v830_v52, 4  ;;  %v4571_v31 = vld [vmem:[%s5700_s8 + $0x9c] sm:$0xe]  ;;  %v4537_v51 = vld [vmem:[%s5700_s8 + $0xa8] sm:$0xf] }
 0x15a   : > { %v3571_v1 = vadd.f32 %v3570_v2, %v3482_v50  ;;  %v833_v28 = vrot.slane %v5503_v18, 5  ;;  %v1203_v6 = vor.u32 %v1202_v19, %v1199_v45  ;;  %v1216_v49 = vshll.u32 %v4555_v23, 16 }
 0x15b   : > { %v3750_v38 = vpop.f32.mrf.mxu1  ;;  %v831_v42 = vsel %vm6036_vm5, %v4507_v57, %v830_v52  ;;  %v1224_v52 = vshll.u32 %v4537_v51, 16 }
 0x15c   : > { %v3660_v22 = vadd.f32 %v3659_v3, %v3571_v1  ;;  %v5301_v3 = vld [vmem:[%s7187_s1 + $0x208] sm:$0xff]  ;;  %v5215_v1 = vld [vmem:[%s5700_s8 + $0x90] sm:$0xff]  ;;  %v1204_v37 = vrot.slane %v1203_v6, 4 }
 0x15d   : > { %4002 = vmatpush.bf16.msra.mxu0 %v5301_v3 }
 0x15e   : > { %v6519_v2 = vadd.f32 %v3748_v27, %v3660_v22  ;;  %v2475_v27 = vpack.c.b16 %v2455_v40, %v2454_v9  ;;  %v834_v9 = vsel %vm6036_vm5, %v832_v35, %v833_v28  ;;  %v6540_v40 = vld [vmem:[%s5700_s8 + $0xac] sm:$0xf]  ;;  %v2248_v35 = vunpack.c.l.b16 %v831_v42 }
 0x15f   : > { %v3483_v50 = vpop.f32.mrf.mxu2 }
 0x160   : > { %7201 = vst [vmem:[#allocation8_spill] sm:$0xff] %v6519_v2  ;;  %v3572_v26 = vpop.f32.mrf.mxu3  ;;  %v3484_v63 = vadd.f32 %v3483_v50, %v6184_v41  ;;  %v1213_v2 = vor.u32 %v1212_v54, %v6522_v8  ;;  %v1442_v41 = vrot.slane %v6497_v29, 5  ;;  %v1218_v29 = vrot.slane %v1216_v49, 5 }
 0x161   : > { %v3664_v22 = vpop.f32.mrf.mxu0  ;;  %v1209_v49 = vsel %vm5741_vm2, %v1204_v37, %v6522_v8 }
 0x162   : > { %v3573_v33 = vadd.f32 %v3572_v26, %v3484_v63  ;;  %v1214_v19 = vrot.slane %v1213_v2, 4  ;;  %v1444_v50 = vrot.slane %v1442_v41, 4  ;;  %v1445_v26 = vrot.slane %v4555_v23, 5 }
 0x163   : > { %v3753_v56 = vpop.f32.mrf.mxu1  ;;  %v1221_v63 = vshrl.u32 %v4537_v51, 16  ;;  %v2249_v23 = vunpack.c.l.b16 %v834_v9  ;;  %v2392_v51 = vunpack.c.l.b16 %v1209_v49  ;;  %v4556_v9 = vld [vmem:[%s5700_s8 + $0xb0] sm:$0x1] }
 0x164   : > { %3525 = vmatmul.bf16.gmra.mxu2 %v2267_v10  ;;  %v3662_v20 = vadd.f32 %v3661_v25, %v3573_v33  ;;  %3703 = vmatmul.bf16.gmra.mxu0 %v2411_v48  ;;  %v4587_v25 = vrot.slane %v4571_v31, 9  ;;  %v1234_v48 = vshrl.u32 %v6540_v40, 16  ;;  %v1219_v2 = vsel %vm5741_vm2, %v1214_v19, %v1218_v29 }
 0x165   : > { %3614 = vmatmul.bf16.gmra.mxu3 %v5215_v1  ;;  %v1230_v1 = vshll.u32 %v6540_v40, 16  ;;  %v1446_v28 = vsel %vm6036_vm5, %v1444_v50, %v1445_v26  ;;  %v1223_v33 = vrot.slane %v1221_v63, 4  ;;  %v2393_v42 = vunpack.c.l.b16 %v1219_v2  ;;  %v5216_v26 = vld [vmem:[%s5700_s8 + $0x9c] sm:$0xff] }
 0x166   : > { %v6542_v45 = vadd.f32 %v3750_v38, %v3662_v20  ;;  %3792 = vmatmul.bf16.gmra.mxu1 %v2475_v27  ;;  %v1443_v18 = vsel %vm6036_vm5, %v4587_v25, %v1442_v41  ;;  %v1226_v20 = vrot.slane %v1224_v52, 5  ;;  %v1236_v31 = vrot.slane %v1234_v48, 4  ;;  %v5504_v25 = vld [vmem:[%s5700_s8 + $0xa0] sm:$0xf]  ;;  %v690_v63 = vld [vmem:[%s5700_s8 + $0x9c] sm:$0xe] }
 0x167   : > { %v3486_v54 = vpop.f32.mrf.mxu2  ;;  %v6559_v8 = vrot.slane %v1230_v1, 5  ;;  %v2456_v19 = vunpack.c.l.b16 %v1443_v18  ;;  %v2457_v41 = vunpack.c.l.b16 %v1446_v28  ;;  %v1240_v1 = vshll.u32 %v4556_v9, 16 }
 0x168   : > { %v3575_v3 = vpop.f32.mrf.mxu3  ;;  %v3487_v10 = vadd.f32 %v3486_v54, %v6199_v14  ;;  %v5313_v14 = vld [vmem:[%s7189_s3 + $0x28] sm:$0xff]  ;;  %v2412_v48 = vpack.c.b16 %v2393_v42, %v2392_v51  ;;  %v5284_v51 = vld [vmem:[%s7187_s1 + $0x180] sm:$0xff] }
 0x169   : > { %v3666_v38 = vpop.f32.mrf.mxu0  ;;  %4203 = vmatpush.bf16.msra.mxu1 %v5313_v14  ;;  %v1237_v52 = vor.u32 %v1236_v31, %v6559_v8  ;;  %v2476_v49 = vpack.c.b16 %v2457_v41, %v2456_v19  ;;  %v4508_v14 = vrot.slane %v690_v63, 9  ;;  %v4572_v31 = vld [vmem:[%s5700_s8 + $0xa8] sm:$0xe]  ;;  %3825 = vmatpush.bf16.msra.mxu2 %v5284_v51  ;;  %v4539_v19 = vld [vmem:[%s5700_s8 + $0xb4] sm:$0xf] }
 0x16a   : > { %v3576_v57 = vadd.f32 %v3575_v3, %v3487_v10  ;;  %v2268_v3 = vpack.c.b16 %v2249_v23, %v2248_v35  ;;  %v1227_v10 = vor.u32 %v1226_v20, %v1223_v33  ;;  %v5505_v35 = vld [vmem:[%s5700_s8 + $0xa4] sm:$0x1]  ;;  %v1242_v20 = vrot.slane %v1240_v1, 5  ;;  %v6579_v41 = vld [vmem:[%s5700_s8 + $0xb8] sm:$0xf] }
 0x16b   : > { %v3755_v27 = vpop.f32.mrf.mxu1  ;;  %v840_v23 = vrot.slane %v5505_v35, 5  ;;  %v1248_v1 = vshll.u32 %v4539_v19, 16 }
 0x16c   : > { %v3665_v6 = vadd.f32 %v3664_v22, %v3576_v57  ;;  %v837_v22 = vrot.slane %v5504_v25, 5  ;;  %v1228_v33 = vrot.slane %v1227_v10, 4 }
 0x16e   : > { %v6562_v37 = vadd.f32 %v3753_v56, %v3665_v6  ;;  %v839_v18 = vrot.slane %v837_v22, 4  ;;  %v1238_v6 = vrot.slane %v1237_v52, 4  ;;  %v1233_v63 = vsel %vm5741_vm2, %v1228_v33, %v6559_v8 }
 0x16f   : > { %v3488_v29 = vpop.f32.mrf.mxu2  ;;  %v1245_v52 = vshrl.u32 %v4539_v19, 16 }
 0x170   : > { %v3577_v54 = vpop.f32.mrf.mxu3  ;;  %v3489_v50 = vadd.f32 %v3488_v29, %v6224_v58  ;;  %v1449_v58 = vrot.slane %v6540_v40, 5  ;;  %v5292_v40 = vld [vmem:[%s7187_s1 + $0x1c0] sm:$0xff]  ;;  %v1243_v10 = vsel %vm5741_vm2, %v1238_v6, %v1242_v20  ;;  %v1250_v6 = vrot.slane %v1248_v1, 5 }
 0x171   : > { %v3669_v57 = vpop.f32.mrf.mxu0  ;;  %3914 = vmatpush.bf16.msra.mxu3 %v5292_v40  ;;  %v1247_v33 = vrot.slane %v1245_v52, 4 }
 0x172   : > { %v3578_v56 = vadd.f32 %v3577_v54, %v3489_v50  ;;  %v838_v54 = vsel %vm6036_vm5, %v4508_v14, %v837_v22  ;;  %v1451_v25 = vrot.slane %v1449_v58, 4  ;;  %v1452_v50 = vrot.slane %v4556_v9, 5 }
 0x173   : > { %v3758_v2 = vpop.f32.mrf.mxu1  ;;  %v1254_v22 = vshll.u32 %v6579_v41, 16 }
 0x174   : > { %3530 = vmatmul.bf16.gmra.mxu2 %v2268_v3  ;;  %v3667_v28 = vadd.f32 %v3666_v38, %v3578_v56  ;;  %3708 = vmatmul.bf16.gmra.mxu0 %v2412_v48  ;;  %v4588_v3 = vrot.slane %v4572_v31, 9  ;;  %v1258_v48 = vshrl.u32 %v6579_v41, 16  ;;  %v1453_v8 = vsel %vm6036_vm5, %v1451_v25, %v1452_v50  ;;  %v5217_v25 = vld [vmem:[%s5700_s8 + $0xa8] sm:$0xff] }
 0x175   : > { %3619 = vmatmul.bf16.gmra.mxu3 %v5216_v26  ;;  %v841_v26 = vsel %vm6036_vm5, %v839_v18, %v840_v23  ;;  %v2394_v23 = vunpack.c.l.b16 %v1233_v63  ;;  %v6602_v20 = vrot.slane %v1254_v22, 5  ;;  %v2459_v40 = vunpack.c.l.b16 %v1453_v8  ;;  %v5506_v50 = vld [vmem:[%s5700_s8 + $0xac] sm:$0xf] }
 0x176   : > { %v6575_v42 = vadd.f32 %v3755_v27, %v3667_v28  ;;  %3797 = vmatmul.bf16.gmra.mxu1 %v2476_v49  ;;  %v1450_v14 = vsel %vm6036_vm5, %v4588_v3, %v1449_v58  ;;  %v2251_v35 = vunpack.c.l.b16 %v841_v26  ;;  %v2395_v28 = vunpack.c.l.b16 %v1243_v10  ;;  %v4557_v58 = vld [vmem:[%s5700_s8 + $0xbc] sm:$0x1] }
 0x177   : > { %v3491_v38 = vpop.f32.mrf.mxu2  ;;  %v1260_v31 = vrot.slane %v1258_v48, 4  ;;  %v2458_v19 = vunpack.c.l.b16 %v1450_v14  ;;  %v1251_v63 = vor.u32 %v1250_v6, %v1247_v33  ;;  %v1264_v52 = vshll.u32 %v4557_v58, 16  ;;  %v4573_v14 = vld [vmem:[%s5700_s8 + $0xb4] sm:$0xe] }
 0x178   : > { %v3580_v29 = vpop.f32.mrf.mxu3  ;;  %v3492_v27 = vadd.f32 %v3491_v38, %v6239_v0  ;;  %v2250_v0 = vunpack.c.l.b16 %v838_v54  ;;  %v2413_v26 = vpack.c.b16 %v2395_v28, %v2394_v23 }
 0x179   : > { %v3671_v56 = vpop.f32.mrf.mxu0  ;;  %v1261_v10 = vor.u32 %v1260_v31, %v6602_v20  ;;  %v2477_v48 = vpack.c.b16 %v2459_v40, %v2458_v19  ;;  %v1252_v28 = vrot.slane %v1251_v63, 4  ;;  %v1266_v6 = vrot.slane %v1264_v52, 5  ;;  %v4541_v19 = vld [vmem:[%s5700_s8 + $0xc0] sm:$0xf] }
 0x17a   : > { %v3581_v9 = vadd.f32 %v3580_v29, %v3492_v27  ;;  %v2269_v3 = vpack.c.b16 %v2251_v35, %v2250_v0  ;;  %v844_v27 = vrot.slane %v5506_v50, 5  ;;  %v5507_v35 = vld [vmem:[%s5700_s8 + $0xb0] sm:$0x1]  ;;  %v4589_v31 = vrot.slane %v4573_v14, 9  ;;  %v5312_v52 = vld [vmem:[%s7189_s3 + $0x20] sm:$0xff] }
 0x17b   : > { %v6596_v49 = vpop.f32.mrf.mxu1  ;;  %v847_v23 = vrot.slane %v5507_v35, 5  ;;  %v1262_v33 = vrot.slane %v1261_v10, 4  ;;  %4204 = vmatpush.bf16.msra.mxu1 %v5312_v52 }
 0x17c   : > { %v3670_v18 = vadd.f32 %v3669_v57, %v3581_v9  ;;  %v5300_v57 = vld [vmem:[%s7187_s1 + $0x200] sm:$0xff] }
 0x17d   : > { %4003 = vmatpush.bf16.msra.mxu0 %v5300_v57  ;;  %v1267_v50 = vsel %vm5741_vm2, %v1262_v33, %v1266_v6 }
 0x17e   : > { %v6604_v51 = vadd.f32 %v3758_v2, %v3670_v18  ;;  %v691_v2 = vld [vmem:[%s5700_s8 + $0xa8] sm:$0xe]  ;;  %v846_v18 = vrot.slane %v844_v27, 4 }
 0x17f   : > { %v3493_v38 = vpop.f32.mrf.mxu2  ;;  %v4509_v8 = vrot.slane %v691_v2, 9  ;;  %v1272_v2 = vshll.u32 %v4541_v19, 16 }
 0x180   : > { %v3582_v29 = vpop.f32.mrf.mxu3  ;;  %v3494_v54 = vadd.f32 %v3493_v38, %v6267_v12  ;;  %v1456_v12 = vrot.slane %v6579_v41, 5  ;;  %v1459_v41 = vrot.slane %v4557_v58, 5 }
 0x181   : > { %v3674_v22 = vpop.f32.mrf.mxu0 }
 0x182   : > { %v3583_v1 = vadd.f32 %v3582_v29, %v3494_v54  ;;  %v1458_v38 = vrot.slane %v1456_v12, 4  ;;  %v6622_v29 = vld [vmem:[%s5700_s8 + $0xc4] sm:$0xf]  ;;  %v845_v54 = vsel %vm6036_vm5, %v4509_v8, %v844_v27 }
 0x183   : > { %v3763_v9 = vpop.f32.mrf.mxu1  ;;  %v1278_v10 = vshll.u32 %v6622_v29, 16  ;;  %v1282_v27 = vshrl.u32 %v6622_v29, 16  ;;  %v2252_v14 = vunpack.c.l.b16 %v845_v54  ;;  %v1463_v52 = vrot.slane %v6622_v29, 5 }
 0x184   : > { %3535 = vmatmul.bf16.gmra.mxu2 %v2269_v3  ;;  %v6617_v0 = vadd.f32 %v3671_v56, %v3583_v1  ;;  %3713 = vmatmul.bf16.gmra.mxu0 %v2413_v26  ;;  %v848_v3 = vsel %vm6036_vm5, %v846_v18, %v847_v23  ;;  %v1269_v26 = vshrl.u32 %v4541_v19, 16  ;;  %v1460_v1 = vsel %vm6036_vm5, %v1458_v38, %v1459_v41 }
 0x185   : > { %3624 = vmatmul.bf16.gmra.mxu3 %v5217_v25  ;;  %v1257_v25 = vsel %vm5741_vm2, %v1252_v28, %v6602_v20  ;;  %v2253_v8 = vunpack.c.l.b16 %v848_v3  ;;  %v1274_v28 = vrot.slane %v1272_v2, 5  ;;  %v2461_v6 = vunpack.c.l.b16 %v1460_v1  ;;  %v692_v3 = vld [vmem:[%s5700_s8 + $0xb4] sm:$0xe]  ;;  %v4591_v1 = vld [vmem:[%s5700_s8 + $0x18] sm:$0xf] }
 0x186   : > { %3802 = vmatmul.bf16.gmra.mxu1 %v2477_v48  ;;  %v2396_v18 = vunpack.c.l.b16 %v1257_v25  ;;  %v1271_v23 = vrot.slane %v1269_v26, 4  ;;  %v1280_v19 = vrot.slane %v1278_v10, 5  ;;  %v5508_v25 = vld [vmem:[%s5700_s8 + $0xb8] sm:$0xf] }
 0x187   : > { %v3496_v40 = vpop.f32.mrf.mxu2  ;;  %v2270_v41 = vpack.c.b16 %v2253_v8, %v2252_v14  ;;  %v4510_v14 = vrot.slane %v692_v3, 9  ;;  %v4574_v8 = vld [vmem:[%s5700_s8 + $0xc0] sm:$0xe] }
 0x188   : > { %v3585_v57 = vpop.f32.mrf.mxu3  ;;  %v3497_v56 = vadd.f32 %v3496_v40, %v6282_v61  ;;  %v1457_v61 = vsel %vm6036_vm5, %v4589_v31, %v1456_v12  ;;  %v2397_v12 = vunpack.c.l.b16 %v1267_v50  ;;  %v4558_v31 = vld [vmem:[%s5700_s8 + $0xc8] sm:$0x1]  ;;  %v1284_v40 = vrot.slane %v1282_v27, 4 }
 0x189   : > { %v3676_v63 = vpop.f32.mrf.mxu0  ;;  %v2460_v35 = vunpack.c.l.b16 %v1457_v61  ;;  %v851_v50 = vrot.slane %v5508_v25, 5  ;;  %v1275_v26 = vor.u32 %v1274_v28, %v1271_v23 }
 0x18a   : > { %v3586_v58 = vadd.f32 %v3585_v57, %v3497_v56  ;;  %v5218_v56 = vld [vmem:[%s5700_s8 + $0xb4] sm:$0xff]  ;;  %v2414_v54 = vpack.c.b16 %v2397_v12, %v2396_v18  ;;  %v1285_v10 = vor.u32 %v1284_v40, %v1280_v19  ;;  %v5509_v12 = vld [vmem:[%s5700_s8 + $0xbc] sm:$0x1]  ;;  %v1524_v40 = vshll.u32 %v4591_v1, 16 }
 0x18b   : > { %v6641_v20 = vpop.f32.mrf.mxu1  ;;  %v2478_v61 = vpack.c.b16 %v2461_v6, %v2460_v35  ;;  %v853_v18 = vrot.slane %v851_v50, 4  ;;  %v854_v23 = vrot.slane %v5509_v12, 5  ;;  %v1276_v28 = vrot.slane %v1275_v26, 4 }
 0x18c   : > { %v3675_v48 = vadd.f32 %v3674_v22, %v3586_v58  ;;  %v1286_v35 = vrot.slane %v1285_v10, 4  ;;  %v1521_v6 = vshrl.u32 %v4591_v1, 16  ;;  %v852_v25 = vsel %vm6036_vm5, %v4510_v14, %v851_v50 }
 0x18d   : > { %v855_v26 = vsel %vm6036_vm5, %v853_v18, %v854_v23  ;;  %v1526_v1 = vrot.slane %v1524_v40, 5 }
 0x18e   : > { %v6645_v33 = vadd.f32 %v3763_v9, %v3675_v48  ;;  %v1288_v9 = vshll.u32 %v4558_v31, 16  ;;  %v2255_v23 = vunpack.c.l.b16 %v855_v26 }
 0x18f   : > { %v3498_v57 = vpop.f32.mrf.mxu2 }
 0x190   : > { %v3587_v38 = vpop.f32.mrf.mxu3  ;;  %v3499_v22 = vadd.f32 %v3498_v57, %v6307_v47  ;;  %v6655_v47 = vld [vmem:[%s5700_s8 + $0x1c] sm:$0xf]  ;;  %v1290_v57 = vrot.slane %v1288_v9, 5  ;;  %v1281_v9 = vsel %vm5741_vm2, %v1276_v28, %v1280_v19  ;;  %v2254_v19 = vunpack.c.l.b16 %v852_v25  ;;  %v4623_v28 = vld [vmem:[%s5700_s8 + $0x20] sm:$0x1] }
 0x191   : > { %v3679_v58 = vpop.f32.mrf.mxu0  ;;  %v1530_v29 = vshll.u32 %v6655_v47, 16  ;;  %v1534_v3 = vshrl.u32 %v6655_v47, 16  ;;  %v4639_v25 = vld [vmem:[%s5700_s8 + $0x18] sm:$0xe] }
 0x192   : > { %v3588_v2 = vadd.f32 %v3587_v38, %v3499_v22  ;;  %v1291_v10 = vsel %vm5741_vm2, %v1286_v35, %v1290_v57 }
 0x193   : > { %v3768_v27 = vpop.f32.mrf.mxu1  ;;  %v1532_v14 = vrot.slane %v1530_v29, 5  ;;  %v1536_v18 = vrot.slane %v1534_v3, 4  ;;  %v2399_v57 = vunpack.c.l.b16 %v1291_v10 }
 0x194   : > { %3540 = vmatmul.bf16.gmra.mxu2 %v2270_v41  ;;  %v6657_v48 = vadd.f32 %v3676_v63, %v3588_v2  ;;  %3718 = vmatmul.bf16.gmra.mxu0 %v2414_v54  ;;  %v4590_v41 = vrot.slane %v4574_v8, 9  ;;  %v1466_v63 = vrot.slane %v4558_v31, 5  ;;  %v1523_v31 = vrot.slane %v1521_v6, 4 }
 0x195   : > { %3629 = vmatmul.bf16.gmra.mxu3 %v5218_v56  ;;  %v1465_v56 = vrot.slane %v1463_v52, 4 }
 0x196   : > { %3807 = vmatmul.bf16.gmra.mxu1 %v2478_v61 }
 0x197   : > { %v3501_v38 = vpop.f32.mrf.mxu2  ;;  %v1467_v50 = vsel %vm6036_vm5, %v1465_v56, %v1466_v63  ;;  %v2271_v56 = vpack.c.b16 %v2255_v23, %v2254_v19  ;;  %v1970_v63 = vrot.slane %v6655_v47, 5  ;;  %v4593_v47 = vld [vmem:[%s5700_s8 + $0x24] sm:$0xf] }
 0x198   : > { %v3590_v22 = vpop.f32.mrf.mxu3  ;;  %v3502_v54 = vadd.f32 %v3501_v38, %v6322_v36  ;;  %v1464_v36 = vsel %vm6036_vm5, %v4590_v41, %v1463_v52  ;;  %v2398_v38 = vunpack.c.l.b16 %v1281_v9  ;;  %v2463_v40 = vunpack.c.l.b16 %v1467_v50 }
 0x199   : > { %v3681_v61 = vpop.f32.mrf.mxu0  ;;  %v2462_v6 = vunpack.c.l.b16 %v1464_v36  ;;  %v1527_v52 = vor.u32 %v1526_v1, %v1523_v31  ;;  %v1537_v41 = vor.u32 %v1536_v18, %v1532_v14  ;;  %v1972_v1 = vrot.slane %v1970_v63, 4 }
 0x19a   : > { %v3591_v2 = vadd.f32 %v3590_v22, %v3502_v54  ;;  %v2415_v3 = vpack.c.b16 %v2399_v57, %v2398_v38  ;;  %v1973_v18 = vrot.slane %v4623_v28, 5 }
 0x19b   : > { %v6672_v8 = vpop.f32.mrf.mxu1  ;;  %v2479_v9 = vpack.c.b16 %v2463_v40, %v2462_v6  ;;  %v1528_v10 = vrot.slane %v1527_v52, 4  ;;  %v1538_v36 = vrot.slane %v1537_v41, 4  ;;  %v1545_v6 = vshrl.u32 %v4593_v47, 16 }
 0x19c   : > { %7202 = vst [vmem:[#allocation9_spill] sm:$0xff] %v6672_v8  ;;  %v3680_v12 = vadd.f32 %v3679_v58, %v3591_v2  ;;  %v1540_v8 = vshll.u32 %v4623_v28, 16  ;;  %v5219_v58 = vld [vmem:[%s5700_s8 + $0xc0] sm:$0xff]  ;;  %v1974_v28 = vsel %vm6036_vm5, %v1972_v1, %v1973_v18  ;;  %v1548_v40 = vshll.u32 %v4593_v47, 16  ;;  %v5220_v47 = vld [vmem:[%s5700_s8 + $0x18] sm:$0xff] }
 0x19d   : > { %v1533_v38 = vsel %vm5741_vm2, %v1528_v10, %v1532_v14 }
 0x19e   : > { %v6679_v35 = vadd.f32 %v3768_v27, %v3680_v12  ;;  %v1542_v50 = vrot.slane %v1540_v8, 5  ;;  %v6689_v12 = vld [vmem:[%s5700_s8 + $0x28] sm:$0xf]  ;;  %v2576_v41 = vunpack.c.l.b16 %v1533_v38 }
 0x19f   : > { %v3503_v22 = vpop.f32.mrf.mxu2 }
 0x1a0   : > { %v3592_v54 = vpop.f32.mrf.mxu3  ;;  %v3504_v29 = vadd.f32 %v3503_v22, %v6350_v30  ;;  %v4655_v30 = vrot.slane %v4639_v25, 9  ;;  %v1543_v8 = vsel %vm5741_vm2, %v1538_v36, %v1542_v50  ;;  %v1554_v22 = vshll.u32 %v6689_v12, 16  ;;  %v4624_v50 = vld [vmem:[%s5700_s8 + $0x2c] sm:$0x1] }
 0x1a1   : > { %v3684_v27 = vpop.f32.mrf.mxu0  ;;  %v1547_v25 = vrot.slane %v1545_v6, 4 }
 0x1a2   : > { %v3593_v26 = vadd.f32 %v3592_v54, %v3504_v29  ;;  %v1558_v54 = vshrl.u32 %v6689_v12, 16 }
 0x1a3   : > { %v3773_v2 = vpop.f32.mrf.mxu1 }
 0x1a4   : > { %3545 = vmatmul.bf16.gmra.mxu2 %v2271_v56  ;;  %v6685_v31 = vadd.f32 %v3681_v61, %v3593_v26  ;;  %3723 = vmatmul.bf16.gmra.mxu0 %v2415_v3  ;;  %v1971_v61 = vsel %vm6036_vm5, %v4655_v30, %v1970_v63  ;;  %v2641_v3 = vunpack.c.l.b16 %v1974_v28  ;;  %v1550_v26 = vrot.slane %v1548_v40, 5 }
 0x1a5   : > { %3634 = vmatmul.bf16.gmra.mxu3 %v5219_v58  ;;  %v2577_v58 = vunpack.c.l.b16 %v1543_v8  ;;  %v2640_v63 = vunpack.c.l.b16 %v1971_v61  ;;  %v1560_v10 = vrot.slane %v1558_v54, 4  ;;  %v1977_v28 = vrot.slane %v6689_v12, 5  ;;  %v6718_v54 = vld [vmem:[%s5700_s8 + $0x34] sm:$0xf] }
 0x1a6   : > { %3812 = vmatmul.bf16.gmra.mxu1 %v2479_v9  ;;  %v1556_v9 = vrot.slane %v1554_v22, 5  ;;  %v4595_v22 = vld [vmem:[%s5700_s8 + $0x30] sm:$0xf] }
 0x1a7   : > { %v3506_v19 = vpop.f32.mrf.mxu2  ;;  %v1572_v12 = vshll.u32 %v4595_v22, 16 }
 0x1a8   : > { %v3595_v23 = vpop.f32.mrf.mxu3  ;;  %v3507_v57 = vadd.f32 %v3506_v19, %v6365_v59  ;;  %v5311_v59 = vld [vmem:[%s7189_s3 + $0x18] sm:$0xff]  ;;  %v2672_v19 = vpack.c.b16 %v2641_v3, %v2640_v63  ;;  %v1561_v38 = vor.u32 %v1560_v10, %v1556_v9  ;;  %v1582_v10 = vshrl.u32 %v6718_v54, 16 }
 0x1a9   : > { %v3686_v14 = vpop.f32.mrf.mxu0  ;;  %4205 = vmatpush.bf16.msra.mxu1 %v5311_v59 }
 0x1aa   : > { %v3596_v52 = vadd.f32 %v3595_v23, %v3507_v57  ;;  %v1551_v23 = vor.u32 %v1550_v26, %v1547_v25  ;;  %v1564_v57 = vshll.u32 %v4624_v50, 16  ;;  %v1569_v25 = vshrl.u32 %v4595_v22, 16  ;;  %v4625_v22 = vld [vmem:[%s5700_s8 + $0x38] sm:$0x1] }
 0x1ab   : > { %v6705_v29 = vpop.f32.mrf.mxu1  ;;  %v1578_v26 = vshll.u32 %v6718_v54, 16 }
 0x1ac   : > { %v3685_v56 = vadd.f32 %v3684_v27, %v3596_v52  ;;  %v2608_v27 = vpack.c.b16 %v2577_v58, %v2576_v41  ;;  %v1562_v52 = vrot.slane %v1561_v38, 4  ;;  %v1566_v59 = vrot.slane %v1564_v57, 5 }
 0x1ad   : > { %v1980_v58 = vrot.slane %v4624_v50, 5  ;;  %v1574_v38 = vrot.slane %v1572_v12, 5  ;;  %v1584_v57 = vrot.slane %v1582_v10, 4  ;;  %v4641_v10 = vld [vmem:[%s5700_s8 + $0x30] sm:$0xe] }
 0x1ae   : > { %v6707_v36 = vadd.f32 %v3773_v2, %v3685_v56  ;;  %v4640_v2 = vld [vmem:[%s5700_s8 + $0x24] sm:$0xe]  ;;  %v1979_v56 = vrot.slane %v1977_v28, 4 }
 0x1af   : > { %v3508_v30 = vpop.f32.mrf.mxu2  ;;  %v4656_v41 = vrot.slane %v4640_v2, 9 }
 0x1b0   : > { %v3597_v1 = vpop.f32.mrf.mxu3  ;;  %v3509_v18 = vadd.f32 %v3508_v30, %v6393_v32  ;;  %v1552_v32 = vrot.slane %v1551_v23, 4  ;;  %v1571_v23 = vrot.slane %v1569_v25, 4  ;;  %v5221_v25 = vld [vmem:[%s5700_s8 + $0x24] sm:$0xff] }
 0x1b1   : > { %v3689_v61 = vpop.f32.mrf.mxu0  ;;  %v1978_v50 = vsel %vm6036_vm5, %v4656_v41, %v1977_v28 }
 0x1b2   : > { %v3598_v8 = vadd.f32 %v3597_v1, %v3509_v18  ;;  %v1557_v30 = vsel %vm5741_vm2, %v1552_v32, %v1556_v9  ;;  %v1567_v1 = vsel %vm5741_vm2, %v1562_v52, %v1566_v59  ;;  %v2642_v32 = vunpack.c.l.b16 %v1978_v50 }
 0x1b3   : > { %v3778_v6 = vpop.f32.mrf.mxu1  ;;  %v2578_v9 = vunpack.c.l.b16 %v1557_v30  ;;  %v2579_v2 = vunpack.c.l.b16 %v1567_v1 }
 0x1b4   : > { %3826 = vmatmul.bf16.vlgmr.msra.gmra.mxu2 %v5220_v47  ;;  %v6714_v40 = vadd.f32 %v3686_v14, %v3598_v8  ;;  %4004 = vmatmul.bf16.vlgmr.msra.gmra.mxu0 %v2672_v19 }
 0x1b5   : > { %3915 = vmatmul.bf16.vlgmr.msra.gmra.mxu3 %v2608_v27  ;;  %v1981_v27 = vsel %vm6036_vm5, %v1979_v56, %v1980_v58  ;;  %v1588_v58 = vshll.u32 %v4625_v22, 16  ;;  %v2609_v12 = vpack.c.b16 %v2579_v2, %v2578_v9 }
 0x1b6   : > { %v2643_v52 = vunpack.c.l.b16 %v1981_v27 }
 0x1b7   : > { %v3511_v63 = vpop.f32.mrf.mxu2  ;;  %v1590_v50 = vrot.slane %v1588_v58, 5 }
 0x1b8   : > { %v3600_v3 = vpop.f32.mrf.mxu3  ;;  %v3512_v14 = vadd.f32 %v3511_v63, %v6090_v5  ;;  %v1580_v5 = vrot.slane %v1578_v26, 5  ;;  %v1575_v63 = vor.u32 %v1574_v38, %v1571_v23  ;;  %v1984_v26 = vrot.slane %v6718_v54, 5  ;;  %v6744_v54 = vld [vmem:[%s5700_s8 + $0x40] sm:$0xf] }
 0x1b9   : > { %v3691_v47 = vpop.f32.mrf.mxu0  ;;  %v4657_v23 = vrot.slane %v4641_v10, 9  ;;  %v1987_v38 = vrot.slane %v4625_v22, 5 }
 0x1ba   : > { %v3601_v18 = vadd.f32 %v3600_v3, %v3512_v14  ;;  %v1585_v56 = vor.u32 %v1584_v57, %v1580_v5  ;;  %v4597_v57 = vld [vmem:[%s5700_s8 + $0x3c] sm:$0xf] }
 0x1bb   : > { %v6731_v19 = vpop.f32.mrf.mxu1 }
 0x1bc   : > { %v3690_v8 = vadd.f32 %v3689_v61, %v3601_v18  ;;  %v2673_v61 = vpack.c.b16 %v2643_v52, %v2642_v32  ;;  %v1586_v18 = vrot.slane %v1585_v56, 4  ;;  %v1606_v56 = vshrl.u32 %v6744_v54, 16 }
 0x1be   : > { %v6734_v59 = vadd.f32 %v3778_v6, %v3690_v8  ;;  %v1576_v6 = vrot.slane %v1575_v63, 4  ;;  %v1591_v52 = vsel %vm5741_vm2, %v1586_v18, %v1590_v50  ;;  %v1602_v63 = vshll.u32 %v6744_v54, 16 }
 0x1bf   : > { %v3513_v28 = vpop.f32.mrf.mxu2  ;;  %v1608_v50 = vrot.slane %v1606_v56, 4 }
 0x1c0   : > { %v3602_v41 = vpop.f32.mrf.mxu3  ;;  %v3514_v3 = vadd.f32 %v3513_v28, %v6111_v43  ;;  %v1986_v43 = vrot.slane %v1984_v26, 4  ;;  %v1581_v2 = vsel %vm5741_vm2, %v1576_v6, %v1580_v5  ;;  %v1593_v28 = vshrl.u32 %v4597_v57, 16 }
 0x1c1   : > { %v3694_v30 = vpop.f32.mrf.mxu0  ;;  %v1604_v18 = vrot.slane %v1602_v63, 5 }
 0x1c2   : > { %v3603_v14 = vadd.f32 %v3602_v41, %v3514_v3  ;;  %v1988_v22 = vsel %vm6036_vm5, %v1986_v43, %v1987_v38  ;;  %v1596_v41 = vshll.u32 %v4597_v57, 16  ;;  %v2580_v3 = vunpack.c.l.b16 %v1581_v2  ;;  %v4626_v43 = vld [vmem:[%s5700_s8 + $0x44] sm:$0x1] }
 0x1c3   : > { %v3783_v1 = vpop.f32.mrf.mxu1  ;;  %v2645_v10 = vunpack.c.l.b16 %v1988_v22 }
 0x1c4   : > { %3831 = vmatmul.bf16.gmra.mxu2 %v5221_v25  ;;  %v6740_v27 = vadd.f32 %v3691_v47, %v3603_v14  ;;  %4009 = vmatmul.bf16.gmra.mxu0 %v2673_v61  ;;  %v1985_v47 = vsel %vm6036_vm5, %v4657_v23, %v1984_v26  ;;  %v2581_v26 = vunpack.c.l.b16 %v1591_v52  ;;  %v1595_v14 = vrot.slane %v1593_v28, 4 }
 0x1c5   : > { %3920 = vmatmul.bf16.gmra.mxu3 %v2609_v12  ;;  %v2644_v61 = vunpack.c.l.b16 %v1985_v47  ;;  %v1598_v6 = vrot.slane %v1596_v41, 5  ;;  %v1609_v52 = vor.u32 %v1608_v50, %v1604_v18  ;;  %v1612_v47 = vshll.u32 %v4626_v43, 16 }
 0x1c6   : > { %v1991_v41 = vrot.slane %v6744_v54, 5 }
 0x1c7   : > { %v3516_v8 = vpop.f32.mrf.mxu2  ;;  %v2674_v2 = vpack.c.b16 %v2645_v10, %v2644_v61  ;;  %v1994_v10 = vrot.slane %v4626_v43, 5 }
 0x1c8   : > { %v3605_v9 = vpop.f32.mrf.mxu3  ;;  %v3517_v32 = vadd.f32 %v3516_v8, %v6130_v11  ;;  %v5310_v11 = vld [vmem:[%s7189_s3 + $0x10] sm:$0xff]  ;;  %v1993_v61 = vrot.slane %v1991_v41, 4 }
 0x1c9   : > { %v3696_v5 = vpop.f32.mrf.mxu0  ;;  %4206 = vmatpush.bf16.msra.mxu1 %v5310_v11  ;;  %v6773_v11 = vld [vmem:[%s5700_s8 + $0x4c] sm:$0xf] }
 0x1ca   : > { %v3606_v58 = vadd.f32 %v3605_v9, %v3517_v32  ;;  %v5222_v9 = vld [vmem:[%s5700_s8 + $0x30] sm:$0xff]  ;;  %v1599_v32 = vor.u32 %v1598_v6, %v1595_v14 }
 0x1cb   : > { %v6760_v25 = vpop.f32.mrf.mxu1 }
 0x1cc   : > { %v3695_v12 = vadd.f32 %v3694_v30, %v3606_v58  ;;  %v2610_v30 = vpack.c.b16 %v2581_v26, %v2580_v3  ;;  %v4599_v58 = vld [vmem:[%s5700_s8 + $0x48] sm:$0xf]  ;;  %v1610_v3 = vrot.slane %v1609_v52, 4 }
 0x1cd   : > { %v1617_v50 = vshrl.u32 %v4599_v58, 16  ;;  %v1620_v54 = vshll.u32 %v4599_v58, 16 }
 0x1ce   : > { %v6762_v23 = vadd.f32 %v3783_v1, %v3695_v12  ;;  %v4642_v1 = vld [vmem:[%s5700_s8 + $0x3c] sm:$0xe]  ;;  %v1614_v12 = vrot.slane %v1612_v47, 5 }
 0x1cf   : > { %v3518_v38 = vpop.f32.mrf.mxu2  ;;  %v4658_v26 = vrot.slane %v4642_v1, 9  ;;  %v1619_v47 = vrot.slane %v1617_v50, 4 }
 0x1d0   : > { %v3607_v57 = vpop.f32.mrf.mxu3  ;;  %v3519_v8 = vadd.f32 %v3518_v38, %v6148_v53  ;;  %v1600_v53 = vrot.slane %v1599_v32, 4  ;;  %v1626_v38 = vshll.u32 %v6773_v11, 16  ;;  %v1995_v32 = vsel %vm6036_vm5, %v1993_v61, %v1994_v10 }
 0x1d1   : > { %v3699_v28 = vpop.f32.mrf.mxu0  ;;  %v1992_v43 = vsel %vm6036_vm5, %v4658_v26, %v1991_v41 }
 0x1d2   : > { %v3608_v22 = vadd.f32 %v3607_v57, %v3519_v8  ;;  %v1630_v57 = vshrl.u32 %v6773_v11, 16  ;;  %v1605_v8 = vsel %vm5741_vm2, %v1600_v53, %v1604_v18 }
 0x1d3   : > { %v3788_v63 = vpop.f32.mrf.mxu1  ;;  %v2582_v18 = vunpack.c.l.b16 %v1605_v8 }
 0x1d4   : > { %3836 = vmatmul.bf16.gmra.mxu2 %v5222_v9  ;;  %v6769_v56 = vadd.f32 %v3696_v5, %v3608_v22  ;;  %4014 = vmatmul.bf16.gmra.mxu0 %v2674_v2  ;;  %v1615_v9 = vsel %vm5741_vm2, %v1610_v3, %v1614_v12  ;;  %v1622_v22 = vrot.slane %v1620_v54, 5  ;;  %v1632_v1 = vrot.slane %v1630_v57, 4  ;;  %v4627_v3 = vld [vmem:[%s5700_s8 + $0x50] sm:$0x1]  ;;  %v5223_v54 = vld [vmem:[%s5700_s8 + $0x3c] sm:$0xff] }
 0x1d5   : > { %3925 = vmatmul.bf16.gmra.mxu3 %v2610_v30  ;;  %v2583_v53 = vunpack.c.l.b16 %v1615_v9  ;;  %v2646_v12 = vunpack.c.l.b16 %v1992_v43  ;;  %v1636_v10 = vshll.u32 %v4627_v3, 16  ;;  %v4643_v57 = vld [vmem:[%s5700_s8 + $0x48] sm:$0xe] }
 0x1d7   : > { %v3521_v14 = vpop.f32.mrf.mxu2 }
 0x1d8   : > { %v3610_v6 = vpop.f32.mrf.mxu3  ;;  %v3522_v5 = vadd.f32 %v3521_v14, %v6173_v24  ;;  %v1628_v24 = vrot.slane %v1626_v38, 5  ;;  %v2647_v14 = vunpack.c.l.b16 %v1995_v32  ;;  %v1998_v38 = vrot.slane %v6773_v11, 5  ;;  %v6799_v11 = vld [vmem:[%s5700_s8 + $0x58] sm:$0xf] }
 0x1d9   : > { %v3701_v2 = vpop.f32.mrf.mxu0  ;;  %v1638_v32 = vrot.slane %v1636_v10, 5 }
 0x1da   : > { %v3611_v30 = vadd.f32 %v3610_v6, %v3522_v5  ;;  %v1623_v5 = vor.u32 %v1622_v22, %v1619_v47  ;;  %v1633_v61 = vor.u32 %v1632_v1, %v1628_v24  ;;  %v4659_v22 = vrot.slane %v4643_v57, 9 }
 0x1db   : > { %v6786_v52 = vpop.f32.mrf.mxu1  ;;  %v2001_v1 = vrot.slane %v4627_v3, 5 }
 0x1dc   : > { %7203 = vst [vmem:[#allocation10_spill] sm:$0xff] %v6786_v52  ;;  %v3700_v58 = vadd.f32 %v3699_v28, %v3611_v30  ;;  %v2611_v52 = vpack.c.b16 %v2583_v53, %v2582_v18  ;;  %v2675_v28 = vpack.c.b16 %v2647_v14, %v2646_v12  ;;  %v1634_v43 = vrot.slane %v1633_v61, 4 }
 0x1dd   : > { %v1654_v61 = vshrl.u32 %v6799_v11, 16 }
 0x1de   : > { %v6789_v6 = vadd.f32 %v3788_v63, %v3700_v58  ;;  %v1624_v63 = vrot.slane %v1623_v5, 4  ;;  %v4601_v58 = vld [vmem:[%s5700_s8 + $0x54] sm:$0xf]  ;;  %v1650_v5 = vshll.u32 %v6799_v11, 16 }
 0x1df   : > { %v3523_v41 = vpop.f32.mrf.mxu2  ;;  %v1641_v3 = vshrl.u32 %v4601_v58, 16 }
 0x1e0   : > { %v3612_v26 = vpop.f32.mrf.mxu3  ;;  %v3524_v50 = vadd.f32 %v3523_v41, %v6194_v62  ;;  %v2000_v62 = vrot.slane %v1998_v38, 4  ;;  %v1629_v12 = vsel %vm5741_vm2, %v1624_v63, %v1628_v24  ;;  %v1639_v41 = vsel %vm5741_vm2, %v1634_v43, %v1638_v32 }
 0x1e1   : > { %v3704_v9 = vpop.f32.mrf.mxu0  ;;  %v1643_v63 = vrot.slane %v1641_v3, 4  ;;  %v1652_v32 = vrot.slane %v1650_v5, 5  ;;  %v2005_v5 = vrot.slane %v6799_v11, 5 }
 0x1e2   : > { %v3613_v8 = vadd.f32 %v3612_v26, %v3524_v50  ;;  %v1644_v26 = vshll.u32 %v4601_v58, 16  ;;  %v2584_v50 = vunpack.c.l.b16 %v1629_v12  ;;  %v5224_v12 = vld [vmem:[%s5700_s8 + $0x48] sm:$0xff] }
 0x1e3   : > { %v3793_v30 = vpop.f32.mrf.mxu1 }
 0x1e4   : > { %3841 = vmatmul.bf16.gmra.mxu2 %v5223_v54  ;;  %v6795_v47 = vadd.f32 %v3701_v2, %v3613_v8  ;;  %4019 = vmatmul.bf16.gmra.mxu0 %v2675_v28  ;;  %v1999_v2 = vsel %vm6036_vm5, %v4659_v22, %v1998_v38  ;;  %v2585_v28 = vunpack.c.l.b16 %v1639_v41  ;;  %v1646_v43 = vrot.slane %v1644_v26, 5 }
 0x1e5   : > { %3930 = vmatmul.bf16.gmra.mxu3 %v2611_v52  ;;  %v2002_v52 = vsel %vm6036_vm5, %v2000_v62, %v2001_v1  ;;  %v2648_v57 = vunpack.c.l.b16 %v1999_v2  ;;  %v1656_v22 = vrot.slane %v1654_v61, 4  ;;  %v4628_v1 = vld [vmem:[%s5700_s8 + $0x5c] sm:$0x1] }
 0x1e6   : > { %v2649_v8 = vunpack.c.l.b16 %v2002_v52  ;;  %v1647_v41 = vor.u32 %v1646_v43, %v1643_v63  ;;  %v1660_v52 = vshll.u32 %v4628_v1, 16  ;;  %v2008_v63 = vrot.slane %v4628_v1, 5 }
 0x1e7   : > { %v3526_v18 = vpop.f32.mrf.mxu2  ;;  %v1657_v2 = vor.u32 %v1656_v22, %v1652_v32 }
 0x1e8   : > { %v3615_v53 = vpop.f32.mrf.mxu3  ;;  %v3527_v14 = vadd.f32 %v3526_v18, %v6213_v39  ;;  %v5309_v39 = vld [vmem:[%s7189_s3 + $0x8] sm:$0xff] }
 0x1e9   : > { %v3706_v24 = vpop.f32.mrf.mxu0  ;;  %4207 = vmatpush.bf16.msra.mxu1 %v5309_v39  ;;  %v4603_v39 = vld [vmem:[%s5700_s8 + $0x60] sm:$0xf] }
 0x1ea   : > { %v3616_v10 = vadd.f32 %v3615_v53, %v3527_v14  ;;  %v2676_v14 = vpack.c.b16 %v2649_v8, %v2648_v57  ;;  %v2007_v8 = vrot.slane %v2005_v5, 4  ;;  %v1668_v11 = vshll.u32 %v4603_v39, 16 }
 0x1eb   : > { %v6815_v54 = vpop.f32.mrf.mxu1 }
 0x1ec   : > { %7204 = vst [vmem:[#allocation11_spill] sm:$0xff] %v6815_v54  ;;  %v3705_v38 = vadd.f32 %v3704_v9, %v3616_v10  ;;  %v2612_v9 = vpack.c.b16 %v2585_v28, %v2584_v50  ;;  %v1658_v50 = vrot.slane %v1657_v2, 4  ;;  %v1662_v28 = vrot.slane %v1660_v52, 5 }
 0x1ed   : > { %v2009_v2 = vsel %vm6036_vm5, %v2007_v8, %v2008_v63 }
 0x1ee   : > { %v6817_v62 = vadd.f32 %v3793_v30, %v3705_v38  ;;  %v4644_v30 = vld [vmem:[%s5700_s8 + $0x54] sm:$0xe]  ;;  %v6828_v38 = vld [vmem:[%s5700_s8 + $0x64] sm:$0xf] }
 0x1ef   : > { %v3528_v58 = vpop.f32.mrf.mxu2  ;;  %v4660_v57 = vrot.slane %v4644_v30, 9  ;;  %v1670_v30 = vrot.slane %v1668_v11, 5  ;;  %v5225_v11 = vld [vmem:[%s5700_s8 + $0x54] sm:$0xff] }
 0x1f0   : > { %v3617_v18 = vpop.f32.mrf.mxu3  ;;  %v3529_v53 = vadd.f32 %v3528_v58, %v6231_v16  ;;  %v1648_v16 = vrot.slane %v1647_v41, 4  ;;  %v1665_v58 = vshrl.u32 %v4603_v39, 16 }
 0x1f1   : > { %v3709_v26 = vpop.f32.mrf.mxu0  ;;  %v2006_v1 = vsel %vm6036_vm5, %v4660_v57, %v2005_v5 }
 0x1f2   : > { %v3618_v3 = vadd.f32 %v3617_v18, %v3529_v53  ;;  %v1674_v18 = vshll.u32 %v6828_v38, 16  ;;  %v1678_v53 = vshrl.u32 %v6828_v38, 16 }
 0x1f3   : > { %v3798_v61 = vpop.f32.mrf.mxu1 }
 0x1f4   : > { %3846 = vmatmul.bf16.gmra.mxu2 %v5224_v12  ;;  %v6824_v10 = vadd.f32 %v3706_v24, %v3618_v3  ;;  %4024 = vmatmul.bf16.gmra.mxu0 %v2676_v14  ;;  %v1653_v12 = vsel %vm5741_vm2, %v1648_v16, %v1652_v32  ;;  %v1667_v3 = vrot.slane %v1665_v58, 4  ;;  %v1680_v39 = vrot.slane %v1678_v53, 4  ;;  %v4645_v53 = vld [vmem:[%s5700_s8 + $0x60] sm:$0xe] }
 0x1f5   : > { %3935 = vmatmul.bf16.gmra.mxu3 %v2612_v9  ;;  %v1663_v9 = vsel %vm5741_vm2, %v1658_v50, %v1662_v28  ;;  %v2586_v32 = vunpack.c.l.b16 %v1653_v12  ;;  %v4629_v50 = vld [vmem:[%s5700_s8 + $0x68] sm:$0x1]  ;;  %v2650_v28 = vunpack.c.l.b16 %v2006_v1 }
 0x1f6   : > { %v2587_v16 = vunpack.c.l.b16 %v1663_v9  ;;  %v1671_v54 = vor.u32 %v1670_v30, %v1667_v3  ;;  %v1684_v63 = vshll.u32 %v4629_v50, 16  ;;  %v4661_v30 = vrot.slane %v4645_v53, 9 }
 0x1f7   : > { %v3531_v43 = vpop.f32.mrf.mxu2 }
 0x1f8   : > { %v3620_v22 = vpop.f32.mrf.mxu3  ;;  %v3532_v24 = vadd.f32 %v3531_v43, %v6256_v21  ;;  %v1676_v21 = vrot.slane %v1674_v18, 5  ;;  %v2012_v18 = vrot.slane %v6828_v38, 5  ;;  %v6854_v38 = vld [vmem:[%s5700_s8 + $0x70] sm:$0xf] }
 0x1f9   : > { %v3711_v41 = vpop.f32.mrf.mxu0 }
 0x1fa   : > { %v3621_v14 = vadd.f32 %v3620_v22, %v3532_v24  ;;  %v2651_v22 = vunpack.c.l.b16 %v2009_v2  ;;  %v1681_v8 = vor.u32 %v1680_v39, %v1676_v21  ;;  %v1686_v2 = vrot.slane %v1684_v63, 5 }
 0x1fb   : > { %v6841_v52 = vpop.f32.mrf.mxu1  ;;  %v2015_v39 = vrot.slane %v4629_v50, 5 }
 0x1fc   : > { %7205 = vst [vmem:[#allocation12_spill] sm:$0xff] %v6841_v52  ;;  %v3710_v43 = vadd.f32 %v3709_v26, %v3621_v14  ;;  %v2613_v52 = vpack.c.b16 %v2587_v16, %v2586_v32  ;;  %v2677_v26 = vpack.c.b16 %v2651_v22, %v2650_v28  ;;  %v1682_v1 = vrot.slane %v1681_v8, 4 }
 0x1fd   : > { %v1702_v8 = vshrl.u32 %v6854_v38, 16 }
 0x1fe   : > { %v6844_v24 = vadd.f32 %v3798_v61, %v3710_v43  ;;  %v1672_v61 = vrot.slane %v1671_v54, 4  ;;  %v4605_v43 = vld [vmem:[%s5700_s8 + $0x6c] sm:$0xf]  ;;  %v1687_v22 = vsel %vm5741_vm2, %v1682_v1, %v1686_v2 }
 0x1ff   : > { %v3533_v5 = vpop.f32.mrf.mxu2  ;;  %v1689_v50 = vshrl.u32 %v4605_v43, 16 }
 0x200   : > { %v3622_v57 = vpop.f32.mrf.mxu3  ;;  %v3534_v58 = vadd.f32 %v3533_v5, %v6277_v46  ;;  %v2014_v46 = vrot.slane %v2012_v18, 4  ;;  %v1677_v28 = vsel %vm5741_vm2, %v1672_v61, %v1676_v21  ;;  %v1692_v5 = vshll.u32 %v4605_v43, 16 }
 0x201   : > { %v3714_v9 = vpop.f32.mrf.mxu0  ;;  %v1691_v61 = vrot.slane %v1689_v50, 4 }
 0x202   : > { %v3623_v12 = vadd.f32 %v3622_v57, %v3534_v58  ;;  %v1698_v57 = vshll.u32 %v6854_v38, 16  ;;  %v2588_v58 = vunpack.c.l.b16 %v1677_v28  ;;  %v1694_v1 = vrot.slane %v1692_v5, 5 }
 0x203   : > { %v3803_v14 = vpop.f32.mrf.mxu1 }
 0x204   : > { %3851 = vmatmul.bf16.gmra.mxu2 %v5225_v11  ;;  %v6850_v3 = vadd.f32 %v3711_v41, %v3623_v12  ;;  %4029 = vmatmul.bf16.gmra.mxu0 %v2677_v26  ;;  %v2013_v41 = vsel %vm6036_vm5, %v4661_v30, %v2012_v18  ;;  %v2589_v18 = vunpack.c.l.b16 %v1687_v22  ;;  %v1700_v2 = vrot.slane %v1698_v57, 5 }
 0x205   : > { %3940 = vmatmul.bf16.gmra.mxu3 %v2613_v52  ;;  %v2016_v52 = vsel %vm6036_vm5, %v2014_v46, %v2015_v39  ;;  %v2652_v53 = vunpack.c.l.b16 %v2013_v41  ;;  %v1704_v30 = vrot.slane %v1702_v8, 4  ;;  %v4630_v39 = vld [vmem:[%s5700_s8 + $0x74] sm:$0x1]  ;;  %v1695_v22 = vor.u32 %v1694_v1, %v1691_v61  ;;  %v4646_v8 = vld [vmem:[%s5700_s8 + $0x6c] sm:$0xe] }
 0x206   : > { %v2653_v12 = vunpack.c.l.b16 %v2016_v52  ;;  %v2614_v28 = vpack.c.b16 %v2589_v18, %v2588_v58  ;;  %v1708_v52 = vshll.u32 %v4630_v39, 16  ;;  %v2019_v57 = vrot.slane %v6854_v38, 5 }
 0x207   : > { %v3536_v32 = vpop.f32.mrf.mxu2  ;;  %v1705_v41 = vor.u32 %v1704_v30, %v1700_v2  ;;  %v2022_v61 = vrot.slane %v4630_v39, 5 }
 0x208   : > { %v3625_v16 = vpop.f32.mrf.mxu3  ;;  %v3537_v54 = vadd.f32 %v3536_v32, %v6296_v15  ;;  %v5308_v15 = vld [vmem:[%s7189_s3] sm:$0xff]  ;;  %v1710_v58 = vrot.slane %v1708_v52, 5 }
 0x209   : > { %v3716_v21 = vpop.f32.mrf.mxu0  ;;  %4208 = vmatpush.bf16.msra.mxu1 %v5308_v15  ;;  %v6883_v15 = vld [vmem:[%s5700_s8 + $0x7c] sm:$0xf] }
 0x20a   : > { %v3626_v63 = vadd.f32 %v3625_v16, %v3537_v54  ;;  %v5226_v16 = vld [vmem:[%s5700_s8 + $0x60] sm:$0xff]  ;;  %v2678_v54 = vpack.c.b16 %v2653_v12, %v2652_v53  ;;  %v4662_v53 = vrot.slane %v4646_v8, 9  ;;  %v2021_v12 = vrot.slane %v2019_v57, 4 }
 0x20b   : > { %v6870_v26 = vpop.f32.mrf.mxu1 }
 0x20c   : > { %v3715_v11 = vadd.f32 %v3714_v9, %v3626_v63  ;;  %7206 = vst [vmem:[#allocation13_spill] sm:$0xff] %v6870_v26  ;;  %v4607_v63 = vld [vmem:[%s5700_s8 + $0x78] sm:$0xf]  ;;  %v2020_v39 = vsel %vm6036_vm5, %v4662_v53, %v2019_v57 }
 0x20d   : > { %v1716_v38 = vshll.u32 %v4607_v63, 16 }
 0x20e   : > { %v6872_v46 = vadd.f32 %v3803_v14, %v3715_v11  ;;  %v1706_v11 = vrot.slane %v1705_v41, 4  ;;  %v2023_v41 = vsel %vm6036_vm5, %v2021_v12, %v2022_v61  ;;  %v5227_v61 = vld [vmem:[%s5700_s8 + $0x6c] sm:$0xff] }
 0x20f   : > { %v3538_v43 = vpop.f32.mrf.mxu2 }
 0x210   : > { %v3627_v32 = vpop.f32.mrf.mxu3  ;;  %v3539_v9 = vadd.f32 %v3538_v43, %v6314_v55  ;;  %v1696_v55 = vrot.slane %v1695_v22, 4  ;;  %v1713_v43 = vshrl.u32 %v4607_v63, 16 }
 0x211   : > { %v3719_v5 = vpop.f32.mrf.mxu0 }
 0x212   : > { %v3628_v50 = vadd.f32 %v3627_v32, %v3539_v9  ;;  %v1722_v32 = vshll.u32 %v6883_v15, 16  ;;  %v1715_v52 = vrot.slane %v1713_v43, 4 }
 0x213   : > { %v3808_v18 = vpop.f32.mrf.mxu1 }
 0x214   : > { %3856 = vmatmul.bf16.gmra.mxu2 %v5226_v16  ;;  %v6879_v14 = vadd.f32 %v3716_v21, %v3628_v50  ;;  %4034 = vmatmul.bf16.gmra.mxu0 %v2678_v54  ;;  %v1726_v21 = vshrl.u32 %v6883_v15, 16  ;;  %v1701_v16 = vsel %vm5741_vm2, %v1696_v55, %v1700_v2  ;;  %v1718_v50 = vrot.slane %v1716_v38, 5  ;;  %v4631_v2 = vld [vmem:[%s5700_s8 + $0x80] sm:$0x1] }
 0x215   : > { %3945 = vmatmul.bf16.gmra.mxu3 %v2614_v28  ;;  %v1711_v28 = vsel %vm5741_vm2, %v1706_v11, %v1710_v58  ;;  %v1724_v8 = vrot.slane %v1722_v32, 5  ;;  %v2654_v55 = vunpack.c.l.b16 %v2020_v39  ;;  %v2655_v11 = vunpack.c.l.b16 %v2023_v41 }
 0x216   : > { %7207 = vst [vmem:[#allocation14_spill] sm:$0xff] %v6879_v14  ;;  %v1728_v63 = vrot.slane %v1726_v21, 4  ;;  %v2591_v26 = vunpack.c.l.b16 %v1711_v28  ;;  %v1719_v57 = vor.u32 %v1718_v50, %v1715_v52  ;;  %v1732_v14 = vshll.u32 %v4631_v2, 16  ;;  %v4647_v21 = vld [vmem:[%s5700_s8 + $0x78] sm:$0xe] }
 0x217   : > { %v3541_v1 = vpop.f32.mrf.mxu2  ;;  %v2026_v38 = vrot.slane %v6883_v15, 5  ;;  %v2679_v32 = vpack.c.b16 %v2655_v11, %v2654_v55  ;;  %v4609_v15 = vld [vmem:[%s5700_s8 + $0x84] sm:$0xf]  ;;  %v6909_v50 = vld [vmem:[%s5700_s8 + $0x88] sm:$0xf] }
 0x218   : > { %v3630_v30 = vpop.f32.mrf.mxu3  ;;  %v3542_v9 = vadd.f32 %v3541_v1, %v6339_v17  ;;  %v2590_v1 = vunpack.c.l.b16 %v1701_v16  ;;  %v1729_v53 = vor.u32 %v1728_v63, %v1724_v8  ;;  %v1720_v28 = vrot.slane %v1719_v57, 4 }
 0x219   : > { %v3721_v22 = vpop.f32.mrf.mxu0  ;;  %v1734_v39 = vrot.slane %v1732_v14, 5  ;;  %v2028_v52 = vrot.slane %v2026_v38, 4  ;;  %v1737_v11 = vshrl.u32 %v4609_v15, 16  ;;  %v1750_v57 = vshrl.u32 %v6909_v50, 16 }
 0x21a   : > { %v3631_v54 = vadd.f32 %v3630_v30, %v3542_v9  ;;  %v2615_v43 = vpack.c.b16 %v2591_v26, %v2590_v1  ;;  %v2029_v26 = vrot.slane %v4631_v2, 5  ;;  %v1725_v1 = vsel %vm5741_vm2, %v1720_v28, %v1724_v8 }
 0x21c   : > { %v3720_v17 = vadd.f32 %v3719_v5, %v3631_v54  ;;  %v6902_v5 = vpop.f32.mrf.mxu1  ;;  %v1730_v54 = vrot.slane %v1729_v53, 4  ;;  %v2030_v2 = vsel %vm6036_vm5, %v2028_v52, %v2029_v26 }
 0x21e   : > { %v6897_v58 = vadd.f32 %v3808_v18, %v3720_v17  ;;  %v1735_v14 = vsel %vm5741_vm2, %v1730_v54, %v1734_v39  ;;  %v1752_v54 = vrot.slane %v1750_v57, 4  ;;  %v4611_v57 = vld [vmem:[%s5700_s8 + $0x90] sm:$0xf] }
 0x21f   : > { %v3543_v30 = vpop.f32.mrf.mxu2 }
 0x220   : > { %v3632_v9 = vpop.f32.mrf.mxu3  ;;  %v3544_v12 = vadd.f32 %v3543_v30, %v6360_v4  ;;  %v4663_v4 = vrot.slane %v4647_v21, 9  ;;  %v1740_v30 = vshll.u32 %v4609_v15, 16  ;;  %v2657_v21 = vunpack.c.l.b16 %v2030_v2 }
 0x221   : > { %v3724_v18 = vpop.f32.mrf.mxu0 }
 0x222   : > { %v3633_v16 = vadd.f32 %v3632_v9, %v3544_v12  ;;  %v1746_v9 = vshll.u32 %v6909_v50, 16  ;;  %v2592_v12 = vunpack.c.l.b16 %v1725_v1 }
 0x224   : > { %3861 = vmatmul.bf16.gmra.mxu2 %v5227_v61  ;;  %v6905_v41 = vadd.f32 %v3721_v22, %v3633_v16  ;;  %4039 = vmatmul.bf16.gmra.mxu0 %v2679_v32  ;;  %v2027_v22 = vsel %vm6036_vm5, %v4663_v4, %v2026_v38  ;;  %v1739_v38 = vrot.slane %v1737_v11, 4  ;;  %v1742_v16 = vrot.slane %v1740_v30, 5  ;;  %v4632_v4 = vld [vmem:[%s5700_s8 + $0x8c] sm:$0x1]  ;;  %v4648_v30 = vld [vmem:[%s5700_s8 + $0x84] sm:$0xe] }
 0x225   : > { %3950 = vmatmul.bf16.gmra.mxu3 %v2615_v43  ;;  %v2593_v43 = vunpack.c.l.b16 %v1735_v14  ;;  %v2656_v32 = vunpack.c.l.b16 %v2027_v22  ;;  %v1748_v28 = vrot.slane %v1746_v9, 5  ;;  %v1756_v14 = vshll.u32 %v4632_v4, 16 }
 0x226   : > { %v1743_v1 = vor.u32 %v1742_v16, %v1739_v38  ;;  %v2033_v11 = vrot.slane %v6909_v50, 5  ;;  %v1761_v16 = vshrl.u32 %v4611_v57, 16  ;;  %v1764_v50 = vshll.u32 %v4611_v57, 16  ;;  %v4633_v57 = vld [vmem:[%s5700_s8 + $0x98] sm:$0x1] }
 0x227   : > { %v3546_v63 = vpop.f32.mrf.mxu2 }
 0x228   : > { %v3635_v17 = vpop.f32.mrf.mxu3  ;;  %v3547_v55 = vadd.f32 %v3546_v63, %v6381_v7  ;;  %v3813_v7 = vpop.f32.mrf.mxu1  ;;  %v5228_v63 = vld [vmem:[%s5700_s8 + $0x78] sm:$0xff] }
 0x229   : > { %v3726_v8 = vpop.f32.mrf.mxu0 }
 0x22a   : > { %v3636_v53 = vadd.f32 %v3635_v17, %v3547_v55  ;;  %v2616_v17 = vpack.c.b16 %v2593_v43, %v2592_v12  ;;  %v1753_v55 = vor.u32 %v1752_v54, %v1748_v28  ;;  %v1758_v12 = vrot.slane %v1756_v14, 5 }
 0x22b   : > { %v2035_v43 = vrot.slane %v2033_v11, 4 }
 0x22c   : > { %v3725_v61 = vadd.f32 %v3724_v18, %v3636_v53  ;;  %v2680_v18 = vpack.c.b16 %v2657_v21, %v2656_v32  ;;  %v6933_v53 = vld [vmem:[%s5700_s8 + $0x94] sm:$0xf]  ;;  %v2036_v32 = vrot.slane %v4632_v4, 5 }
 0x22d   : > { %v1770_v54 = vshll.u32 %v6933_v53, 16 }
 0x22e   : > { %v6922_v39 = vadd.f32 %v3813_v7, %v3725_v61  ;;  %v1754_v7 = vrot.slane %v1753_v55, 4  ;;  %v4664_v61 = vrot.slane %v4648_v30, 9  ;;  %v1766_v55 = vrot.slane %v1764_v50, 5 }
 0x22f   : > { %v3548_v52 = vpop.f32.mrf.mxu2  ;;  %v1772_v14 = vrot.slane %v1770_v54, 5  ;;  %v4649_v54 = vld [vmem:[%s5700_s8 + $0x90] sm:$0xe] }
 0x230   : > { %7208 = vst [vmem:[#allocation15_spill] sm:$0xff] %v6922_v39  ;;  %v3637_v26 = vpop.f32.mrf.mxu3  ;;  %v3549_v15 = vadd.f32 %v3548_v52, %v6405_v34  ;;  %v1744_v34 = vrot.slane %v1743_v1, 4  ;;  %v2034_v4 = vsel %vm6036_vm5, %v4664_v61, %v2033_v11  ;;  %v1763_v1 = vrot.slane %v1761_v16, 4 }
 0x231   : > { %v4005_v2 = vpop.f32.mrf.mxu0  ;;  %v1780_v11 = vshll.u32 %v4633_v57, 16  ;;  %v2040_v16 = vrot.slane %v6933_v53, 5 }
 0x232   : > { %v3638_v22 = vadd.f32 %v3637_v26, %v3549_v15  ;;  %v1749_v52 = vsel %vm5741_vm2, %v1744_v34, %v1748_v28  ;;  %v1759_v26 = vsel %vm5741_vm2, %v1754_v7, %v1758_v12  ;;  %v7210_v15 = vld [vmem:[#allocation5_spill] sm:$0xff]  ;;  %v2658_v34 = vunpack.c.l.b16 %v2034_v4 }
 0x233   : > { %v2594_v30 = vunpack.c.l.b16 %v1749_v52  ;;  %v2595_v28 = vunpack.c.l.b16 %v1759_v26 }
 0x234   : > { %3866 = vmatmul.bf16.gmra.mxu2 %v5228_v63  ;;  %v6929_v9 = vadd.f32 %v3726_v8, %v3638_v22  ;;  %4044 = vmatmul.bf16.gmra.mxu0 %v2680_v18  ;;  %v1774_v8 = vshrl.u32 %v6933_v53, 16  ;;  %v2037_v18 = vsel %vm6036_vm5, %v2035_v43, %v2036_v32  ;;  %v5229_v43 = vld [vmem:[%s5700_s8 + $0x84] sm:$0xff]  ;;  %v4613_v53 = vld [vmem:[%s5700_s8 + $0x9c] sm:$0xf] }
 0x235   : > { %3955 = vmatmul.bf16.gmra.mxu3 %v2616_v17  ;;  %v2659_v7 = vunpack.c.l.b16 %v2037_v18  ;;  %v2617_v32 = vpack.c.b16 %v2595_v28, %v2594_v30  ;;  %v6953_v28 = vld [vmem:[%s5700_s8 + $0xa0] sm:$0xf] }
 0x236   : > { %7209 = vst [vmem:[#allocation16_spill] sm:$0xff] %v6929_v9  ;;  %v1776_v22 = vrot.slane %v1774_v8, 4  ;;  %v1767_v9 = vor.u32 %v1766_v55, %v1763_v1  ;;  %v4665_v1 = vrot.slane %v4649_v54, 9  ;;  %v2042_v55 = vrot.slane %v2040_v16, 4 }
 0x237   : > { %v3827_v21 = vpop.f32.mrf.mxu2  ;;  %v2681_v50 = vpack.c.b16 %v2659_v7, %v2658_v34 }
 0x238   : > { %v3916_v38 = vpop.f32.mrf.mxu3  ;;  %v3828_v63 = vadd.f32 %v3827_v21, %v7210_v15  ;;  %v1777_v39 = vor.u32 %v1776_v22, %v1772_v14  ;;  %v1768_v4 = vrot.slane %v1767_v9, 4 }
 0x239   : > { %v4007_v17 = vpop.f32.mrf.mxu0 }
 0x23a   : > { %v3917_v12 = vadd.f32 %v3916_v38, %v3828_v63  ;;  %v1778_v38 = vrot.slane %v1777_v39, 4  ;;  %v1782_v63 = vrot.slane %v1780_v11, 5  ;;  %v1773_v7 = vsel %vm5741_vm2, %v1768_v4, %v1772_v14 }
 0x23b   : > { %v1798_v11 = vshrl.u32 %v6953_v28, 16 }
 0x23c   : > { %v4006_v8 = vadd.f32 %v4005_v2, %v3917_v12  ;;  %v1783_v39 = vsel %vm5741_vm2, %v1778_v38, %v1782_v63  ;;  %v1785_v12 = vshrl.u32 %v4613_v53, 16 }
 0x23d   : > { %v1800_v38 = vrot.slane %v1798_v11, 4  ;;  %v4615_v11 = vld [vmem:[%s5700_s8 + $0xa8] sm:$0xf] }
 0x23e   : > { %v4085_v22 = vmax.f32 %v4006_v8, 0.0 }
 0x23f   : > { %v3829_v21 = vpop.f32.mrf.mxu2 }
 0x240   : > { %v3918_v15 = vpop.f32.mrf.mxu3  ;;  %v3830_v61 = vadd.f32 %v3829_v21, %v6453_v60  ;;  %v2043_v60 = vrot.slane %v4633_v57, 5  ;;  %v1788_v21 = vshll.u32 %v4613_v53, 16 }
 0x241   : > { %v4010_v26 = vpop.f32.mrf.mxu0 }
 0x242   : > { %v3919_v52 = vadd.f32 %v3918_v15, %v3830_v61  ;;  %v2044_v57 = vsel %vm6036_vm5, %v2042_v55, %v2043_v60  ;;  %v1794_v15 = vshll.u32 %v6953_v28, 16  ;;  %v7211_v61 = vld [vmem:[#allocation6_spill] sm:$0xff]  ;;  %v7212_v60 = vld [vmem:[#allocation7_spill] sm:$0xff] }
 0x243   : > { %v2661_v8 = vunpack.c.l.b16 %v2044_v57 }
 0x244   : > { %v4008_v18 = vadd.f32 %v4007_v17, %v3919_v52  ;;  %3871 = vmatmul.bf16.gmra.mxu2 %v5229_v43  ;;  %4049 = vmatmul.bf16.gmra.mxu0 %v2681_v50  ;;  %v2041_v17 = vsel %vm6036_vm5, %v4665_v1, %v2040_v16  ;;  %v2597_v50 = vunpack.c.l.b16 %v1783_v39  ;;  %v1787_v16 = vrot.slane %v1785_v12, 4 }
 0x245   : > { %3960 = vmatmul.bf16.gmra.mxu3 %v2617_v32  ;;  %v2596_v32 = vunpack.c.l.b16 %v1773_v7  ;;  %v2660_v54 = vunpack.c.l.b16 %v2041_v17  ;;  %v1790_v52 = vrot.slane %v1788_v21, 5  ;;  %v1796_v4 = vrot.slane %v1794_v15, 5  ;;  %v4650_v21 = vld [vmem:[%s5700_s8 + $0x9c] sm:$0xe] }
 0x246   : > { %v4086_v30 = vmax.f32 %v4008_v18, 0.0  ;;  %v4634_v18 = vld [vmem:[%s5700_s8 + $0xa4] sm:$0x1]  ;;  %v2047_v15 = vrot.slane %v6953_v28, 5 }
 0x247   : > { %v3832_v34 = vpop.f32.mrf.mxu2  ;;  %v2618_v53 = vpack.c.b16 %v2597_v50, %v2596_v32  ;;  %v1791_v7 = vor.u32 %v1790_v52, %v1787_v16  ;;  %v1804_v39 = vshll.u32 %v4634_v18, 16  ;;  %v4666_v50 = vrot.slane %v4650_v21, 9 }
 0x248   : > { %v3921_v2 = vpop.f32.mrf.mxu3  ;;  %v4117_v9 = vpack.c.bf16 %v4086_v30, %v4085_v22  ;;  %v3833_v43 = vadd.f32 %v3832_v34, %v7211_v61  ;;  %v5230_v30 = vld [vmem:[%s5700_s8 + $0x90] sm:$0xff]  ;;  %v2682_v34 = vpack.c.b16 %v2661_v8, %v2660_v54  ;;  %v6973_v61 = vld [vmem:[%s5700_s8 + $0xac] sm:$0xf]  ;;  %v2049_v16 = vrot.slane %v2047_v15, 4 }
 0x249   : > { %v4012_v14 = vpop.f32.mrf.mxu0  ;;  %v1806_v32 = vrot.slane %v1804_v39, 5  ;;  %v1818_v28 = vshll.u32 %v6973_v61, 16 }
 0x24a   : > { %4209 = vmatmul.bf16.vlgmr.msra.gmra.mxu1 %v4117_v9  ;;  %v3922_v63 = vadd.f32 %v3921_v2, %v3833_v43  ;;  %v1801_v9 = vor.u32 %v1800_v38, %v1796_v4  ;;  %v1792_v43 = vrot.slane %v1791_v7, 4  ;;  %v2048_v7 = vsel %vm6036_vm5, %v4666_v50, %v2047_v15 }
 0x24c   : > { %v4011_v17 = vadd.f32 %v4010_v26, %v3922_v63  ;;  %v2050_v26 = vrot.slane %v4634_v18, 5  ;;  %v1809_v63 = vshrl.u32 %v4615_v11, 16 }
 0x24e   : > { %v4087_v54 = vmax.f32 %v4011_v17, 0.0  ;;  %v1811_v39 = vrot.slane %v1809_v63, 4  ;;  %v2054_v63 = vrot.slane %v6973_v61, 5 }
 0x24f   : > { %v3834_v1 = vpop.f32.mrf.mxu2 }
 0x250   : > { %v3923_v55 = vpop.f32.mrf.mxu3  ;;  %v3835_v22 = vadd.f32 %v3834_v1, %v7212_v60  ;;  %v1802_v1 = vrot.slane %v1801_v9, 4  ;;  %v2051_v9 = vsel %vm6036_vm5, %v2049_v16, %v2050_v26  ;;  %v5231_v16 = vld [vmem:[%s5700_s8 + $0x9c] sm:$0xff] }
 0x251   : > { %v4015_v12 = vpop.f32.mrf.mxu0 }
 0x252   : > { %v3924_v57 = vadd.f32 %v3923_v55, %v3835_v22  ;;  %v1812_v55 = vshll.u32 %v4615_v11, 16  ;;  %v1797_v22 = vsel %vm5741_vm2, %v1792_v43, %v1796_v4  ;;  %v4635_v11 = vld [vmem:[%s5700_s8 + $0xb0] sm:$0x1]  ;;  %v2662_v43 = vunpack.c.l.b16 %v2048_v7 }
 0x253   : > { %v1828_v15 = vshll.u32 %v4635_v11, 16 }
 0x254   : > { %v4013_v2 = vadd.f32 %v4012_v14, %v3924_v57  ;;  %3876 = vmatmul.bf16.gmra.mxu2 %v5230_v30  ;;  %4054 = vmatmul.bf16.gmra.mxu0 %v2682_v34  ;;  %v1822_v14 = vshrl.u32 %v6973_v61, 16  ;;  %v1807_v30 = vsel %vm5741_vm2, %v1802_v1, %v1806_v32  ;;  %v1814_v17 = vrot.slane %v1812_v55, 5  ;;  %v4617_v61 = vld [vmem:[%s5700_s8 + $0xb4] sm:$0xf] }
 0x255   : > { %3965 = vmatmul.bf16.gmra.mxu3 %v2618_v53  ;;  %v7213_v53 = vld [vmem:[#allocation8_spill] sm:$0xff]  ;;  %v1820_v57 = vrot.slane %v1818_v28, 5  ;;  %v2599_v4 = vunpack.c.l.b16 %v1807_v30  ;;  %v2663_v1 = vunpack.c.l.b16 %v2051_v9  ;;  %v4651_v28 = vld [vmem:[%s5700_s8 + $0xa8] sm:$0xe] }
 0x256   : > { %v4088_v8 = vmax.f32 %v4013_v2, 0.0  ;;  %v1824_v21 = vrot.slane %v1822_v14, 4  ;;  %v2598_v2 = vunpack.c.l.b16 %v1797_v22  ;;  %v4667_v9 = vrot.slane %v4651_v28, 9 }
 0x257   : > { %v3837_v52 = vpop.f32.mrf.mxu2  ;;  %v2683_v55 = vpack.c.b16 %v2663_v1, %v2662_v43 }
 0x258   : > { %v3926_v38 = vpop.f32.mrf.mxu3  ;;  %v4118_v60 = vpack.c.bf16 %v4088_v8, %v4087_v54  ;;  %v3838_v34 = vadd.f32 %v3837_v52, %v7213_v53  ;;  %v1815_v52 = vor.u32 %v1814_v17, %v1811_v39  ;;  %v2619_v26 = vpack.c.b16 %v2599_v4, %v2598_v2  ;;  %v6993_v2 = vld [vmem:[%s5700_s8 + $0xb8] sm:$0xf] }
 0x259   : > { %v4017_v18 = vpop.f32.mrf.mxu0  ;;  %v2056_v39 = vrot.slane %v2054_v63, 4 }
 0x25a   : > { %4214 = vmatmul.bf16.gmra.mxu1 %v4118_v60  ;;  %v3927_v32 = vadd.f32 %v3926_v38, %v3838_v34  ;;  %v1825_v60 = vor.u32 %v1824_v21, %v1820_v57  ;;  %v1816_v53 = vrot.slane %v1815_v52, 4  ;;  %v1830_v34 = vrot.slane %v1828_v15, 5 }
 0x25b   : > { %v1842_v52 = vshll.u32 %v6993_v2, 16 }
 0x25c   : > { %v4016_v14 = vadd.f32 %v4015_v12, %v3927_v32  ;;  %v1826_v38 = vrot.slane %v1825_v60, 4  ;;  %v1821_v43 = vsel %vm5741_vm2, %v1816_v53, %v1820_v57  ;;  %v2055_v32 = vsel %vm6036_vm5, %v4667_v9, %v2054_v63 }
 0x25d   : > { %v1846_v60 = vshrl.u32 %v6993_v2, 16 }
 0x25e   : > { %v4089_v17 = vmax.f32 %v4016_v14, 0.0  ;;  %v1844_v14 = vrot.slane %v1842_v52, 5 }
 0x25f   : > { %v3839_v54 = vpop.f32.mrf.mxu2 }
 0x260   : > { %v3928_v8 = vpop.f32.mrf.mxu3  ;;  %v3840_v50 = vadd.f32 %v3839_v54, %v6542_v45  ;;  %v2057_v45 = vrot.slane %v4635_v11, 5  ;;  %v1833_v54 = vshrl.u32 %v4617_v61, 16 }
 0x261   : > { %v4020_v30 = vpop.f32.mrf.mxu0 }
 0x262   : > { %v3929_v22 = vadd.f32 %v3928_v8, %v3840_v50  ;;  %v2058_v11 = vsel %vm6036_vm5, %v2056_v39, %v2057_v45  ;;  %v1836_v8 = vshll.u32 %v4617_v61, 16  ;;  %v2600_v50 = vunpack.c.l.b16 %v1821_v43 }
 0x263   : > { %v1835_v63 = vrot.slane %v1833_v54, 4  ;;  %v7013_v54 = vld [vmem:[%s5700_s8 + $0xc4] sm:$0xf] }
 0x264   : > { %v4018_v7 = vadd.f32 %v4017_v18, %v3929_v22  ;;  %3881 = vmatmul.bf16.gmra.mxu2 %v5231_v16  ;;  %4059 = vmatmul.bf16.gmra.mxu0 %v2683_v55  ;;  %v1831_v18 = vsel %vm5741_vm2, %v1826_v38, %v1830_v34  ;;  %v2665_v55 = vunpack.c.l.b16 %v2058_v11  ;;  %v1838_v28 = vrot.slane %v1836_v8, 5  ;;  %v4636_v38 = vld [vmem:[%s5700_s8 + $0xbc] sm:$0x1]  ;;  %v4619_v11 = vld [vmem:[%s5700_s8 + $0xc0] sm:$0xf] }
 0x265   : > { %3970 = vmatmul.bf16.gmra.mxu3 %v2619_v26  ;;  %v2601_v16 = vunpack.c.l.b16 %v1831_v18  ;;  %v2664_v26 = vunpack.c.l.b16 %v2055_v32  ;;  %v1848_v22 = vrot.slane %v1846_v60, 4  ;;  %v1852_v61 = vshll.u32 %v4636_v38, 16  ;;  %v4652_v18 = vld [vmem:[%s5700_s8 + $0xb4] sm:$0xe] }
 0x266   : > { %v4090_v21 = vmax.f32 %v4018_v7, 0.0  ;;  %v2061_v32 = vrot.slane %v6993_v2, 5  ;;  %v4668_v60 = vrot.slane %v4652_v18, 9  ;;  %v1866_v2 = vshll.u32 %v7013_v54, 16 }
 0x267   : > { %v3842_v4 = vpop.f32.mrf.mxu2  ;;  %v2620_v39 = vpack.c.b16 %v2601_v16, %v2600_v50  ;;  %v2684_v45 = vpack.c.b16 %v2665_v55, %v2664_v26  ;;  %v1854_v52 = vrot.slane %v1852_v61, 5 }
 0x268   : > { %v3931_v12 = vpop.f32.mrf.mxu3  ;;  %v4119_v1 = vpack.c.bf16 %v4090_v21, %v4089_v17  ;;  %v3843_v15 = vadd.f32 %v3842_v4, %v6562_v37  ;;  %v5232_v37 = vld [vmem:[%s5700_s8 + $0xa8] sm:$0xff]  ;;  %v1839_v17 = vor.u32 %v1838_v28, %v1835_v63  ;;  %v1849_v21 = vor.u32 %v1848_v22, %v1844_v14 }
 0x269   : > { %v4022_v57 = vpop.f32.mrf.mxu0  ;;  %v2063_v16 = vrot.slane %v2061_v32, 4  ;;  %v1857_v63 = vshrl.u32 %v4619_v11, 16  ;;  %v1860_v28 = vshll.u32 %v4619_v11, 16 }
 0x26a   : > { %4219 = vmatmul.bf16.gmra.mxu1 %v4119_v1  ;;  %v3932_v53 = vadd.f32 %v3931_v12, %v3843_v15  ;;  %v1850_v8 = vrot.slane %v1849_v21, 4 }
 0x26c   : > { %v4021_v4 = vadd.f32 %v4020_v30, %v3932_v53  ;;  %v2064_v30 = vrot.slane %v4636_v38, 5 }
 0x26e   : > { %v4091_v15 = vmax.f32 %v4021_v4, 0.0  ;;  %v4637_v4 = vld [vmem:[%s5700_s8 + $0xc8] sm:$0x1] }
 0x26f   : > { %v3844_v34 = vpop.f32.mrf.mxu2 }
 0x270   : > { %v3933_v7 = vpop.f32.mrf.mxu3  ;;  %v3845_v9 = vadd.f32 %v3844_v34, %v6575_v42  ;;  %v1840_v42 = vrot.slane %v1839_v17, 4  ;;  %v1855_v34 = vsel %vm5741_vm2, %v1850_v8, %v1854_v52  ;;  %v1868_v17 = vrot.slane %v1866_v2, 5 }
 0x271   : > { %v4025_v1 = vpop.f32.mrf.mxu0  ;;  %v1876_v52 = vshll.u32 %v4637_v4, 16 }
 0x272   : > { %v3934_v43 = vadd.f32 %v3933_v7, %v3845_v9  ;;  %v1845_v53 = vsel %vm5741_vm2, %v1840_v42, %v1844_v14  ;;  %v2062_v9 = vsel %vm6036_vm5, %v4668_v60, %v2061_v32  ;;  %v2603_v14 = vunpack.c.l.b16 %v1855_v34 }
 0x273   : > { %v2602_v61 = vunpack.c.l.b16 %v1845_v53  ;;  %v2071_v34 = vrot.slane %v4637_v4, 5 }
 0x274   : > { %v4023_v12 = vadd.f32 %v4022_v57, %v3934_v43  ;;  %3886 = vmatmul.bf16.gmra.mxu2 %v5232_v37  ;;  %4064 = vmatmul.bf16.gmra.mxu0 %v2684_v45  ;;  %v1870_v57 = vshrl.u32 %v7013_v54, 16  ;;  %v2065_v37 = vsel %vm6036_vm5, %v2063_v16, %v2064_v30  ;;  %v1862_v45 = vrot.slane %v1860_v28, 5 }
 0x275   : > { %3975 = vmatmul.bf16.gmra.mxu3 %v2620_v39  ;;  %v1859_v39 = vrot.slane %v1857_v63, 4  ;;  %v2666_v43 = vunpack.c.l.b16 %v2062_v9  ;;  %v2667_v18 = vunpack.c.l.b16 %v2065_v37  ;;  %v2068_v16 = vrot.slane %v7013_v54, 5  ;;  %v4621_v54 = vld [vmem:[%s5700_s8 + $0xcc] sm:$0xf]  ;;  %v4622_v37 = vld [vmem:[%s5700_s8 + $0xd0] sm:$0xf] }
 0x276   : > { %v4092_v50 = vmax.f32 %v4023_v12, 0.0  ;;  %v1872_v21 = vrot.slane %v1870_v57, 4  ;;  %v1881_v4 = vshrl.u32 %v4621_v54, 16 }
 0x277   : > { %v3847_v26 = vpop.f32.mrf.mxu2  ;;  %v1863_v42 = vor.u32 %v1862_v45, %v1859_v39  ;;  %v2685_v30 = vpack.c.b16 %v2667_v18, %v2666_v43  ;;  %v2070_v53 = vrot.slane %v2068_v16, 4  ;;  %v1884_v43 = vshll.u32 %v4621_v54, 16  ;;  %v4654_v54 = vld [vmem:[%s5700_s8 + $0xcc] sm:$0xe] }
 0x278   : > { %v3936_v55 = vpop.f32.mrf.mxu3  ;;  %v4120_v22 = vpack.c.bf16 %v4092_v50, %v4091_v15  ;;  %v3848_v7 = vadd.f32 %v3847_v26, %v6604_v51  ;;  %v3761_v51 = vadd.f32 %v6596_v49, %v6617_v0  ;;  %v1873_v8 = vor.u32 %v1872_v21, %v1868_v17  ;;  %v5233_v15 = vld [vmem:[%s5700_s8 + $0xb4] sm:$0xff]  ;;  %v4653_v26 = vld [vmem:[%s5700_s8 + $0xc0] sm:$0xe] }
 0x279   : > { %v4027_v38 = vpop.f32.mrf.mxu0  ;;  %v2621_v50 = vpack.c.b16 %v2603_v14, %v2602_v61  ;;  %v1864_v57 = vrot.slane %v1863_v42, 4  ;;  %v1878_v0 = vrot.slane %v1876_v52, 5  ;;  %v2072_v14 = vsel %vm6036_vm5, %v2070_v53, %v2071_v34 }
 0x27a   : > { %4224 = vmatmul.bf16.gmra.mxu1 %v4120_v22  ;;  %v3937_v12 = vadd.f32 %v3936_v55, %v3848_v7  ;;  %v1874_v49 = vrot.slane %v1873_v8, 4  ;;  %v4669_v22 = vrot.slane %v4653_v26, 9  ;;  %v1890_v18 = vshll.u32 %v4622_v37, 16  ;;  %v4638_v26 = vld [vmem:[%s5700_s8 + $0xd4] sm:$0x1] }
 0x27b   : > { %v2669_v8 = vunpack.c.l.b16 %v2072_v14  ;;  %v1883_v52 = vrot.slane %v1881_v4, 4  ;;  %v1900_v53 = vshll.u32 %v4638_v26, 16  ;;  %v2078_v4 = vrot.slane %v4638_v26, 5 }
 0x27c   : > { %v4026_v63 = vadd.f32 %v4025_v1, %v3937_v12  ;;  %v1869_v1 = vsel %vm5741_vm2, %v1864_v57, %v1868_v17  ;;  %v1879_v61 = vsel %vm5741_vm2, %v1874_v49, %v1878_v0  ;;  %v5234_v57 = vld [vmem:[%s5700_s8 + $0xc0] sm:$0xff] }
 0x27e   : > { %v4093_v7 = vmax.f32 %v4026_v63, 0.0 }
 0x27f   : > { %v3849_v11 = vpop.f32.mrf.mxu2 }
 0x280   : > { %v3938_v32 = vpop.f32.mrf.mxu3  ;;  %v3850_v60 = vadd.f32 %v3849_v11, %v3761_v51  ;;  %v1894_v51 = vshrl.u32 %v4622_v37, 16  ;;  %v2604_v11 = vunpack.c.l.b16 %v1869_v1 }
 0x281   : > { %v4030_v2 = vpop.f32.mrf.mxu0 }
 0x282   : > { %v3939_v28 = vadd.f32 %v3938_v32, %v3850_v60  ;;  %v2605_v32 = vunpack.c.l.b16 %v1879_v61  ;;  %v1886_v60 = vrot.slane %v1884_v43, 5 }
 0x284   : > { %v4028_v55 = vadd.f32 %v4027_v38, %v3939_v28  ;;  %3891 = vmatmul.bf16.gmra.mxu2 %v5233_v15  ;;  %4069 = vmatmul.bf16.gmra.mxu0 %v2685_v30  ;;  %v2069_v38 = vsel %vm6036_vm5, %v4669_v22, %v2068_v16  ;;  %v1892_v15 = vrot.slane %v1890_v18, 5  ;;  %v3766_v16 = vadd.f32 %v6641_v20, %v6657_v48 }
 0x285   : > { %3980 = vmatmul.bf16.gmra.mxu3 %v2621_v50  ;;  %v2668_v42 = vunpack.c.l.b16 %v2069_v38  ;;  %v1896_v50 = vrot.slane %v1894_v51, 4  ;;  %v2622_v49 = vpack.c.b16 %v2605_v32, %v2604_v11 }
 0x286   : > { %v4094_v9 = vmax.f32 %v4028_v55, 0.0  ;;  %v1887_v55 = vor.u32 %v1886_v60, %v1883_v52 }
 0x287   : > { %v3852_v39 = vpop.f32.mrf.mxu2  ;;  %v2686_v0 = vpack.c.b16 %v2669_v8, %v2668_v42  ;;  %v1897_v22 = vor.u32 %v1896_v50, %v1892_v15 }
 0x288   : > { %v3941_v45 = vpop.f32.mrf.mxu3  ;;  %v4121_v21 = vpack.c.bf16 %v4094_v9, %v4093_v7  ;;  %v3853_v12 = vadd.f32 %v3852_v39, %v6645_v33  ;;  %v2075_v39 = vrot.slane %v4622_v37, 5  ;;  %v1888_v20 = vrot.slane %v1887_v55, 4 }
 0x289   : > { %v4032_v17 = vpop.f32.mrf.mxu0  ;;  %v1898_v48 = vrot.slane %v1897_v22, 4 }
 0x28a   : > { %4229 = vmatmul.bf16.gmra.mxu1 %v4121_v21  ;;  %v3942_v30 = vadd.f32 %v3941_v45, %v3853_v12  ;;  %v1902_v45 = vrot.slane %v1900_v53, 5  ;;  %v4670_v21 = vrot.slane %v4654_v54, 9  ;;  %v2077_v14 = vrot.slane %v2075_v39, 4 }
 0x28b   : > { %v3776_v54 = vadd.f32 %v6705_v29, %v6714_v40  ;;  %v3781_v29 = vadd.f32 %v6731_v19, %v6740_v27 }
 0x28c   : > { %v4031_v34 = vadd.f32 %v4030_v2, %v3942_v30  ;;  %v1893_v2 = vsel %vm5741_vm2, %v1888_v20, %v1892_v15  ;;  %v1903_v37 = vsel %vm5741_vm2, %v1898_v48, %v1902_v45  ;;  %v2076_v11 = vsel %vm6036_vm5, %v4670_v21, %v2075_v39  ;;  %v7214_v15 = vld [vmem:[#allocation9_spill] sm:$0xff] }
 0x28d   : > { %v2079_v32 = vsel %vm6036_vm5, %v2077_v14, %v2078_v4  ;;  %v2606_v42 = vunpack.c.l.b16 %v1893_v2  ;;  %v2607_v8 = vunpack.c.l.b16 %v1903_v37  ;;  %v2670_v52 = vunpack.c.l.b16 %v2076_v11 }
 0x28e   : > { %v4095_v61 = vmax.f32 %v4031_v34, 0.0  ;;  %v2671_v60 = vunpack.c.l.b16 %v2079_v32  ;;  %v3771_v50 = vadd.f32 %v7214_v15, %v6685_v31 }
 0x28f   : > { %v3854_v63 = vpop.f32.mrf.mxu2 }
 0x290   : > { %v3943_v28 = vpop.f32.mrf.mxu3  ;;  %v3855_v33 = vadd.f32 %v3854_v63, %v3766_v16  ;;  %v2623_v63 = vpack.c.b16 %v2607_v8, %v2606_v42 }
 0x291   : > { %v4035_v9 = vpop.f32.mrf.mxu0 }
 0x292   : > { %v3944_v7 = vadd.f32 %v3943_v28, %v3855_v33  ;;  %v2687_v28 = vpack.c.b16 %v2671_v60, %v2670_v52 }
 0x294   : > { %v4033_v1 = vadd.f32 %v4032_v17, %v3944_v7  ;;  %3896 = vmatmul.bf16.gmra.mxu2 %v5234_v57  ;;  %4074 = vmatmul.bf16.gmra.mxu0 %v2686_v0 }
 0x295   : > { %3985 = vmatmul.bf16.gmra.mxu3 %v2622_v49 }
 0x296   : > { %v4096_v38 = vmax.f32 %v4033_v1, 0.0 }
 0x297   : > { %v3857_v43 = vpop.f32.mrf.mxu2 }
 0x298   : > { %v3946_v18 = vpop.f32.mrf.mxu3  ;;  %v4122_v51 = vpack.c.bf16 %v4096_v38, %v4095_v61  ;;  %v3858_v12 = vadd.f32 %v3857_v43, %v6679_v35  ;;  %v5235_v35 = vld [vmem:[%s5700_s8 + $0xcc] sm:$0xff]  ;;  %s5530_s8 = scalar_lea.hbm %s7191_s5, 256 }
 0x299   : > { %v4037_v17 = vpop.f32.mrf.mxu0  ;;  %p5532_p2 = scmp.lt.s32.totalorder %s5530_s8, %s5526_s24 }
 0x29a   : > { %4234 = vmatmul.bf16.gmra.mxu1 %v4122_v51  ;;  %v3947_v44 = vadd.f32 %v3946_v18, %v3858_v12  ;;  %v7066_v12 = vpop.f32.mrf.mxu1 }
 0x29b   : > { %p5533_p3 = por %p5532_p2, %p5531_p1 }
 0x29c   : > { %v4036_v33 = vadd.f32 %v4035_v9, %v3947_v44 }
 0x29d   : > { %p5534_p5 = pnand %p5533_p3, %p5529_p0 }
 0x29e   : > { %v4097_v13 = vmax.f32 %v4036_v33, 0.0 }
 0x29f   : > { %v3859_v16 = vpop.f32.mrf.mxu2 }
 0x2a0   : > { %v3948_v30 = vpop.f32.mrf.mxu3  ;;  %v3860_v26 = vadd.f32 %v3859_v16, %v3771_v50  ;;  %v7072_v16 = vld [vmem:[%s7190_s4] ss:$0 sm:$0xff] }
 0x2a1   : > { %v4040_v49 = vpop.f32.mrf.mxu0 }
 0x2a2   : > { %v3949_v57 = vadd.f32 %v3948_v30, %v3860_v26  ;;  %v3786_v30 = vadd.f32 %v6760_v25, %v6769_v56 }
 0x2a4   : > { %v4038_v0 = vadd.f32 %v4037_v17, %v3949_v57  ;;  %3901 = vmatmul.bf16.gmra.mxu2 %v5235_v35  ;;  %4079 = vmatmul.bf16.gmra.mxu0 %v2687_v28 }
 0x2a5   : > { %3990 = vmatmul.bf16.gmra.mxu3 %v2623_v63 }
 0x2a6   : > { %v4098_v55 = vmax.f32 %v4038_v0, 0.0 }
 0x2a7   : > { %v3862_v22 = vpop.f32.mrf.mxu2 }
 0x2a8   : > { %v3951_v53 = vpop.f32.mrf.mxu3  ;;  %v4123_v34 = vpack.c.bf16 %v4098_v55, %v4097_v13  ;;  %v3863_v31 = vadd.f32 %v3862_v22, %v6707_v36 }
 0x2a9   : > { %v4042_v7 = vpop.f32.mrf.mxu0 }
 0x2aa   : > { %4239 = vmatmul.bf16.gmra.mxu1 %v4123_v34  ;;  %v3952_v39 = vadd.f32 %v3951_v53, %v3863_v31 }
 0x2ac   : > { %v4041_v48 = vadd.f32 %v4040_v49, %v3952_v39 }
 0x2ae   : > { %v4099_v38 = vmax.f32 %v4041_v48, 0.0 }
 0x2af   : > { %v3864_v9 = vpop.f32.mrf.mxu2 }
 0x2b0   : > { %v3953_v1 = vpop.f32.mrf.mxu3  ;;  %v3865_v20 = vadd.f32 %v3864_v9, %v3776_v54 }
 0x2b1   : > { %v4045_v21 = vpop.f32.mrf.mxu0 }
 0x2b2   : > { %v3954_v45 = vadd.f32 %v3953_v1, %v3865_v20  ;;  %v7215_v20 = vld [vmem:[#allocation10_spill] sm:$0xff] }
 0x2b3   : > { %v3791_v48 = vadd.f32 %v7215_v20, %v6795_v47 }
 0x2b4   : > { %v4043_v61 = vadd.f32 %v4042_v7, %v3954_v45 }
 0x2b6   : > { %v4100_v14 = vmax.f32 %v4043_v61, 0.0 }
 0x2b7   : > { %v3867_v4 = vpop.f32.mrf.mxu2 }
 0x2b8   : > { %v3956_v43 = vpop.f32.mrf.mxu3  ;;  %v4124_v18 = vpack.c.bf16 %v4100_v14, %v4099_v38  ;;  %v3868_v36 = vadd.f32 %v3867_v4, %v6734_v59 }
 0x2b9   : > { %v4047_v51 = vpop.f32.mrf.mxu0 }
 0x2ba   : > { %4244 = vmatmul.bf16.gmra.mxu1 %v4124_v18  ;;  %v3957_v40 = vadd.f32 %v3956_v43, %v3868_v36 }
 0x2bc   : > { %v4046_v11 = vadd.f32 %v4045_v21, %v3957_v40 }
 0x2be   : > { %v4101_v52 = vmax.f32 %v4046_v11, 0.0 }
 0x2bf   : > { %v3869_v2 = vpop.f32.mrf.mxu2 }
 0x2c0   : > { %v3958_v37 = vpop.f32.mrf.mxu3  ;;  %v3870_v17 = vadd.f32 %v3869_v2, %v3781_v29 }
 0x2c1   : > { %v4050_v42 = vpop.f32.mrf.mxu0 }
 0x2c2   : > { %v3959_v32 = vadd.f32 %v3958_v37, %v3870_v17 }
 0x2c4   : > { %v4048_v8 = vadd.f32 %v4047_v51, %v3959_v32 }
 0x2c6   : > { %v4102_v60 = vmax.f32 %v4048_v8, 0.0 }
 0x2c7   : > { %v3872_v15 = vpop.f32.mrf.mxu2  ;;  %v4210_v50 = vpop.f32.mrf.mxu1 }
 0x2c8   : > { %v3961_v59 = vpop.f32.mrf.mxu3  ;;  %v4125_v44 = vpack.c.bf16 %v4102_v60, %v4101_v52  ;;  %v3873_v19 = vadd.f32 %v3872_v15, %v6762_v23  ;;  %v4211_v35 = vadd.f32 %v7072_v16, %v4210_v50  ;;  %v7216_v60 = vld [vmem:[#allocation11_spill] sm:$0xff] }
 0x2c9   : > { %v4052_v27 = vpop.f32.mrf.mxu0  ;;  %v3796_v15 = vadd.f32 %v7216_v60, %v6824_v10 }
 0x2ca   : > { %4249 = vmatmul.bf16.gmra.mxu1 %v4125_v44  ;;  %v3962_v26 = vadd.f32 %v3961_v59, %v3873_v19  ;;  %v4290_v55 = vmax.f32 %v4211_v35, 0.0 }
 0x2cc   : > { %v4051_v49 = vadd.f32 %v4050_v42, %v3962_v26 }
 0x2ce   : > { %v4103_v25 = vmax.f32 %v4051_v49, 0.0 }
 0x2cf   : > { %v3874_v63 = vpop.f32.mrf.mxu2  ;;  %v4212_v57 = vpop.f32.mrf.mxu1 }
 0x2d0   : > { %v3963_v28 = vpop.f32.mrf.mxu3  ;;  %v3875_v33 = vadd.f32 %v3874_v63, %v3786_v30  ;;  %v4213_v23 = vadd.f32 %v7072_v16, %v4212_v57 }
 0x2d1   : > { %v4055_v13 = vpop.f32.mrf.mxu0 }
 0x2d2   : > { %v3964_v0 = vadd.f32 %v3963_v28, %v3875_v33  ;;  %v4291_v22 = vmax.f32 %v4213_v23, 0.0 }
 0x2d4   : > { %v4053_v53 = vadd.f32 %v4052_v27, %v3964_v0  ;;  %v5320_v34 = vpack.c.bf16 %v4291_v22, %v4290_v55 }
 0x2d6   : > { %v4104_v56 = vmax.f32 %v4053_v53, 0.0  ;;  %5321 = vst [vmem:[%s7081_s10] sm:$0xff] %v5320_v34  }
 0x2d7   : > { %v3877_v31 = vpop.f32.mrf.mxu2  ;;  %v4215_v54 = vpop.f32.mrf.mxu1 }
 0x2d8   : > { %v3966_v7 = vpop.f32.mrf.mxu3  ;;  %v4126_v39 = vpack.c.bf16 %v4104_v56, %v4103_v25  ;;  %v3878_v9 = vadd.f32 %v3877_v31, %v6789_v6  ;;  %v4216_v21 = vadd.f32 %v7072_v16, %v4215_v54  ;;  %v7217_v25 = vld [vmem:[#allocation12_spill] sm:$0xff] }
 0x2d9   : > { %v4057_v1 = vpop.f32.mrf.mxu0  ;;  %v3801_v56 = vadd.f32 %v7217_v25, %v6850_v3 }
 0x2da   : > { %4254 = vmatmul.bf16.gmra.mxu1 %v4126_v39  ;;  %v3967_v45 = vadd.f32 %v3966_v7, %v3878_v9  ;;  %v4292_v29 = vmax.f32 %v4216_v21, 0.0 }
 0x2dc   : > { %v4056_v18 = vadd.f32 %v4055_v13, %v3967_v45 }
 0x2de   : > { %v4105_v37 = vmax.f32 %v4056_v18, 0.0 }
 0x2df   : > { %v3879_v61 = vpop.f32.mrf.mxu2  ;;  %v4217_v4 = vpop.f32.mrf.mxu1 }
 0x2e0   : > { %v3968_v38 = vpop.f32.mrf.mxu3  ;;  %v3880_v14 = vadd.f32 %v3879_v61, %v3791_v48  ;;  %v4218_v43 = vadd.f32 %v7072_v16, %v4217_v4 }
 0x2e1   : > { %v4060_v51 = vpop.f32.mrf.mxu0 }
 0x2e2   : > { %v3969_v36 = vadd.f32 %v3968_v38, %v3880_v14  ;;  %v4293_v6 = vmax.f32 %v4218_v43, 0.0 }
 0x2e4   : > { %v4058_v40 = vadd.f32 %v4057_v1, %v3969_v36  ;;  %v5325_v2 = vpack.c.bf16 %v4293_v6, %v4292_v29 }
 0x2e6   : > { %v4106_v17 = vmax.f32 %v4058_v40, 0.0  ;;  %5397 = vst [vmem:[%s7081_s10 + $0x8] sm:$0xff] %v5325_v2   ;;  %v7218_v40 = vld [vmem:[#allocation14_spill] sm:$0xff]  ;;  %v7219_v2 = vld [vmem:[#allocation13_spill] sm:$0xff] }
 0x2e7   : > { %v3882_v47 = vpop.f32.mrf.mxu2  ;;  %v4220_v32 = vpop.f32.mrf.mxu1 }
 0x2e8   : > { %v3971_v11 = vpop.f32.mrf.mxu3  ;;  %v4127_v42 = vpack.c.bf16 %v4106_v17, %v4105_v37  ;;  %v3883_v8 = vadd.f32 %v3882_v47, %v6817_v62  ;;  %v4221_v50 = vadd.f32 %v7072_v16, %v4220_v32  ;;  %v3806_v37 = vadd.f32 %v7219_v2, %v7218_v40 }
 0x2e9   : > { %v4062_v52 = vpop.f32.mrf.mxu0 }
 0x2ea   : > { %4259 = vmatmul.bf16.gmra.mxu1 %v4127_v42  ;;  %v3972_v59 = vadd.f32 %v3971_v11, %v3883_v8  ;;  %v4294_v33 = vmax.f32 %v4221_v50, 0.0 }
 0x2ec   : > { %v4061_v35 = vadd.f32 %v4060_v51, %v3972_v59 }
 0x2ee   : > { %v4107_v49 = vmax.f32 %v4061_v35, 0.0 }
 0x2ef   : > { %v3884_v44 = vpop.f32.mrf.mxu2  ;;  %v4222_v30 = vpop.f32.mrf.mxu1 }
 0x2f0   : > { %v3973_v19 = vpop.f32.mrf.mxu3  ;;  %v3885_v27 = vadd.f32 %v3884_v44, %v3796_v15  ;;  %v4223_v26 = vadd.f32 %v7072_v16, %v4222_v30 }
 0x2f1   : > { %v4065_v28 = vpop.f32.mrf.mxu0 }
 0x2f2   : > { %v3974_v63 = vadd.f32 %v3973_v19, %v3885_v27  ;;  %v4295_v62 = vmax.f32 %v4223_v26, 0.0 }
 0x2f4   : > { %v4063_v57 = vadd.f32 %v4062_v52, %v3974_v63  ;;  %v5330_v23 = vpack.c.bf16 %v4295_v62, %v4294_v33  ;;  %v3811_v62 = vadd.f32 %v6902_v5, %v6905_v41 }
 0x2f6   : > { %v4108_v0 = vmax.f32 %v4063_v57, 0.0  ;;  %5398 = vst [vmem:[%s7081_s10 + $0x10] sm:$0xff] %v5330_v23  }
 0x2f7   : > { %v3887_v10 = vpop.f32.mrf.mxu2  ;;  %v4225_v55 = vpop.f32.mrf.mxu1 }
 0x2f8   : > { %v3976_v13 = vpop.f32.mrf.mxu3  ;;  %v4128_v22 = vpack.c.bf16 %v4108_v0, %v4107_v49  ;;  %v3888_v53 = vadd.f32 %v3887_v10, %v6844_v24  ;;  %v4226_v7 = vadd.f32 %v7072_v16, %v4225_v55 }
 0x2f9   : > { %v4067_v34 = vpop.f32.mrf.mxu0 }
 0x2fa   : > { %4264 = vmatmul.bf16.gmra.mxu1 %v4128_v22  ;;  %v3977_v31 = vadd.f32 %v3976_v13, %v3888_v53  ;;  %v4296_v61 = vmax.f32 %v4226_v7, 0.0 }
 0x2fc   : > { %v4066_v48 = vadd.f32 %v4065_v28, %v3977_v31 }
 0x2fe   : > { %v4109_v4 = vmax.f32 %v4066_v48, 0.0 }
 0x2ff   : > { %v3889_v54 = vpop.f32.mrf.mxu2  ;;  %v4227_v1 = vpop.f32.mrf.mxu1 }
 0x300   : > { %v3978_v39 = vpop.f32.mrf.mxu3  ;;  %v3890_v9 = vadd.f32 %v3889_v54, %v3801_v56  ;;  %v4228_v20 = vadd.f32 %v7072_v16, %v4227_v1 }
 0x301   : > { %v4070_v21 = vpop.f32.mrf.mxu0 }
 0x302   : > { %v3979_v45 = vadd.f32 %v3978_v39, %v3890_v9  ;;  %v4297_v24 = vmax.f32 %v4228_v20, 0.0  ;;  %v7220_v20 = vld [vmem:[#allocation15_spill] sm:$0xff] }
 0x304   : > { %v4068_v38 = vadd.f32 %v4067_v34, %v3979_v45  ;;  %v5335_v14 = vpack.c.bf16 %v4297_v24, %v4296_v61  ;;  %v7221_v45 = vld [vmem:[#allocation16_spill] sm:$0xff] }
 0x306   : > { %v4110_v43 = vmax.f32 %v4068_v38, 0.0  ;;  %5399 = vst [vmem:[%s7081_s10 + $0x18] sm:$0xff] %v5335_v14  }
 0x307   : > { %v3892_v3 = vpop.f32.mrf.mxu2  ;;  %v4230_v36 = vpop.f32.mrf.mxu1 }
 0x308   : > { %v3981_v18 = vpop.f32.mrf.mxu3  ;;  %v4129_v51 = vpack.c.bf16 %v4110_v43, %v4109_v4  ;;  %v3893_v29 = vadd.f32 %v3892_v3, %v6872_v46  ;;  %v4231_v47 = vadd.f32 %v7072_v16, %v4230_v36 }
 0x309   : > { %v4072_v6 = vpop.f32.mrf.mxu0 }
 0x30a   : > { %4269 = vmatmul.bf16.gmra.mxu1 %v4129_v51  ;;  %v3982_v17 = vadd.f32 %v3981_v18, %v3893_v29  ;;  %v4298_v59 = vmax.f32 %v4231_v47, 0.0 }
 0x30c   : > { %v4071_v60 = vadd.f32 %v4070_v21, %v3982_v17  ;;  %v3816_v21 = vadd.f32 %v7066_v12, %v7221_v45 }
 0x30e   : > { %v4111_v27 = vmax.f32 %v4071_v60, 0.0 }
 0x30f   : > { %v3894_v11 = vpop.f32.mrf.mxu2  ;;  %v4232_v8 = vpop.f32.mrf.mxu1 }
 0x310   : > { %v3983_v32 = vpop.f32.mrf.mxu3  ;;  %v3895_v42 = vadd.f32 %v3894_v11, %v3806_v37  ;;  %v4233_v52 = vadd.f32 %v7072_v16, %v4232_v8 }
 0x311   : > { %v4075_v44 = vpop.f32.mrf.mxu0 }
 0x312   : > { %v3984_v15 = vadd.f32 %v3983_v32, %v3895_v42  ;;  %v4299_v50 = vmax.f32 %v4233_v52, 0.0 }
 0x314   : > { %v4073_v46 = vadd.f32 %v4072_v6, %v3984_v15  ;;  %v5340_v19 = vpack.c.bf16 %v4299_v50, %v4298_v59 }
 0x316   : > { %v4112_v30 = vmax.f32 %v4073_v46, 0.0  ;;  %5400 = vst [vmem:[%s7081_s10 + $0x20] sm:$0xff] %v5340_v19  }
 0x317   : > { %v3897_v26 = vpop.f32.mrf.mxu2  ;;  %v4235_v63 = vpop.f32.mrf.mxu1 }
 0x318   : > { %v3986_v35 = vpop.f32.mrf.mxu3  ;;  %v4130_v28 = vpack.c.bf16 %v4112_v30, %v4111_v27  ;;  %v3898_v33 = vadd.f32 %v3897_v26, %v6897_v58  ;;  %v4236_v49 = vadd.f32 %v7072_v16, %v4235_v63 }
 0x319   : > { %v4077_v23 = vpop.f32.mrf.mxu0 }
 0x31a   : > { %4274 = vmatmul.bf16.gmra.mxu1 %v4130_v28  ;;  %v3987_v57 = vadd.f32 %v3986_v35, %v3898_v33  ;;  %v4300_v25 = vmax.f32 %v4236_v49, 0.0 }
 0x31c   : > { %v4076_v53 = vadd.f32 %v4075_v44, %v3987_v57 }
 0x31e   : > { %v4113_v7 = vmax.f32 %v4076_v53, 0.0 }
 0x31f   : > { %v3899_v0 = vpop.f32.mrf.mxu2  ;;  %v4237_v55 = vpop.f32.mrf.mxu1 }
 0x320   : > { %v3988_v10 = vpop.f32.mrf.mxu3  ;;  %v3900_v13 = vadd.f32 %v3899_v0, %v3811_v62  ;;  %v4238_v22 = vadd.f32 %v7072_v16, %v4237_v55 }
 0x321   : > { %v4080_v1 = vpop.f32.mrf.mxu0 }
 0x322   : > { %v3989_v34 = vadd.f32 %v3988_v10, %v3900_v13  ;;  %v4301_v56 = vmax.f32 %v4238_v22, 0.0 }
 0x324   : > { %v4078_v58 = vadd.f32 %v4077_v23, %v3989_v34  ;;  %v5345_v31 = vpack.c.bf16 %v4301_v56, %v4300_v25 }
 0x326   : > { %v4114_v54 = vmax.f32 %v4078_v58, 0.0  ;;  %5401 = vst [vmem:[%s7081_s10 + $0x28] sm:$0xff] %v5345_v31  }
 0x327   : > { %v3902_v5 = vpop.f32.mrf.mxu2  ;;  %v4240_v39 = vpop.f32.mrf.mxu1 }
 0x328   : > { %v3991_v41 = vpop.f32.mrf.mxu3  ;;  %v4131_v9 = vpack.c.bf16 %v4114_v54, %v4113_v7  ;;  %v3903_v48 = vadd.f32 %v3902_v5, %v7220_v20  ;;  %v4241_v24 = vadd.f32 %v7072_v16, %v4240_v39 }
 0x329   : > { %v4082_v29 = vpop.f32.mrf.mxu0 }
 0x32a   : > { %4279 = vmatmul.bf16.gmra.mxu1 %v4131_v9  ;;  %v3992_v61 = vadd.f32 %v3991_v41, %v3903_v48  ;;  %v4302_v51 = vmax.f32 %v4241_v24, 0.0 }
 0x32c   : > { %v4081_v18 = vadd.f32 %v4080_v1, %v3992_v61 }
 0x32e   : > { %v4115_v37 = vmax.f32 %v4081_v18, 0.0 }
 0x32f   : > { %v3904_v38 = vpop.f32.mrf.mxu2  ;;  %v4242_v4 = vpop.f32.mrf.mxu1 }
 0x330   : > { %v3905_v14 = vadd.f32 %v3904_v38, %v3816_v21  ;;  %v3993_v43 = vpop.f32.mrf.mxu3  ;;  %v4243_v3 = vadd.f32 %v7072_v16, %v4242_v4 }
 0x332   : > { %v3994_v36 = vadd.f32 %v3993_v43, %v3905_v14  ;;  %v4303_v6 = vmax.f32 %v4243_v3, 0.0 }
 0x334   : > { %v4083_v40 = vadd.f32 %v4082_v29, %v3994_v36  ;;  %v5350_v2 = vpack.c.bf16 %v4303_v6, %v4302_v51 }
 0x336   : > { %v4116_v12 = vmax.f32 %v4083_v40, 0.0  ;;  %5402 = vst [vmem:[%s7081_s10 + $0x30] sm:$0xff] %v5350_v2  }
 0x337   : > { %v4245_v17 = vpop.f32.mrf.mxu1 }
 0x338   : > { %v4132_v47 = vpack.c.bf16 %v4116_v12, %v4115_v37  ;;  %v4246_v11 = vadd.f32 %v7072_v16, %v4245_v17 }
 0x33a   : > { %4284 = vmatmul.bf16.gmra.mxu1 %v4132_v47  ;;  %v4304_v8 = vmax.f32 %v4246_v11, 0.0 }
 0x33f   : > { %v4247_v32 = vpop.f32.mrf.mxu1 }
 0x340   : > { %v4248_v42 = vadd.f32 %v7072_v16, %v4247_v32 }
 0x342   : > { %v4305_v52 = vmax.f32 %v4248_v42, 0.0 }
 0x344   : > { %v5355_v60 = vpack.c.bf16 %v4305_v52, %v4304_v8 }
 0x346   : > { %5403 = vst [vmem:[%s7081_s10 + $0x38] sm:$0xff] %v5355_v60  }
 0x347   : > { %v4250_v15 = vpop.f32.mrf.mxu1 }
 0x348   : > { %v4251_v59 = vadd.f32 %v7072_v16, %v4250_v15 }
 0x34a   : > { %v4306_v44 = vmax.f32 %v4251_v59, 0.0 }
 0x34f   : > { %v4252_v50 = vpop.f32.mrf.mxu1 }
 0x350   : > { %v4253_v46 = vadd.f32 %v7072_v16, %v4252_v50 }
 0x352   : > { %v4307_v19 = vmax.f32 %v4253_v46, 0.0 }
 0x354   : > { %v5360_v27 = vpack.c.bf16 %v4307_v19, %v4306_v44 }
 0x356   : > { %5404 = vst [vmem:[%s7081_s10 + $0x40] sm:$0xff] %v5360_v27  }
 0x357   : > { %v4255_v30 = vpop.f32.mrf.mxu1 }
 0x358   : > { %v4256_v26 = vadd.f32 %v7072_v16, %v4255_v30 }
 0x35a   : > { %v4308_v28 = vmax.f32 %v4256_v26, 0.0 }
 0x35f   : > { %v4257_v35 = vpop.f32.mrf.mxu1 }
 0x360   : > { %v4258_v63 = vadd.f32 %v7072_v16, %v4257_v35 }
 0x362   : > { %v4309_v33 = vmax.f32 %v4258_v63, 0.0 }
 0x364   : > { %v5365_v62 = vpack.c.bf16 %v4309_v33, %v4308_v28 }
 0x366   : > { %5405 = vst [vmem:[%s7081_s10 + $0x48] sm:$0xff] %v5365_v62  }
 0x367   : > { %v4260_v57 = vpop.f32.mrf.mxu1 }
 0x368   : > { %v4261_v23 = vadd.f32 %v7072_v16, %v4260_v57 }
 0x36a   : > { %v4310_v10 = vmax.f32 %v4261_v23, 0.0 }
 0x36f   : > { %v4262_v49 = vpop.f32.mrf.mxu1 }
 0x370   : > { %v4263_v0 = vadd.f32 %v7072_v16, %v4262_v49 }
 0x372   : > { %v4311_v13 = vmax.f32 %v4263_v0, 0.0 }
 0x374   : > { %v5370_v55 = vpack.c.bf16 %v4311_v13, %v4310_v10 }
 0x376   : > { %5406 = vst [vmem:[%s7081_s10 + $0x50] sm:$0xff] %v5370_v55  }
 0x377   : > { %v4265_v22 = vpop.f32.mrf.mxu1 }
 0x378   : > { %v4266_v53 = vadd.f32 %v7072_v16, %v4265_v22 }
 0x37a   : > { %v4312_v56 = vmax.f32 %v4266_v53, 0.0 }
 0x37f   : > { %v4267_v34 = vpop.f32.mrf.mxu1 }
 0x380   : > { %v4268_v25 = vadd.f32 %v7072_v16, %v4267_v34 }
 0x382   : > { %v4313_v58 = vmax.f32 %v4268_v25, 0.0 }
 0x384   : > { %v5375_v31 = vpack.c.bf16 %v4313_v58, %v4312_v56 }
 0x386   : > { %5407 = vst [vmem:[%s7081_s10 + $0x58] sm:$0xff] %v5375_v31  }
 0x387   : > { %v4270_v7 = vpop.f32.mrf.mxu1 }
 0x388   : > { %v4271_v54 = vadd.f32 %v7072_v16, %v4270_v7 }
 0x38a   : > { %v4314_v39 = vmax.f32 %v4271_v54, 0.0 }
 0x38f   : > { %v4272_v5 = vpop.f32.mrf.mxu1 }
 0x390   : > { %v4273_v41 = vadd.f32 %v7072_v16, %v4272_v5 }
 0x392   : > { %v4315_v9 = vmax.f32 %v4273_v41, 0.0 }
 0x394   : > { %v5380_v1 = vpack.c.bf16 %v4315_v9, %v4314_v39 }
 0x396   : > { %5408 = vst [vmem:[%s7081_s10 + $0x60] sm:$0xff] %v5380_v1  }
 0x397   : > { %v4275_v20 = vpop.f32.mrf.mxu1 }
 0x398   : > { %v4276_v48 = vadd.f32 %v7072_v16, %v4275_v20 }
 0x39a   : > { %v4316_v61 = vmax.f32 %v4276_v48, 0.0 }
 0x39f   : > { %v4277_v45 = vpop.f32.mrf.mxu1 }
 0x3a0   : > { %v4278_v21 = vadd.f32 %v7072_v16, %v4277_v45 }
 0x3a2   : > { %v4317_v24 = vmax.f32 %v4278_v21, 0.0 }
 0x3a4   : > { %v5385_v38 = vpack.c.bf16 %v4317_v24, %v4316_v61 }
 0x3a6   : > { %5409 = vst [vmem:[%s7081_s10 + $0x68] sm:$0xff] %v5385_v38  }
 0x3a7   : > { %v4280_v14 = vpop.f32.mrf.mxu1 }
 0x3a8   : > { %v4281_v4 = vadd.f32 %v7072_v16, %v4280_v14 }
 0x3aa   : > { %v4318_v18 = vmax.f32 %v4281_v4, 0.0 }
 0x3af   : > { %v4282_v43 = vpop.f32.mrf.mxu1 }
 0x3b0   : > { %v4283_v3 = vadd.f32 %v7072_v16, %v4282_v43 }
 0x3b2   : > { %v4319_v36 = vmax.f32 %v4283_v3, 0.0 }
 0x3b4   : > { %v5390_v51 = vpack.c.bf16 %v4319_v36, %v4318_v18 }
 0x3b6   : > { %5410 = vst [vmem:[%s7081_s10 + $0x70] sm:$0xff] %v5390_v51  }
 0x3b7   : > { %v4285_v29 = vpop.f32.mrf.mxu1 }
 0x3b8   : > { %v4286_v6 = vadd.f32 %v7072_v16, %v4285_v29 }
 0x3ba   : > { %v4320_v37 = vmax.f32 %v4286_v6, 0.0 }
 0x3bf   : > { %v4287_v40 = vpop.f32.mrf.mxu1 }
 0x3c0   : > { %v4288_v2 = vadd.f32 %v7072_v16, %v4287_v40 }
 0x3c2   : > { %v4321_v12 = vmax.f32 %v4288_v2, 0.0 }
 0x3c4   : > { %v5395_v17 = vpack.c.bf16 %v4321_v12, %v4320_v37 }
 0x3c6   : > { %5411 = vst [vmem:[%s7081_s10 + $0x78] sm:$0xff] %v5395_v17  }
 0x3c7   : > { %5537 = shalt.err (!%p5534_p5)
}
 0x3c8   : > { %s5590_s7 = smov 64   ;;  %s5591_s10 = smov 4  }
 0x3c9   : > { %5429 = dma.vmem_to_hbm [thread:$0]  (%p5662_p4), %s4403_s15, 2048, %s4405_s16, %s4387_s21, %s5590_s7, %s5590_s7, %s5591_s10  }
 0x3ca PF: > { %p5435_p6 = scmp.ge.s32.totalorder %s5588_s23, 2  ;;  %s4419_s11 = sand.u32 1, %s5568_s18  }
 0x3cb   : > { %s4420_s12 = scalar_lea.sflag [#allocation3], %s4419_s11 }
 0x3cc   : > { %p5432_p7 = pnand %p5435_p6, %p5669_p8 }
 0x3ce   : > { %p5433_p9 = pneg %p5432_p7 }
 0x3d0   : > { %5563 = dma.done.wait (%p5433_p9), %s4420_s12, 2048  }
 0x3d1   : > { %5565 = vsyncadd (%p5433_p9), %s4420_s12, 4294965248  ;;  %s18_s23 = sadd.s32 1, %s5588_s23   ;;  %s7222_s18 = smov %s5572_s19 }
 0x3d2   : > { %p15_p10 = scmp.ge.s32.totalorder %s18_s23, 4   ;;  %s7223_s19 = smov %s5576_s20 }
 0x3d3   : > { %s7224_s20 = smov %s5675_s6  ;;  %s7225_s21 = smov %s5584_s22 }
 0x3d4   : > { %s7226_s22 = smov %s7228_s26  ;;  %17 = sbr.rel (!%p15_p10) target bundleno = 4 (0x4), region = 78 }
 0x3d9   :  { %4426 = vsyncpa [#allocation3], 1 }
 0x3da   :  { %4428 = vsyncpa [#allocation3 + $0x1], 1 }

// kernel: tpu_custom_call.1
= control target key start
LH: loop header
LB: loop body
LE: loop exit
PB: predicated region body
PF: predicated region fallthrough
CT: control target
= control target key end

     0   :  { %10 = vsyncpa [#allocation3], 0  ;;  %s7186_s0 = inlined_call_operand.vmem [shape: bf16[2,18,18,128], index: 0, kind: input, shape index: {}]   ;;  %s7187_s1 = inlined_call_operand.vmem [shape: bf16[1152,128], index: 1, kind: input, shape index: {}]   ;;  %s7188_s2 = inlined_call_operand.vmem [shape: f32[1,128], index: 2, kind: input, shape index: {}]   ;;  %s7189_s3 = inlined_call_operand.vmem [shape: bf16[128,128], index: 3, kind: input, shape index: {}]   ;;  %s7190_s4 = inlined_call_operand.vmem [shape: f32[1,128], index: 4, kind: input, shape index: {}]   ;;  %s7191_s5 = inlined_call_operand.hbm [shape: bf16[2,16,16,128], index: 5, kind: output, shape index: {}]  }
   0x1   :  { %12 = vsyncpa [#allocation3 + $0x1], 0  ;;  %s5622_s18 = smov 0   ;;  %s5624_s19 = smov 0  }
   0x2   :  { %s5626_s20 = smov 0   ;;  %s5628_s21 = smov 0  }
   0x3   :  { %s5630_s22 = smov 0   ;;  %s5632_s23 = smov 0  }
   0x4 LB: > { %s4488_s24 = sadd.s32 4294967295, %s5588_s23   ;;  %s4489_s25 = sadd.s32 4294967294, %s5588_s23   ;;  %s5588_s23 = sphi %s5632_s23, %s18_s23   ;;  %s5584_s22 = sphi %s5630_s22, %s7226_s22   ;;  %s5580_s21 = sphi %s5628_s21, %s7225_s21   ;;  %s5576_s20 = sphi %s5626_s20, %s7224_s20   ;;  %s5572_s19 = sphi %s5624_s19, %s7223_s19   ;;  %s5568_s18 = sphi %s5622_s18, %s7222_s18  }
   0x5   : > { %s30_s26 = sadd.s32 1, %s5584_s22  ;;  %s149_s27 = sadd.s32 1, %s5576_s20 }
   0x6   : > { %p32_p0 = scmp.ge.s32.totalorder %s30_s26, 2  ;;  %p159_p1 = scmp.ne.s32.totalorder %s5576_s20, %s5572_s19 }
   0x7   : > { %p160_p2 = scmp.eq.s32.totalorder %s4488_s24, 1  ;;  %p165_p3 = scmp.ne.s32.totalorder %s5572_s19, %s5568_s18 }
   0x8   : > { %s7228_s26 = smov (%p32_p0, %s30_s26), 0  ;;  %p166_p5 = scmp.eq.s32.totalorder %s4489_s25, 1 }
   0x9   : > { %p5662_p4 = por %p160_p2, %p159_p1  ;;  %s144_s29 = ssub.s32 %s5584_s22, %s7228_s26 }
   0xa   : > { %p4492_p6 = scmp.ge.s32.totalorder %s5588_s23, 1  ;;  %p147_p7 = scmp.eq.s32.totalorder %s144_s29, 0 }
   0xb   : > { %p5669_p8 = por %p166_p5, %p165_p3  ;;  %p204_p9 = scmp.lt.s32.totalorder %s5588_s23, 3 }
   0xc   : > { %s5675_s6 = scalar_select %p147_p7, %s5576_s20, %s149_s27  }
   0xd   : > { %p205_p10 = pnand %p4492_p6, %p204_p9 }
   0xf   : > { %208 = sbr.rel (%p205_p10) target bundleno = 970 (0x3ca), region = 40 }
  0x14   : > { %v5243_v0 = vld [vmem:[%s7187_s1 + $0x38] sm:$0xff]  ;;  %p232_p11 = scmp.lt.s32.totalorder %s5580_s21, 1  ;;  %v5242_v2 = vld [vmem:[%s7187_s1 + $0x30] sm:$0xff]  ;;  %v5241_v4 = vld [vmem:[%s7187_s1 + $0x28] sm:$0xff]  ;;  %vm290_vm0 = vsmask.f32 3328 }
  0x15   : > { %v5251_v1 = vld [vmem:[%s7187_s1 + $0x78] sm:$0xff]  ;;  %5412 = vmatpush.bf16.msra.mxu2 %v5243_v0  ;;  %v5250_v3 = vld [vmem:[%s7187_s1 + $0x70] sm:$0xff]  ;;  %3284 = vmatpush.bf16.msra.mxu0 %v5243_v0  ;;  %v5249_v5 = vld [vmem:[%s7187_s1 + $0x68] sm:$0xff]  ;;  %vm291_vm1 = vsmask.f32 7440  ;;  %vm741_vm3 = vcmask 1042432  }
  0x16   : > { %5420 = vmatpush.bf16.msra.mxu3 %v5251_v1  ;;  %s233_s15 = scalar_select %p232_p11, %s5580_s21, 1  ;;  %3373 = vmatpush.bf16.msra.mxu1 %v5251_v1  ;;  %v5240_v14 = vld [vmem:[%s7187_s1 + $0x20] sm:$0xff]  ;;  %v5239_v29 = vld [vmem:[%s7187_s1 + $0x18] sm:$0xff]  ;;  %v5238_v38 = vld [vmem:[%s7187_s1 + $0x10] sm:$0xff]  ;;  %vm742_vm4 = vcmask 1046532  }
  0x17   : > { %v5248_v15 = vld [vmem:[%s7187_s1 + $0x60] sm:$0xff]  ;;  %v5247_v30 = vld [vmem:[%s7187_s1 + $0x58] sm:$0xff]  ;;  %v5246_v39 = vld [vmem:[%s7187_s1 + $0x50] sm:$0xff]  ;;  %s229_s7 = sand.u32 1, %s5572_s19   ;;  %s5316_s11 = sshll.u32 %s5580_s21, 7 }
  0x18   : > { %s5428_s16 = smul.u32 216, %s233_s15  ;;  %vm5741_vm2 = vmor %vm290_vm0, %vm291_vm1  ;;  %v5237_v53 = vld [vmem:[%s7187_s1 + $0x8] sm:$0xff]  ;;  %s4493_s9 = sshll.u32 %s229_s7, 7 }
  0x19   : > { %5413 = vmatpush.bf16.msra.mxu2 %v5242_v2  ;;  %3285 = vmatpush.bf16.msra.mxu0 %v5242_v2  ;;  %v5245_v54 = vld [vmem:[%s7187_s1 + $0x48] sm:$0xff]  ;;  %vm6036_vm5 = vmor %vm741_vm3, %vm742_vm4  ;;  %s7081_s10 = scalar_lea.vmem [#allocation2], %s4493_s9  ;;  %s4401_s14 = scalar_lea.hbm %s7191_s5, %s5316_s11 }
  0x1a   : > { %5421 = vmatpush.bf16.msra.mxu3 %v5250_v3  ;;  %s5700_s8 = scalar_lea.vmem %s7186_s0, %s5428_s16  ;;  %3374 = vmatpush.bf16.msra.mxu1 %v5250_v3  ;;  %v5236_v3 = vld [vmem:[%s7187_s1] sm:$0xff]  ;;  %s4402_s15 = sshll.u32 %s7081_s10, 4  ;;  %s4403_s15 = int_to_ptr.vmem [resolvable:$true] %s4402_s15 }
  0x1b   : > { %v258_v6 = vld [vmem:[%s5700_s8 + $0x60] sm:$0xf]  ;;  %v259_v7 = vld [vmem:[%s5700_s8 + $0x64] sm:$0xf]  ;;  %v282_v20 = vld [vmem:[%s5700_s8 + $0x68] sm:$0x1] }
  0x1c   : > { %v486_v8 = vshrl.u32 %v258_v6, 16  ;;  %v489_v9 = vshll.u32 %v258_v6, 16  ;;  %v495_v10 = vshll.u32 %v259_v7, 16  ;;  %v499_v11 = vshrl.u32 %v259_v7, 16  ;;  %v242_v12 = vld [vmem:[%s5700_s8] sm:$0xf] }
  0x1d   : > { %v5706_v13 = vld [vmem:[%s5700_s8 + $0x4] sm:$0xf]  ;;  %5414 = vmatpush.bf16.msra.mxu2 %v5241_v4  ;;  %3286 = vmatpush.bf16.msra.mxu0 %v5241_v4  ;;  %v294_v21 = vshrl.u32 %v242_v12, 16  ;;  %v297_v22 = vshll.u32 %v242_v12, 16  ;;  %v5720_v25 = vld [vmem:[%s5700_s8 + $0x8] sm:$0x1] }
  0x1e   : > { %5422 = vmatpush.bf16.msra.mxu3 %v5249_v5  ;;  %v488_v16 = vrot.slane %v486_v8, 4  ;;  %v491_v17 = vrot.slane %v489_v9, 5  ;;  %v5714_v18 = vrot.slane %v495_v10, 5  ;;  %v501_v19 = vrot.slane %v499_v11, 4  ;;  %3375 = vmatpush.bf16.msra.mxu1 %v5249_v5  ;;  %v260_v43 = vld [vmem:[%s5700_s8 + $0x6c] sm:$0xf] }
  0x1f   : > { %v303_v23 = vshll.u32 %v5706_v13, 16  ;;  %v307_v24 = vshrl.u32 %v5706_v13, 16  ;;  %v296_v26 = vrot.slane %v294_v21, 4  ;;  %v299_v27 = vrot.slane %v297_v22, 5  ;;  %v261_v45 = vld [vmem:[%s5700_s8 + $0x70] sm:$0xf] }
  0x20   : > { %v492_v31 = vor.u32 %v491_v17, %v488_v16  ;;  %v502_v32 = vor.u32 %v501_v19, %v5714_v18  ;;  %v505_v33 = vshll.u32 %v282_v20, 16  ;;  %v313_v37 = vshll.u32 %v5720_v25, 16  ;;  %v244_v49 = vld [vmem:[%s5700_s8 + $0xc] sm:$0xf]  ;;  %v5748_v52 = vld [vmem:[%s5700_s8 + $0x10] sm:$0xf] }
  0x21   : > { %v5722_v28 = vrot.slane %v303_v23, 5  ;;  %5415 = vmatpush.bf16.msra.mxu2 %v5240_v14  ;;  %v309_v34 = vrot.slane %v307_v24, 4  ;;  %3287 = vmatpush.bf16.msra.mxu0 %v5240_v14  ;;  %v300_v35 = vor.u32 %v299_v27, %v296_v26  ;;  %v510_v50 = vshrl.u32 %v260_v43, 16  ;;  %v5244_v4 = vld [vmem:[%s7187_s1 + $0x40] sm:$0xff]  ;;  %v5259_v9 = vld [vmem:[%s7187_s1 + $0xb8] sm:$0xff]  ;;  %s4404_s16 = sshll.u32 %s4401_s14, 4  ;;  %s4405_s16 = int_to_ptr.hbm [resolvable:$true] %s4404_s16 }
  0x22   : > { %5423 = vmatpush.bf16.msra.mxu3 %v5248_v15  ;;  %3376 = vmatpush.bf16.msra.mxu1 %v5248_v15  ;;  %v493_v40 = vrot.slane %v492_v31, 4  ;;  %v503_v41 = vrot.slane %v502_v32, 4  ;;  %v507_v42 = vrot.slane %v505_v33, 5  ;;  %v315_v48 = vrot.slane %v313_v37, 5  ;;  %v283_v12 = vld [vmem:[%s5700_s8 + $0x74] sm:$0x1] }
  0x23   : > { %v310_v36 = vor.u32 %v309_v34, %v5722_v28  ;;  %v301_v46 = vrot.slane %v300_v35, 4  ;;  %v513_v51 = vshll.u32 %v260_v43, 16  ;;  %v519_v57 = vshll.u32 %v261_v45, 16  ;;  %v5267_v16 = vld [vmem:[%s7187_s1 + $0xf8] sm:$0xff]  ;;  %v5196_v19 = vld [vmem:[%s5700_s8 + $0x60] sm:$0xff]  ;;  %v5258_v31 = vld [vmem:[%s7187_s1 + $0xb0] sm:$0xff] }
  0x24   : > { %v498_v55 = vsel %vm5741_vm2, %v493_v40, %v5714_v18  ;;  %v508_v56 = vsel %vm5741_vm2, %v503_v41, %v507_v42  ;;  %v523_v58 = vshrl.u32 %v261_v45, 16  ;;  %v318_v59 = vshrl.u32 %v244_v49, 16  ;;  %v5787_v21 = vld [vmem:[%s5700_s8 + $0x14] sm:$0x1]  ;;  %v5188_v22 = vld [vmem:[%s5700_s8] sm:$0xff]  ;;  %s4387_s21 = scalar_lea.sflag [#allocation3], %s229_s7 }
  0x25   : > { %5416 = vmatpush.bf16.msra.mxu2 %v5239_v29  ;;  %3288 = vmatpush.bf16.msra.mxu0 %v5239_v29  ;;  %v311_v47 = vrot.slane %v310_v36, 4  ;;  %v321_v60 = vshll.u32 %v244_v49, 16  ;;  %v306_v61 = vsel %vm5741_vm2, %v301_v46, %v5722_v28  ;;  %v327_v63 = vshll.u32 %v5748_v52, 16  ;;  %v5275_v28 = vld [vmem:[%s7187_s1 + $0x138] sm:$0xff]  ;;  %v5266_v32 = vld [vmem:[%s7187_s1 + $0xf0] sm:$0xff]  ;;  %v5257_v49 = vld [vmem:[%s7187_s1 + $0xa8] sm:$0xff] }
  0x26   : > { %5424 = vmatpush.bf16.msra.mxu3 %v5247_v30  ;;  %3377 = vmatpush.bf16.msra.mxu1 %v5247_v30  ;;  %v331_v0 = vshrl.u32 %v5748_v52, 16  ;;  %v2176_v1 = vunpack.c.l.b16 %v498_v55  ;;  %v2177_v2 = vunpack.c.l.b16 %v508_v56  ;;  %v512_v5 = vrot.slane %v510_v50, 4  ;;  %v262_v30 = vld [vmem:[%s5700_s8 + $0x78] sm:$0xf]  ;;  %v263_v35 = vld [vmem:[%s5700_s8 + $0x7c] sm:$0xf] }
  0x27   : > { %v316_v62 = vsel %vm5741_vm2, %v311_v47, %v315_v48  ;;  %v515_v6 = vrot.slane %v513_v51, 5  ;;  %v5774_v7 = vrot.slane %v519_v57, 5  ;;  %v525_v8 = vrot.slane %v523_v58, 4  ;;  %v246_v46 = vld [vmem:[%s5700_s8 + $0x18] sm:$0xf]  ;;  %v5265_v50 = vld [vmem:[%s7187_s1 + $0xe8] sm:$0xff] }
  0x28   : > { %v2160_v10 = vunpack.c.l.b16 %v306_v61  ;;  %v2161_v11 = vunpack.c.l.b16 %v316_v62  ;;  %v320_v14 = vrot.slane %v318_v59, 4  ;;  %v323_v15 = vrot.slane %v321_v60, 5  ;;  %v5815_v51 = vld [vmem:[%s5700_s8 + $0x1c] sm:$0xf]  ;;  %v284_v58 = vld [vmem:[%s5700_s8 + $0x80] sm:$0x1] }
  0x29   : > { %5417 = vmatpush.bf16.msra.mxu2 %v5238_v38  ;;  %3289 = vmatpush.bf16.msra.mxu0 %v5238_v38  ;;  %v5783_v17 = vrot.slane %v327_v63, 5  ;;  %v333_v18 = vrot.slane %v331_v0, 4  ;;  %v2200_v20 = vpack.c.b16 %v2177_v2, %v2176_v1  ;;  %v516_v23 = vor.u32 %v515_v6, %v512_v5  ;;  %v5273_v62 = vld [vmem:[%s7187_s1 + $0x128] sm:$0xff]  ;;  %s5524_s17 = sshra.s32 %s4405_s16, 4  ;;  %s5525_s17 = int_to_ptr.hbm [resolvable:$true] %s5524_s17 }
  0x2a   : > { %5425 = vmatpush.bf16.msra.mxu3 %v5246_v39  ;;  %3378 = vmatpush.bf16.msra.mxu1 %v5246_v39  ;;  %v526_v24 = vor.u32 %v525_v8, %v5774_v7  ;;  %v529_v26 = vshll.u32 %v283_v12, 16  ;;  %v2192_v27 = vpack.c.b16 %v2161_v11, %v2160_v10  ;;  %v324_v29 = vor.u32 %v323_v15, %v320_v14  ;;  %v5274_v39 = vld [vmem:[%s7187_s1 + $0x130] sm:$0xff]  ;;  %s5526_s24 = scalar_lea.hbm %s5525_s17, 128  ;;  %p5531_p1 = scmp.lt.s32.totalorder %s5525_s17, %s7191_s5 }
  0x2b   : > { %v334_v33 = vor.u32 %v333_v18, %v5783_v17  ;;  %v337_v34 = vshll.u32 %v5787_v21, 16  ;;  %v517_v36 = vrot.slane %v516_v23, 4  ;;  %v534_v40 = vshrl.u32 %v262_v30, 16  ;;  %v5197_v15 = vld [vmem:[%s5700_s8 + $0x6c] sm:$0xff]  ;;  %p5527_p12 = scmp.ne.s32.totalorder %s5525_s17, %s5526_s24 }
  0x2c   : > { %v527_v37 = vrot.slane %v526_v24, 4  ;;  %v531_v38 = vrot.slane %v529_v26, 5  ;;  %v325_v41 = vrot.slane %v324_v29, 4  ;;  %v537_v42 = vshll.u32 %v262_v30, 16  ;;  %v5189_v18 = vld [vmem:[%s5700_s8 + $0xc] sm:$0xff] }
  0x2d   : > { %5418 = vmatpush.bf16.msra.mxu2 %v5237_v53  ;;  %3290 = vmatpush.bf16.msra.mxu0 %v5237_v53  ;;  %v543_v43 = vshll.u32 %v263_v35, 16  ;;  %v547_v45 = vshrl.u32 %v263_v35, 16  ;;  %v335_v47 = vrot.slane %v334_v33, 4  ;;  %v339_v48 = vrot.slane %v337_v34, 5  ;;  %v264_v29 = vld [vmem:[%s5700_s8 + $0x84] sm:$0xf]  ;;  %p5528_p13 = pnand %p5527_p12, %p5662_p4 }
  0x2e   : > { %5426 = vmatpush.bf16.msra.mxu3 %v5245_v54  ;;  %3379 = vmatpush.bf16.msra.mxu1 %v5245_v54  ;;  %v522_v53 = vsel %vm5741_vm2, %v517_v36, %v5774_v7  ;;  %v532_v54 = vsel %vm5741_vm2, %v527_v37, %v531_v38  ;;  %v536_v55 = vrot.slane %v534_v40, 4  ;;  %v342_v56 = vshrl.u32 %v246_v46, 16  ;;  %v265_v30 = vld [vmem:[%s5700_s8 + $0x88] sm:$0xf]  ;;  %v248_v33 = vld [vmem:[%s5700_s8 + $0x24] sm:$0xf] }
  0x2f   : > { %v330_v57 = vsel %vm5741_vm2, %v325_v41, %v5783_v17  ;;  %v539_v59 = vrot.slane %v537_v42, 5  ;;  %v545_v60 = vrot.slane %v543_v43, 5  ;;  %v549_v61 = vrot.slane %v547_v45, 4  ;;  %v5835_v17 = vld [vmem:[%s5700_s8 + $0x20] sm:$0x1]  ;;  %p5529_p0 = pneg %p5528_p13 }
  0x30   : > { %v340_v63 = vsel %vm5741_vm2, %v335_v47, %v339_v48  ;;  %v345_v0 = vshll.u32 %v246_v46, 16  ;;  %v351_v1 = vshll.u32 %v5815_v51, 16  ;;  %v355_v2 = vshrl.u32 %v5815_v51, 16  ;;  %v5851_v34 = vld [vmem:[%s5700_s8 + $0x28] sm:$0xf]  ;;  %v5272_v35 = vld [vmem:[%s7187_s1 + $0x120] sm:$0xff] }
  0x31   : > { %5419 = vmatpush.bf16.msra.mxu2 %v5236_v3  ;;  %3291 = vmatpush.bf16.msra.mxu0 %v5236_v3  ;;  %v2178_v3 = vunpack.c.l.b16 %v522_v53  ;;  %v553_v5 = vshll.u32 %v284_v58, 16  ;;  %v2162_v6 = vunpack.c.l.b16 %v330_v57  ;;  %v2163_v7 = vunpack.c.l.b16 %v340_v63 }
  0x32   : > { %5427 = vmatpush.bf16.msra.mxu3 %v5244_v4  ;;  %3380 = vmatpush.bf16.msra.mxu1 %v5244_v4  ;;  %v2179_v4 = vunpack.c.l.b16 %v532_v54  ;;  %v540_v8 = vor.u32 %v539_v59, %v536_v55  ;;  %v550_v10 = vor.u32 %v549_v61, %v545_v60  ;;  %v347_v11 = vrot.slane %v345_v0, 5  ;;  %v285_v59 = vld [vmem:[%s5700_s8 + $0x8c] sm:$0x1] }
  0x33   : > { %v353_v12 = vrot.slane %v351_v1, 5  ;;  %v357_v14 = vrot.slane %v355_v2, 4  ;;  %v558_v40 = vshrl.u32 %v264_v29, 16  ;;  %v561_v41 = vshll.u32 %v264_v29, 16  ;;  %v5866_v2 = vld [vmem:[%s5700_s8 + $0x2c] sm:$0x1] }
  0x34   : > { %3332 = vmatmul.bf16.vlgmr.msra.gmra.mxu2 %v5196_v19  ;;  %3292 = vmatmul.bf16.vlgmr.msra.gmra.mxu0 %v5188_v22  ;;  %v2193_v19 = vpack.c.b16 %v2163_v7, %v2162_v6  ;;  %v555_v22 = vrot.slane %v553_v5, 5  ;;  %v551_v23 = vrot.slane %v550_v10, 4  ;;  %v567_v42 = vshll.u32 %v265_v30, 16  ;;  %v5190_v7 = vld [vmem:[%s5700_s8 + $0x18] sm:$0xff] }
  0x35   : > { %3462 = vmatpush.bf16.msrb.mxu2 %v5259_v9  ;;  %3421 = vmatmul.bf16.vlgmr.msra.gmra.mxu3 %v2200_v20  ;;  %v344_v9 = vrot.slane %v342_v56, 4  ;;  %v541_v20 = vrot.slane %v540_v8, 4  ;;  %v358_v26 = vor.u32 %v357_v14, %v353_v12  ;;  %v571_v43 = vshrl.u32 %v265_v30, 16  ;;  %v266_v14 = vld [vmem:[%s5700_s8 + $0x90] sm:$0xf] }
  0x36   : > { %3551 = vmatpush.bf16.msrb.mxu3 %v5267_v16  ;;  %3381 = vmatmul.bf16.vlgmr.msra.gmra.mxu1 %v2192_v27  ;;  %v2201_v16 = vpack.c.b16 %v2179_v4, %v2178_v3  ;;  %v361_v27 = vshll.u32 %v5835_v17, 16  ;;  %v556_v36 = vsel %vm5741_vm2, %v551_v23, %v555_v22  ;;  %v366_v45 = vshrl.u32 %v248_v33, 16  ;;  %v5198_v3 = vld [vmem:[%s5700_s8 + $0x78] sm:$0xff] }
  0x37   : > { %3640 = vmatpush.bf16.msrb.mxu0 %v5275_v28  ;;  %v348_v24 = vor.u32 %v347_v11, %v344_v9  ;;  %v5256_v28 = vld [vmem:[%s7187_s1 + $0xa0] sm:$0xff]  ;;  %v359_v38 = vrot.slane %v358_v26, 4  ;;  %v369_v46 = vshll.u32 %v248_v33, 16  ;;  %v375_v47 = vshll.u32 %v5851_v34, 16  ;;  %v5263_v26 = vld [vmem:[%s7187_s1 + $0xd8] sm:$0xff] }
  0x38   : > { %v379_v48 = vshrl.u32 %v5851_v34, 16  ;;  %v560_v55 = vrot.slane %v558_v40, 4  ;;  %v563_v56 = vrot.slane %v561_v41, 5  ;;  %v569_v57 = vrot.slane %v567_v42, 5  ;;  %v5884_v33 = vld [vmem:[%s5700_s8 + $0x34] sm:$0xf] }
  0x39   : > { %3463 = vmatpush.bf16.msrb.mxu2 %v5258_v31  ;;  %v5264_v31 = vld [vmem:[%s7187_s1 + $0xe0] sm:$0xff]  ;;  %v349_v37 = vrot.slane %v348_v24, 4  ;;  %v573_v58 = vrot.slane %v571_v43, 4  ;;  %v371_v61 = vrot.slane %v369_v46, 5  ;;  %v577_v6 = vshll.u32 %v285_v59, 16 }
  0x3a   : > { %3552 = vmatpush.bf16.msrb.mxu3 %v5266_v32  ;;  %v546_v32 = vsel %vm5741_vm2, %v541_v20, %v545_v60  ;;  %v368_v60 = vrot.slane %v366_v45, 4  ;;  %v381_v63 = vrot.slane %v379_v48, 4  ;;  %v564_v5 = vor.u32 %v563_v56, %v560_v55  ;;  %v286_v43 = vld [vmem:[%s5700_s8 + $0x98] sm:$0x1] }
  0x3b   : > { %3641 = vmatpush.bf16.msrb.mxu0 %v5274_v39  ;;  %v363_v39 = vrot.slane %v361_v27, 5  ;;  %v354_v53 = vsel %vm5741_vm2, %v349_v37, %v353_v12  ;;  %v574_v8 = vor.u32 %v573_v58, %v569_v57  ;;  %v385_v11 = vshll.u32 %v5866_v2, 16 }
  0x3c   : > { %v2164_v0 = vunpack.c.l.b16 %v354_v53  ;;  %v372_v9 = vor.u32 %v371_v61, %v368_v60  ;;  %v582_v27 = vshrl.u32 %v266_v14, 16  ;;  %v403_v48 = vshrl.u32 %v5884_v33, 16 }
  0x3d   : > { %3464 = vmatpush.bf16.msrb.mxu2 %v5257_v49  ;;  %v2180_v49 = vunpack.c.l.b16 %v546_v32  ;;  %v364_v54 = vsel %vm5741_vm2, %v359_v38, %v363_v39  ;;  %v575_v20 = vrot.slane %v574_v8, 4  ;;  %v387_v24 = vrot.slane %v385_v11, 5  ;;  %v250_v32 = vld [vmem:[%s5700_s8 + $0x30] sm:$0xf]  ;;  %v268_v11 = vld [vmem:[%s5700_s8 + $0x9c] sm:$0xf] }
  0x3e   : > { %3553 = vmatpush.bf16.msrb.mxu3 %v5265_v50  ;;  %v2181_v50 = vunpack.c.l.b16 %v556_v36  ;;  %v2165_v1 = vunpack.c.l.b16 %v364_v54  ;;  %v373_v22 = vrot.slane %v372_v9, 4  ;;  %v584_v39 = vrot.slane %v582_v27, 4 }
  0x3f   : > { %3642 = vmatpush.bf16.msrb.mxu0 %v5273_v62  ;;  %v377_v62 = vrot.slane %v375_v47, 5  ;;  %v390_v45 = vshrl.u32 %v250_v32, 16  ;;  %v393_v46 = vshll.u32 %v250_v32, 16  ;;  %v399_v47 = vshll.u32 %v5884_v33, 16 }
  0x40   : > { %v2202_v4 = vpack.c.b16 %v2181_v50, %v2180_v49  ;;  %v2194_v12 = vpack.c.b16 %v2165_v1, %v2164_v0  ;;  %v405_v61 = vrot.slane %v403_v48, 4  ;;  %v5899_v0 = vld [vmem:[%s5700_s8 + $0x38] sm:$0x1]  ;;  %v5191_v1 = vld [vmem:[%s5700_s8 + $0x24] sm:$0xff]  ;;  %v609_v27 = vshll.u32 %v268_v11, 16 }
  0x41   : > { %3465 = vmatpush.bf16.msrb.mxu2 %v5256_v28  ;;  %v382_v10 = vor.u32 %v381_v63, %v377_v62  ;;  %v585_v28 = vshll.u32 %v266_v14, 16  ;;  %v378_v37 = vsel %vm5741_vm2, %v373_v22, %v377_v62  ;;  %v392_v58 = vrot.slane %v390_v45, 4  ;;  %v5199_v62 = vld [vmem:[%s5700_s8 + $0x84] sm:$0xff]  ;;  %v5262_v14 = vld [vmem:[%s7187_s1 + $0xd0] sm:$0xff] }
  0x42   : > { %3554 = vmatpush.bf16.msrb.mxu3 %v5264_v31  ;;  %v5271_v31 = vld [vmem:[%s7187_s1 + $0x118] sm:$0xff]  ;;  %v2166_v53 = vunpack.c.l.b16 %v378_v37  ;;  %v395_v59 = vrot.slane %v393_v46, 5  ;;  %v401_v60 = vrot.slane %v399_v47, 5  ;;  %v409_v9 = vshll.u32 %v5899_v0, 16  ;;  %v287_v45 = vld [vmem:[%s5700_s8 + $0xa4] sm:$0x1] }
  0x43   : > { %3643 = vmatpush.bf16.msrb.mxu0 %v5272_v35  ;;  %v383_v23 = vrot.slane %v382_v10, 4  ;;  %v587_v40 = vrot.slane %v585_v28, 5  ;;  %v5254_v10 = vld [vmem:[%s7187_s1 + $0x90] sm:$0xff] }
  0x44   : > { %3337 = vmatmul.bf16.gmra.mxu2 %v5197_v15  ;;  %3297 = vmatmul.bf16.gmra.mxu0 %v5189_v18  ;;  %v267_v15 = vld [vmem:[%s5700_s8 + $0x94] sm:$0xf]  ;;  %v579_v18 = vrot.slane %v577_v6, 5  ;;  %v406_v8 = vor.u32 %v405_v61, %v401_v60 }
  0x45   : > { %3426 = vmatmul.bf16.gmra.mxu3 %v2201_v16  ;;  %v565_v16 = vrot.slane %v564_v5, 4  ;;  %v591_v29 = vshll.u32 %v267_v15, 16  ;;  %v595_v30 = vshrl.u32 %v267_v15, 16  ;;  %v388_v38 = vsel %vm5741_vm2, %v383_v23, %v387_v24 }
  0x46   : > { %3386 = vmatmul.bf16.gmra.mxu1 %v2193_v19  ;;  %v5255_v19 = vld [vmem:[%s7187_s1 + $0x98] sm:$0xff]  ;;  %3555 = vmatpush.bf16.msrb.mxu3 %v5263_v26  ;;  %v580_v36 = vsel %vm5741_vm2, %v575_v20, %v579_v18  ;;  %v2167_v54 = vunpack.c.l.b16 %v388_v38  ;;  %v588_v55 = vor.u32 %v587_v40, %v584_v39  ;;  %v253_v18 = vld [vmem:[%s5700_s8 + $0x40] sm:$0xf]  ;;  %v407_v23 = vrot.slane %v406_v8, 4 }
  0x47   : > { %3466 = vmatpush.bf16.msrb.mxu2 %v5255_v19  ;;  %3644 = vmatpush.bf16.msrb.mxu0 %v5271_v31  ;;  %v570_v35 = vsel %vm5741_vm2, %v565_v16, %v569_v57  ;;  %v593_v41 = vrot.slane %v591_v29, 5  ;;  %v597_v42 = vrot.slane %v595_v30, 4  ;;  %v2183_v50 = vunpack.c.l.b16 %v580_v36  ;;  %v252_v16 = vld [vmem:[%s5700_s8 + $0x3c] sm:$0xf]  ;;  %v5270_v19 = vld [vmem:[%s7187_s1 + $0x110] sm:$0xff] }
  0x48   : > { %v2182_v49 = vunpack.c.l.b16 %v570_v35  ;;  %v601_v57 = vshll.u32 %v286_v43, 16  ;;  %v411_v24 = vrot.slane %v409_v9, 5  ;;  %v606_v26 = vshrl.u32 %v268_v11, 16 }
  0x49   : > { %v598_v56 = vor.u32 %v597_v42, %v593_v41  ;;  %v414_v30 = vshrl.u32 %v252_v16, 16  ;;  %v417_v31 = vshll.u32 %v252_v16, 16  ;;  %v423_v32 = vshll.u32 %v253_v18, 16 }
  0x4a   : > { %v2203_v63 = vpack.c.b16 %v2183_v50, %v2182_v49  ;;  %v603_v5 = vrot.slane %v601_v57, 5  ;;  %3556 = vmatpush.bf16.msrb.mxu3 %v5262_v14  ;;  %v427_v35 = vshrl.u32 %v253_v18, 16  ;;  %v412_v39 = vsel %vm5741_vm2, %v407_v23, %v411_v24  ;;  %v255_v23 = vld [vmem:[%s5700_s8 + $0x4c] sm:$0xf] }
  0x4b   : > { %v599_v6 = vrot.slane %v598_v56, 4  ;;  %3467 = vmatpush.bf16.msrb.mxu2 %v5254_v10  ;;  %3645 = vmatpush.bf16.msrb.mxu0 %v5270_v19  ;;  %v608_v40 = vrot.slane %v606_v26, 4  ;;  %v416_v46 = vrot.slane %v414_v30, 4  ;;  %v419_v47 = vrot.slane %v417_v31, 5  ;;  %v5269_v19 = vld [vmem:[%s7187_s1 + $0x108] sm:$0xff] }
  0x4c   : > { %v425_v48 = vrot.slane %v423_v32, 5  ;;  %v429_v49 = vrot.slane %v427_v35, 4  ;;  %v288_v35 = vld [vmem:[%s5700_s8 + $0xb0] sm:$0x1] }
  0x4d   : > { %v604_v20 = vsel %vm5741_vm2, %v599_v6, %v603_v5  ;;  %v420_v61 = vor.u32 %v419_v47, %v416_v46  ;;  %v649_v47 = vshll.u32 %v288_v35, 16 }
  0x4e   : > { %v2185_v37 = vunpack.c.l.b16 %v604_v20  ;;  %v5283_v20 = vld [vmem:[%s7187_s1 + $0x178] sm:$0xff] }
  0x4f   : > { %v421_v9 = vrot.slane %v420_v61, 4  ;;  %3646 = vmatpush.bf16.msrb.mxu0 %v5269_v19  ;;  %3729 = vmatpush.bf16.msrb.mxu1 %v5283_v20  ;;  %v651_v61 = vrot.slane %v649_v47, 5  ;;  %v5279_v47 = vld [vmem:[%s7187_s1 + $0x158] sm:$0xff] }
  0x54   : > { %3342 = vmatmul.bf16.gmra.mxu2 %v5198_v3  ;;  %3302 = vmatmul.bf16.gmra.mxu0 %v5190_v7  ;;  %v2195_v3 = vpack.c.b16 %v2167_v54, %v2166_v53  ;;  %v396_v7 = vor.u32 %v395_v59, %v392_v58  ;;  %v2169_v53 = vunpack.c.l.b16 %v412_v39  ;;  %v5926_v54 = vld [vmem:[%s5700_s8 + $0x44] sm:$0x1]  ;;  %v625_v58 = vshll.u32 %v287_v45, 16  ;;  %v5192_v59 = vld [vmem:[%s5700_s8 + $0x30] sm:$0xff] }
  0x55   : > { %3431 = vmatmul.bf16.gmra.mxu3 %v2202_v4  ;;  %v589_v4 = vrot.slane %v588_v55, 4  ;;  %v5200_v55 = vld [vmem:[%s5700_s8 + $0x90] sm:$0xff]  ;;  %v451_v39 = vshrl.u32 %v255_v23, 16 }
  0x56   : > { %3391 = vmatmul.bf16.gmra.mxu1 %v2194_v12  ;;  %v269_v12 = vld [vmem:[%s5700_s8 + $0xa0] sm:$0xf]  ;;  %v397_v22 = vrot.slane %v396_v7, 4  ;;  %v627_v6 = vrot.slane %v625_v58, 5  ;;  %v5253_v7 = vld [vmem:[%s7187_s1 + $0x88] sm:$0xff] }
  0x57   : > { %v594_v15 = vsel %vm5741_vm2, %v589_v4, %v593_v41  ;;  %v615_v28 = vshll.u32 %v269_v12, 16  ;;  %v619_v29 = vshrl.u32 %v269_v12, 16  ;;  %v611_v41 = vrot.slane %v609_v27, 5  ;;  %v271_v4 = vld [vmem:[%s5700_s8 + $0xac] sm:$0xf]  ;;  %3468 = vmatpush.bf16.msrb.mxu2 %v5253_v7  ;;  %v5193_v58 = vld [vmem:[%s5700_s8 + $0x3c] sm:$0xff] }
  0x58   : > { %v2184_v36 = vunpack.c.l.b16 %v594_v15  ;;  %v402_v38 = vsel %vm5741_vm2, %v397_v22, %v401_v60  ;;  %v5261_v12 = vld [vmem:[%s7187_s1 + $0xc8] sm:$0xff]  ;;  %v639_v16 = vshll.u32 %v271_v4, 16  ;;  %v643_v18 = vshrl.u32 %v271_v4, 16  ;;  %v5282_v4 = vld [vmem:[%s7187_s1 + $0x170] sm:$0xff]  ;;  %v273_v7 = vld [vmem:[%s5700_s8 + $0xb8] sm:$0xf] }
  0x59   : > { %v617_v42 = vrot.slane %v615_v28, 5  ;;  %v621_v43 = vrot.slane %v619_v29, 4  ;;  %v2168_v50 = vunpack.c.l.b16 %v402_v38  ;;  %v612_v57 = vor.u32 %v611_v41, %v608_v40  ;;  %3557 = vmatpush.bf16.msrb.mxu3 %v5261_v12  ;;  %v254_v22 = vld [vmem:[%s5700_s8 + $0x48] sm:$0xf]  ;;  %3730 = vmatpush.bf16.msrb.mxu1 %v5282_v4 }
  0x5a   : > { %v2204_v56 = vpack.c.b16 %v2185_v37, %v2184_v36  ;;  %v426_v27 = vsel %vm5741_vm2, %v421_v9, %v425_v48  ;;  %v641_v31 = vrot.slane %v639_v16, 5  ;;  %v645_v32 = vrot.slane %v643_v18, 4  ;;  %v256_v9 = vld [vmem:[%s5700_s8 + $0x54] sm:$0xf]  ;;  %v5281_v12 = vld [vmem:[%s7187_s1 + $0x168] sm:$0xff] }
  0x5b   : > { %v622_v60 = vor.u32 %v621_v43, %v617_v42  ;;  %v613_v5 = vrot.slane %v612_v57, 4  ;;  %v438_v36 = vshrl.u32 %v254_v22, 16  ;;  %v441_v37 = vshll.u32 %v254_v22, 16  ;;  %v280_v57 = vld [vmem:[%s5700_s8 + $0x50] sm:$0x1] }
  0x5c   : > { %v447_v38 = vshll.u32 %v255_v23, 16  ;;  %v646_v46 = vor.u32 %v645_v32, %v641_v31  ;;  %v663_v23 = vshll.u32 %v273_v7, 16 }
  0x5d   : > { %v623_v8 = vrot.slane %v622_v60, 4  ;;  %v618_v24 = vsel %vm5741_vm2, %v613_v5, %v617_v42  ;;  %v2170_v42 = vunpack.c.l.b16 %v426_v27  ;;  %v272_v5 = vld [vmem:[%s5700_s8 + $0xb4] sm:$0xf]  ;;  %v465_v27 = vshll.u32 %v256_v9, 16  ;;  %3731 = vmatpush.bf16.msrb.mxu1 %v5281_v12  ;;  %v6007_v12 = vld [vmem:[%s5700_s8 + $0x10] sm:$0xf] }
  0x5e   : > { %v2186_v40 = vunpack.c.l.b16 %v618_v24  ;;  %v654_v20 = vshrl.u32 %v272_v5, 16  ;;  %v657_v22 = vshll.u32 %v272_v5, 16  ;;  %v667_v24 = vshrl.u32 %v273_v7, 16  ;;  %v5291_v5 = vld [vmem:[%s7187_s1 + $0x1b8] sm:$0xff] }
  0x5f   : > { %v628_v26 = vsel %vm5741_vm2, %v623_v8, %v627_v6  ;;  %v5252_v6 = vld [vmem:[%s7187_s1 + $0x80] sm:$0xff] }
  0x60   : > { %v2187_v41 = vunpack.c.l.b16 %v628_v26  ;;  %v5260_v8 = vld [vmem:[%s7187_s1 + $0xc0] sm:$0xff]  ;;  %3469 = vmatpush.bf16.msrb.mxu2 %v5252_v6  ;;  %v462_v26 = vshrl.u32 %v256_v9, 16 }
  0x61   : > { %3558 = vmatpush.bf16.msrb.mxu3 %v5260_v8 }
  0x64   : > { %3347 = vmatmul.bf16.gmra.mxu2 %v5199_v62  ;;  %3307 = vmatmul.bf16.gmra.mxu0 %v5191_v1  ;;  %v430_v62 = vor.u32 %v429_v49, %v425_v48  ;;  %v2196_v1 = vpack.c.b16 %v2169_v53, %v2168_v50  ;;  %v440_v48 = vrot.slane %v438_v36, 4  ;;  %v443_v49 = vrot.slane %v441_v37, 5  ;;  %v289_v37 = vld [vmem:[%s5700_s8 + $0xbc] sm:$0x1] }
  0x65   : > { %3436 = vmatmul.bf16.gmra.mxu3 %v2203_v63  ;;  %v433_v63 = vshll.u32 %v5926_v54, 16  ;;  %v449_v50 = vrot.slane %v447_v38, 5  ;;  %v453_v53 = vrot.slane %v451_v39, 4  ;;  %v656_v38 = vrot.slane %v654_v20, 4  ;;  %3818 = vmatpush.bf16.msra.mxu2 %v5291_v5 }
  0x66   : > { %3396 = vmatmul.bf16.gmra.mxu1 %v2195_v3  ;;  %v270_v3 = vld [vmem:[%s5700_s8 + $0xa8] sm:$0xf]  ;;  %v431_v10 = vrot.slane %v430_v62, 4  ;;  %v647_v62 = vrot.slane %v646_v46, 4  ;;  %v659_v39 = vrot.slane %v657_v22, 5 }
  0x67   : > { %v435_v11 = vrot.slane %v433_v63, 5  ;;  %v630_v14 = vshrl.u32 %v270_v3, 16  ;;  %v633_v15 = vshll.u32 %v270_v3, 16  ;;  %v444_v63 = vor.u32 %v443_v49, %v440_v48 }
  0x68   : > { %v457_v3 = vshll.u32 %v280_v57, 16  ;;  %v673_v57 = vshll.u32 %v289_v37, 16 }
  0x69   : > { %v436_v28 = vsel %vm5741_vm2, %v431_v10, %v435_v11  ;;  %v632_v29 = vrot.slane %v630_v14, 4  ;;  %v635_v30 = vrot.slane %v633_v15, 5  ;;  %v257_v11 = vld [vmem:[%s5700_s8 + $0x58] sm:$0xf]  ;;  %v5268_v14 = vld [vmem:[%s7187_s1 + $0x100] sm:$0xff]  ;;  %v652_v15 = vsel %vm5741_vm2, %v647_v62, %v651_v61 }
  0x6a   : > { %v2171_v43 = vunpack.c.l.b16 %v436_v28  ;;  %v445_v16 = vrot.slane %v444_v63, 4  ;;  %v459_v19 = vrot.slane %v457_v3, 5  ;;  %3647 = vmatpush.bf16.msrb.mxu0 %v5268_v14  ;;  %v471_v28 = vshll.u32 %v257_v11, 16  ;;  %v5277_v14 = vld [vmem:[%s7187_s1 + $0x148] sm:$0xff] }
  0x6b   : > { %v636_v45 = vor.u32 %v635_v30, %v632_v29  ;;  %v475_v29 = vshrl.u32 %v257_v11, 16  ;;  %v5280_v30 = vld [vmem:[%s7187_s1 + $0x160] sm:$0xff]  ;;  %v2189_v32 = vunpack.c.l.b16 %v652_v15  ;;  %v675_v4 = vrot.slane %v673_v57, 5  ;;  %v4511_v11 = vld [vmem:[%s5700_s8 + $0xc] sm:$0xf] }
  0x6c   : > { %v450_v35 = vsel %vm5741_vm2, %v445_v16, %v449_v50  ;;  %3732 = vmatpush.bf16.msrb.mxu1 %v5280_v30  ;;  %v909_v20 = vshrl.u32 %v4511_v11, 16  ;;  %v912_v22 = vshll.u32 %v4511_v11, 16 }
  0x6d   : > { %v637_v60 = vrot.slane %v636_v45, 4  ;;  %v473_v45 = vrot.slane %v471_v28, 5  ;;  %v477_v46 = vrot.slane %v475_v29, 4  ;;  %v2172_v48 = vunpack.c.l.b16 %v450_v35 }
  0x6e   : > { %v914_v35 = vrot.slane %v912_v22, 5 }
  0x6f   : > { %v642_v10 = vsel %vm5741_vm2, %v637_v60, %v641_v31  ;;  %v478_v61 = vor.u32 %v477_v46, %v473_v45 }
  0x70   : > { %v2188_v31 = vunpack.c.l.b16 %v642_v10  ;;  %3733 = vmatpush.bf16.msrb.mxu1 %v5279_v47  ;;  %v5299_v10 = vld [vmem:[%s7187_s1 + $0x1f8] sm:$0xff] }
  0x71   : > { %v479_v8 = vrot.slane %v478_v61, 4  ;;  %3907 = vmatpush.bf16.msra.mxu3 %v5299_v10 }
  0x74   : > { %3352 = vmatmul.bf16.gmra.mxu2 %v5200_v55  ;;  %3312 = vmatmul.bf16.gmra.mxu0 %v5192_v59  ;;  %v5201_v55 = vld [vmem:[%s5700_s8 + $0x9c] sm:$0xff]  ;;  %v2197_v59 = vpack.c.b16 %v2171_v43, %v2170_v42  ;;  %v464_v42 = vrot.slane %v462_v26, 4  ;;  %v467_v43 = vrot.slane %v465_v27, 5 }
  0x75   : > { %3441 = vmatmul.bf16.gmra.mxu3 %v2204_v56  ;;  %v2205_v56 = vpack.c.b16 %v2187_v41, %v2186_v40  ;;  %v665_v40 = vrot.slane %v663_v23, 5  ;;  %v669_v41 = vrot.slane %v667_v24, 4  ;;  %v918_v23 = vshll.u32 %v6007_v12, 16  ;;  %v5276_v26 = vld [vmem:[%s7187_s1 + $0x140] sm:$0xff] }
  0x76   : > { %3401 = vmatmul.bf16.gmra.mxu1 %v2196_v1  ;;  %v454_v1 = vor.u32 %v453_v53, %v449_v50  ;;  %v281_v50 = vld [vmem:[%s5700_s8 + $0x5c] sm:$0x1]  ;;  %v5202_v53 = vld [vmem:[%s5700_s8 + $0xa8] sm:$0xff]  ;;  %v468_v60 = vor.u32 %v467_v43, %v464_v42  ;;  %v922_v24 = vshrl.u32 %v6007_v12, 16  ;;  %v746_v42 = vrot.slane %v5706_v13, 5 }
  0x77   : > { %v481_v62 = vshll.u32 %v281_v50, 16  ;;  %v4559_v50 = vld [vmem:[%s5700_s8 + $0xc] sm:$0xe] }
  0x78   : > { %v455_v18 = vrot.slane %v454_v1, 4  ;;  %v5278_v1 = vld [vmem:[%s7187_s1 + $0x150] sm:$0xff]  ;;  %v469_v7 = vrot.slane %v468_v60, 4  ;;  %v924_v37 = vrot.slane %v922_v24, 4  ;;  %v4513_v60 = vld [vmem:[%s5700_s8 + $0x18] sm:$0xf] }
  0x79   : > { %v483_v9 = vrot.slane %v481_v62, 5  ;;  %3734 = vmatpush.bf16.msrb.mxu1 %v5278_v1  ;;  %v4575_v61 = vrot.slane %v4559_v50, 9  ;;  %v6042_v1 = vld [vmem:[%s5700_s8 + $0x1c] sm:$0xf]  ;;  %v936_v5 = vshll.u32 %v4513_v60, 16  ;;  %v5298_v50 = vld [vmem:[%s7187_s1 + $0x1f0] sm:$0xff] }
  0x7a   : > { %v460_v36 = vsel %vm5741_vm2, %v455_v18, %v459_v19  ;;  %v474_v18 = vsel %vm5741_vm2, %v469_v7, %v473_v45  ;;  %v677_v45 = vld [vmem:[%s5700_s8] sm:$0xe]  ;;  %3908 = vmatpush.bf16.msra.mxu3 %v5298_v50 }
  0x7b   : > { %v2173_v49 = vunpack.c.l.b16 %v460_v36  ;;  %v484_v19 = vsel %vm5741_vm2, %v479_v8, %v483_v9  ;;  %v2174_v29 = vunpack.c.l.b16 %v474_v18  ;;  %v920_v36 = vrot.slane %v918_v23, 5 }
  0x7c   : > { %v2175_v30 = vunpack.c.l.b16 %v484_v19  ;;  %v942_v8 = vshll.u32 %v6042_v1, 16  ;;  %v946_v9 = vshrl.u32 %v6042_v1, 16  ;;  %v938_v19 = vrot.slane %v936_v5, 5 }
  0x7d   : > { %v2198_v63 = vpack.c.b16 %v2173_v49, %v2172_v48  ;;  %3735 = vmatpush.bf16.msrb.mxu1 %v5277_v14  ;;  %v925_v47 = vor.u32 %v924_v37, %v920_v36  ;;  %v1358_v49 = vrot.slane %v6007_v12, 5 }
  0x7e   : > { %v2199_v43 = vpack.c.b16 %v2175_v30, %v2174_v29  ;;  %v944_v23 = vrot.slane %v942_v8, 5  ;;  %v948_v24 = vrot.slane %v946_v9, 4  ;;  %v6063_v29 = vld [vmem:[%s7188_s2] ss:$0 sm:$0xff] }
  0x7f   : > { %v1360_v62 = vrot.slane %v1358_v49, 4  ;;  %v1359_v10 = vsel %vm6036_vm5, %v4575_v61, %v1358_v49 }
  0x81   : > { %3736 = vmatpush.bf16.msrb.mxu1 %v5276_v26  ;;  %v4544_v26 = vld [vmem:[%s5700_s8 + $0x20] sm:$0x1] }
  0x82   : > { %v1368_v61 = vrot.slane %v4544_v26, 5 }
  0x84   : > { %3357 = vmatmul.bf16.gmra.mxu2 %v5201_v55  ;;  %3317 = vmatmul.bf16.gmra.mxu0 %v5193_v58  ;;  %v2206_v55 = vpack.c.b16 %v2189_v32, %v2188_v31  ;;  %v5194_v58 = vld [vmem:[%s5700_s8 + $0x48] sm:$0xff]  ;;  %v5307_v31 = vld [vmem:[%s7187_s1 + $0x238] sm:$0xff]  ;;  %v911_v32 = vrot.slane %v909_v20, 4  ;;  %v2432_v20 = vunpack.c.l.b16 %v1359_v10 }
  0x85   : > { %3446 = vmatmul.bf16.gmra.mxu3 %v2205_v56  ;;  %v660_v56 = vor.u32 %v659_v39, %v656_v38  ;;  %v4543_v38 = vld [vmem:[%s5700_s8 + $0x14] sm:$0x1]  ;;  %3996 = vmatpush.bf16.msra.mxu0 %v5307_v31  ;;  %v678_v31 = vld [vmem:[%s5700_s8 + $0xc] sm:$0xe] }
  0x86   : > { %3406 = vmatmul.bf16.gmra.mxu1 %v2197_v59  ;;  %v670_v59 = vor.u32 %v669_v41, %v665_v40  ;;  %v5203_v39 = vld [vmem:[%s5700_s8 + $0xb4] sm:$0xff]  ;;  %v915_v46 = vor.u32 %v914_v35, %v911_v32  ;;  %v928_v48 = vshll.u32 %v4543_v38, 16  ;;  %v753_v32 = vrot.slane %v5748_v52, 5 }
  0x87   : > { %v661_v3 = vrot.slane %v660_v56, 4  ;;  %v5195_v41 = vld [vmem:[%s5700_s8 + $0x54] sm:$0xff]  ;;  %v749_v56 = vrot.slane %v5720_v25, 5 }
  0x88   : > { %v671_v6 = vrot.slane %v670_v59, 4  ;;  %v916_v57 = vrot.slane %v915_v46, 4  ;;  %v930_v59 = vrot.slane %v928_v48, 5  ;;  %v5290_v46 = vld [vmem:[%s7187_s1 + $0x1b0] sm:$0xff]  ;;  %v756_v48 = vrot.slane %v5787_v21, 5 }
  0x89   : > { %v666_v15 = vsel %vm5741_vm2, %v661_v3, %v665_v40  ;;  %3819 = vmatpush.bf16.msra.mxu2 %v5290_v46 }
  0x8a   : > { %v676_v16 = vsel %vm5741_vm2, %v671_v6, %v675_v4  ;;  %v2190_v27 = vunpack.c.l.b16 %v666_v15  ;;  %v933_v4 = vshrl.u32 %v4513_v60, 16  ;;  %v921_v6 = vsel %vm5741_vm2, %v916_v57, %v920_v36 }
  0x8b   : > { %v2191_v28 = vunpack.c.l.b16 %v676_v16  ;;  %v2368_v15 = vunpack.c.l.b16 %v921_v6 }
  0x8c   : > { %v935_v18 = vrot.slane %v933_v4, 4 }
  0x8d   : > { %v2207_v40 = vpack.c.b16 %v2191_v28, %v2190_v27  ;;  %v5204_v28 = vld [vmem:[%s5700_s8 + $0xc] sm:$0xff] }
  0x8e   : > { %v939_v35 = vor.u32 %v938_v19, %v935_v18 }
  0x90   : > { %v940_v49 = vrot.slane %v939_v35, 4  ;;  %v4545_v35 = vld [vmem:[%s5700_s8 + $0x2c] sm:$0x1] }
  0x94   : > { %3362 = vmatmul.bf16.gmra.mxu2 %v5202_v53  ;;  %3322 = vmatmul.bf16.gmra.mxu0 %v5194_v58  ;;  %v4495_v53 = vrot.slane %v677_v45, 9  ;;  %v926_v58 = vrot.slane %v925_v47, 4  ;;  %v4560_v45 = vld [vmem:[%s5700_s8 + $0x18] sm:$0xe]  ;;  %v755_v47 = vrot.slane %v753_v32, 4 }
  0x95   : > { %3451 = vmatmul.bf16.gmra.mxu3 %v2206_v55  ;;  %v748_v55 = vrot.slane %v746_v42, 4 }
  0x96   : > { %3411 = vmatmul.bf16.gmra.mxu1 %v2198_v63  ;;  %v1361_v63 = vrot.slane %v4543_v38, 5  ;;  %v747_v3 = vsel %vm6036_vm5, %v4495_v53, %v746_v42  ;;  %v931_v7 = vsel %vm5741_vm2, %v926_v58, %v930_v59  ;;  %v949_v38 = vor.u32 %v948_v24, %v944_v23  ;;  %v5306_v24 = vld [vmem:[%s7187_s1 + $0x230] sm:$0xff] }
  0x97   : > { %v750_v25 = vsel %vm6036_vm5, %v748_v55, %v749_v56  ;;  %v2224_v12 = vunpack.c.l.b16 %v747_v3  ;;  %v2369_v16 = vunpack.c.l.b16 %v931_v7  ;;  %v1365_v42 = vrot.slane %v6042_v1, 5  ;;  %v4515_v56 = vld [vmem:[%s5700_s8 + $0x24] sm:$0xf]  ;;  %3997 = vmatpush.bf16.msra.mxu0 %v5306_v24 }
  0x98   : > { %v1362_v11 = vsel %vm6036_vm5, %v1360_v62, %v1361_v63  ;;  %v2225_v14 = vunpack.c.l.b16 %v750_v25  ;;  %v950_v53 = vrot.slane %v949_v38, 4  ;;  %v4576_v59 = vrot.slane %v4560_v45, 9  ;;  %v6081_v62 = vld [vmem:[%s5700_s8 + $0x28] sm:$0xf]  ;;  %v5205_v38 = vld [vmem:[%s5700_s8 + $0x18] sm:$0xff] }
  0x99   : > { %v2433_v22 = vunpack.c.l.b16 %v1362_v11  ;;  %v2400_v30 = vpack.c.b16 %v2369_v16, %v2368_v15  ;;  %v1367_v60 = vrot.slane %v1365_v42, 4  ;;  %v757_v1 = vsel %vm6036_vm5, %v755_v47, %v756_v48 }
  0x9a   : > { %v2256_v27 = vpack.c.b16 %v2225_v14, %v2224_v12  ;;  %v945_v3 = vsel %vm5741_vm2, %v940_v49, %v944_v23  ;;  %v957_v25 = vshrl.u32 %v4515_v56, 16  ;;  %v960_v4 = vshll.u32 %v4515_v56, 16  ;;  %v4561_v56 = vld [vmem:[%s5700_s8 + $0x24] sm:$0xe] }
  0x9b   : > { %v2464_v37 = vpack.c.b16 %v2433_v22, %v2432_v20  ;;  %v966_v8 = vshll.u32 %v6081_v62, 16  ;;  %v970_v9 = vshrl.u32 %v6081_v62, 16  ;;  %v1366_v12 = vsel %vm6036_vm5, %v4576_v59, %v1365_v42 }
  0x9c   : > { %v1369_v14 = vsel %vm6036_vm5, %v1367_v60, %v1368_v61  ;;  %v2227_v16 = vunpack.c.l.b16 %v757_v1  ;;  %v2370_v18 = vunpack.c.l.b16 %v945_v3  ;;  %v959_v22 = vrot.slane %v957_v25, 4 }
  0x9d   : > { %v962_v23 = vrot.slane %v960_v4, 5  ;;  %v976_v48 = vshll.u32 %v4545_v35, 16  ;;  %v4577_v3 = vrot.slane %v4561_v56, 9  ;;  %v1375_v25 = vrot.slane %v4545_v35, 5  ;;  %v6121_v4 = vld [vmem:[%s5700_s8 + $0x34] sm:$0xf] }
  0x9f   : > { %v963_v42 = vor.u32 %v962_v23, %v959_v22  ;;  %v978_v61 = vrot.slane %v976_v48, 5  ;;  %v680_v48 = vld [vmem:[%s5700_s8 + $0x24] sm:$0xe] }
  0xa1   : > { %v964_v59 = vrot.slane %v963_v42, 4 }
  0xa4   : > { %3367 = vmatmul.bf16.gmra.mxu2 %v5203_v39  ;;  %3327 = vmatmul.bf16.gmra.mxu0 %v5195_v41  ;;  %v952_v39 = vshll.u32 %v4544_v26, 16  ;;  %v2434_v26 = vunpack.c.l.b16 %v1366_v12 }
  0xa5   : > { %3456 = vmatmul.bf16.gmra.mxu3 %v2207_v40 }
  0xa6   : > { %3416 = vmatmul.bf16.gmra.mxu1 %v2199_v43  ;;  %v4496_v43 = vrot.slane %v678_v31, 9  ;;  %v954_v55 = vrot.slane %v952_v39, 5 }
  0xa8   : > { %v754_v63 = vsel %vm6036_vm5, %v4496_v43, %v753_v32  ;;  %v955_v7 = vsel %vm5741_vm2, %v950_v53, %v954_v55  ;;  %v1372_v53 = vrot.slane %v6081_v62, 5 }
  0xa9   : > { %v2226_v15 = vunpack.c.l.b16 %v754_v63  ;;  %v2371_v20 = vunpack.c.l.b16 %v955_v7 }
  0xaa   : > { %v1374_v62 = vrot.slane %v1372_v53, 4  ;;  %v1373_v22 = vsel %vm6036_vm5, %v4577_v3, %v1372_v53 }
  0xab   : > { %v2401_v39 = vpack.c.b16 %v2371_v20, %v2370_v18  ;;  %v2436_v35 = vunpack.c.l.b16 %v1373_v22 }
  0xac   : > { %v1376_v23 = vsel %vm6036_vm5, %v1374_v62, %v1375_v25  ;;  %v770_v62 = vrot.slane %v5866_v2, 5 }
  0xb1   : > { %v3293_v36 = vpop.f32.mrf.mxu0 }
  0xb2   : > { %v3294_v40 = vadd.f32 %v6063_v29, %v3293_v36 }
  0xb3   : > { %v3382_v41 = vpop.f32.mrf.mxu1 }
  0xb4   : > { %3470 = vmatmul.bf16.vlgmr.msrb.gmra.mxu2 %v2256_v27  ;;  %v6073_v52 = vadd.f32 %v3382_v41, %v3294_v40  ;;  %3648 = vmatmul.bf16.vlgmr.msrb.gmra.mxu0 %v2400_v30  ;;  %v2435_v27 = vunpack.c.l.b16 %v1369_v14  ;;  %v972_v30 = vrot.slane %v970_v9, 4  ;;  %v679_v40 = vld [vmem:[%s5700_s8 + $0x18] sm:$0xe]  ;;  %v760_v41 = vrot.slane %v5815_v51, 5 }
  0xb5   : > { %3559 = vmatmul.bf16.vlgmr.msrb.gmra.mxu3 %v5204_v28  ;;  %v968_v28 = vrot.slane %v966_v8, 5  ;;  %v4497_v55 = vrot.slane %v679_v40, 9 }
  0xb6   : > { %3737 = vmatmul.bf16.vlgmr.msrb.gmra.mxu1 %v2464_v37  ;;  %v2257_v37 = vpack.c.b16 %v2227_v16, %v2226_v15  ;;  %v2465_v46 = vpack.c.b16 %v2435_v27, %v2434_v26  ;;  %v762_v51 = vrot.slane %v760_v41, 4  ;;  %v990_v15 = vshll.u32 %v6121_v4, 16 }
  0xb7   : > { %v3333_v57 = vpop.f32.mrf.mxu2  ;;  %v973_v47 = vor.u32 %v972_v30, %v968_v28  ;;  %v761_v7 = vsel %vm6036_vm5, %v4497_v55, %v760_v41  ;;  %v969_v8 = vsel %vm5741_vm2, %v964_v59, %v968_v28  ;;  %v994_v16 = vshrl.u32 %v6121_v4, 16  ;;  %v4546_v41 = vld [vmem:[%s5700_s8 + $0x38] sm:$0x1] }
  0xb8   : > { %v3422_v58 = vpop.f32.mrf.mxu3  ;;  %v3334_v21 = vadd.f32 %v6063_v29, %v3333_v57  ;;  %v2228_v24 = vunpack.c.l.b16 %v761_v7  ;;  %v2372_v27 = vunpack.c.l.b16 %v969_v8 }
  0xb9   : > { %v3295_v6 = vpop.f32.mrf.mxu0  ;;  %v974_v60 = vrot.slane %v973_v47, 4 }
  0xba   : > { %v6090_v5 = vadd.f32 %v3422_v58, %v3334_v21  ;;  %v3296_v10 = vadd.f32 %v6063_v29, %v3295_v6  ;;  %v763_v58 = vrot.slane %v5835_v17, 5  ;;  %v4517_v21 = vld [vmem:[%s5700_s8 + $0x30] sm:$0xf] }
  0xbb   : > { %v3384_v11 = vpop.f32.mrf.mxu1  ;;  %v981_v9 = vshrl.u32 %v4517_v21, 16  ;;  %v979_v14 = vsel %vm5741_vm2, %v974_v60, %v978_v61  ;;  %v1379_v61 = vrot.slane %v6121_v4, 5  ;;  %v5297_v4 = vld [vmem:[%s7187_s1 + $0x1e8] sm:$0xff] }
  0xbc   : > { %v6101_v19 = vadd.f32 %v3384_v11, %v3296_v10  ;;  %v764_v17 = vsel %vm6036_vm5, %v762_v51, %v763_v58  ;;  %v984_v10 = vshll.u32 %v4517_v21, 16  ;;  %v2373_v30 = vunpack.c.l.b16 %v979_v14  ;;  %3909 = vmatpush.bf16.msra.mxu3 %v5297_v4 }
  0xbd   : > { %v2229_v26 = vunpack.c.l.b16 %v764_v17  ;;  %v1000_v58 = vshll.u32 %v4546_v41, 16  ;;  %v4498_v21 = vrot.slane %v680_v48, 9  ;;  %v4519_v17 = vld [vmem:[%s5700_s8 + $0x3c] sm:$0xf]  ;;  %v1382_v14 = vrot.slane %v4546_v41, 5 }
  0xbe   : > { %v2402_v47 = vpack.c.b16 %v2373_v30, %v2372_v27  ;;  %v1005_v22 = vshrl.u32 %v4519_v17, 16 }
  0xbf   : > { %v3335_v31 = vpop.f32.mrf.mxu2  ;;  %v1002_v7 = vrot.slane %v1000_v58, 5  ;;  %v4547_v58 = vld [vmem:[%s5700_s8 + $0x44] sm:$0x1] }
  0xc0   : > { %v3424_v32 = vpop.f32.mrf.mxu3  ;;  %v3336_v36 = vadd.f32 %v6063_v29, %v3335_v31  ;;  %v983_v31 = vrot.slane %v981_v9, 4 }
  0xc1   : > { %v3298_v45 = vpop.f32.mrf.mxu0 }
  0xc2   : > { %v6111_v43 = vadd.f32 %v3424_v32, %v3336_v36  ;;  %v3299_v49 = vadd.f32 %v6063_v29, %v3298_v45  ;;  %v986_v32 = vrot.slane %v984_v10, 5  ;;  %v2437_v36 = vunpack.c.l.b16 %v1376_v23 }
  0xc3   : > { %v3387_v50 = vpop.f32.mrf.mxu1  ;;  %v2258_v45 = vpack.c.b16 %v2229_v26, %v2228_v24  ;;  %v1008_v23 = vshll.u32 %v4519_v17, 16 }
  0xc4   : > { %3475 = vmatmul.bf16.gmra.mxu2 %v2257_v37  ;;  %v6116_v57 = vadd.f32 %v3387_v50, %v3299_v49  ;;  %3653 = vmatmul.bf16.gmra.mxu0 %v2401_v39  ;;  %v992_v37 = vrot.slane %v990_v15, 5  ;;  %v767_v49 = vrot.slane %v5851_v34, 5  ;;  %v987_v50 = vor.u32 %v986_v32, %v983_v31  ;;  %v5289_v34 = vld [vmem:[%s7187_s1 + $0x1a8] sm:$0xff]  ;;  %v6164_v15 = vld [vmem:[%s5700_s8 + $0x40] sm:$0xf] }
  0xc5   : > { %3564 = vmatmul.bf16.gmra.mxu3 %v5205_v38  ;;  %v996_v38 = vrot.slane %v994_v16, 4  ;;  %v2466_v56 = vpack.c.b16 %v2437_v36, %v2436_v35  ;;  %3820 = vmatpush.bf16.msra.mxu2 %v5289_v34  ;;  %v1014_v30 = vshll.u32 %v6164_v15, 16  ;;  %v1018_v31 = vshrl.u32 %v6164_v15, 16 }
  0xc6   : > { %3742 = vmatmul.bf16.gmra.mxu1 %v2465_v46  ;;  %v5206_v46 = vld [vmem:[%s5700_s8 + $0x24] sm:$0xff]  ;;  %v769_v3 = vrot.slane %v767_v49, 4  ;;  %v988_v25 = vrot.slane %v987_v50, 4  ;;  %v768_v16 = vsel %vm6036_vm5, %v4498_v21, %v767_v49  ;;  %v774_v34 = vrot.slane %v5884_v33, 5 }
  0xc7   : > { %v3338_v63 = vpop.f32.mrf.mxu2  ;;  %v997_v51 = vor.u32 %v996_v38, %v992_v37  ;;  %v2230_v38 = vunpack.c.l.b16 %v768_v16  ;;  %v1016_v50 = vrot.slane %v1014_v30, 5  ;;  %v1389_v30 = vrot.slane %v4547_v58, 5 }
  0xc8   : > { %v3427_v1 = vpop.f32.mrf.mxu3  ;;  %v3339_v6 = vadd.f32 %v6063_v29, %v3338_v63  ;;  %v4562_v63 = vld [vmem:[%s5700_s8 + $0x30] sm:$0xe]  ;;  %v776_v33 = vrot.slane %v774_v34, 4 }
  0xc9   : > { %v3300_v12 = vpop.f32.mrf.mxu0  ;;  %v4578_v10 = vrot.slane %v4562_v63, 9  ;;  %v681_v63 = vld [vmem:[%s5700_s8 + $0x30] sm:$0xe] }
  0xca   : > { %v6130_v11 = vadd.f32 %v3427_v1, %v3339_v6  ;;  %v3301_v18 = vadd.f32 %v6063_v29, %v3300_v12  ;;  %v998_v6 = vrot.slane %v997_v51, 4  ;;  %v1381_v12 = vrot.slane %v1379_v61, 4 }
  0xcb   : > { %v3389_v20 = vpop.f32.mrf.mxu1  ;;  %v1380_v36 = vsel %vm6036_vm5, %v4578_v10, %v1379_v61  ;;  %v5207_v61 = vld [vmem:[%s5700_s8 + $0x30] sm:$0xff]  ;;  %v4499_v10 = vrot.slane %v681_v63, 9 }
  0xcc   : > { %v6141_v28 = vadd.f32 %v3389_v20, %v3301_v18  ;;  %v771_v18 = vsel %vm6036_vm5, %v769_v3, %v770_v62  ;;  %v993_v20 = vsel %vm5741_vm2, %v988_v25, %v992_v37  ;;  %v1003_v27 = vsel %vm5741_vm2, %v998_v6, %v1002_v7 }
  0xcd   : > { %v1383_v37 = vsel %vm6036_vm5, %v1381_v12, %v1382_v14  ;;  %v2438_v48 = vunpack.c.l.b16 %v1380_v36  ;;  %v1024_v7 = vshll.u32 %v4547_v58, 16  ;;  %v4563_v12 = vld [vmem:[%s5700_s8 + $0x3c] sm:$0xe] }
  0xce   : > { %v2439_v49 = vunpack.c.l.b16 %v1383_v37 }
  0xcf   : > { %v3340_v39 = vpop.f32.mrf.mxu2 }
  0xd0   : > { %v3429_v40 = vpop.f32.mrf.mxu3  ;;  %v3341_v42 = vadd.f32 %v6063_v29, %v3340_v39  ;;  %v2231_v39 = vunpack.c.l.b16 %v771_v18  ;;  %v2467_v4 = vpack.c.b16 %v2439_v49, %v2438_v48 }
  0xd1   : > { %v3303_v55 = vpop.f32.mrf.mxu0 }
  0xd2   : > { %v6148_v53 = vadd.f32 %v3429_v40, %v3341_v42  ;;  %v3304_v59 = vadd.f32 %v6063_v29, %v3303_v55  ;;  %v2374_v40 = vunpack.c.l.b16 %v993_v20  ;;  %v2375_v42 = vunpack.c.l.b16 %v1003_v27 }
  0xd3   : > { %v3392_v60 = vpop.f32.mrf.mxu1  ;;  %v1020_v55 = vrot.slane %v1018_v31, 4  ;;  %v1026_v20 = vrot.slane %v1024_v7, 5  ;;  %v4579_v27 = vrot.slane %v4563_v12, 9  ;;  %v6204_v31 = vld [vmem:[%s5700_s8 + $0x4c] sm:$0xf] }
  0xd4   : > { %3480 = vmatmul.bf16.gmra.mxu2 %v2258_v45  ;;  %v6156_v1 = vadd.f32 %v3392_v60, %v3304_v59  ;;  %3658 = vmatmul.bf16.gmra.mxu0 %v2402_v47  ;;  %v1007_v45 = vrot.slane %v1005_v22, 4  ;;  %v5305_v47 = vld [vmem:[%s7187_s1 + $0x228] sm:$0xff]  ;;  %v2259_v60 = vpack.c.b16 %v2231_v39, %v2230_v38  ;;  %v2403_v21 = vpack.c.b16 %v2375_v42, %v2374_v40  ;;  %v5488_v12 = vld [vmem:[%s5700_s8 + $0x40] sm:$0xf] }
  0xd5   : > { %3569 = vmatmul.bf16.gmra.mxu3 %v5206_v46  ;;  %v1010_v46 = vrot.slane %v1008_v23, 5  ;;  %3998 = vmatpush.bf16.msra.mxu0 %v5305_v47  ;;  %v1021_v6 = vor.u32 %v1020_v55, %v1016_v50  ;;  %v4521_v22 = vld [vmem:[%s5700_s8 + $0x48] sm:$0xf] }
  0xd6   : > { %3747 = vmatmul.bf16.gmra.mxu1 %v2466_v56  ;;  %v1029_v37 = vshrl.u32 %v4521_v22, 16  ;;  %v1032_v38 = vshll.u32 %v4521_v22, 16 }
  0xd7   : > { %v3343_v8 = vpop.f32.mrf.mxu2  ;;  %v1011_v3 = vor.u32 %v1010_v46, %v1007_v45  ;;  %v1022_v18 = vrot.slane %v1021_v6, 4  ;;  %v1038_v45 = vshll.u32 %v6204_v31, 16  ;;  %v1042_v46 = vshrl.u32 %v6204_v31, 16  ;;  %v4548_v6 = vld [vmem:[%s5700_s8 + $0x50] sm:$0x1] }
  0xd8   : > { %v3432_v9 = vpop.f32.mrf.mxu3  ;;  %v3344_v2 = vadd.f32 %v6063_v29, %v3343_v8 }
  0xd9   : > { %v3305_v26 = vpop.f32.mrf.mxu0  ;;  %v1012_v16 = vrot.slane %v1011_v3, 4  ;;  %v1027_v42 = vsel %vm5741_vm2, %v1022_v18, %v1026_v20  ;;  %v1044_v3 = vrot.slane %v1042_v46, 4 }
  0xda   : > { %v6173_v24 = vadd.f32 %v3432_v9, %v3344_v2  ;;  %v3306_v32 = vadd.f32 %v6063_v29, %v3305_v26  ;;  %v1386_v9 = vrot.slane %v6164_v15, 5  ;;  %v777_v2 = vrot.slane %v5899_v0, 5 }
  0xdb   : > { %v3394_v35 = vpop.f32.mrf.mxu1  ;;  %v1017_v36 = vsel %vm5741_vm2, %v1012_v16, %v1016_v50 }
  0xdc   : > { %v6184_v41 = vadd.f32 %v3394_v35, %v3306_v32  ;;  %v1388_v15 = vrot.slane %v1386_v9, 4  ;;  %v775_v35 = vsel %vm6036_vm5, %v4499_v10, %v774_v34  ;;  %v778_v0 = vsel %vm6036_vm5, %v776_v33, %v777_v2  ;;  %v682_v10 = vld [vmem:[%s5700_s8 + $0x3c] sm:$0xe] }
  0xdd   : > { %v1387_v49 = vsel %vm6036_vm5, %v4579_v27, %v1386_v9  ;;  %v2232_v55 = vunpack.c.l.b16 %v775_v35  ;;  %v1040_v34 = vrot.slane %v1038_v45, 5  ;;  %v781_v33 = vrot.slane %v5488_v12, 5  ;;  %v5288_v35 = vld [vmem:[%s7187_s1 + $0x1a0] sm:$0xff]  ;;  %v4523_v45 = vld [vmem:[%s5700_s8 + $0x54] sm:$0xf] }
  0xde   : > { %v1390_v50 = vsel %vm6036_vm5, %v1388_v15, %v1389_v30  ;;  %v1393_v15 = vrot.slane %v6204_v31, 5  ;;  %v4500_v30 = vrot.slane %v682_v10, 9  ;;  %v5296_v31 = vld [vmem:[%s7187_s1 + $0x1e0] sm:$0xff]  ;;  %3821 = vmatpush.bf16.msra.mxu2 %v5288_v35 }
  0xdf   : > { %v3345_v56 = vpop.f32.mrf.mxu2  ;;  %v2441_v63 = vunpack.c.l.b16 %v1390_v50  ;;  %v1045_v22 = vor.u32 %v1044_v3, %v1040_v34  ;;  %v1396_v50 = vrot.slane %v4548_v6, 5  ;;  %3910 = vmatpush.bf16.msra.mxu3 %v5296_v31  ;;  %v683_v31 = vld [vmem:[%s5700_s8 + $0x48] sm:$0xe] }
  0xe0   : > { %v3434_v51 = vpop.f32.mrf.mxu3  ;;  %v3346_v59 = vadd.f32 %v6063_v29, %v3345_v56  ;;  %v2233_v56 = vunpack.c.l.b16 %v778_v0 }
  0xe1   : > { %v3308_v25 = vpop.f32.mrf.mxu0 }
  0xe2   : > { %v6194_v62 = vadd.f32 %v3434_v51, %v3346_v59  ;;  %v3309_v17 = vadd.f32 %v6063_v29, %v3308_v25  ;;  %v2376_v51 = vunpack.c.l.b16 %v1017_v36  ;;  %v2377_v59 = vunpack.c.l.b16 %v1027_v42 }
  0xe3   : > { %v3397_v8 = vpop.f32.mrf.mxu1  ;;  %v783_v36 = vrot.slane %v781_v33, 4 }
  0xe4   : > { %3485 = vmatmul.bf16.gmra.mxu2 %v2259_v60  ;;  %v6199_v14 = vadd.f32 %v3397_v8, %v3309_v17  ;;  %3663 = vmatmul.bf16.gmra.mxu0 %v2403_v21  ;;  %v1031_v60 = vrot.slane %v1029_v37, 4  ;;  %v2440_v21 = vunpack.c.l.b16 %v1387_v49  ;;  %v2260_v17 = vpack.c.b16 %v2233_v56, %v2232_v55  ;;  %v5208_v8 = vld [vmem:[%s5700_s8 + $0x3c] sm:$0xff]  ;;  %v6247_v55 = vld [vmem:[%s5700_s8 + $0x58] sm:$0xf] }
  0xe5   : > { %3574 = vmatmul.bf16.gmra.mxu3 %v5207_v61  ;;  %v1034_v61 = vrot.slane %v1032_v38, 5  ;;  %v2404_v9 = vpack.c.b16 %v2377_v59, %v2376_v51  ;;  %v784_v37 = vrot.slane %v5926_v54, 5  ;;  %v1395_v49 = vrot.slane %v1393_v15, 4 }
  0xe6   : > { %3752 = vmatmul.bf16.gmra.mxu1 %v2467_v4  ;;  %v2468_v20 = vpack.c.b16 %v2441_v63, %v2440_v21  ;;  %v782_v56 = vsel %vm6036_vm5, %v4500_v30, %v781_v33 }
  0xe7   : > { %v3348_v23 = vpop.f32.mrf.mxu2  ;;  %v1035_v2 = vor.u32 %v1034_v61, %v1031_v60  ;;  %v785_v51 = vsel %vm6036_vm5, %v783_v36, %v784_v37  ;;  %v1053_v60 = vshrl.u32 %v4523_v45, 16  ;;  %v1056_v61 = vshll.u32 %v4523_v45, 16  ;;  %v5209_v37 = vld [vmem:[%s5700_s8 + $0x48] sm:$0xff] }
  0xe8   : > { %v3437_v26 = vpop.f32.mrf.mxu3  ;;  %v3349_v32 = vadd.f32 %v6063_v29, %v3348_v23  ;;  %v1048_v23 = vshll.u32 %v4548_v6, 16 }
  0xe9   : > { %v3310_v40 = vpop.f32.mrf.mxu0  ;;  %v1036_v38 = vrot.slane %v1035_v2, 4  ;;  %v1055_v2 = vrot.slane %v1053_v60, 4  ;;  %v4565_v60 = vld [vmem:[%s5700_s8 + $0x54] sm:$0xe] }
  0xea   : > { %v6213_v39 = vadd.f32 %v3437_v26, %v3349_v32  ;;  %v3311_v47 = vadd.f32 %v6063_v29, %v3310_v40  ;;  %v4564_v32 = vld [vmem:[%s5700_s8 + $0x48] sm:$0xe]  ;;  %v1046_v40 = vrot.slane %v1045_v22, 4  ;;  %v1050_v42 = vrot.slane %v1048_v23, 5 }
  0xeb   : > { %v3399_v48 = vpop.f32.mrf.mxu1  ;;  %v1041_v59 = vsel %vm5741_vm2, %v1036_v38, %v1040_v34  ;;  %v1397_v34 = vsel %vm6036_vm5, %v1395_v49, %v1396_v50 }
  0xec   : > { %v6224_v58 = vadd.f32 %v3399_v48, %v3311_v47  ;;  %v4580_v48 = vrot.slane %v4564_v32, 9  ;;  %v1051_v3 = vsel %vm5741_vm2, %v1046_v40, %v1050_v42  ;;  %v2378_v10 = vunpack.c.l.b16 %v1041_v59  ;;  %v4549_v32 = vld [vmem:[%s5700_s8 + $0x5c] sm:$0x1]  ;;  %v5489_v40 = vld [vmem:[%s5700_s8 + $0x4c] sm:$0xf] }
  0xed   : > { %v2379_v33 = vunpack.c.l.b16 %v1051_v3  ;;  %v2443_v23 = vunpack.c.l.b16 %v1397_v34  ;;  %v788_v42 = vrot.slane %v5489_v40, 5  ;;  %v1072_v50 = vshll.u32 %v4549_v32, 16  ;;  %v5490_v3 = vld [vmem:[%s5700_s8 + $0x50] sm:$0x1] }
  0xee   : > { %v4501_v59 = vrot.slane %v683_v31, 9 }
  0xef   : > { %v3350_v25 = vpop.f32.mrf.mxu2  ;;  %v2405_v38 = vpack.c.b16 %v2379_v33, %v2378_v10  ;;  %v1403_v10 = vrot.slane %v4549_v32, 5  ;;  %v6287_v33 = vld [vmem:[%s5700_s8 + $0x64] sm:$0xf] }
  0xf0   : > { %v3439_v4 = vpop.f32.mrf.mxu3  ;;  %v3351_v7 = vadd.f32 %v6063_v29, %v3350_v25  ;;  %v1062_v25 = vshll.u32 %v6247_v55, 16 }
  0xf1   : > { %v3313_v18 = vpop.f32.mrf.mxu0 }
  0xf2   : > { %v6231_v16 = vadd.f32 %v3439_v4, %v3351_v7  ;;  %v3314_v26 = vadd.f32 %v6063_v29, %v3313_v18  ;;  %v1066_v4 = vshrl.u32 %v6247_v55, 16  ;;  %v1058_v18 = vrot.slane %v1056_v61, 5 }
  0xf3   : > { %v3402_v27 = vpop.f32.mrf.mxu1 }
  0xf4   : > { %3490 = vmatmul.bf16.gmra.mxu2 %v2260_v17  ;;  %v6239_v0 = vadd.f32 %v3402_v27, %v3314_v26  ;;  %3668 = vmatmul.bf16.gmra.mxu0 %v2404_v9  ;;  %v1394_v17 = vsel %vm6036_vm5, %v4580_v48, %v1393_v15  ;;  %v2235_v9 = vunpack.c.l.b16 %v785_v51  ;;  %v1064_v26 = vrot.slane %v1062_v25, 5 }
  0xf5   : > { %3579 = vmatmul.bf16.gmra.mxu3 %v5208_v8  ;;  %v2234_v8 = vunpack.c.l.b16 %v782_v56  ;;  %v2442_v22 = vunpack.c.l.b16 %v1394_v17  ;;  %v1068_v27 = vrot.slane %v1066_v4, 4  ;;  %v1059_v45 = vor.u32 %v1058_v18, %v1055_v2  ;;  %v4525_v17 = vld [vmem:[%s5700_s8 + $0x60] sm:$0xf] }
  0xf6   : > { %3757 = vmatmul.bf16.gmra.mxu1 %v2468_v20  ;;  %v5304_v20 = vld [vmem:[%s7187_s1 + $0x220] sm:$0xff]  ;;  %v1400_v51 = vrot.slane %v6247_v55, 5  ;;  %v791_v25 = vrot.slane %v5490_v3, 5  ;;  %v789_v18 = vsel %vm6036_vm5, %v4501_v59, %v788_v42  ;;  %v4550_v3 = vld [vmem:[%s5700_s8 + $0x68] sm:$0x1] }
  0xf7   : > { %v3353_v46 = vpop.f32.mrf.mxu2  ;;  %3999 = vmatpush.bf16.msra.mxu0 %v5304_v20  ;;  %v2261_v36 = vpack.c.b16 %v2235_v9, %v2234_v8  ;;  %v2469_v48 = vpack.c.b16 %v2443_v23, %v2442_v22  ;;  %v1069_v49 = vor.u32 %v1068_v27, %v1064_v26  ;;  %v1060_v4 = vrot.slane %v1059_v45, 4 }
  0xf8   : > { %v3442_v47 = vpop.f32.mrf.mxu3  ;;  %v3354_v54 = vadd.f32 %v6063_v29, %v3353_v46  ;;  %v4581_v9 = vrot.slane %v4565_v60, 9  ;;  %v1402_v55 = vrot.slane %v1400_v51, 4  ;;  %v1077_v23 = vshrl.u32 %v4525_v17, 16 }
  0xf9   : > { %v3315_v63 = vpop.f32.mrf.mxu0  ;;  %v1065_v22 = vsel %vm5741_vm2, %v1060_v4, %v1064_v26  ;;  %v1080_v27 = vshll.u32 %v4525_v17, 16  ;;  %v2236_v40 = vunpack.c.l.b16 %v789_v18  ;;  %v684_v17 = vld [vmem:[%s5700_s8 + $0x54] sm:$0xe] }
  0xfa   : > { %v6256_v21 = vadd.f32 %v3442_v47, %v3354_v54  ;;  %v3316_v6 = vadd.f32 %v6063_v29, %v3315_v63  ;;  %v790_v63 = vrot.slane %v788_v42, 4  ;;  %v1401_v31 = vsel %vm6036_vm5, %v4581_v9, %v1400_v51 }
  0xfb   : > { %v3404_v7 = vpop.f32.mrf.mxu1  ;;  %v1404_v26 = vsel %vm6036_vm5, %v1402_v55, %v1403_v10  ;;  %v2380_v45 = vunpack.c.l.b16 %v1065_v22 }
  0xfc   : > { %v6267_v12 = vadd.f32 %v3404_v7, %v3316_v6  ;;  %v1070_v6 = vrot.slane %v1069_v49, 4  ;;  %v1074_v7 = vrot.slane %v1072_v50, 5  ;;  %v792_v20 = vsel %vm6036_vm5, %v790_v63, %v791_v25 }
  0xfd   : > { %v2237_v42 = vunpack.c.l.b16 %v792_v20  ;;  %v1079_v49 = vrot.slane %v1077_v23, 4  ;;  %v1082_v50 = vrot.slane %v1080_v27, 5  ;;  %v1096_v20 = vshll.u32 %v4550_v3, 16 }
  0xfe   : > { %v1075_v32 = vsel %vm5741_vm2, %v1070_v6, %v1074_v7  ;;  %v5210_v6 = vld [vmem:[%s5700_s8 + $0x54] sm:$0xff]  ;;  %v1407_v27 = vrot.slane %v6287_v33, 5 }
  0xff   : > { %v3355_v15 = vpop.f32.mrf.mxu2  ;;  %v2262_v4 = vpack.c.b16 %v2237_v42, %v2236_v40  ;;  %v1083_v9 = vor.u32 %v1082_v50, %v1079_v49  ;;  %v1098_v42 = vrot.slane %v1096_v20, 5 }
 0x100   : > { %v3444_v30 = vpop.f32.mrf.mxu3  ;;  %v3356_v35 = vadd.f32 %v6063_v29, %v3355_v15 }
 0x101   : > { %v3318_v47 = vpop.f32.mrf.mxu0 }
 0x102   : > { %v6277_v46 = vadd.f32 %v3444_v30, %v3356_v35  ;;  %v3319_v54 = vadd.f32 %v6063_v29, %v3318_v47  ;;  %v1086_v35 = vshll.u32 %v6287_v33, 16 }
 0x103   : > { %v3407_v56 = vpop.f32.mrf.mxu1 }
 0x104   : > { %3495 = vmatmul.bf16.gmra.mxu2 %v2261_v36  ;;  %v6282_v61 = vadd.f32 %v3407_v56, %v3319_v54  ;;  %3673 = vmatmul.bf16.gmra.mxu0 %v2405_v38  ;;  %v1090_v36 = vshrl.u32 %v6287_v33, 16  ;;  %v2444_v54 = vunpack.c.l.b16 %v1401_v31  ;;  %v2445_v56 = vunpack.c.l.b16 %v1404_v26  ;;  %v5295_v33 = vld [vmem:[%s7187_s1 + $0x1d8] sm:$0xff] }
 0x105   : > { %3584 = vmatmul.bf16.gmra.mxu3 %v5209_v37  ;;  %v1088_v59 = vrot.slane %v1086_v35, 5  ;;  %v5287_v35 = vld [vmem:[%s7187_s1 + $0x198] sm:$0xff]  ;;  %v1084_v26 = vrot.slane %v1083_v9, 4 }
 0x106   : > { %3762 = vmatmul.bf16.gmra.mxu1 %v2469_v48  ;;  %v2381_v48 = vunpack.c.l.b16 %v1075_v32  ;;  %v1092_v60 = vrot.slane %v1090_v36, 4  ;;  %v4566_v32 = vld [vmem:[%s5700_s8 + $0x60] sm:$0xe]  ;;  %3822 = vmatpush.bf16.msra.mxu2 %v5287_v35 }
 0x107   : > { %v3358_v34 = vpop.f32.mrf.mxu2  ;;  %v4582_v50 = vrot.slane %v4566_v32, 9  ;;  %3911 = vmatpush.bf16.msra.mxu3 %v5295_v33 }
 0x108   : > { %v3447_v8 = vpop.f32.mrf.mxu3  ;;  %v3359_v2 = vadd.f32 %v6063_v29, %v3358_v34  ;;  %v2406_v7 = vpack.c.b16 %v2381_v48, %v2380_v45  ;;  %v5491_v34 = vld [vmem:[%s5700_s8 + $0x58] sm:$0xf]  ;;  %v1093_v18 = vor.u32 %v1092_v60, %v1088_v59  ;;  %v4527_v45 = vld [vmem:[%s5700_s8 + $0x6c] sm:$0xf]  ;;  %v6330_v60 = vld [vmem:[%s5700_s8 + $0x70] sm:$0xf] }
 0x109   : > { %v3320_v30 = vpop.f32.mrf.mxu0  ;;  %v1110_v9 = vshll.u32 %v6330_v60, 16 }
 0x10a   : > { %v6296_v15 = vadd.f32 %v3447_v8, %v3359_v2  ;;  %v3321_v37 = vadd.f32 %v6063_v29, %v3320_v30  ;;  %v795_v8 = vrot.slane %v5491_v34, 5  ;;  %v2470_v2 = vpack.c.b16 %v2445_v56, %v2444_v54 }
 0x10b   : > { %v3409_v38 = vpop.f32.mrf.mxu1  ;;  %v4502_v30 = vrot.slane %v684_v17, 9  ;;  %v1094_v40 = vrot.slane %v1093_v18, 4  ;;  %v1409_v54 = vrot.slane %v1407_v27, 4  ;;  %v1410_v56 = vrot.slane %v4550_v3, 5 }
 0x10c   : > { %v6307_v47 = vadd.f32 %v3409_v38, %v3321_v37  ;;  %v797_v37 = vrot.slane %v795_v8, 4  ;;  %v5492_v38 = vld [vmem:[%s5700_s8 + $0x5c] sm:$0x1]  ;;  %v1408_v18 = vsel %vm6036_vm5, %v4582_v50, %v1407_v27  ;;  %v5211_v50 = vld [vmem:[%s5700_s8 + $0x60] sm:$0xff] }
 0x10d   : > { %v798_v31 = vrot.slane %v5492_v38, 5  ;;  %v1099_v3 = vsel %vm5741_vm2, %v1094_v40, %v1098_v42  ;;  %v2446_v38 = vunpack.c.l.b16 %v1408_v18  ;;  %v5303_v27 = vld [vmem:[%s7187_s1 + $0x218] sm:$0xff]  ;;  %v4567_v18 = vld [vmem:[%s5700_s8 + $0x6c] sm:$0xe] }
 0x10e   : > { %v2383_v32 = vunpack.c.l.b16 %v1099_v3  ;;  %4000 = vmatpush.bf16.msra.mxu0 %v5303_v27 }
 0x10f   : > { %v3360_v63 = vpop.f32.mrf.mxu2 }
 0x110   : > { %v3449_v51 = vpop.f32.mrf.mxu3  ;;  %v3361_v25 = vadd.f32 %v6063_v29, %v3360_v63 }
 0x111   : > { %v3323_v10 = vpop.f32.mrf.mxu0 }
 0x112   : > { %v6314_v55 = vadd.f32 %v3449_v51, %v3361_v25  ;;  %v3324_v22 = vadd.f32 %v6063_v29, %v3323_v10  ;;  %v796_v51 = vsel %vm6036_vm5, %v4502_v30, %v795_v8  ;;  %v799_v25 = vsel %vm6036_vm5, %v797_v37, %v798_v31 }
 0x113   : > { %v3412_v23 = vpop.f32.mrf.mxu1  ;;  %v1114_v10 = vshrl.u32 %v6330_v60, 16  ;;  %v2238_v20 = vunpack.c.l.b16 %v796_v51 }
 0x114   : > { %3500 = vmatmul.bf16.gmra.mxu2 %v2262_v4  ;;  %v6322_v36 = vadd.f32 %v3412_v23, %v3324_v22  ;;  %3678 = vmatmul.bf16.gmra.mxu0 %v2406_v7  ;;  %v1089_v4 = vsel %vm5741_vm2, %v1084_v26, %v1088_v59  ;;  %v1104_v7 = vshll.u32 %v4527_v45, 16  ;;  %v1411_v59 = vsel %vm6036_vm5, %v1409_v54, %v1410_v56  ;;  %v685_v56 = vld [vmem:[%s5700_s8 + $0x60] sm:$0xe] }
 0x115   : > { %3589 = vmatmul.bf16.gmra.mxu3 %v5210_v6  ;;  %v1101_v6 = vshrl.u32 %v4527_v45, 16  ;;  %v2239_v22 = vunpack.c.l.b16 %v799_v25  ;;  %v2382_v23 = vunpack.c.l.b16 %v1089_v4  ;;  %v2447_v31 = vunpack.c.l.b16 %v1411_v59  ;;  %v4551_v45 = vld [vmem:[%s5700_s8 + $0x74] sm:$0x1] }
 0x116   : > { %3767 = vmatmul.bf16.gmra.mxu1 %v2470_v2  ;;  %v1106_v37 = vrot.slane %v1104_v7, 5  ;;  %v1112_v26 = vrot.slane %v1110_v9, 5  ;;  %v1116_v33 = vrot.slane %v1114_v10, 4  ;;  %v1120_v3 = vshll.u32 %v4551_v45, 16 }
 0x117   : > { %v3363_v48 = vpop.f32.mrf.mxu2  ;;  %v1103_v35 = vrot.slane %v1101_v6, 4  ;;  %v2407_v54 = vpack.c.b16 %v2383_v32, %v2382_v23  ;;  %v2471_v7 = vpack.c.b16 %v2447_v31, %v2446_v38  ;;  %v6370_v31 = vld [vmem:[%s5700_s8 + $0x7c] sm:$0xf] }
 0x118   : > { %v3452_v49 = vpop.f32.mrf.mxu3  ;;  %v3364_v63 = vadd.f32 %v6063_v29, %v3363_v48  ;;  %v1122_v38 = vrot.slane %v1120_v3, 5 }
 0x119   : > { %v3325_v34 = vpop.f32.mrf.mxu0  ;;  %v1107_v25 = vor.u32 %v1106_v37, %v1103_v35  ;;  %v4529_v35 = vld [vmem:[%s5700_s8 + $0x78] sm:$0xf] }
 0x11a   : > { %v6339_v17 = vadd.f32 %v3452_v49, %v3364_v63  ;;  %v3326_v8 = vadd.f32 %v6063_v29, %v3325_v34  ;;  %v2263_v49 = vpack.c.b16 %v2239_v22, %v2238_v20  ;;  %v5493_v63 = vld [vmem:[%s5700_s8 + $0x64] sm:$0xf]  ;;  %v1117_v34 = vor.u32 %v1116_v33, %v1112_v26  ;;  %v5494_v22 = vld [vmem:[%s5700_s8 + $0x68] sm:$0x1] }
 0x11b   : > { %v3414_v2 = vpop.f32.mrf.mxu1  ;;  %v802_v51 = vrot.slane %v5493_v63, 5  ;;  %v805_v23 = vrot.slane %v5494_v22, 5  ;;  %v1108_v32 = vrot.slane %v1107_v25, 4  ;;  %v1134_v25 = vshll.u32 %v6370_v31, 16 }
 0x11c   : > { %v6350_v30 = vadd.f32 %v3414_v2, %v3326_v8  ;;  %v1414_v8 = vrot.slane %v6330_v60, 5  ;;  %v4503_v2 = vrot.slane %v685_v56, 9  ;;  %v1118_v37 = vrot.slane %v1117_v34, 4 }
 0x11d   : > { %v804_v20 = vrot.slane %v802_v51, 4  ;;  %v4583_v60 = vrot.slane %v4567_v18, 9  ;;  %v1113_v63 = vsel %vm5741_vm2, %v1108_v32, %v1112_v26 }
 0x11e   : > { %v1123_v34 = vsel %vm5741_vm2, %v1118_v37, %v1122_v38 }
 0x11f   : > { %v3365_v40 = vpop.f32.mrf.mxu2  ;;  %v806_v56 = vsel %vm6036_vm5, %v804_v20, %v805_v23  ;;  %v1415_v26 = vsel %vm6036_vm5, %v4583_v60, %v1414_v8  ;;  %v2384_v20 = vunpack.c.l.b16 %v1113_v63 }
 0x120   : > { %v3454_v42 = vpop.f32.mrf.mxu3  ;;  %v3366_v48 = vadd.f32 %v6063_v29, %v3365_v40  ;;  %v1416_v40 = vrot.slane %v1414_v8, 4  ;;  %v2241_v18 = vunpack.c.l.b16 %v806_v56  ;;  %v2448_v38 = vunpack.c.l.b16 %v1415_v26  ;;  %v4552_v8 = vld [vmem:[%s5700_s8 + $0x80] sm:$0x1] }
 0x121   : > { %v3328_v6 = vpop.f32.mrf.mxu0 }
 0x122   : > { %v6360_v4 = vadd.f32 %v3454_v42, %v3366_v48  ;;  %v3329_v9 = vadd.f32 %v6063_v29, %v3328_v6  ;;  %v1417_v42 = vrot.slane %v4551_v45, 5  ;;  %v1138_v6 = vshrl.u32 %v6370_v31, 16 }
 0x123   : > { %v3417_v10 = vpop.f32.mrf.mxu1 }
 0x124   : > { %3505 = vmatmul.bf16.gmra.mxu2 %v2263_v49  ;;  %v6365_v59 = vadd.f32 %v3417_v10, %v3329_v9  ;;  %3683 = vmatmul.bf16.gmra.mxu0 %v2407_v54  ;;  %v803_v49 = vsel %vm6036_vm5, %v4503_v2, %v802_v51  ;;  %v1128_v54 = vshll.u32 %v4529_v35, 16  ;;  %v5315_v51 = vld [vmem:[%s7189_s3 + $0x38] sm:$0xff]  ;;  %v1418_v2 = vsel %vm6036_vm5, %v1416_v40, %v1417_v42  ;;  %v5495_v40 = vld [vmem:[%s7188_s2] ss:$0 sm:$0xff] }
 0x125   : > { %3594 = vmatmul.bf16.gmra.mxu3 %v5211_v50  ;;  %v1125_v50 = vshrl.u32 %v4529_v35, 16  ;;  %v2240_v10 = vunpack.c.l.b16 %v803_v49  ;;  %4201 = vmatpush.bf16.msra.mxu1 %v5315_v51  ;;  %v2385_v35 = vunpack.c.l.b16 %v1123_v34  ;;  %v1140_v37 = vrot.slane %v1138_v6, 4  ;;  %v5212_v49 = vld [vmem:[%s5700_s8 + $0x6c] sm:$0xff] }
 0x126   : > { %3772 = vmatmul.bf16.gmra.mxu1 %v2471_v7  ;;  %v1130_v23 = vrot.slane %v1128_v54, 5 }
 0x127   : > { %v3368_v33 = vpop.f32.mrf.mxu2  ;;  %v1127_v22 = vrot.slane %v1125_v50, 4  ;;  %v5496_v50 = vld [vmem:[%s5700_s8 + $0x70] sm:$0xf]  ;;  %v2408_v63 = vpack.c.b16 %v2385_v35, %v2384_v20 }
 0x128   : > { %v3457_v27 = vpop.f32.mrf.mxu3  ;;  %v3369_v48 = vadd.f32 %v6063_v29, %v3368_v33  ;;  %v2449_v33 = vunpack.c.l.b16 %v1418_v2  ;;  %v809_v54 = vrot.slane %v5496_v50, 5  ;;  %v4568_v2 = vld [vmem:[%s5700_s8 + $0x78] sm:$0xe]  ;;  %v5286_v35 = vld [vmem:[%s7187_s1 + $0x190] sm:$0xff] }
 0x129   : > { %v3330_v45 = vpop.f32.mrf.mxu0  ;;  %v1131_v56 = vor.u32 %v1130_v23, %v1127_v22  ;;  %v5497_v22 = vld [vmem:[%s5700_s8 + $0x74] sm:$0x1]  ;;  %3823 = vmatpush.bf16.msra.mxu2 %v5286_v35 }
 0x12a   : > { %v6381_v7 = vadd.f32 %v3457_v27, %v3369_v48  ;;  %v3331_v3 = vadd.f32 %v6063_v29, %v3330_v45  ;;  %v6395_v29 = vrot.slane %v1134_v25, 5  ;;  %v2264_v48 = vpack.c.b16 %v2241_v18, %v2240_v10  ;;  %v686_v25 = vld [vmem:[%s5700_s8 + $0x6c] sm:$0xe] }
 0x12b   : > { %v3419_v9 = vpop.f32.mrf.mxu1  ;;  %v1144_v45 = vshll.u32 %v4552_v8, 16  ;;  %v4504_v10 = vrot.slane %v686_v25, 9  ;;  %v811_v18 = vrot.slane %v809_v54, 4  ;;  %v812_v20 = vrot.slane %v5497_v22, 5 }
 0x12c   : > { %v6393_v32 = vadd.f32 %v3419_v9, %v3331_v3  ;;  %v1141_v6 = vor.u32 %v1140_v37, %v6395_v29  ;;  %v2472_v3 = vpack.c.b16 %v2449_v33, %v2448_v38  ;;  %v1421_v9 = vrot.slane %v6370_v31, 5  ;;  %v4531_v38 = vld [vmem:[%s5700_s8 + $0x84] sm:$0xf] }
 0x12d   : > { %v1132_v23 = vrot.slane %v1131_v56, 4  ;;  %v4584_v31 = vrot.slane %v4568_v2, 9  ;;  %v810_v56 = vsel %vm6036_vm5, %v4504_v10, %v809_v54 }
 0x12e   : > { %v1142_v37 = vrot.slane %v1141_v6, 4  ;;  %v1423_v33 = vrot.slane %v1421_v9, 4  ;;  %v1149_v6 = vshrl.u32 %v4531_v38, 16 }
 0x12f   : > { %v3370_v27 = vpop.f32.mrf.mxu2  ;;  %v1422_v54 = vsel %vm6036_vm5, %v4584_v31, %v1421_v9 }
 0x130   : > { %v3459_v60 = vpop.f32.mrf.mxu3  ;;  %v3371_v42 = vadd.f32 %v5495_v40, %v3370_v27  ;;  %v1146_v27 = vrot.slane %v1144_v45, 5  ;;  %v6415_v40 = vld [vmem:[%s5700_s8 + $0x88] sm:$0xf]  ;;  %v1152_v45 = vshll.u32 %v4531_v38, 16 }
 0x131   : > { %v3649_v51 = vpop.f32.mrf.mxu0 }
 0x132   : > { %v6405_v34 = vadd.f32 %v3459_v60, %v3371_v42  ;;  %v1424_v60 = vrot.slane %v4552_v8, 5  ;;  %v5294_v42 = vld [vmem:[%s7187_s1 + $0x1d0] sm:$0xff]  ;;  %v1137_v8 = vsel %vm5741_vm2, %v1132_v23, %v6395_v29  ;;  %v1147_v25 = vsel %vm5741_vm2, %v1142_v37, %v1146_v27 }
 0x133   : > { %v3738_v26 = vpop.f32.mrf.mxu1  ;;  %3912 = vmatpush.bf16.msra.mxu3 %v5294_v42  ;;  %v2386_v35 = vunpack.c.l.b16 %v1137_v8  ;;  %v2387_v37 = vunpack.c.l.b16 %v1147_v25  ;;  %v2450_v27 = vunpack.c.l.b16 %v1422_v54  ;;  %v1151_v42 = vrot.slane %v1149_v6, 4  ;;  %v5213_v8 = vld [vmem:[%s5700_s8 + $0x78] sm:$0xff] }
 0x134   : > { %3510 = vmatmul.bf16.gmra.mxu2 %v2264_v48  ;;  %3688 = vmatmul.bf16.gmra.mxu0 %v2408_v63  ;;  %v813_v63 = vsel %vm6036_vm5, %v811_v18, %v812_v20  ;;  %v1425_v10 = vsel %vm6036_vm5, %v1423_v33, %v1424_v60  ;;  %v1162_v18 = vshrl.u32 %v6415_v40, 16  ;;  %v2242_v20 = vunpack.c.l.b16 %v810_v56  ;;  %v687_v6 = vld [vmem:[%s5700_s8 + $0x78] sm:$0xe] }
 0x135   : > { %3599 = vmatmul.bf16.gmra.mxu3 %v5212_v49  ;;  %v2243_v23 = vunpack.c.l.b16 %v813_v63  ;;  %v2451_v38 = vunpack.c.l.b16 %v1425_v10  ;;  %v1154_v9 = vrot.slane %v1152_v45, 5  ;;  %v2409_v25 = vpack.c.b16 %v2387_v37, %v2386_v35  ;;  %v5498_v45 = vld [vmem:[%s5700_s8 + $0x7c] sm:$0xf]  ;;  %v4569_v35 = vld [vmem:[%s5700_s8 + $0x84] sm:$0xe] }
 0x136   : > { %3777 = vmatmul.bf16.gmra.mxu1 %v2472_v3  ;;  %v1158_v3 = vshll.u32 %v6415_v40, 16  ;;  %v1164_v33 = vrot.slane %v1162_v18, 4 }
 0x137   : > { %v3471_v48 = vpop.f32.mrf.mxu2  ;;  %v2265_v63 = vpack.c.b16 %v2243_v23, %v2242_v20  ;;  %v1155_v10 = vor.u32 %v1154_v9, %v1151_v42  ;;  %v4505_v23 = vrot.slane %v687_v6, 9 }
 0x138   : > { %v3560_v49 = vpop.f32.mrf.mxu3  ;;  %v3472_v50 = vadd.f32 %v3471_v48, %v6073_v52  ;;  %v6438_v31 = vrot.slane %v1158_v3, 5  ;;  %v816_v3 = vrot.slane %v5498_v45, 5 }
 0x139   : > { %v3651_v52 = vpop.f32.mrf.mxu0  ;;  %v1156_v42 = vrot.slane %v1155_v10, 4 }
 0x13a   : > { %v3561_v2 = vadd.f32 %v3560_v49, %v3472_v50  ;;  %v4553_v50 = vld [vmem:[%s5700_s8 + $0x8c] sm:$0x1]  ;;  %v1165_v18 = vor.u32 %v1164_v33, %v6438_v31  ;;  %v818_v37 = vrot.slane %v816_v3, 4 }
 0x13b   : > { %v3740_v22 = vpop.f32.mrf.mxu1 }
 0x13c   : > { %v3650_v29 = vadd.f32 %v3649_v51, %v3561_v2  ;;  %v5302_v51 = vld [vmem:[%s7187_s1 + $0x210] sm:$0xff]  ;;  %v1166_v9 = vrot.slane %v1165_v18, 4 }
 0x13d   : > { %4001 = vmatpush.bf16.msra.mxu0 %v5302_v51  ;;  %v4533_v51 = vld [vmem:[%s5700_s8 + $0x90] sm:$0xf] }
 0x13e   : > { %v6436_v48 = vadd.f32 %v3738_v26, %v3650_v29  ;;  %v2473_v26 = vpack.c.b16 %v2451_v38, %v2450_v27  ;;  %v1168_v29 = vshll.u32 %v4553_v50, 16  ;;  %v5499_v27 = vld [vmem:[%s5700_s8 + $0x80] sm:$0x1]  ;;  %v1173_v45 = vshrl.u32 %v4533_v51, 16 }
 0x13f   : > { %v3473_v60 = vpop.f32.mrf.mxu2  ;;  %v819_v38 = vrot.slane %v5499_v27, 5 }
 0x140   : > { %7198 = vst [vmem:[#allocation5_spill] sm:$0xff] %v6436_v48  ;;  %v3562_v49 = vpop.f32.mrf.mxu3  ;;  %v3474_v56 = vadd.f32 %v3473_v60, %v6101_v19  ;;  %v1428_v19 = vrot.slane %v6415_v40, 5  ;;  %v1170_v33 = vrot.slane %v1168_v29, 5 }
 0x141   : > { %v3654_v54 = vpop.f32.mrf.mxu0 }
 0x142   : > { %v3563_v2 = vadd.f32 %v3562_v49, %v3474_v56  ;;  %v6456_v49 = vld [vmem:[%s5700_s8 + $0x94] sm:$0xf] }
 0x143   : > { %v3743_v48 = vpop.f32.mrf.mxu1  ;;  %v1186_v10 = vshrl.u32 %v6456_v49, 16 }
 0x144   : > { %3515 = vmatmul.bf16.gmra.mxu2 %v2265_v63  ;;  %v3652_v20 = vadd.f32 %v3651_v52, %v3563_v2  ;;  %3693 = vmatmul.bf16.gmra.mxu0 %v2409_v25  ;;  %v4585_v63 = vrot.slane %v4569_v35, 9  ;;  %v1431_v52 = vrot.slane %v4553_v50, 5  ;;  %v817_v25 = vsel %vm6036_vm5, %v4505_v23, %v816_v3  ;;  %v5314_v3 = vld [vmem:[%s7189_s3 + $0x30] sm:$0xff] }
 0x145   : > { %3604 = vmatmul.bf16.gmra.mxu3 %v5213_v8  ;;  %v1430_v8 = vrot.slane %v1428_v19, 4  ;;  %v1176_v2 = vshll.u32 %v4533_v51, 16  ;;  %v1161_v50 = vsel %vm5741_vm2, %v1156_v42, %v6438_v31  ;;  %v1175_v31 = vrot.slane %v1173_v45, 4  ;;  %4202 = vmatpush.bf16.msra.mxu1 %v5314_v3  ;;  %v5214_v45 = vld [vmem:[%s5700_s8 + $0x84] sm:$0xff] }
 0x146   : > { %v6453_v60 = vadd.f32 %v3740_v22, %v3652_v20  ;;  %3782 = vmatmul.bf16.gmra.mxu1 %v2473_v26  ;;  %v820_v22 = vsel %vm6036_vm5, %v818_v37, %v819_v38  ;;  %v1182_v26 = vshll.u32 %v6456_v49, 16  ;;  %v2244_v20 = vunpack.c.l.b16 %v817_v25 }
 0x147   : > { %v3476_v40 = vpop.f32.mrf.mxu2  ;;  %v1429_v35 = vsel %vm6036_vm5, %v4585_v63, %v1428_v19  ;;  %v1432_v37 = vsel %vm6036_vm5, %v1430_v8, %v1431_v52  ;;  %v2245_v38 = vunpack.c.l.b16 %v820_v22  ;;  %v1178_v51 = vrot.slane %v1176_v2, 5  ;;  %v4554_v63 = vld [vmem:[%s5700_s8 + $0x98] sm:$0x1]  ;;  %v688_v2 = vld [vmem:[%s5700_s8 + $0x84] sm:$0xe] }
 0x148   : > { %v3565_v56 = vpop.f32.mrf.mxu3  ;;  %v3477_v6 = vadd.f32 %v3476_v40, %v6116_v57  ;;  %v1171_v57 = vsel %vm5741_vm2, %v1166_v9, %v1170_v33  ;;  %v2388_v42 = vunpack.c.l.b16 %v1161_v50  ;;  %v6477_v33 = vrot.slane %v1182_v26, 5  ;;  %v5500_v22 = vld [vmem:[%s5700_s8 + $0x88] sm:$0xf] }
 0x149   : > { %v3656_v29 = vpop.f32.mrf.mxu0  ;;  %v2389_v9 = vunpack.c.l.b16 %v1171_v57  ;;  %v1188_v40 = vrot.slane %v1186_v10, 4  ;;  %v2453_v19 = vunpack.c.l.b16 %v1432_v37  ;;  %v2266_v52 = vpack.c.b16 %v2245_v38, %v2244_v20 }
 0x14a   : > { %v3566_v18 = vadd.f32 %v3565_v56, %v3477_v6  ;;  %v2452_v6 = vunpack.c.l.b16 %v1429_v35  ;;  %v1179_v50 = vor.u32 %v1178_v51, %v1175_v31  ;;  %v1435_v37 = vrot.slane %v6456_v49, 5 }
 0x14b   : > { %v3745_v23 = vpop.f32.mrf.mxu1  ;;  %v2410_v26 = vpack.c.b16 %v2389_v9, %v2388_v42  ;;  %v1189_v10 = vor.u32 %v1188_v40, %v6477_v33  ;;  %v5285_v42 = vld [vmem:[%s7187_s1 + $0x188] sm:$0xff] }
 0x14c   : > { %v3655_v27 = vadd.f32 %v3654_v54, %v3566_v18  ;;  %v823_v18 = vrot.slane %v5500_v22, 5  ;;  %v2474_v35 = vpack.c.b16 %v2453_v19, %v2452_v6  ;;  %v5501_v22 = vld [vmem:[%s5700_s8 + $0x8c] sm:$0x1]  ;;  %v1180_v51 = vrot.slane %v1179_v50, 4  ;;  %v4535_v6 = vld [vmem:[%s5700_s8 + $0x9c] sm:$0xf]  ;;  %3824 = vmatpush.bf16.msra.mxu2 %v5285_v42 }
 0x14d   : > { %v826_v31 = vrot.slane %v5501_v22, 5  ;;  %v1190_v9 = vrot.slane %v1189_v10, 4 }
 0x14e   : > { %v6479_v56 = vadd.f32 %v3743_v48, %v3655_v27  ;;  %v1192_v48 = vshll.u32 %v4554_v63, 16  ;;  %v825_v38 = vrot.slane %v823_v18, 4 }
 0x14f   : > { %v3478_v25 = vpop.f32.mrf.mxu2 }
 0x150   : > { %7199 = vst [vmem:[#allocation6_spill] sm:$0xff] %v6479_v56  ;;  %v3567_v8 = vpop.f32.mrf.mxu3  ;;  %v3479_v54 = vadd.f32 %v3478_v25, %v6141_v28  ;;  %v4506_v28 = vrot.slane %v688_v2, 9  ;;  %v4570_v25 = vld [vmem:[%s5700_s8 + $0x90] sm:$0xe]  ;;  %v1194_v40 = vrot.slane %v1192_v48, 5  ;;  %v1197_v48 = vshrl.u32 %v4535_v6, 16 }
 0x151   : > { %v3659_v3 = vpop.f32.mrf.mxu0  ;;  %v4586_v19 = vrot.slane %v4570_v25, 9 }
 0x152   : > { %v3568_v57 = vadd.f32 %v3567_v8, %v3479_v54  ;;  %v1437_v8 = vrot.slane %v1435_v37, 4  ;;  %v1438_v54 = vrot.slane %v4554_v63, 5  ;;  %v1185_v63 = vsel %vm5741_vm2, %v1180_v51, %v6477_v33 }
 0x153   : > { %v3748_v27 = vpop.f32.mrf.mxu1  ;;  %v1195_v10 = vsel %vm5741_vm2, %v1190_v9, %v1194_v40  ;;  %v2390_v51 = vunpack.c.l.b16 %v1185_v63 }
 0x154   : > { %3520 = vmatmul.bf16.gmra.mxu2 %v2266_v52  ;;  %v3657_v20 = vadd.f32 %v3656_v29, %v3568_v57  ;;  %3698 = vmatmul.bf16.gmra.mxu0 %v2410_v26  ;;  %v6497_v29 = vld [vmem:[%s5700_s8 + $0xa0] sm:$0xf]  ;;  %v5293_v52 = vld [vmem:[%s7187_s1 + $0x1c8] sm:$0xff]  ;;  %v824_v26 = vsel %vm6036_vm5, %v4506_v28, %v823_v18  ;;  %v1200_v57 = vshll.u32 %v4535_v6, 16  ;;  %v1436_v18 = vsel %vm6036_vm5, %v4586_v19, %v1435_v37  ;;  %v5502_v6 = vld [vmem:[%s5700_s8 + $0x94] sm:$0xf] }
 0x155   : > { %3609 = vmatmul.bf16.gmra.mxu3 %v5214_v45  ;;  %v1439_v28 = vsel %vm6036_vm5, %v1437_v8, %v1438_v54  ;;  %v1210_v33 = vshrl.u32 %v6497_v29, 16  ;;  %v2391_v42 = vunpack.c.l.b16 %v1195_v10  ;;  %v2454_v9 = vunpack.c.l.b16 %v1436_v18  ;;  %v689_v37 = vld [vmem:[%s5700_s8 + $0x90] sm:$0xe]  ;;  %v5503_v18 = vld [vmem:[%s5700_s8 + $0x98] sm:$0x1] }
 0x156   : > { %v6494_v49 = vadd.f32 %v3745_v23, %v3657_v20  ;;  %3787 = vmatmul.bf16.gmra.mxu1 %v2474_v35  ;;  %v827_v23 = vsel %vm6036_vm5, %v825_v38, %v826_v31  ;;  %3913 = vmatpush.bf16.msra.mxu3 %v5293_v52  ;;  %v1206_v35 = vshll.u32 %v6497_v29, 16  ;;  %v2246_v20 = vunpack.c.l.b16 %v824_v26 }
 0x157   : > { %v3481_v45 = vpop.f32.mrf.mxu2  ;;  %v2247_v31 = vunpack.c.l.b16 %v827_v23  ;;  %v2455_v40 = vunpack.c.l.b16 %v1439_v28  ;;  %v830_v52 = vrot.slane %v5502_v6, 5  ;;  %v1202_v19 = vrot.slane %v1200_v57, 5  ;;  %v4555_v23 = vld [vmem:[%s5700_s8 + $0xa4] sm:$0x1] }
 0x158   : > { %7200 = vst [vmem:[#allocation7_spill] sm:$0xff] %v6494_v49  ;;  %v3570_v2 = vpop.f32.mrf.mxu3  ;;  %v3482_v50 = vadd.f32 %v3481_v45, %v6156_v1  ;;  %v1199_v45 = vrot.slane %v1197_v48, 4  ;;  %v6522_v8 = vrot.slane %v1206_v35, 5  ;;  %v1212_v54 = vrot.slane %v1210_v33, 4 }
 0x159   : > { %v3661_v25 = vpop.f32.mrf.mxu0  ;;  %v2267_v10 = vpack.c.b16 %v2247_v31, %v2246_v20  ;;  %v2411_v48 = vpack.c.b16 %v2391_v42, %v2390_v51  ;;  %v4507_v57 = vrot.slane %v689_v37, 9  ;;  %v832_v35 = vrot.slane %v830_v52, 4  ;;  %v4571_v31 = vld [vmem:[%s5700_s8 + $0x9c] sm:$0xe]  ;;  %v4537_v51 = vld [vmem:[%s5700_s8 + $0xa8] sm:$0xf] }
 0x15a   : > { %v3571_v1 = vadd.f32 %v3570_v2, %v3482_v50  ;;  %v833_v28 = vrot.slane %v5503_v18, 5  ;;  %v1203_v6 = vor.u32 %v1202_v19, %v1199_v45  ;;  %v1216_v49 = vshll.u32 %v4555_v23, 16 }
 0x15b   : > { %v3750_v38 = vpop.f32.mrf.mxu1  ;;  %v831_v42 = vsel %vm6036_vm5, %v4507_v57, %v830_v52  ;;  %v1224_v52 = vshll.u32 %v4537_v51, 16 }
 0x15c   : > { %v3660_v22 = vadd.f32 %v3659_v3, %v3571_v1  ;;  %v5301_v3 = vld [vmem:[%s7187_s1 + $0x208] sm:$0xff]  ;;  %v5215_v1 = vld [vmem:[%s5700_s8 + $0x90] sm:$0xff]  ;;  %v1204_v37 = vrot.slane %v1203_v6, 4 }
 0x15d   : > { %4002 = vmatpush.bf16.msra.mxu0 %v5301_v3 }
 0x15e   : > { %v6519_v2 = vadd.f32 %v3748_v27, %v3660_v22  ;;  %v2475_v27 = vpack.c.b16 %v2455_v40, %v2454_v9  ;;  %v834_v9 = vsel %vm6036_vm5, %v832_v35, %v833_v28  ;;  %v6540_v40 = vld [vmem:[%s5700_s8 + $0xac] sm:$0xf]  ;;  %v2248_v35 = vunpack.c.l.b16 %v831_v42 }
 0x15f   : > { %v3483_v50 = vpop.f32.mrf.mxu2 }
 0x160   : > { %7201 = vst [vmem:[#allocation8_spill] sm:$0xff] %v6519_v2  ;;  %v3572_v26 = vpop.f32.mrf.mxu3  ;;  %v3484_v63 = vadd.f32 %v3483_v50, %v6184_v41  ;;  %v1213_v2 = vor.u32 %v1212_v54, %v6522_v8  ;;  %v1442_v41 = vrot.slane %v6497_v29, 5  ;;  %v1218_v29 = vrot.slane %v1216_v49, 5 }
 0x161   : > { %v3664_v22 = vpop.f32.mrf.mxu0  ;;  %v1209_v49 = vsel %vm5741_vm2, %v1204_v37, %v6522_v8 }
 0x162   : > { %v3573_v33 = vadd.f32 %v3572_v26, %v3484_v63  ;;  %v1214_v19 = vrot.slane %v1213_v2, 4  ;;  %v1444_v50 = vrot.slane %v1442_v41, 4  ;;  %v1445_v26 = vrot.slane %v4555_v23, 5 }
 0x163   : > { %v3753_v56 = vpop.f32.mrf.mxu1  ;;  %v1221_v63 = vshrl.u32 %v4537_v51, 16  ;;  %v2249_v23 = vunpack.c.l.b16 %v834_v9  ;;  %v2392_v51 = vunpack.c.l.b16 %v1209_v49  ;;  %v4556_v9 = vld [vmem:[%s5700_s8 + $0xb0] sm:$0x1] }
 0x164   : > { %3525 = vmatmul.bf16.gmra.mxu2 %v2267_v10  ;;  %v3662_v20 = vadd.f32 %v3661_v25, %v3573_v33  ;;  %3703 = vmatmul.bf16.gmra.mxu0 %v2411_v48  ;;  %v4587_v25 = vrot.slane %v4571_v31, 9  ;;  %v1234_v48 = vshrl.u32 %v6540_v40, 16  ;;  %v1219_v2 = vsel %vm5741_vm2, %v1214_v19, %v1218_v29 }
 0x165   : > { %3614 = vmatmul.bf16.gmra.mxu3 %v5215_v1  ;;  %v1230_v1 = vshll.u32 %v6540_v40, 16  ;;  %v1446_v28 = vsel %vm6036_vm5, %v1444_v50, %v1445_v26  ;;  %v1223_v33 = vrot.slane %v1221_v63, 4  ;;  %v2393_v42 = vunpack.c.l.b16 %v1219_v2  ;;  %v5216_v26 = vld [vmem:[%s5700_s8 + $0x9c] sm:$0xff] }
 0x166   : > { %v6542_v45 = vadd.f32 %v3750_v38, %v3662_v20  ;;  %3792 = vmatmul.bf16.gmra.mxu1 %v2475_v27  ;;  %v1443_v18 = vsel %vm6036_vm5, %v4587_v25, %v1442_v41  ;;  %v1226_v20 = vrot.slane %v1224_v52, 5  ;;  %v1236_v31 = vrot.slane %v1234_v48, 4  ;;  %v5504_v25 = vld [vmem:[%s5700_s8 + $0xa0] sm:$0xf]  ;;  %v690_v63 = vld [vmem:[%s5700_s8 + $0x9c] sm:$0xe] }
 0x167   : > { %v3486_v54 = vpop.f32.mrf.mxu2  ;;  %v6559_v8 = vrot.slane %v1230_v1, 5  ;;  %v2456_v19 = vunpack.c.l.b16 %v1443_v18  ;;  %v2457_v41 = vunpack.c.l.b16 %v1446_v28  ;;  %v1240_v1 = vshll.u32 %v4556_v9, 16 }
 0x168   : > { %v3575_v3 = vpop.f32.mrf.mxu3  ;;  %v3487_v10 = vadd.f32 %v3486_v54, %v6199_v14  ;;  %v5313_v14 = vld [vmem:[%s7189_s3 + $0x28] sm:$0xff]  ;;  %v2412_v48 = vpack.c.b16 %v2393_v42, %v2392_v51  ;;  %v5284_v51 = vld [vmem:[%s7187_s1 + $0x180] sm:$0xff] }
 0x169   : > { %v3666_v38 = vpop.f32.mrf.mxu0  ;;  %4203 = vmatpush.bf16.msra.mxu1 %v5313_v14  ;;  %v1237_v52 = vor.u32 %v1236_v31, %v6559_v8  ;;  %v2476_v49 = vpack.c.b16 %v2457_v41, %v2456_v19  ;;  %v4508_v14 = vrot.slane %v690_v63, 9  ;;  %v4572_v31 = vld [vmem:[%s5700_s8 + $0xa8] sm:$0xe]  ;;  %3825 = vmatpush.bf16.msra.mxu2 %v5284_v51  ;;  %v4539_v19 = vld [vmem:[%s5700_s8 + $0xb4] sm:$0xf] }
 0x16a   : > { %v3576_v57 = vadd.f32 %v3575_v3, %v3487_v10  ;;  %v2268_v3 = vpack.c.b16 %v2249_v23, %v2248_v35  ;;  %v1227_v10 = vor.u32 %v1226_v20, %v1223_v33  ;;  %v5505_v35 = vld [vmem:[%s5700_s8 + $0xa4] sm:$0x1]  ;;  %v1242_v20 = vrot.slane %v1240_v1, 5  ;;  %v6579_v41 = vld [vmem:[%s5700_s8 + $0xb8] sm:$0xf] }
 0x16b   : > { %v3755_v27 = vpop.f32.mrf.mxu1  ;;  %v840_v23 = vrot.slane %v5505_v35, 5  ;;  %v1248_v1 = vshll.u32 %v4539_v19, 16 }
 0x16c   : > { %v3665_v6 = vadd.f32 %v3664_v22, %v3576_v57  ;;  %v837_v22 = vrot.slane %v5504_v25, 5  ;;  %v1228_v33 = vrot.slane %v1227_v10, 4 }
 0x16e   : > { %v6562_v37 = vadd.f32 %v3753_v56, %v3665_v6  ;;  %v839_v18 = vrot.slane %v837_v22, 4  ;;  %v1238_v6 = vrot.slane %v1237_v52, 4  ;;  %v1233_v63 = vsel %vm5741_vm2, %v1228_v33, %v6559_v8 }
 0x16f   : > { %v3488_v29 = vpop.f32.mrf.mxu2  ;;  %v1245_v52 = vshrl.u32 %v4539_v19, 16 }
 0x170   : > { %v3577_v54 = vpop.f32.mrf.mxu3  ;;  %v3489_v50 = vadd.f32 %v3488_v29, %v6224_v58  ;;  %v1449_v58 = vrot.slane %v6540_v40, 5  ;;  %v5292_v40 = vld [vmem:[%s7187_s1 + $0x1c0] sm:$0xff]  ;;  %v1243_v10 = vsel %vm5741_vm2, %v1238_v6, %v1242_v20  ;;  %v1250_v6 = vrot.slane %v1248_v1, 5 }
 0x171   : > { %v3669_v57 = vpop.f32.mrf.mxu0  ;;  %3914 = vmatpush.bf16.msra.mxu3 %v5292_v40  ;;  %v1247_v33 = vrot.slane %v1245_v52, 4 }
 0x172   : > { %v3578_v56 = vadd.f32 %v3577_v54, %v3489_v50  ;;  %v838_v54 = vsel %vm6036_vm5, %v4508_v14, %v837_v22  ;;  %v1451_v25 = vrot.slane %v1449_v58, 4  ;;  %v1452_v50 = vrot.slane %v4556_v9, 5 }
 0x173   : > { %v3758_v2 = vpop.f32.mrf.mxu1  ;;  %v1254_v22 = vshll.u32 %v6579_v41, 16 }
 0x174   : > { %3530 = vmatmul.bf16.gmra.mxu2 %v2268_v3  ;;  %v3667_v28 = vadd.f32 %v3666_v38, %v3578_v56  ;;  %3708 = vmatmul.bf16.gmra.mxu0 %v2412_v48  ;;  %v4588_v3 = vrot.slane %v4572_v31, 9  ;;  %v1258_v48 = vshrl.u32 %v6579_v41, 16  ;;  %v1453_v8 = vsel %vm6036_vm5, %v1451_v25, %v1452_v50  ;;  %v5217_v25 = vld [vmem:[%s5700_s8 + $0xa8] sm:$0xff] }
 0x175   : > { %3619 = vmatmul.bf16.gmra.mxu3 %v5216_v26  ;;  %v841_v26 = vsel %vm6036_vm5, %v839_v18, %v840_v23  ;;  %v2394_v23 = vunpack.c.l.b16 %v1233_v63  ;;  %v6602_v20 = vrot.slane %v1254_v22, 5  ;;  %v2459_v40 = vunpack.c.l.b16 %v1453_v8  ;;  %v5506_v50 = vld [vmem:[%s5700_s8 + $0xac] sm:$0xf] }
 0x176   : > { %v6575_v42 = vadd.f32 %v3755_v27, %v3667_v28  ;;  %3797 = vmatmul.bf16.gmra.mxu1 %v2476_v49  ;;  %v1450_v14 = vsel %vm6036_vm5, %v4588_v3, %v1449_v58  ;;  %v2251_v35 = vunpack.c.l.b16 %v841_v26  ;;  %v2395_v28 = vunpack.c.l.b16 %v1243_v10  ;;  %v4557_v58 = vld [vmem:[%s5700_s8 + $0xbc] sm:$0x1] }
 0x177   : > { %v3491_v38 = vpop.f32.mrf.mxu2  ;;  %v1260_v31 = vrot.slane %v1258_v48, 4  ;;  %v2458_v19 = vunpack.c.l.b16 %v1450_v14  ;;  %v1251_v63 = vor.u32 %v1250_v6, %v1247_v33  ;;  %v1264_v52 = vshll.u32 %v4557_v58, 16  ;;  %v4573_v14 = vld [vmem:[%s5700_s8 + $0xb4] sm:$0xe] }
 0x178   : > { %v3580_v29 = vpop.f32.mrf.mxu3  ;;  %v3492_v27 = vadd.f32 %v3491_v38, %v6239_v0  ;;  %v2250_v0 = vunpack.c.l.b16 %v838_v54  ;;  %v2413_v26 = vpack.c.b16 %v2395_v28, %v2394_v23 }
 0x179   : > { %v3671_v56 = vpop.f32.mrf.mxu0  ;;  %v1261_v10 = vor.u32 %v1260_v31, %v6602_v20  ;;  %v2477_v48 = vpack.c.b16 %v2459_v40, %v2458_v19  ;;  %v1252_v28 = vrot.slane %v1251_v63, 4  ;;  %v1266_v6 = vrot.slane %v1264_v52, 5  ;;  %v4541_v19 = vld [vmem:[%s5700_s8 + $0xc0] sm:$0xf] }
 0x17a   : > { %v3581_v9 = vadd.f32 %v3580_v29, %v3492_v27  ;;  %v2269_v3 = vpack.c.b16 %v2251_v35, %v2250_v0  ;;  %v844_v27 = vrot.slane %v5506_v50, 5  ;;  %v5507_v35 = vld [vmem:[%s5700_s8 + $0xb0] sm:$0x1]  ;;  %v4589_v31 = vrot.slane %v4573_v14, 9  ;;  %v5312_v52 = vld [vmem:[%s7189_s3 + $0x20] sm:$0xff] }
 0x17b   : > { %v6596_v49 = vpop.f32.mrf.mxu1  ;;  %v847_v23 = vrot.slane %v5507_v35, 5  ;;  %v1262_v33 = vrot.slane %v1261_v10, 4  ;;  %4204 = vmatpush.bf16.msra.mxu1 %v5312_v52 }
 0x17c   : > { %v3670_v18 = vadd.f32 %v3669_v57, %v3581_v9  ;;  %v5300_v57 = vld [vmem:[%s7187_s1 + $0x200] sm:$0xff] }
 0x17d   : > { %4003 = vmatpush.bf16.msra.mxu0 %v5300_v57  ;;  %v1267_v50 = vsel %vm5741_vm2, %v1262_v33, %v1266_v6 }
 0x17e   : > { %v6604_v51 = vadd.f32 %v3758_v2, %v3670_v18  ;;  %v691_v2 = vld [vmem:[%s5700_s8 + $0xa8] sm:$0xe]  ;;  %v846_v18 = vrot.slane %v844_v27, 4 }
 0x17f   : > { %v3493_v38 = vpop.f32.mrf.mxu2  ;;  %v4509_v8 = vrot.slane %v691_v2, 9  ;;  %v1272_v2 = vshll.u32 %v4541_v19, 16 }
 0x180   : > { %v3582_v29 = vpop.f32.mrf.mxu3  ;;  %v3494_v54 = vadd.f32 %v3493_v38, %v6267_v12  ;;  %v1456_v12 = vrot.slane %v6579_v41, 5  ;;  %v1459_v41 = vrot.slane %v4557_v58, 5 }
 0x181   : > { %v3674_v22 = vpop.f32.mrf.mxu0 }
 0x182   : > { %v3583_v1 = vadd.f32 %v3582_v29, %v3494_v54  ;;  %v1458_v38 = vrot.slane %v1456_v12, 4  ;;  %v6622_v29 = vld [vmem:[%s5700_s8 + $0xc4] sm:$0xf]  ;;  %v845_v54 = vsel %vm6036_vm5, %v4509_v8, %v844_v27 }
 0x183   : > { %v3763_v9 = vpop.f32.mrf.mxu1  ;;  %v1278_v10 = vshll.u32 %v6622_v29, 16  ;;  %v1282_v27 = vshrl.u32 %v6622_v29, 16  ;;  %v2252_v14 = vunpack.c.l.b16 %v845_v54  ;;  %v1463_v52 = vrot.slane %v6622_v29, 5 }
 0x184   : > { %3535 = vmatmul.bf16.gmra.mxu2 %v2269_v3  ;;  %v6617_v0 = vadd.f32 %v3671_v56, %v3583_v1  ;;  %3713 = vmatmul.bf16.gmra.mxu0 %v2413_v26  ;;  %v848_v3 = vsel %vm6036_vm5, %v846_v18, %v847_v23  ;;  %v1269_v26 = vshrl.u32 %v4541_v19, 16  ;;  %v1460_v1 = vsel %vm6036_vm5, %v1458_v38, %v1459_v41 }
 0x185   : > { %3624 = vmatmul.bf16.gmra.mxu3 %v5217_v25  ;;  %v1257_v25 = vsel %vm5741_vm2, %v1252_v28, %v6602_v20  ;;  %v2253_v8 = vunpack.c.l.b16 %v848_v3  ;;  %v1274_v28 = vrot.slane %v1272_v2, 5  ;;  %v2461_v6 = vunpack.c.l.b16 %v1460_v1  ;;  %v692_v3 = vld [vmem:[%s5700_s8 + $0xb4] sm:$0xe]  ;;  %v4591_v1 = vld [vmem:[%s5700_s8 + $0x18] sm:$0xf] }
 0x186   : > { %3802 = vmatmul.bf16.gmra.mxu1 %v2477_v48  ;;  %v2396_v18 = vunpack.c.l.b16 %v1257_v25  ;;  %v1271_v23 = vrot.slane %v1269_v26, 4  ;;  %v1280_v19 = vrot.slane %v1278_v10, 5  ;;  %v5508_v25 = vld [vmem:[%s5700_s8 + $0xb8] sm:$0xf] }
 0x187   : > { %v3496_v40 = vpop.f32.mrf.mxu2  ;;  %v2270_v41 = vpack.c.b16 %v2253_v8, %v2252_v14  ;;  %v4510_v14 = vrot.slane %v692_v3, 9  ;;  %v4574_v8 = vld [vmem:[%s5700_s8 + $0xc0] sm:$0xe] }
 0x188   : > { %v3585_v57 = vpop.f32.mrf.mxu3  ;;  %v3497_v56 = vadd.f32 %v3496_v40, %v6282_v61  ;;  %v1457_v61 = vsel %vm6036_vm5, %v4589_v31, %v1456_v12  ;;  %v2397_v12 = vunpack.c.l.b16 %v1267_v50  ;;  %v4558_v31 = vld [vmem:[%s5700_s8 + $0xc8] sm:$0x1]  ;;  %v1284_v40 = vrot.slane %v1282_v27, 4 }
 0x189   : > { %v3676_v63 = vpop.f32.mrf.mxu0  ;;  %v2460_v35 = vunpack.c.l.b16 %v1457_v61  ;;  %v851_v50 = vrot.slane %v5508_v25, 5  ;;  %v1275_v26 = vor.u32 %v1274_v28, %v1271_v23 }
 0x18a   : > { %v3586_v58 = vadd.f32 %v3585_v57, %v3497_v56  ;;  %v5218_v56 = vld [vmem:[%s5700_s8 + $0xb4] sm:$0xff]  ;;  %v2414_v54 = vpack.c.b16 %v2397_v12, %v2396_v18  ;;  %v1285_v10 = vor.u32 %v1284_v40, %v1280_v19  ;;  %v5509_v12 = vld [vmem:[%s5700_s8 + $0xbc] sm:$0x1]  ;;  %v1524_v40 = vshll.u32 %v4591_v1, 16 }
 0x18b   : > { %v6641_v20 = vpop.f32.mrf.mxu1  ;;  %v2478_v61 = vpack.c.b16 %v2461_v6, %v2460_v35  ;;  %v853_v18 = vrot.slane %v851_v50, 4  ;;  %v854_v23 = vrot.slane %v5509_v12, 5  ;;  %v1276_v28 = vrot.slane %v1275_v26, 4 }
 0x18c   : > { %v3675_v48 = vadd.f32 %v3674_v22, %v3586_v58  ;;  %v1286_v35 = vrot.slane %v1285_v10, 4  ;;  %v1521_v6 = vshrl.u32 %v4591_v1, 16  ;;  %v852_v25 = vsel %vm6036_vm5, %v4510_v14, %v851_v50 }
 0x18d   : > { %v855_v26 = vsel %vm6036_vm5, %v853_v18, %v854_v23  ;;  %v1526_v1 = vrot.slane %v1524_v40, 5 }
 0x18e   : > { %v6645_v33 = vadd.f32 %v3763_v9, %v3675_v48  ;;  %v1288_v9 = vshll.u32 %v4558_v31, 16  ;;  %v2255_v23 = vunpack.c.l.b16 %v855_v26 }
 0x18f   : > { %v3498_v57 = vpop.f32.mrf.mxu2 }
 0x190   : > { %v3587_v38 = vpop.f32.mrf.mxu3  ;;  %v3499_v22 = vadd.f32 %v3498_v57, %v6307_v47  ;;  %v6655_v47 = vld [vmem:[%s5700_s8 + $0x1c] sm:$0xf]  ;;  %v1290_v57 = vrot.slane %v1288_v9, 5  ;;  %v1281_v9 = vsel %vm5741_vm2, %v1276_v28, %v1280_v19  ;;  %v2254_v19 = vunpack.c.l.b16 %v852_v25  ;;  %v4623_v28 = vld [vmem:[%s5700_s8 + $0x20] sm:$0x1] }
 0x191   : > { %v3679_v58 = vpop.f32.mrf.mxu0  ;;  %v1530_v29 = vshll.u32 %v6655_v47, 16  ;;  %v1534_v3 = vshrl.u32 %v6655_v47, 16  ;;  %v4639_v25 = vld [vmem:[%s5700_s8 + $0x18] sm:$0xe] }
 0x192   : > { %v3588_v2 = vadd.f32 %v3587_v38, %v3499_v22  ;;  %v1291_v10 = vsel %vm5741_vm2, %v1286_v35, %v1290_v57 }
 0x193   : > { %v3768_v27 = vpop.f32.mrf.mxu1  ;;  %v1532_v14 = vrot.slane %v1530_v29, 5  ;;  %v1536_v18 = vrot.slane %v1534_v3, 4  ;;  %v2399_v57 = vunpack.c.l.b16 %v1291_v10 }
 0x194   : > { %3540 = vmatmul.bf16.gmra.mxu2 %v2270_v41  ;;  %v6657_v48 = vadd.f32 %v3676_v63, %v3588_v2  ;;  %3718 = vmatmul.bf16.gmra.mxu0 %v2414_v54  ;;  %v4590_v41 = vrot.slane %v4574_v8, 9  ;;  %v1466_v63 = vrot.slane %v4558_v31, 5  ;;  %v1523_v31 = vrot.slane %v1521_v6, 4 }
 0x195   : > { %3629 = vmatmul.bf16.gmra.mxu3 %v5218_v56  ;;  %v1465_v56 = vrot.slane %v1463_v52, 4 }
 0x196   : > { %3807 = vmatmul.bf16.gmra.mxu1 %v2478_v61 }
 0x197   : > { %v3501_v38 = vpop.f32.mrf.mxu2  ;;  %v1467_v50 = vsel %vm6036_vm5, %v1465_v56, %v1466_v63  ;;  %v2271_v56 = vpack.c.b16 %v2255_v23, %v2254_v19  ;;  %v1970_v63 = vrot.slane %v6655_v47, 5  ;;  %v4593_v47 = vld [vmem:[%s5700_s8 + $0x24] sm:$0xf] }
 0x198   : > { %v3590_v22 = vpop.f32.mrf.mxu3  ;;  %v3502_v54 = vadd.f32 %v3501_v38, %v6322_v36  ;;  %v1464_v36 = vsel %vm6036_vm5, %v4590_v41, %v1463_v52  ;;  %v2398_v38 = vunpack.c.l.b16 %v1281_v9  ;;  %v2463_v40 = vunpack.c.l.b16 %v1467_v50 }
 0x199   : > { %v3681_v61 = vpop.f32.mrf.mxu0  ;;  %v2462_v6 = vunpack.c.l.b16 %v1464_v36  ;;  %v1527_v52 = vor.u32 %v1526_v1, %v1523_v31  ;;  %v1537_v41 = vor.u32 %v1536_v18, %v1532_v14  ;;  %v1972_v1 = vrot.slane %v1970_v63, 4 }
 0x19a   : > { %v3591_v2 = vadd.f32 %v3590_v22, %v3502_v54  ;;  %v2415_v3 = vpack.c.b16 %v2399_v57, %v2398_v38  ;;  %v1973_v18 = vrot.slane %v4623_v28, 5 }
 0x19b   : > { %v6672_v8 = vpop.f32.mrf.mxu1  ;;  %v2479_v9 = vpack.c.b16 %v2463_v40, %v2462_v6  ;;  %v1528_v10 = vrot.slane %v1527_v52, 4  ;;  %v1538_v36 = vrot.slane %v1537_v41, 4  ;;  %v1545_v6 = vshrl.u32 %v4593_v47, 16 }
 0x19c   : > { %7202 = vst [vmem:[#allocation9_spill] sm:$0xff] %v6672_v8  ;;  %v3680_v12 = vadd.f32 %v3679_v58, %v3591_v2  ;;  %v1540_v8 = vshll.u32 %v4623_v28, 16  ;;  %v5219_v58 = vld [vmem:[%s5700_s8 + $0xc0] sm:$0xff]  ;;  %v1974_v28 = vsel %vm6036_vm5, %v1972_v1, %v1973_v18  ;;  %v1548_v40 = vshll.u32 %v4593_v47, 16  ;;  %v5220_v47 = vld [vmem:[%s5700_s8 + $0x18] sm:$0xff] }
 0x19d   : > { %v1533_v38 = vsel %vm5741_vm2, %v1528_v10, %v1532_v14 }
 0x19e   : > { %v6679_v35 = vadd.f32 %v3768_v27, %v3680_v12  ;;  %v1542_v50 = vrot.slane %v1540_v8, 5  ;;  %v6689_v12 = vld [vmem:[%s5700_s8 + $0x28] sm:$0xf]  ;;  %v2576_v41 = vunpack.c.l.b16 %v1533_v38 }
 0x19f   : > { %v3503_v22 = vpop.f32.mrf.mxu2 }
 0x1a0   : > { %v3592_v54 = vpop.f32.mrf.mxu3  ;;  %v3504_v29 = vadd.f32 %v3503_v22, %v6350_v30  ;;  %v4655_v30 = vrot.slane %v4639_v25, 9  ;;  %v1543_v8 = vsel %vm5741_vm2, %v1538_v36, %v1542_v50  ;;  %v1554_v22 = vshll.u32 %v6689_v12, 16  ;;  %v4624_v50 = vld [vmem:[%s5700_s8 + $0x2c] sm:$0x1] }
 0x1a1   : > { %v3684_v27 = vpop.f32.mrf.mxu0  ;;  %v1547_v25 = vrot.slane %v1545_v6, 4 }
 0x1a2   : > { %v3593_v26 = vadd.f32 %v3592_v54, %v3504_v29  ;;  %v1558_v54 = vshrl.u32 %v6689_v12, 16 }
 0x1a3   : > { %v3773_v2 = vpop.f32.mrf.mxu1 }
 0x1a4   : > { %3545 = vmatmul.bf16.gmra.mxu2 %v2271_v56  ;;  %v6685_v31 = vadd.f32 %v3681_v61, %v3593_v26  ;;  %3723 = vmatmul.bf16.gmra.mxu0 %v2415_v3  ;;  %v1971_v61 = vsel %vm6036_vm5, %v4655_v30, %v1970_v63  ;;  %v2641_v3 = vunpack.c.l.b16 %v1974_v28  ;;  %v1550_v26 = vrot.slane %v1548_v40, 5 }
 0x1a5   : > { %3634 = vmatmul.bf16.gmra.mxu3 %v5219_v58  ;;  %v2577_v58 = vunpack.c.l.b16 %v1543_v8  ;;  %v2640_v63 = vunpack.c.l.b16 %v1971_v61  ;;  %v1560_v10 = vrot.slane %v1558_v54, 4  ;;  %v1977_v28 = vrot.slane %v6689_v12, 5  ;;  %v6718_v54 = vld [vmem:[%s5700_s8 + $0x34] sm:$0xf] }
 0x1a6   : > { %3812 = vmatmul.bf16.gmra.mxu1 %v2479_v9  ;;  %v1556_v9 = vrot.slane %v1554_v22, 5  ;;  %v4595_v22 = vld [vmem:[%s5700_s8 + $0x30] sm:$0xf] }
 0x1a7   : > { %v3506_v19 = vpop.f32.mrf.mxu2  ;;  %v1572_v12 = vshll.u32 %v4595_v22, 16 }
 0x1a8   : > { %v3595_v23 = vpop.f32.mrf.mxu3  ;;  %v3507_v57 = vadd.f32 %v3506_v19, %v6365_v59  ;;  %v5311_v59 = vld [vmem:[%s7189_s3 + $0x18] sm:$0xff]  ;;  %v2672_v19 = vpack.c.b16 %v2641_v3, %v2640_v63  ;;  %v1561_v38 = vor.u32 %v1560_v10, %v1556_v9  ;;  %v1582_v10 = vshrl.u32 %v6718_v54, 16 }
 0x1a9   : > { %v3686_v14 = vpop.f32.mrf.mxu0  ;;  %4205 = vmatpush.bf16.msra.mxu1 %v5311_v59 }
 0x1aa   : > { %v3596_v52 = vadd.f32 %v3595_v23, %v3507_v57  ;;  %v1551_v23 = vor.u32 %v1550_v26, %v1547_v25  ;;  %v1564_v57 = vshll.u32 %v4624_v50, 16  ;;  %v1569_v25 = vshrl.u32 %v4595_v22, 16  ;;  %v4625_v22 = vld [vmem:[%s5700_s8 + $0x38] sm:$0x1] }
 0x1ab   : > { %v6705_v29 = vpop.f32.mrf.mxu1  ;;  %v1578_v26 = vshll.u32 %v6718_v54, 16 }
 0x1ac   : > { %v3685_v56 = vadd.f32 %v3684_v27, %v3596_v52  ;;  %v2608_v27 = vpack.c.b16 %v2577_v58, %v2576_v41  ;;  %v1562_v52 = vrot.slane %v1561_v38, 4  ;;  %v1566_v59 = vrot.slane %v1564_v57, 5 }
 0x1ad   : > { %v1980_v58 = vrot.slane %v4624_v50, 5  ;;  %v1574_v38 = vrot.slane %v1572_v12, 5  ;;  %v1584_v57 = vrot.slane %v1582_v10, 4  ;;  %v4641_v10 = vld [vmem:[%s5700_s8 + $0x30] sm:$0xe] }
 0x1ae   : > { %v6707_v36 = vadd.f32 %v3773_v2, %v3685_v56  ;;  %v4640_v2 = vld [vmem:[%s5700_s8 + $0x24] sm:$0xe]  ;;  %v1979_v56 = vrot.slane %v1977_v28, 4 }
 0x1af   : > { %v3508_v30 = vpop.f32.mrf.mxu2  ;;  %v4656_v41 = vrot.slane %v4640_v2, 9 }
 0x1b0   : > { %v3597_v1 = vpop.f32.mrf.mxu3  ;;  %v3509_v18 = vadd.f32 %v3508_v30, %v6393_v32  ;;  %v1552_v32 = vrot.slane %v1551_v23, 4  ;;  %v1571_v23 = vrot.slane %v1569_v25, 4  ;;  %v5221_v25 = vld [vmem:[%s5700_s8 + $0x24] sm:$0xff] }
 0x1b1   : > { %v3689_v61 = vpop.f32.mrf.mxu0  ;;  %v1978_v50 = vsel %vm6036_vm5, %v4656_v41, %v1977_v28 }
 0x1b2   : > { %v3598_v8 = vadd.f32 %v3597_v1, %v3509_v18  ;;  %v1557_v30 = vsel %vm5741_vm2, %v1552_v32, %v1556_v9  ;;  %v1567_v1 = vsel %vm5741_vm2, %v1562_v52, %v1566_v59  ;;  %v2642_v32 = vunpack.c.l.b16 %v1978_v50 }
 0x1b3   : > { %v3778_v6 = vpop.f32.mrf.mxu1  ;;  %v2578_v9 = vunpack.c.l.b16 %v1557_v30  ;;  %v2579_v2 = vunpack.c.l.b16 %v1567_v1 }
 0x1b4   : > { %3826 = vmatmul.bf16.vlgmr.msra.gmra.mxu2 %v5220_v47  ;;  %v6714_v40 = vadd.f32 %v3686_v14, %v3598_v8  ;;  %4004 = vmatmul.bf16.vlgmr.msra.gmra.mxu0 %v2672_v19 }
 0x1b5   : > { %3915 = vmatmul.bf16.vlgmr.msra.gmra.mxu3 %v2608_v27  ;;  %v1981_v27 = vsel %vm6036_vm5, %v1979_v56, %v1980_v58  ;;  %v1588_v58 = vshll.u32 %v4625_v22, 16  ;;  %v2609_v12 = vpack.c.b16 %v2579_v2, %v2578_v9 }
 0x1b6   : > { %v2643_v52 = vunpack.c.l.b16 %v1981_v27 }
 0x1b7   : > { %v3511_v63 = vpop.f32.mrf.mxu2  ;;  %v1590_v50 = vrot.slane %v1588_v58, 5 }
 0x1b8   : > { %v3600_v3 = vpop.f32.mrf.mxu3  ;;  %v3512_v14 = vadd.f32 %v3511_v63, %v6090_v5  ;;  %v1580_v5 = vrot.slane %v1578_v26, 5  ;;  %v1575_v63 = vor.u32 %v1574_v38, %v1571_v23  ;;  %v1984_v26 = vrot.slane %v6718_v54, 5  ;;  %v6744_v54 = vld [vmem:[%s5700_s8 + $0x40] sm:$0xf] }
 0x1b9   : > { %v3691_v47 = vpop.f32.mrf.mxu0  ;;  %v4657_v23 = vrot.slane %v4641_v10, 9  ;;  %v1987_v38 = vrot.slane %v4625_v22, 5 }
 0x1ba   : > { %v3601_v18 = vadd.f32 %v3600_v3, %v3512_v14  ;;  %v1585_v56 = vor.u32 %v1584_v57, %v1580_v5  ;;  %v4597_v57 = vld [vmem:[%s5700_s8 + $0x3c] sm:$0xf] }
 0x1bb   : > { %v6731_v19 = vpop.f32.mrf.mxu1 }
 0x1bc   : > { %v3690_v8 = vadd.f32 %v3689_v61, %v3601_v18  ;;  %v2673_v61 = vpack.c.b16 %v2643_v52, %v2642_v32  ;;  %v1586_v18 = vrot.slane %v1585_v56, 4  ;;  %v1606_v56 = vshrl.u32 %v6744_v54, 16 }
 0x1be   : > { %v6734_v59 = vadd.f32 %v3778_v6, %v3690_v8  ;;  %v1576_v6 = vrot.slane %v1575_v63, 4  ;;  %v1591_v52 = vsel %vm5741_vm2, %v1586_v18, %v1590_v50  ;;  %v1602_v63 = vshll.u32 %v6744_v54, 16 }
 0x1bf   : > { %v3513_v28 = vpop.f32.mrf.mxu2  ;;  %v1608_v50 = vrot.slane %v1606_v56, 4 }
 0x1c0   : > { %v3602_v41 = vpop.f32.mrf.mxu3  ;;  %v3514_v3 = vadd.f32 %v3513_v28, %v6111_v43  ;;  %v1986_v43 = vrot.slane %v1984_v26, 4  ;;  %v1581_v2 = vsel %vm5741_vm2, %v1576_v6, %v1580_v5  ;;  %v1593_v28 = vshrl.u32 %v4597_v57, 16 }
 0x1c1   : > { %v3694_v30 = vpop.f32.mrf.mxu0  ;;  %v1604_v18 = vrot.slane %v1602_v63, 5 }
 0x1c2   : > { %v3603_v14 = vadd.f32 %v3602_v41, %v3514_v3  ;;  %v1988_v22 = vsel %vm6036_vm5, %v1986_v43, %v1987_v38  ;;  %v1596_v41 = vshll.u32 %v4597_v57, 16  ;;  %v2580_v3 = vunpack.c.l.b16 %v1581_v2  ;;  %v4626_v43 = vld [vmem:[%s5700_s8 + $0x44] sm:$0x1] }
 0x1c3   : > { %v3783_v1 = vpop.f32.mrf.mxu1  ;;  %v2645_v10 = vunpack.c.l.b16 %v1988_v22 }
 0x1c4   : > { %3831 = vmatmul.bf16.gmra.mxu2 %v5221_v25  ;;  %v6740_v27 = vadd.f32 %v3691_v47, %v3603_v14  ;;  %4009 = vmatmul.bf16.gmra.mxu0 %v2673_v61  ;;  %v1985_v47 = vsel %vm6036_vm5, %v4657_v23, %v1984_v26  ;;  %v2581_v26 = vunpack.c.l.b16 %v1591_v52  ;;  %v1595_v14 = vrot.slane %v1593_v28, 4 }
 0x1c5   : > { %3920 = vmatmul.bf16.gmra.mxu3 %v2609_v12  ;;  %v2644_v61 = vunpack.c.l.b16 %v1985_v47  ;;  %v1598_v6 = vrot.slane %v1596_v41, 5  ;;  %v1609_v52 = vor.u32 %v1608_v50, %v1604_v18  ;;  %v1612_v47 = vshll.u32 %v4626_v43, 16 }
 0x1c6   : > { %v1991_v41 = vrot.slane %v6744_v54, 5 }
 0x1c7   : > { %v3516_v8 = vpop.f32.mrf.mxu2  ;;  %v2674_v2 = vpack.c.b16 %v2645_v10, %v2644_v61  ;;  %v1994_v10 = vrot.slane %v4626_v43, 5 }
 0x1c8   : > { %v3605_v9 = vpop.f32.mrf.mxu3  ;;  %v3517_v32 = vadd.f32 %v3516_v8, %v6130_v11  ;;  %v5310_v11 = vld [vmem:[%s7189_s3 + $0x10] sm:$0xff]  ;;  %v1993_v61 = vrot.slane %v1991_v41, 4 }
 0x1c9   : > { %v3696_v5 = vpop.f32.mrf.mxu0  ;;  %4206 = vmatpush.bf16.msra.mxu1 %v5310_v11  ;;  %v6773_v11 = vld [vmem:[%s5700_s8 + $0x4c] sm:$0xf] }
 0x1ca   : > { %v3606_v58 = vadd.f32 %v3605_v9, %v3517_v32  ;;  %v5222_v9 = vld [vmem:[%s5700_s8 + $0x30] sm:$0xff]  ;;  %v1599_v32 = vor.u32 %v1598_v6, %v1595_v14 }
 0x1cb   : > { %v6760_v25 = vpop.f32.mrf.mxu1 }
 0x1cc   : > { %v3695_v12 = vadd.f32 %v3694_v30, %v3606_v58  ;;  %v2610_v30 = vpack.c.b16 %v2581_v26, %v2580_v3  ;;  %v4599_v58 = vld [vmem:[%s5700_s8 + $0x48] sm:$0xf]  ;;  %v1610_v3 = vrot.slane %v1609_v52, 4 }
 0x1cd   : > { %v1617_v50 = vshrl.u32 %v4599_v58, 16  ;;  %v1620_v54 = vshll.u32 %v4599_v58, 16 }
 0x1ce   : > { %v6762_v23 = vadd.f32 %v3783_v1, %v3695_v12  ;;  %v4642_v1 = vld [vmem:[%s5700_s8 + $0x3c] sm:$0xe]  ;;  %v1614_v12 = vrot.slane %v1612_v47, 5 }
 0x1cf   : > { %v3518_v38 = vpop.f32.mrf.mxu2  ;;  %v4658_v26 = vrot.slane %v4642_v1, 9  ;;  %v1619_v47 = vrot.slane %v1617_v50, 4 }
 0x1d0   : > { %v3607_v57 = vpop.f32.mrf.mxu3  ;;  %v3519_v8 = vadd.f32 %v3518_v38, %v6148_v53  ;;  %v1600_v53 = vrot.slane %v1599_v32, 4  ;;  %v1626_v38 = vshll.u32 %v6773_v11, 16  ;;  %v1995_v32 = vsel %vm6036_vm5, %v1993_v61, %v1994_v10 }
 0x1d1   : > { %v3699_v28 = vpop.f32.mrf.mxu0  ;;  %v1992_v43 = vsel %vm6036_vm5, %v4658_v26, %v1991_v41 }
 0x1d2   : > { %v3608_v22 = vadd.f32 %v3607_v57, %v3519_v8  ;;  %v1630_v57 = vshrl.u32 %v6773_v11, 16  ;;  %v1605_v8 = vsel %vm5741_vm2, %v1600_v53, %v1604_v18 }
 0x1d3   : > { %v3788_v63 = vpop.f32.mrf.mxu1  ;;  %v2582_v18 = vunpack.c.l.b16 %v1605_v8 }
 0x1d4   : > { %3836 = vmatmul.bf16.gmra.mxu2 %v5222_v9  ;;  %v6769_v56 = vadd.f32 %v3696_v5, %v3608_v22  ;;  %4014 = vmatmul.bf16.gmra.mxu0 %v2674_v2  ;;  %v1615_v9 = vsel %vm5741_vm2, %v1610_v3, %v1614_v12  ;;  %v1622_v22 = vrot.slane %v1620_v54, 5  ;;  %v1632_v1 = vrot.slane %v1630_v57, 4  ;;  %v4627_v3 = vld [vmem:[%s5700_s8 + $0x50] sm:$0x1]  ;;  %v5223_v54 = vld [vmem:[%s5700_s8 + $0x3c] sm:$0xff] }
 0x1d5   : > { %3925 = vmatmul.bf16.gmra.mxu3 %v2610_v30  ;;  %v2583_v53 = vunpack.c.l.b16 %v1615_v9  ;;  %v2646_v12 = vunpack.c.l.b16 %v1992_v43  ;;  %v1636_v10 = vshll.u32 %v4627_v3, 16  ;;  %v4643_v57 = vld [vmem:[%s5700_s8 + $0x48] sm:$0xe] }
 0x1d7   : > { %v3521_v14 = vpop.f32.mrf.mxu2 }
 0x1d8   : > { %v3610_v6 = vpop.f32.mrf.mxu3  ;;  %v3522_v5 = vadd.f32 %v3521_v14, %v6173_v24  ;;  %v1628_v24 = vrot.slane %v1626_v38, 5  ;;  %v2647_v14 = vunpack.c.l.b16 %v1995_v32  ;;  %v1998_v38 = vrot.slane %v6773_v11, 5  ;;  %v6799_v11 = vld [vmem:[%s5700_s8 + $0x58] sm:$0xf] }
 0x1d9   : > { %v3701_v2 = vpop.f32.mrf.mxu0  ;;  %v1638_v32 = vrot.slane %v1636_v10, 5 }
 0x1da   : > { %v3611_v30 = vadd.f32 %v3610_v6, %v3522_v5  ;;  %v1623_v5 = vor.u32 %v1622_v22, %v1619_v47  ;;  %v1633_v61 = vor.u32 %v1632_v1, %v1628_v24  ;;  %v4659_v22 = vrot.slane %v4643_v57, 9 }
 0x1db   : > { %v6786_v52 = vpop.f32.mrf.mxu1  ;;  %v2001_v1 = vrot.slane %v4627_v3, 5 }
 0x1dc   : > { %7203 = vst [vmem:[#allocation10_spill] sm:$0xff] %v6786_v52  ;;  %v3700_v58 = vadd.f32 %v3699_v28, %v3611_v30  ;;  %v2611_v52 = vpack.c.b16 %v2583_v53, %v2582_v18  ;;  %v2675_v28 = vpack.c.b16 %v2647_v14, %v2646_v12  ;;  %v1634_v43 = vrot.slane %v1633_v61, 4 }
 0x1dd   : > { %v1654_v61 = vshrl.u32 %v6799_v11, 16 }
 0x1de   : > { %v6789_v6 = vadd.f32 %v3788_v63, %v3700_v58  ;;  %v1624_v63 = vrot.slane %v1623_v5, 4  ;;  %v4601_v58 = vld [vmem:[%s5700_s8 + $0x54] sm:$0xf]  ;;  %v1650_v5 = vshll.u32 %v6799_v11, 16 }
 0x1df   : > { %v3523_v41 = vpop.f32.mrf.mxu2  ;;  %v1641_v3 = vshrl.u32 %v4601_v58, 16 }
 0x1e0   : > { %v3612_v26 = vpop.f32.mrf.mxu3  ;;  %v3524_v50 = vadd.f32 %v3523_v41, %v6194_v62  ;;  %v2000_v62 = vrot.slane %v1998_v38, 4  ;;  %v1629_v12 = vsel %vm5741_vm2, %v1624_v63, %v1628_v24  ;;  %v1639_v41 = vsel %vm5741_vm2, %v1634_v43, %v1638_v32 }
 0x1e1   : > { %v3704_v9 = vpop.f32.mrf.mxu0  ;;  %v1643_v63 = vrot.slane %v1641_v3, 4  ;;  %v1652_v32 = vrot.slane %v1650_v5, 5  ;;  %v2005_v5 = vrot.slane %v6799_v11, 5 }
 0x1e2   : > { %v3613_v8 = vadd.f32 %v3612_v26, %v3524_v50  ;;  %v1644_v26 = vshll.u32 %v4601_v58, 16  ;;  %v2584_v50 = vunpack.c.l.b16 %v1629_v12  ;;  %v5224_v12 = vld [vmem:[%s5700_s8 + $0x48] sm:$0xff] }
 0x1e3   : > { %v3793_v30 = vpop.f32.mrf.mxu1 }
 0x1e4   : > { %3841 = vmatmul.bf16.gmra.mxu2 %v5223_v54  ;;  %v6795_v47 = vadd.f32 %v3701_v2, %v3613_v8  ;;  %4019 = vmatmul.bf16.gmra.mxu0 %v2675_v28  ;;  %v1999_v2 = vsel %vm6036_vm5, %v4659_v22, %v1998_v38  ;;  %v2585_v28 = vunpack.c.l.b16 %v1639_v41  ;;  %v1646_v43 = vrot.slane %v1644_v26, 5 }
 0x1e5   : > { %3930 = vmatmul.bf16.gmra.mxu3 %v2611_v52  ;;  %v2002_v52 = vsel %vm6036_vm5, %v2000_v62, %v2001_v1  ;;  %v2648_v57 = vunpack.c.l.b16 %v1999_v2  ;;  %v1656_v22 = vrot.slane %v1654_v61, 4  ;;  %v4628_v1 = vld [vmem:[%s5700_s8 + $0x5c] sm:$0x1] }
 0x1e6   : > { %v2649_v8 = vunpack.c.l.b16 %v2002_v52  ;;  %v1647_v41 = vor.u32 %v1646_v43, %v1643_v63  ;;  %v1660_v52 = vshll.u32 %v4628_v1, 16  ;;  %v2008_v63 = vrot.slane %v4628_v1, 5 }
 0x1e7   : > { %v3526_v18 = vpop.f32.mrf.mxu2  ;;  %v1657_v2 = vor.u32 %v1656_v22, %v1652_v32 }
 0x1e8   : > { %v3615_v53 = vpop.f32.mrf.mxu3  ;;  %v3527_v14 = vadd.f32 %v3526_v18, %v6213_v39  ;;  %v5309_v39 = vld [vmem:[%s7189_s3 + $0x8] sm:$0xff] }
 0x1e9   : > { %v3706_v24 = vpop.f32.mrf.mxu0  ;;  %4207 = vmatpush.bf16.msra.mxu1 %v5309_v39  ;;  %v4603_v39 = vld [vmem:[%s5700_s8 + $0x60] sm:$0xf] }
 0x1ea   : > { %v3616_v10 = vadd.f32 %v3615_v53, %v3527_v14  ;;  %v2676_v14 = vpack.c.b16 %v2649_v8, %v2648_v57  ;;  %v2007_v8 = vrot.slane %v2005_v5, 4  ;;  %v1668_v11 = vshll.u32 %v4603_v39, 16 }
 0x1eb   : > { %v6815_v54 = vpop.f32.mrf.mxu1 }
 0x1ec   : > { %7204 = vst [vmem:[#allocation11_spill] sm:$0xff] %v6815_v54  ;;  %v3705_v38 = vadd.f32 %v3704_v9, %v3616_v10  ;;  %v2612_v9 = vpack.c.b16 %v2585_v28, %v2584_v50  ;;  %v1658_v50 = vrot.slane %v1657_v2, 4  ;;  %v1662_v28 = vrot.slane %v1660_v52, 5 }
 0x1ed   : > { %v2009_v2 = vsel %vm6036_vm5, %v2007_v8, %v2008_v63 }
 0x1ee   : > { %v6817_v62 = vadd.f32 %v3793_v30, %v3705_v38  ;;  %v4644_v30 = vld [vmem:[%s5700_s8 + $0x54] sm:$0xe]  ;;  %v6828_v38 = vld [vmem:[%s5700_s8 + $0x64] sm:$0xf] }
 0x1ef   : > { %v3528_v58 = vpop.f32.mrf.mxu2  ;;  %v4660_v57 = vrot.slane %v4644_v30, 9  ;;  %v1670_v30 = vrot.slane %v1668_v11, 5  ;;  %v5225_v11 = vld [vmem:[%s5700_s8 + $0x54] sm:$0xff] }
 0x1f0   : > { %v3617_v18 = vpop.f32.mrf.mxu3  ;;  %v3529_v53 = vadd.f32 %v3528_v58, %v6231_v16  ;;  %v1648_v16 = vrot.slane %v1647_v41, 4  ;;  %v1665_v58 = vshrl.u32 %v4603_v39, 16 }
 0x1f1   : > { %v3709_v26 = vpop.f32.mrf.mxu0  ;;  %v2006_v1 = vsel %vm6036_vm5, %v4660_v57, %v2005_v5 }
 0x1f2   : > { %v3618_v3 = vadd.f32 %v3617_v18, %v3529_v53  ;;  %v1674_v18 = vshll.u32 %v6828_v38, 16  ;;  %v1678_v53 = vshrl.u32 %v6828_v38, 16 }
 0x1f3   : > { %v3798_v61 = vpop.f32.mrf.mxu1 }
 0x1f4   : > { %3846 = vmatmul.bf16.gmra.mxu2 %v5224_v12  ;;  %v6824_v10 = vadd.f32 %v3706_v24, %v3618_v3  ;;  %4024 = vmatmul.bf16.gmra.mxu0 %v2676_v14  ;;  %v1653_v12 = vsel %vm5741_vm2, %v1648_v16, %v1652_v32  ;;  %v1667_v3 = vrot.slane %v1665_v58, 4  ;;  %v1680_v39 = vrot.slane %v1678_v53, 4  ;;  %v4645_v53 = vld [vmem:[%s5700_s8 + $0x60] sm:$0xe] }
 0x1f5   : > { %3935 = vmatmul.bf16.gmra.mxu3 %v2612_v9  ;;  %v1663_v9 = vsel %vm5741_vm2, %v1658_v50, %v1662_v28  ;;  %v2586_v32 = vunpack.c.l.b16 %v1653_v12  ;;  %v4629_v50 = vld [vmem:[%s5700_s8 + $0x68] sm:$0x1]  ;;  %v2650_v28 = vunpack.c.l.b16 %v2006_v1 }
 0x1f6   : > { %v2587_v16 = vunpack.c.l.b16 %v1663_v9  ;;  %v1671_v54 = vor.u32 %v1670_v30, %v1667_v3  ;;  %v1684_v63 = vshll.u32 %v4629_v50, 16  ;;  %v4661_v30 = vrot.slane %v4645_v53, 9 }
 0x1f7   : > { %v3531_v43 = vpop.f32.mrf.mxu2 }
 0x1f8   : > { %v3620_v22 = vpop.f32.mrf.mxu3  ;;  %v3532_v24 = vadd.f32 %v3531_v43, %v6256_v21  ;;  %v1676_v21 = vrot.slane %v1674_v18, 5  ;;  %v2012_v18 = vrot.slane %v6828_v38, 5  ;;  %v6854_v38 = vld [vmem:[%s5700_s8 + $0x70] sm:$0xf] }
 0x1f9   : > { %v3711_v41 = vpop.f32.mrf.mxu0 }
 0x1fa   : > { %v3621_v14 = vadd.f32 %v3620_v22, %v3532_v24  ;;  %v2651_v22 = vunpack.c.l.b16 %v2009_v2  ;;  %v1681_v8 = vor.u32 %v1680_v39, %v1676_v21  ;;  %v1686_v2 = vrot.slane %v1684_v63, 5 }
 0x1fb   : > { %v6841_v52 = vpop.f32.mrf.mxu1  ;;  %v2015_v39 = vrot.slane %v4629_v50, 5 }
 0x1fc   : > { %7205 = vst [vmem:[#allocation12_spill] sm:$0xff] %v6841_v52  ;;  %v3710_v43 = vadd.f32 %v3709_v26, %v3621_v14  ;;  %v2613_v52 = vpack.c.b16 %v2587_v16, %v2586_v32  ;;  %v2677_v26 = vpack.c.b16 %v2651_v22, %v2650_v28  ;;  %v1682_v1 = vrot.slane %v1681_v8, 4 }
 0x1fd   : > { %v1702_v8 = vshrl.u32 %v6854_v38, 16 }
 0x1fe   : > { %v6844_v24 = vadd.f32 %v3798_v61, %v3710_v43  ;;  %v1672_v61 = vrot.slane %v1671_v54, 4  ;;  %v4605_v43 = vld [vmem:[%s5700_s8 + $0x6c] sm:$0xf]  ;;  %v1687_v22 = vsel %vm5741_vm2, %v1682_v1, %v1686_v2 }
 0x1ff   : > { %v3533_v5 = vpop.f32.mrf.mxu2  ;;  %v1689_v50 = vshrl.u32 %v4605_v43, 16 }
 0x200   : > { %v3622_v57 = vpop.f32.mrf.mxu3  ;;  %v3534_v58 = vadd.f32 %v3533_v5, %v6277_v46  ;;  %v2014_v46 = vrot.slane %v2012_v18, 4  ;;  %v1677_v28 = vsel %vm5741_vm2, %v1672_v61, %v1676_v21  ;;  %v1692_v5 = vshll.u32 %v4605_v43, 16 }
 0x201   : > { %v3714_v9 = vpop.f32.mrf.mxu0  ;;  %v1691_v61 = vrot.slane %v1689_v50, 4 }
 0x202   : > { %v3623_v12 = vadd.f32 %v3622_v57, %v3534_v58  ;;  %v1698_v57 = vshll.u32 %v6854_v38, 16  ;;  %v2588_v58 = vunpack.c.l.b16 %v1677_v28  ;;  %v1694_v1 = vrot.slane %v1692_v5, 5 }
 0x203   : > { %v3803_v14 = vpop.f32.mrf.mxu1 }
 0x204   : > { %3851 = vmatmul.bf16.gmra.mxu2 %v5225_v11  ;;  %v6850_v3 = vadd.f32 %v3711_v41, %v3623_v12  ;;  %4029 = vmatmul.bf16.gmra.mxu0 %v2677_v26  ;;  %v2013_v41 = vsel %vm6036_vm5, %v4661_v30, %v2012_v18  ;;  %v2589_v18 = vunpack.c.l.b16 %v1687_v22  ;;  %v1700_v2 = vrot.slane %v1698_v57, 5 }
 0x205   : > { %3940 = vmatmul.bf16.gmra.mxu3 %v2613_v52  ;;  %v2016_v52 = vsel %vm6036_vm5, %v2014_v46, %v2015_v39  ;;  %v2652_v53 = vunpack.c.l.b16 %v2013_v41  ;;  %v1704_v30 = vrot.slane %v1702_v8, 4  ;;  %v4630_v39 = vld [vmem:[%s5700_s8 + $0x74] sm:$0x1]  ;;  %v1695_v22 = vor.u32 %v1694_v1, %v1691_v61  ;;  %v4646_v8 = vld [vmem:[%s5700_s8 + $0x6c] sm:$0xe] }
 0x206   : > { %v2653_v12 = vunpack.c.l.b16 %v2016_v52  ;;  %v2614_v28 = vpack.c.b16 %v2589_v18, %v2588_v58  ;;  %v1708_v52 = vshll.u32 %v4630_v39, 16  ;;  %v2019_v57 = vrot.slane %v6854_v38, 5 }
 0x207   : > { %v3536_v32 = vpop.f32.mrf.mxu2  ;;  %v1705_v41 = vor.u32 %v1704_v30, %v1700_v2  ;;  %v2022_v61 = vrot.slane %v4630_v39, 5 }
 0x208   : > { %v3625_v16 = vpop.f32.mrf.mxu3  ;;  %v3537_v54 = vadd.f32 %v3536_v32, %v6296_v15  ;;  %v5308_v15 = vld [vmem:[%s7189_s3] sm:$0xff]  ;;  %v1710_v58 = vrot.slane %v1708_v52, 5 }
 0x209   : > { %v3716_v21 = vpop.f32.mrf.mxu0  ;;  %4208 = vmatpush.bf16.msra.mxu1 %v5308_v15  ;;  %v6883_v15 = vld [vmem:[%s5700_s8 + $0x7c] sm:$0xf] }
 0x20a   : > { %v3626_v63 = vadd.f32 %v3625_v16, %v3537_v54  ;;  %v5226_v16 = vld [vmem:[%s5700_s8 + $0x60] sm:$0xff]  ;;  %v2678_v54 = vpack.c.b16 %v2653_v12, %v2652_v53  ;;  %v4662_v53 = vrot.slane %v4646_v8, 9  ;;  %v2021_v12 = vrot.slane %v2019_v57, 4 }
 0x20b   : > { %v6870_v26 = vpop.f32.mrf.mxu1 }
 0x20c   : > { %v3715_v11 = vadd.f32 %v3714_v9, %v3626_v63  ;;  %7206 = vst [vmem:[#allocation13_spill] sm:$0xff] %v6870_v26  ;;  %v4607_v63 = vld [vmem:[%s5700_s8 + $0x78] sm:$0xf]  ;;  %v2020_v39 = vsel %vm6036_vm5, %v4662_v53, %v2019_v57 }
 0x20d   : > { %v1716_v38 = vshll.u32 %v4607_v63, 16 }
 0x20e   : > { %v6872_v46 = vadd.f32 %v3803_v14, %v3715_v11  ;;  %v1706_v11 = vrot.slane %v1705_v41, 4  ;;  %v2023_v41 = vsel %vm6036_vm5, %v2021_v12, %v2022_v61  ;;  %v5227_v61 = vld [vmem:[%s5700_s8 + $0x6c] sm:$0xff] }
 0x20f   : > { %v3538_v43 = vpop.f32.mrf.mxu2 }
 0x210   : > { %v3627_v32 = vpop.f32.mrf.mxu3  ;;  %v3539_v9 = vadd.f32 %v3538_v43, %v6314_v55  ;;  %v1696_v55 = vrot.slane %v1695_v22, 4  ;;  %v1713_v43 = vshrl.u32 %v4607_v63, 16 }
 0x211   : > { %v3719_v5 = vpop.f32.mrf.mxu0 }
 0x212   : > { %v3628_v50 = vadd.f32 %v3627_v32, %v3539_v9  ;;  %v1722_v32 = vshll.u32 %v6883_v15, 16  ;;  %v1715_v52 = vrot.slane %v1713_v43, 4 }
 0x213   : > { %v3808_v18 = vpop.f32.mrf.mxu1 }
 0x214   : > { %3856 = vmatmul.bf16.gmra.mxu2 %v5226_v16  ;;  %v6879_v14 = vadd.f32 %v3716_v21, %v3628_v50  ;;  %4034 = vmatmul.bf16.gmra.mxu0 %v2678_v54  ;;  %v1726_v21 = vshrl.u32 %v6883_v15, 16  ;;  %v1701_v16 = vsel %vm5741_vm2, %v1696_v55, %v1700_v2  ;;  %v1718_v50 = vrot.slane %v1716_v38, 5  ;;  %v4631_v2 = vld [vmem:[%s5700_s8 + $0x80] sm:$0x1] }
 0x215   : > { %3945 = vmatmul.bf16.gmra.mxu3 %v2614_v28  ;;  %v1711_v28 = vsel %vm5741_vm2, %v1706_v11, %v1710_v58  ;;  %v1724_v8 = vrot.slane %v1722_v32, 5  ;;  %v2654_v55 = vunpack.c.l.b16 %v2020_v39  ;;  %v2655_v11 = vunpack.c.l.b16 %v2023_v41 }
 0x216   : > { %7207 = vst [vmem:[#allocation14_spill] sm:$0xff] %v6879_v14  ;;  %v1728_v63 = vrot.slane %v1726_v21, 4  ;;  %v2591_v26 = vunpack.c.l.b16 %v1711_v28  ;;  %v1719_v57 = vor.u32 %v1718_v50, %v1715_v52  ;;  %v1732_v14 = vshll.u32 %v4631_v2, 16  ;;  %v4647_v21 = vld [vmem:[%s5700_s8 + $0x78] sm:$0xe] }
 0x217   : > { %v3541_v1 = vpop.f32.mrf.mxu2  ;;  %v2026_v38 = vrot.slane %v6883_v15, 5  ;;  %v2679_v32 = vpack.c.b16 %v2655_v11, %v2654_v55  ;;  %v4609_v15 = vld [vmem:[%s5700_s8 + $0x84] sm:$0xf]  ;;  %v6909_v50 = vld [vmem:[%s5700_s8 + $0x88] sm:$0xf] }
 0x218   : > { %v3630_v30 = vpop.f32.mrf.mxu3  ;;  %v3542_v9 = vadd.f32 %v3541_v1, %v6339_v17  ;;  %v2590_v1 = vunpack.c.l.b16 %v1701_v16  ;;  %v1729_v53 = vor.u32 %v1728_v63, %v1724_v8  ;;  %v1720_v28 = vrot.slane %v1719_v57, 4 }
 0x219   : > { %v3721_v22 = vpop.f32.mrf.mxu0  ;;  %v1734_v39 = vrot.slane %v1732_v14, 5  ;;  %v2028_v52 = vrot.slane %v2026_v38, 4  ;;  %v1737_v11 = vshrl.u32 %v4609_v15, 16  ;;  %v1750_v57 = vshrl.u32 %v6909_v50, 16 }
 0x21a   : > { %v3631_v54 = vadd.f32 %v3630_v30, %v3542_v9  ;;  %v2615_v43 = vpack.c.b16 %v2591_v26, %v2590_v1  ;;  %v2029_v26 = vrot.slane %v4631_v2, 5  ;;  %v1725_v1 = vsel %vm5741_vm2, %v1720_v28, %v1724_v8 }
 0x21c   : > { %v3720_v17 = vadd.f32 %v3719_v5, %v3631_v54  ;;  %v6902_v5 = vpop.f32.mrf.mxu1  ;;  %v1730_v54 = vrot.slane %v1729_v53, 4  ;;  %v2030_v2 = vsel %vm6036_vm5, %v2028_v52, %v2029_v26 }
 0x21e   : > { %v6897_v58 = vadd.f32 %v3808_v18, %v3720_v17  ;;  %v1735_v14 = vsel %vm5741_vm2, %v1730_v54, %v1734_v39  ;;  %v1752_v54 = vrot.slane %v1750_v57, 4  ;;  %v4611_v57 = vld [vmem:[%s5700_s8 + $0x90] sm:$0xf] }
 0x21f   : > { %v3543_v30 = vpop.f32.mrf.mxu2 }
 0x220   : > { %v3632_v9 = vpop.f32.mrf.mxu3  ;;  %v3544_v12 = vadd.f32 %v3543_v30, %v6360_v4  ;;  %v4663_v4 = vrot.slane %v4647_v21, 9  ;;  %v1740_v30 = vshll.u32 %v4609_v15, 16  ;;  %v2657_v21 = vunpack.c.l.b16 %v2030_v2 }
 0x221   : > { %v3724_v18 = vpop.f32.mrf.mxu0 }
 0x222   : > { %v3633_v16 = vadd.f32 %v3632_v9, %v3544_v12  ;;  %v1746_v9 = vshll.u32 %v6909_v50, 16  ;;  %v2592_v12 = vunpack.c.l.b16 %v1725_v1 }
 0x224   : > { %3861 = vmatmul.bf16.gmra.mxu2 %v5227_v61  ;;  %v6905_v41 = vadd.f32 %v3721_v22, %v3633_v16  ;;  %4039 = vmatmul.bf16.gmra.mxu0 %v2679_v32  ;;  %v2027_v22 = vsel %vm6036_vm5, %v4663_v4, %v2026_v38  ;;  %v1739_v38 = vrot.slane %v1737_v11, 4  ;;  %v1742_v16 = vrot.slane %v1740_v30, 5  ;;  %v4632_v4 = vld [vmem:[%s5700_s8 + $0x8c] sm:$0x1]  ;;  %v4648_v30 = vld [vmem:[%s5700_s8 + $0x84] sm:$0xe] }
 0x225   : > { %3950 = vmatmul.bf16.gmra.mxu3 %v2615_v43  ;;  %v2593_v43 = vunpack.c.l.b16 %v1735_v14  ;;  %v2656_v32 = vunpack.c.l.b16 %v2027_v22  ;;  %v1748_v28 = vrot.slane %v1746_v9, 5  ;;  %v1756_v14 = vshll.u32 %v4632_v4, 16 }
 0x226   : > { %v1743_v1 = vor.u32 %v1742_v16, %v1739_v38  ;;  %v2033_v11 = vrot.slane %v6909_v50, 5  ;;  %v1761_v16 = vshrl.u32 %v4611_v57, 16  ;;  %v1764_v50 = vshll.u32 %v4611_v57, 16  ;;  %v4633_v57 = vld [vmem:[%s5700_s8 + $0x98] sm:$0x1] }
 0x227   : > { %v3546_v63 = vpop.f32.mrf.mxu2 }
 0x228   : > { %v3635_v17 = vpop.f32.mrf.mxu3  ;;  %v3547_v55 = vadd.f32 %v3546_v63, %v6381_v7  ;;  %v3813_v7 = vpop.f32.mrf.mxu1  ;;  %v5228_v63 = vld [vmem:[%s5700_s8 + $0x78] sm:$0xff] }
 0x229   : > { %v3726_v8 = vpop.f32.mrf.mxu0 }
 0x22a   : > { %v3636_v53 = vadd.f32 %v3635_v17, %v3547_v55  ;;  %v2616_v17 = vpack.c.b16 %v2593_v43, %v2592_v12  ;;  %v1753_v55 = vor.u32 %v1752_v54, %v1748_v28  ;;  %v1758_v12 = vrot.slane %v1756_v14, 5 }
 0x22b   : > { %v2035_v43 = vrot.slane %v2033_v11, 4 }
 0x22c   : > { %v3725_v61 = vadd.f32 %v3724_v18, %v3636_v53  ;;  %v2680_v18 = vpack.c.b16 %v2657_v21, %v2656_v32  ;;  %v6933_v53 = vld [vmem:[%s5700_s8 + $0x94] sm:$0xf]  ;;  %v2036_v32 = vrot.slane %v4632_v4, 5 }
 0x22d   : > { %v1770_v54 = vshll.u32 %v6933_v53, 16 }
 0x22e   : > { %v6922_v39 = vadd.f32 %v3813_v7, %v3725_v61  ;;  %v1754_v7 = vrot.slane %v1753_v55, 4  ;;  %v4664_v61 = vrot.slane %v4648_v30, 9  ;;  %v1766_v55 = vrot.slane %v1764_v50, 5 }
 0x22f   : > { %v3548_v52 = vpop.f32.mrf.mxu2  ;;  %v1772_v14 = vrot.slane %v1770_v54, 5  ;;  %v4649_v54 = vld [vmem:[%s5700_s8 + $0x90] sm:$0xe] }
 0x230   : > { %7208 = vst [vmem:[#allocation15_spill] sm:$0xff] %v6922_v39  ;;  %v3637_v26 = vpop.f32.mrf.mxu3  ;;  %v3549_v15 = vadd.f32 %v3548_v52, %v6405_v34  ;;  %v1744_v34 = vrot.slane %v1743_v1, 4  ;;  %v2034_v4 = vsel %vm6036_vm5, %v4664_v61, %v2033_v11  ;;  %v1763_v1 = vrot.slane %v1761_v16, 4 }
 0x231   : > { %v4005_v2 = vpop.f32.mrf.mxu0  ;;  %v1780_v11 = vshll.u32 %v4633_v57, 16  ;;  %v2040_v16 = vrot.slane %v6933_v53, 5 }
 0x232   : > { %v3638_v22 = vadd.f32 %v3637_v26, %v3549_v15  ;;  %v1749_v52 = vsel %vm5741_vm2, %v1744_v34, %v1748_v28  ;;  %v1759_v26 = vsel %vm5741_vm2, %v1754_v7, %v1758_v12  ;;  %v7210_v15 = vld [vmem:[#allocation5_spill] sm:$0xff]  ;;  %v2658_v34 = vunpack.c.l.b16 %v2034_v4 }
 0x233   : > { %v2594_v30 = vunpack.c.l.b16 %v1749_v52  ;;  %v2595_v28 = vunpack.c.l.b16 %v1759_v26 }
 0x234   : > { %3866 = vmatmul.bf16.gmra.mxu2 %v5228_v63  ;;  %v6929_v9 = vadd.f32 %v3726_v8, %v3638_v22  ;;  %4044 = vmatmul.bf16.gmra.mxu0 %v2680_v18  ;;  %v1774_v8 = vshrl.u32 %v6933_v53, 16  ;;  %v2037_v18 = vsel %vm6036_vm5, %v2035_v43, %v2036_v32  ;;  %v5229_v43 = vld [vmem:[%s5700_s8 + $0x84] sm:$0xff]  ;;  %v4613_v53 = vld [vmem:[%s5700_s8 + $0x9c] sm:$0xf] }
 0x235   : > { %3955 = vmatmul.bf16.gmra.mxu3 %v2616_v17  ;;  %v2659_v7 = vunpack.c.l.b16 %v2037_v18  ;;  %v2617_v32 = vpack.c.b16 %v2595_v28, %v2594_v30  ;;  %v6953_v28 = vld [vmem:[%s5700_s8 + $0xa0] sm:$0xf] }
 0x236   : > { %7209 = vst [vmem:[#allocation16_spill] sm:$0xff] %v6929_v9  ;;  %v1776_v22 = vrot.slane %v1774_v8, 4  ;;  %v1767_v9 = vor.u32 %v1766_v55, %v1763_v1  ;;  %v4665_v1 = vrot.slane %v4649_v54, 9  ;;  %v2042_v55 = vrot.slane %v2040_v16, 4 }
 0x237   : > { %v3827_v21 = vpop.f32.mrf.mxu2  ;;  %v2681_v50 = vpack.c.b16 %v2659_v7, %v2658_v34 }
 0x238   : > { %v3916_v38 = vpop.f32.mrf.mxu3  ;;  %v3828_v63 = vadd.f32 %v3827_v21, %v7210_v15  ;;  %v1777_v39 = vor.u32 %v1776_v22, %v1772_v14  ;;  %v1768_v4 = vrot.slane %v1767_v9, 4 }
 0x239   : > { %v4007_v17 = vpop.f32.mrf.mxu0 }
 0x23a   : > { %v3917_v12 = vadd.f32 %v3916_v38, %v3828_v63  ;;  %v1778_v38 = vrot.slane %v1777_v39, 4  ;;  %v1782_v63 = vrot.slane %v1780_v11, 5  ;;  %v1773_v7 = vsel %vm5741_vm2, %v1768_v4, %v1772_v14 }
 0x23b   : > { %v1798_v11 = vshrl.u32 %v6953_v28, 16 }
 0x23c   : > { %v4006_v8 = vadd.f32 %v4005_v2, %v3917_v12  ;;  %v1783_v39 = vsel %vm5741_vm2, %v1778_v38, %v1782_v63  ;;  %v1785_v12 = vshrl.u32 %v4613_v53, 16 }
 0x23d   : > { %v1800_v38 = vrot.slane %v1798_v11, 4  ;;  %v4615_v11 = vld [vmem:[%s5700_s8 + $0xa8] sm:$0xf] }
 0x23e   : > { %v4085_v22 = vmax.f32 %v4006_v8, 0.0 }
 0x23f   : > { %v3829_v21 = vpop.f32.mrf.mxu2 }
 0x240   : > { %v3918_v15 = vpop.f32.mrf.mxu3  ;;  %v3830_v61 = vadd.f32 %v3829_v21, %v6453_v60  ;;  %v2043_v60 = vrot.slane %v4633_v57, 5  ;;  %v1788_v21 = vshll.u32 %v4613_v53, 16 }
 0x241   : > { %v4010_v26 = vpop.f32.mrf.mxu0 }
 0x242   : > { %v3919_v52 = vadd.f32 %v3918_v15, %v3830_v61  ;;  %v2044_v57 = vsel %vm6036_vm5, %v2042_v55, %v2043_v60  ;;  %v1794_v15 = vshll.u32 %v6953_v28, 16  ;;  %v7211_v61 = vld [vmem:[#allocation6_spill] sm:$0xff]  ;;  %v7212_v60 = vld [vmem:[#allocation7_spill] sm:$0xff] }
 0x243   : > { %v2661_v8 = vunpack.c.l.b16 %v2044_v57 }
 0x244   : > { %v4008_v18 = vadd.f32 %v4007_v17, %v3919_v52  ;;  %3871 = vmatmul.bf16.gmra.mxu2 %v5229_v43  ;;  %4049 = vmatmul.bf16.gmra.mxu0 %v2681_v50  ;;  %v2041_v17 = vsel %vm6036_vm5, %v4665_v1, %v2040_v16  ;;  %v2597_v50 = vunpack.c.l.b16 %v1783_v39  ;;  %v1787_v16 = vrot.slane %v1785_v12, 4 }
 0x245   : > { %3960 = vmatmul.bf16.gmra.mxu3 %v2617_v32  ;;  %v2596_v32 = vunpack.c.l.b16 %v1773_v7  ;;  %v2660_v54 = vunpack.c.l.b16 %v2041_v17  ;;  %v1790_v52 = vrot.slane %v1788_v21, 5  ;;  %v1796_v4 = vrot.slane %v1794_v15, 5  ;;  %v4650_v21 = vld [vmem:[%s5700_s8 + $0x9c] sm:$0xe] }
 0x246   : > { %v4086_v30 = vmax.f32 %v4008_v18, 0.0  ;;  %v4634_v18 = vld [vmem:[%s5700_s8 + $0xa4] sm:$0x1]  ;;  %v2047_v15 = vrot.slane %v6953_v28, 5 }
 0x247   : > { %v3832_v34 = vpop.f32.mrf.mxu2  ;;  %v2618_v53 = vpack.c.b16 %v2597_v50, %v2596_v32  ;;  %v1791_v7 = vor.u32 %v1790_v52, %v1787_v16  ;;  %v1804_v39 = vshll.u32 %v4634_v18, 16  ;;  %v4666_v50 = vrot.slane %v4650_v21, 9 }
 0x248   : > { %v3921_v2 = vpop.f32.mrf.mxu3  ;;  %v4117_v9 = vpack.c.bf16 %v4086_v30, %v4085_v22  ;;  %v3833_v43 = vadd.f32 %v3832_v34, %v7211_v61  ;;  %v5230_v30 = vld [vmem:[%s5700_s8 + $0x90] sm:$0xff]  ;;  %v2682_v34 = vpack.c.b16 %v2661_v8, %v2660_v54  ;;  %v6973_v61 = vld [vmem:[%s5700_s8 + $0xac] sm:$0xf]  ;;  %v2049_v16 = vrot.slane %v2047_v15, 4 }
 0x249   : > { %v4012_v14 = vpop.f32.mrf.mxu0  ;;  %v1806_v32 = vrot.slane %v1804_v39, 5  ;;  %v1818_v28 = vshll.u32 %v6973_v61, 16 }
 0x24a   : > { %4209 = vmatmul.bf16.vlgmr.msra.gmra.mxu1 %v4117_v9  ;;  %v3922_v63 = vadd.f32 %v3921_v2, %v3833_v43  ;;  %v1801_v9 = vor.u32 %v1800_v38, %v1796_v4  ;;  %v1792_v43 = vrot.slane %v1791_v7, 4  ;;  %v2048_v7 = vsel %vm6036_vm5, %v4666_v50, %v2047_v15 }
 0x24c   : > { %v4011_v17 = vadd.f32 %v4010_v26, %v3922_v63  ;;  %v2050_v26 = vrot.slane %v4634_v18, 5  ;;  %v1809_v63 = vshrl.u32 %v4615_v11, 16 }
 0x24e   : > { %v4087_v54 = vmax.f32 %v4011_v17, 0.0  ;;  %v1811_v39 = vrot.slane %v1809_v63, 4  ;;  %v2054_v63 = vrot.slane %v6973_v61, 5 }
 0x24f   : > { %v3834_v1 = vpop.f32.mrf.mxu2 }
 0x250   : > { %v3923_v55 = vpop.f32.mrf.mxu3  ;;  %v3835_v22 = vadd.f32 %v3834_v1, %v7212_v60  ;;  %v1802_v1 = vrot.slane %v1801_v9, 4  ;;  %v2051_v9 = vsel %vm6036_vm5, %v2049_v16, %v2050_v26  ;;  %v5231_v16 = vld [vmem:[%s5700_s8 + $0x9c] sm:$0xff] }
 0x251   : > { %v4015_v12 = vpop.f32.mrf.mxu0 }
 0x252   : > { %v3924_v57 = vadd.f32 %v3923_v55, %v3835_v22  ;;  %v1812_v55 = vshll.u32 %v4615_v11, 16  ;;  %v1797_v22 = vsel %vm5741_vm2, %v1792_v43, %v1796_v4  ;;  %v4635_v11 = vld [vmem:[%s5700_s8 + $0xb0] sm:$0x1]  ;;  %v2662_v43 = vunpack.c.l.b16 %v2048_v7 }
 0x253   : > { %v1828_v15 = vshll.u32 %v4635_v11, 16 }
 0x254   : > { %v4013_v2 = vadd.f32 %v4012_v14, %v3924_v57  ;;  %3876 = vmatmul.bf16.gmra.mxu2 %v5230_v30  ;;  %4054 = vmatmul.bf16.gmra.mxu0 %v2682_v34  ;;  %v1822_v14 = vshrl.u32 %v6973_v61, 16  ;;  %v1807_v30 = vsel %vm5741_vm2, %v1802_v1, %v1806_v32  ;;  %v1814_v17 = vrot.slane %v1812_v55, 5  ;;  %v4617_v61 = vld [vmem:[%s5700_s8 + $0xb4] sm:$0xf] }
 0x255   : > { %3965 = vmatmul.bf16.gmra.mxu3 %v2618_v53  ;;  %v7213_v53 = vld [vmem:[#allocation8_spill] sm:$0xff]  ;;  %v1820_v57 = vrot.slane %v1818_v28, 5  ;;  %v2599_v4 = vunpack.c.l.b16 %v1807_v30  ;;  %v2663_v1 = vunpack.c.l.b16 %v2051_v9  ;;  %v4651_v28 = vld [vmem:[%s5700_s8 + $0xa8] sm:$0xe] }
 0x256   : > { %v4088_v8 = vmax.f32 %v4013_v2, 0.0  ;;  %v1824_v21 = vrot.slane %v1822_v14, 4  ;;  %v2598_v2 = vunpack.c.l.b16 %v1797_v22  ;;  %v4667_v9 = vrot.slane %v4651_v28, 9 }
 0x257   : > { %v3837_v52 = vpop.f32.mrf.mxu2  ;;  %v2683_v55 = vpack.c.b16 %v2663_v1, %v2662_v43 }
 0x258   : > { %v3926_v38 = vpop.f32.mrf.mxu3  ;;  %v4118_v60 = vpack.c.bf16 %v4088_v8, %v4087_v54  ;;  %v3838_v34 = vadd.f32 %v3837_v52, %v7213_v53  ;;  %v1815_v52 = vor.u32 %v1814_v17, %v1811_v39  ;;  %v2619_v26 = vpack.c.b16 %v2599_v4, %v2598_v2  ;;  %v6993_v2 = vld [vmem:[%s5700_s8 + $0xb8] sm:$0xf] }
 0x259   : > { %v4017_v18 = vpop.f32.mrf.mxu0  ;;  %v2056_v39 = vrot.slane %v2054_v63, 4 }
 0x25a   : > { %4214 = vmatmul.bf16.gmra.mxu1 %v4118_v60  ;;  %v3927_v32 = vadd.f32 %v3926_v38, %v3838_v34  ;;  %v1825_v60 = vor.u32 %v1824_v21, %v1820_v57  ;;  %v1816_v53 = vrot.slane %v1815_v52, 4  ;;  %v1830_v34 = vrot.slane %v1828_v15, 5 }
 0x25b   : > { %v1842_v52 = vshll.u32 %v6993_v2, 16 }
 0x25c   : > { %v4016_v14 = vadd.f32 %v4015_v12, %v3927_v32  ;;  %v1826_v38 = vrot.slane %v1825_v60, 4  ;;  %v1821_v43 = vsel %vm5741_vm2, %v1816_v53, %v1820_v57  ;;  %v2055_v32 = vsel %vm6036_vm5, %v4667_v9, %v2054_v63 }
 0x25d   : > { %v1846_v60 = vshrl.u32 %v6993_v2, 16 }
 0x25e   : > { %v4089_v17 = vmax.f32 %v4016_v14, 0.0  ;;  %v1844_v14 = vrot.slane %v1842_v52, 5 }
 0x25f   : > { %v3839_v54 = vpop.f32.mrf.mxu2 }
 0x260   : > { %v3928_v8 = vpop.f32.mrf.mxu3  ;;  %v3840_v50 = vadd.f32 %v3839_v54, %v6542_v45  ;;  %v2057_v45 = vrot.slane %v4635_v11, 5  ;;  %v1833_v54 = vshrl.u32 %v4617_v61, 16 }
 0x261   : > { %v4020_v30 = vpop.f32.mrf.mxu0 }
 0x262   : > { %v3929_v22 = vadd.f32 %v3928_v8, %v3840_v50  ;;  %v2058_v11 = vsel %vm6036_vm5, %v2056_v39, %v2057_v45  ;;  %v1836_v8 = vshll.u32 %v4617_v61, 16  ;;  %v2600_v50 = vunpack.c.l.b16 %v1821_v43 }
 0x263   : > { %v1835_v63 = vrot.slane %v1833_v54, 4  ;;  %v7013_v54 = vld [vmem:[%s5700_s8 + $0xc4] sm:$0xf] }
 0x264   : > { %v4018_v7 = vadd.f32 %v4017_v18, %v3929_v22  ;;  %3881 = vmatmul.bf16.gmra.mxu2 %v5231_v16  ;;  %4059 = vmatmul.bf16.gmra.mxu0 %v2683_v55  ;;  %v1831_v18 = vsel %vm5741_vm2, %v1826_v38, %v1830_v34  ;;  %v2665_v55 = vunpack.c.l.b16 %v2058_v11  ;;  %v1838_v28 = vrot.slane %v1836_v8, 5  ;;  %v4636_v38 = vld [vmem:[%s5700_s8 + $0xbc] sm:$0x1]  ;;  %v4619_v11 = vld [vmem:[%s5700_s8 + $0xc0] sm:$0xf] }
 0x265   : > { %3970 = vmatmul.bf16.gmra.mxu3 %v2619_v26  ;;  %v2601_v16 = vunpack.c.l.b16 %v1831_v18  ;;  %v2664_v26 = vunpack.c.l.b16 %v2055_v32  ;;  %v1848_v22 = vrot.slane %v1846_v60, 4  ;;  %v1852_v61 = vshll.u32 %v4636_v38, 16  ;;  %v4652_v18 = vld [vmem:[%s5700_s8 + $0xb4] sm:$0xe] }
 0x266   : > { %v4090_v21 = vmax.f32 %v4018_v7, 0.0  ;;  %v2061_v32 = vrot.slane %v6993_v2, 5  ;;  %v4668_v60 = vrot.slane %v4652_v18, 9  ;;  %v1866_v2 = vshll.u32 %v7013_v54, 16 }
 0x267   : > { %v3842_v4 = vpop.f32.mrf.mxu2  ;;  %v2620_v39 = vpack.c.b16 %v2601_v16, %v2600_v50  ;;  %v2684_v45 = vpack.c.b16 %v2665_v55, %v2664_v26  ;;  %v1854_v52 = vrot.slane %v1852_v61, 5 }
 0x268   : > { %v3931_v12 = vpop.f32.mrf.mxu3  ;;  %v4119_v1 = vpack.c.bf16 %v4090_v21, %v4089_v17  ;;  %v3843_v15 = vadd.f32 %v3842_v4, %v6562_v37  ;;  %v5232_v37 = vld [vmem:[%s5700_s8 + $0xa8] sm:$0xff]  ;;  %v1839_v17 = vor.u32 %v1838_v28, %v1835_v63  ;;  %v1849_v21 = vor.u32 %v1848_v22, %v1844_v14 }
 0x269   : > { %v4022_v57 = vpop.f32.mrf.mxu0  ;;  %v2063_v16 = vrot.slane %v2061_v32, 4  ;;  %v1857_v63 = vshrl.u32 %v4619_v11, 16  ;;  %v1860_v28 = vshll.u32 %v4619_v11, 16 }
 0x26a   : > { %4219 = vmatmul.bf16.gmra.mxu1 %v4119_v1  ;;  %v3932_v53 = vadd.f32 %v3931_v12, %v3843_v15  ;;  %v1850_v8 = vrot.slane %v1849_v21, 4 }
 0x26c   : > { %v4021_v4 = vadd.f32 %v4020_v30, %v3932_v53  ;;  %v2064_v30 = vrot.slane %v4636_v38, 5 }
 0x26e   : > { %v4091_v15 = vmax.f32 %v4021_v4, 0.0  ;;  %v4637_v4 = vld [vmem:[%s5700_s8 + $0xc8] sm:$0x1] }
 0x26f   : > { %v3844_v34 = vpop.f32.mrf.mxu2 }
 0x270   : > { %v3933_v7 = vpop.f32.mrf.mxu3  ;;  %v3845_v9 = vadd.f32 %v3844_v34, %v6575_v42  ;;  %v1840_v42 = vrot.slane %v1839_v17, 4  ;;  %v1855_v34 = vsel %vm5741_vm2, %v1850_v8, %v1854_v52  ;;  %v1868_v17 = vrot.slane %v1866_v2, 5 }
 0x271   : > { %v4025_v1 = vpop.f32.mrf.mxu0  ;;  %v1876_v52 = vshll.u32 %v4637_v4, 16 }
 0x272   : > { %v3934_v43 = vadd.f32 %v3933_v7, %v3845_v9  ;;  %v1845_v53 = vsel %vm5741_vm2, %v1840_v42, %v1844_v14  ;;  %v2062_v9 = vsel %vm6036_vm5, %v4668_v60, %v2061_v32  ;;  %v2603_v14 = vunpack.c.l.b16 %v1855_v34 }
 0x273   : > { %v2602_v61 = vunpack.c.l.b16 %v1845_v53  ;;  %v2071_v34 = vrot.slane %v4637_v4, 5 }
 0x274   : > { %v4023_v12 = vadd.f32 %v4022_v57, %v3934_v43  ;;  %3886 = vmatmul.bf16.gmra.mxu2 %v5232_v37  ;;  %4064 = vmatmul.bf16.gmra.mxu0 %v2684_v45  ;;  %v1870_v57 = vshrl.u32 %v7013_v54, 16  ;;  %v2065_v37 = vsel %vm6036_vm5, %v2063_v16, %v2064_v30  ;;  %v1862_v45 = vrot.slane %v1860_v28, 5 }
 0x275   : > { %3975 = vmatmul.bf16.gmra.mxu3 %v2620_v39  ;;  %v1859_v39 = vrot.slane %v1857_v63, 4  ;;  %v2666_v43 = vunpack.c.l.b16 %v2062_v9  ;;  %v2667_v18 = vunpack.c.l.b16 %v2065_v37  ;;  %v2068_v16 = vrot.slane %v7013_v54, 5  ;;  %v4621_v54 = vld [vmem:[%s5700_s8 + $0xcc] sm:$0xf]  ;;  %v4622_v37 = vld [vmem:[%s5700_s8 + $0xd0] sm:$0xf] }
 0x276   : > { %v4092_v50 = vmax.f32 %v4023_v12, 0.0  ;;  %v1872_v21 = vrot.slane %v1870_v57, 4  ;;  %v1881_v4 = vshrl.u32 %v4621_v54, 16 }
 0x277   : > { %v3847_v26 = vpop.f32.mrf.mxu2  ;;  %v1863_v42 = vor.u32 %v1862_v45, %v1859_v39  ;;  %v2685_v30 = vpack.c.b16 %v2667_v18, %v2666_v43  ;;  %v2070_v53 = vrot.slane %v2068_v16, 4  ;;  %v1884_v43 = vshll.u32 %v4621_v54, 16  ;;  %v4654_v54 = vld [vmem:[%s5700_s8 + $0xcc] sm:$0xe] }
 0x278   : > { %v3936_v55 = vpop.f32.mrf.mxu3  ;;  %v4120_v22 = vpack.c.bf16 %v4092_v50, %v4091_v15  ;;  %v3848_v7 = vadd.f32 %v3847_v26, %v6604_v51  ;;  %v3761_v51 = vadd.f32 %v6596_v49, %v6617_v0  ;;  %v1873_v8 = vor.u32 %v1872_v21, %v1868_v17  ;;  %v5233_v15 = vld [vmem:[%s5700_s8 + $0xb4] sm:$0xff]  ;;  %v4653_v26 = vld [vmem:[%s5700_s8 + $0xc0] sm:$0xe] }
 0x279   : > { %v4027_v38 = vpop.f32.mrf.mxu0  ;;  %v2621_v50 = vpack.c.b16 %v2603_v14, %v2602_v61  ;;  %v1864_v57 = vrot.slane %v1863_v42, 4  ;;  %v1878_v0 = vrot.slane %v1876_v52, 5  ;;  %v2072_v14 = vsel %vm6036_vm5, %v2070_v53, %v2071_v34 }
 0x27a   : > { %4224 = vmatmul.bf16.gmra.mxu1 %v4120_v22  ;;  %v3937_v12 = vadd.f32 %v3936_v55, %v3848_v7  ;;  %v1874_v49 = vrot.slane %v1873_v8, 4  ;;  %v4669_v22 = vrot.slane %v4653_v26, 9  ;;  %v1890_v18 = vshll.u32 %v4622_v37, 16  ;;  %v4638_v26 = vld [vmem:[%s5700_s8 + $0xd4] sm:$0x1] }
 0x27b   : > { %v2669_v8 = vunpack.c.l.b16 %v2072_v14  ;;  %v1883_v52 = vrot.slane %v1881_v4, 4  ;;  %v1900_v53 = vshll.u32 %v4638_v26, 16  ;;  %v2078_v4 = vrot.slane %v4638_v26, 5 }
 0x27c   : > { %v4026_v63 = vadd.f32 %v4025_v1, %v3937_v12  ;;  %v1869_v1 = vsel %vm5741_vm2, %v1864_v57, %v1868_v17  ;;  %v1879_v61 = vsel %vm5741_vm2, %v1874_v49, %v1878_v0  ;;  %v5234_v57 = vld [vmem:[%s5700_s8 + $0xc0] sm:$0xff] }
 0x27e   : > { %v4093_v7 = vmax.f32 %v4026_v63, 0.0 }
 0x27f   : > { %v3849_v11 = vpop.f32.mrf.mxu2 }
 0x280   : > { %v3938_v32 = vpop.f32.mrf.mxu3  ;;  %v3850_v60 = vadd.f32 %v3849_v11, %v3761_v51  ;;  %v1894_v51 = vshrl.u32 %v4622_v37, 16  ;;  %v2604_v11 = vunpack.c.l.b16 %v1869_v1 }
 0x281   : > { %v4030_v2 = vpop.f32.mrf.mxu0 }
 0x282   : > { %v3939_v28 = vadd.f32 %v3938_v32, %v3850_v60  ;;  %v2605_v32 = vunpack.c.l.b16 %v1879_v61  ;;  %v1886_v60 = vrot.slane %v1884_v43, 5 }
 0x284   : > { %v4028_v55 = vadd.f32 %v4027_v38, %v3939_v28  ;;  %3891 = vmatmul.bf16.gmra.mxu2 %v5233_v15  ;;  %4069 = vmatmul.bf16.gmra.mxu0 %v2685_v30  ;;  %v2069_v38 = vsel %vm6036_vm5, %v4669_v22, %v2068_v16  ;;  %v1892_v15 = vrot.slane %v1890_v18, 5  ;;  %v3766_v16 = vadd.f32 %v6641_v20, %v6657_v48 }
 0x285   : > { %3980 = vmatmul.bf16.gmra.mxu3 %v2621_v50  ;;  %v2668_v42 = vunpack.c.l.b16 %v2069_v38  ;;  %v1896_v50 = vrot.slane %v1894_v51, 4  ;;  %v2622_v49 = vpack.c.b16 %v2605_v32, %v2604_v11 }
 0x286   : > { %v4094_v9 = vmax.f32 %v4028_v55, 0.0  ;;  %v1887_v55 = vor.u32 %v1886_v60, %v1883_v52 }
 0x287   : > { %v3852_v39 = vpop.f32.mrf.mxu2  ;;  %v2686_v0 = vpack.c.b16 %v2669_v8, %v2668_v42  ;;  %v1897_v22 = vor.u32 %v1896_v50, %v1892_v15 }
 0x288   : > { %v3941_v45 = vpop.f32.mrf.mxu3  ;;  %v4121_v21 = vpack.c.bf16 %v4094_v9, %v4093_v7  ;;  %v3853_v12 = vadd.f32 %v3852_v39, %v6645_v33  ;;  %v2075_v39 = vrot.slane %v4622_v37, 5  ;;  %v1888_v20 = vrot.slane %v1887_v55, 4 }
 0x289   : > { %v4032_v17 = vpop.f32.mrf.mxu0  ;;  %v1898_v48 = vrot.slane %v1897_v22, 4 }
 0x28a   : > { %4229 = vmatmul.bf16.gmra.mxu1 %v4121_v21  ;;  %v3942_v30 = vadd.f32 %v3941_v45, %v3853_v12  ;;  %v1902_v45 = vrot.slane %v1900_v53, 5  ;;  %v4670_v21 = vrot.slane %v4654_v54, 9  ;;  %v2077_v14 = vrot.slane %v2075_v39, 4 }
 0x28b   : > { %v3776_v54 = vadd.f32 %v6705_v29, %v6714_v40  ;;  %v3781_v29 = vadd.f32 %v6731_v19, %v6740_v27 }
 0x28c   : > { %v4031_v34 = vadd.f32 %v4030_v2, %v3942_v30  ;;  %v1893_v2 = vsel %vm5741_vm2, %v1888_v20, %v1892_v15  ;;  %v1903_v37 = vsel %vm5741_vm2, %v1898_v48, %v1902_v45  ;;  %v2076_v11 = vsel %vm6036_vm5, %v4670_v21, %v2075_v39  ;;  %v7214_v15 = vld [vmem:[#allocation9_spill] sm:$0xff] }
 0x28d   : > { %v2079_v32 = vsel %vm6036_vm5, %v2077_v14, %v2078_v4  ;;  %v2606_v42 = vunpack.c.l.b16 %v1893_v2  ;;  %v2607_v8 = vunpack.c.l.b16 %v1903_v37  ;;  %v2670_v52 = vunpack.c.l.b16 %v2076_v11 }
 0x28e   : > { %v4095_v61 = vmax.f32 %v4031_v34, 0.0  ;;  %v2671_v60 = vunpack.c.l.b16 %v2079_v32  ;;  %v3771_v50 = vadd.f32 %v7214_v15, %v6685_v31 }
 0x28f   : > { %v3854_v63 = vpop.f32.mrf.mxu2 }
 0x290   : > { %v3943_v28 = vpop.f32.mrf.mxu3  ;;  %v3855_v33 = vadd.f32 %v3854_v63, %v3766_v16  ;;  %v2623_v63 = vpack.c.b16 %v2607_v8, %v2606_v42 }
 0x291   : > { %v4035_v9 = vpop.f32.mrf.mxu0 }
 0x292   : > { %v3944_v7 = vadd.f32 %v3943_v28, %v3855_v33  ;;  %v2687_v28 = vpack.c.b16 %v2671_v60, %v2670_v52 }
 0x294   : > { %v4033_v1 = vadd.f32 %v4032_v17, %v3944_v7  ;;  %3896 = vmatmul.bf16.gmra.mxu2 %v5234_v57  ;;  %4074 = vmatmul.bf16.gmra.mxu0 %v2686_v0 }
 0x295   : > { %3985 = vmatmul.bf16.gmra.mxu3 %v2622_v49 }
 0x296   : > { %v4096_v38 = vmax.f32 %v4033_v1, 0.0 }
 0x297   : > { %v3857_v43 = vpop.f32.mrf.mxu2 }
 0x298   : > { %v3946_v18 = vpop.f32.mrf.mxu3  ;;  %v4122_v51 = vpack.c.bf16 %v4096_v38, %v4095_v61  ;;  %v3858_v12 = vadd.f32 %v3857_v43, %v6679_v35  ;;  %v5235_v35 = vld [vmem:[%s5700_s8 + $0xcc] sm:$0xff]  ;;  %s5530_s8 = scalar_lea.hbm %s7191_s5, 256 }
 0x299   : > { %v4037_v17 = vpop.f32.mrf.mxu0  ;;  %p5532_p2 = scmp.lt.s32.totalorder %s5530_s8, %s5526_s24 }
 0x29a   : > { %4234 = vmatmul.bf16.gmra.mxu1 %v4122_v51  ;;  %v3947_v44 = vadd.f32 %v3946_v18, %v3858_v12  ;;  %v7066_v12 = vpop.f32.mrf.mxu1 }
 0x29b   : > { %p5533_p3 = por %p5532_p2, %p5531_p1 }
 0x29c   : > { %v4036_v33 = vadd.f32 %v4035_v9, %v3947_v44 }
 0x29d   : > { %p5534_p5 = pnand %p5533_p3, %p5529_p0 }
 0x29e   : > { %v4097_v13 = vmax.f32 %v4036_v33, 0.0 }
 0x29f   : > { %v3859_v16 = vpop.f32.mrf.mxu2 }
 0x2a0   : > { %v3948_v30 = vpop.f32.mrf.mxu3  ;;  %v3860_v26 = vadd.f32 %v3859_v16, %v3771_v50  ;;  %v7072_v16 = vld [vmem:[%s7190_s4] ss:$0 sm:$0xff] }
 0x2a1   : > { %v4040_v49 = vpop.f32.mrf.mxu0 }
 0x2a2   : > { %v3949_v57 = vadd.f32 %v3948_v30, %v3860_v26  ;;  %v3786_v30 = vadd.f32 %v6760_v25, %v6769_v56 }
 0x2a4   : > { %v4038_v0 = vadd.f32 %v4037_v17, %v3949_v57  ;;  %3901 = vmatmul.bf16.gmra.mxu2 %v5235_v35  ;;  %4079 = vmatmul.bf16.gmra.mxu0 %v2687_v28 }
 0x2a5   : > { %3990 = vmatmul.bf16.gmra.mxu3 %v2623_v63 }
 0x2a6   : > { %v4098_v55 = vmax.f32 %v4038_v0, 0.0 }
 0x2a7   : > { %v3862_v22 = vpop.f32.mrf.mxu2 }
 0x2a8   : > { %v3951_v53 = vpop.f32.mrf.mxu3  ;;  %v4123_v34 = vpack.c.bf16 %v4098_v55, %v4097_v13  ;;  %v3863_v31 = vadd.f32 %v3862_v22, %v6707_v36 }
 0x2a9   : > { %v4042_v7 = vpop.f32.mrf.mxu0 }
 0x2aa   : > { %4239 = vmatmul.bf16.gmra.mxu1 %v4123_v34  ;;  %v3952_v39 = vadd.f32 %v3951_v53, %v3863_v31 }
 0x2ac   : > { %v4041_v48 = vadd.f32 %v4040_v49, %v3952_v39 }
 0x2ae   : > { %v4099_v38 = vmax.f32 %v4041_v48, 0.0 }
 0x2af   : > { %v3864_v9 = vpop.f32.mrf.mxu2 }
 0x2b0   : > { %v3953_v1 = vpop.f32.mrf.mxu3  ;;  %v3865_v20 = vadd.f32 %v3864_v9, %v3776_v54 }
 0x2b1   : > { %v4045_v21 = vpop.f32.mrf.mxu0 }
 0x2b2   : > { %v3954_v45 = vadd.f32 %v3953_v1, %v3865_v20  ;;  %v7215_v20 = vld [vmem:[#allocation10_spill] sm:$0xff] }
 0x2b3   : > { %v3791_v48 = vadd.f32 %v7215_v20, %v6795_v47 }
 0x2b4   : > { %v4043_v61 = vadd.f32 %v4042_v7, %v3954_v45 }
 0x2b6   : > { %v4100_v14 = vmax.f32 %v4043_v61, 0.0 }
 0x2b7   : > { %v3867_v4 = vpop.f32.mrf.mxu2 }
 0x2b8   : > { %v3956_v43 = vpop.f32.mrf.mxu3  ;;  %v4124_v18 = vpack.c.bf16 %v4100_v14, %v4099_v38  ;;  %v3868_v36 = vadd.f32 %v3867_v4, %v6734_v59 }
 0x2b9   : > { %v4047_v51 = vpop.f32.mrf.mxu0 }
 0x2ba   : > { %4244 = vmatmul.bf16.gmra.mxu1 %v4124_v18  ;;  %v3957_v40 = vadd.f32 %v3956_v43, %v3868_v36 }
 0x2bc   : > { %v4046_v11 = vadd.f32 %v4045_v21, %v3957_v40 }
 0x2be   : > { %v4101_v52 = vmax.f32 %v4046_v11, 0.0 }
 0x2bf   : > { %v3869_v2 = vpop.f32.mrf.mxu2 }
 0x2c0   : > { %v3958_v37 = vpop.f32.mrf.mxu3  ;;  %v3870_v17 = vadd.f32 %v3869_v2, %v3781_v29 }
 0x2c1   : > { %v4050_v42 = vpop.f32.mrf.mxu0 }
 0x2c2   : > { %v3959_v32 = vadd.f32 %v3958_v37, %v3870_v17 }
 0x2c4   : > { %v4048_v8 = vadd.f32 %v4047_v51, %v3959_v32 }
 0x2c6   : > { %v4102_v60 = vmax.f32 %v4048_v8, 0.0 }
 0x2c7   : > { %v3872_v15 = vpop.f32.mrf.mxu2  ;;  %v4210_v50 = vpop.f32.mrf.mxu1 }
 0x2c8   : > { %v3961_v59 = vpop.f32.mrf.mxu3  ;;  %v4125_v44 = vpack.c.bf16 %v4102_v60, %v4101_v52  ;;  %v3873_v19 = vadd.f32 %v3872_v15, %v6762_v23  ;;  %v4211_v35 = vadd.f32 %v7072_v16, %v4210_v50  ;;  %v7216_v60 = vld [vmem:[#allocation11_spill] sm:$0xff] }
 0x2c9   : > { %v4052_v27 = vpop.f32.mrf.mxu0  ;;  %v3796_v15 = vadd.f32 %v7216_v60, %v6824_v10 }
 0x2ca   : > { %4249 = vmatmul.bf16.gmra.mxu1 %v4125_v44  ;;  %v3962_v26 = vadd.f32 %v3961_v59, %v3873_v19  ;;  %v4290_v55 = vmax.f32 %v4211_v35, 0.0 }
 0x2cc   : > { %v4051_v49 = vadd.f32 %v4050_v42, %v3962_v26 }
 0x2ce   : > { %v4103_v25 = vmax.f32 %v4051_v49, 0.0 }
 0x2cf   : > { %v3874_v63 = vpop.f32.mrf.mxu2  ;;  %v4212_v57 = vpop.f32.mrf.mxu1 }
 0x2d0   : > { %v3963_v28 = vpop.f32.mrf.mxu3  ;;  %v3875_v33 = vadd.f32 %v3874_v63, %v3786_v30  ;;  %v4213_v23 = vadd.f32 %v7072_v16, %v4212_v57 }
 0x2d1   : > { %v4055_v13 = vpop.f32.mrf.mxu0 }
 0x2d2   : > { %v3964_v0 = vadd.f32 %v3963_v28, %v3875_v33  ;;  %v4291_v22 = vmax.f32 %v4213_v23, 0.0 }
 0x2d4   : > { %v4053_v53 = vadd.f32 %v4052_v27, %v3964_v0  ;;  %v5320_v34 = vpack.c.bf16 %v4291_v22, %v4290_v55 }
 0x2d6   : > { %v4104_v56 = vmax.f32 %v4053_v53, 0.0  ;;  %5321 = vst [vmem:[%s7081_s10] sm:$0xff] %v5320_v34  }
 0x2d7   : > { %v3877_v31 = vpop.f32.mrf.mxu2  ;;  %v4215_v54 = vpop.f32.mrf.mxu1 }
 0x2d8   : > { %v3966_v7 = vpop.f32.mrf.mxu3  ;;  %v4126_v39 = vpack.c.bf16 %v4104_v56, %v4103_v25  ;;  %v3878_v9 = vadd.f32 %v3877_v31, %v6789_v6  ;;  %v4216_v21 = vadd.f32 %v7072_v16, %v4215_v54  ;;  %v7217_v25 = vld [vmem:[#allocation12_spill] sm:$0xff] }
 0x2d9   : > { %v4057_v1 = vpop.f32.mrf.mxu0  ;;  %v3801_v56 = vadd.f32 %v7217_v25, %v6850_v3 }
 0x2da   : > { %4254 = vmatmul.bf16.gmra.mxu1 %v4126_v39  ;;  %v3967_v45 = vadd.f32 %v3966_v7, %v3878_v9  ;;  %v4292_v29 = vmax.f32 %v4216_v21, 0.0 }
 0x2dc   : > { %v4056_v18 = vadd.f32 %v4055_v13, %v3967_v45 }
 0x2de   : > { %v4105_v37 = vmax.f32 %v4056_v18, 0.0 }
 0x2df   : > { %v3879_v61 = vpop.f32.mrf.mxu2  ;;  %v4217_v4 = vpop.f32.mrf.mxu1 }
 0x2e0   : > { %v3968_v38 = vpop.f32.mrf.mxu3  ;;  %v3880_v14 = vadd.f32 %v3879_v61, %v3791_v48  ;;  %v4218_v43 = vadd.f32 %v7072_v16, %v4217_v4 }
 0x2e1   : > { %v4060_v51 = vpop.f32.mrf.mxu0 }
 0x2e2   : > { %v3969_v36 = vadd.f32 %v3968_v38, %v3880_v14  ;;  %v4293_v6 = vmax.f32 %v4218_v43, 0.0 }
 0x2e4   : > { %v4058_v40 = vadd.f32 %v4057_v1, %v3969_v36  ;;  %v5325_v2 = vpack.c.bf16 %v4293_v6, %v4292_v29 }
 0x2e6   : > { %v4106_v17 = vmax.f32 %v4058_v40, 0.0  ;;  %5397 = vst [vmem:[%s7081_s10 + $0x8] sm:$0xff] %v5325_v2   ;;  %v7218_v40 = vld [vmem:[#allocation14_spill] sm:$0xff]  ;;  %v7219_v2 = vld [vmem:[#allocation13_spill] sm:$0xff] }
 0x2e7   : > { %v3882_v47 = vpop.f32.mrf.mxu2  ;;  %v4220_v32 = vpop.f32.mrf.mxu1 }
 0x2e8   : > { %v3971_v11 = vpop.f32.mrf.mxu3  ;;  %v4127_v42 = vpack.c.bf16 %v4106_v17, %v4105_v37  ;;  %v3883_v8 = vadd.f32 %v3882_v47, %v6817_v62  ;;  %v4221_v50 = vadd.f32 %v7072_v16, %v4220_v32  ;;  %v3806_v37 = vadd.f32 %v7219_v2, %v7218_v40 }
 0x2e9   : > { %v4062_v52 = vpop.f32.mrf.mxu0 }
 0x2ea   : > { %4259 = vmatmul.bf16.gmra.mxu1 %v4127_v42  ;;  %v3972_v59 = vadd.f32 %v3971_v11, %v3883_v8  ;;  %v4294_v33 = vmax.f32 %v4221_v50, 0.0 }
 0x2ec   : > { %v4061_v35 = vadd.f32 %v4060_v51, %v3972_v59 }
 0x2ee   : > { %v4107_v49 = vmax.f32 %v4061_v35, 0.0 }
 0x2ef   : > { %v3884_v44 = vpop.f32.mrf.mxu2  ;;  %v4222_v30 = vpop.f32.mrf.mxu1 }
 0x2f0   : > { %v3973_v19 = vpop.f32.mrf.mxu3  ;;  %v3885_v27 = vadd.f32 %v3884_v44, %v3796_v15  ;;  %v4223_v26 = vadd.f32 %v7072_v16, %v4222_v30 }
 0x2f1   : > { %v4065_v28 = vpop.f32.mrf.mxu0 }
 0x2f2   : > { %v3974_v63 = vadd.f32 %v3973_v19, %v3885_v27  ;;  %v4295_v62 = vmax.f32 %v4223_v26, 0.0 }
 0x2f4   : > { %v4063_v57 = vadd.f32 %v4062_v52, %v3974_v63  ;;  %v5330_v23 = vpack.c.bf16 %v4295_v62, %v4294_v33  ;;  %v3811_v62 = vadd.f32 %v6902_v5, %v6905_v41 }
 0x2f6   : > { %v4108_v0 = vmax.f32 %v4063_v57, 0.0  ;;  %5398 = vst [vmem:[%s7081_s10 + $0x10] sm:$0xff] %v5330_v23  }
 0x2f7   : > { %v3887_v10 = vpop.f32.mrf.mxu2  ;;  %v4225_v55 = vpop.f32.mrf.mxu1 }
 0x2f8   : > { %v3976_v13 = vpop.f32.mrf.mxu3  ;;  %v4128_v22 = vpack.c.bf16 %v4108_v0, %v4107_v49  ;;  %v3888_v53 = vadd.f32 %v3887_v10, %v6844_v24  ;;  %v4226_v7 = vadd.f32 %v7072_v16, %v4225_v55 }
 0x2f9   : > { %v4067_v34 = vpop.f32.mrf.mxu0 }
 0x2fa   : > { %4264 = vmatmul.bf16.gmra.mxu1 %v4128_v22  ;;  %v3977_v31 = vadd.f32 %v3976_v13, %v3888_v53  ;;  %v4296_v61 = vmax.f32 %v4226_v7, 0.0 }
 0x2fc   : > { %v4066_v48 = vadd.f32 %v4065_v28, %v3977_v31 }
 0x2fe   : > { %v4109_v4 = vmax.f32 %v4066_v48, 0.0 }
 0x2ff   : > { %v3889_v54 = vpop.f32.mrf.mxu2  ;;  %v4227_v1 = vpop.f32.mrf.mxu1 }
 0x300   : > { %v3978_v39 = vpop.f32.mrf.mxu3  ;;  %v3890_v9 = vadd.f32 %v3889_v54, %v3801_v56  ;;  %v4228_v20 = vadd.f32 %v7072_v16, %v4227_v1 }
 0x301   : > { %v4070_v21 = vpop.f32.mrf.mxu0 }
 0x302   : > { %v3979_v45 = vadd.f32 %v3978_v39, %v3890_v9  ;;  %v4297_v24 = vmax.f32 %v4228_v20, 0.0  ;;  %v7220_v20 = vld [vmem:[#allocation15_spill] sm:$0xff] }
 0x304   : > { %v4068_v38 = vadd.f32 %v4067_v34, %v3979_v45  ;;  %v5335_v14 = vpack.c.bf16 %v4297_v24, %v4296_v61  ;;  %v7221_v45 = vld [vmem:[#allocation16_spill] sm:$0xff] }
 0x306   : > { %v4110_v43 = vmax.f32 %v4068_v38, 0.0  ;;  %5399 = vst [vmem:[%s7081_s10 + $0x18] sm:$0xff] %v5335_v14  }
 0x307   : > { %v3892_v3 = vpop.f32.mrf.mxu2  ;;  %v4230_v36 = vpop.f32.mrf.mxu1 }
 0x308   : > { %v3981_v18 = vpop.f32.mrf.mxu3  ;;  %v4129_v51 = vpack.c.bf16 %v4110_v43, %v4109_v4  ;;  %v3893_v29 = vadd.f32 %v3892_v3, %v6872_v46  ;;  %v4231_v47 = vadd.f32 %v7072_v16, %v4230_v36 }
 0x309   : > { %v4072_v6 = vpop.f32.mrf.mxu0 }
 0x30a   : > { %4269 = vmatmul.bf16.gmra.mxu1 %v4129_v51  ;;  %v3982_v17 = vadd.f32 %v3981_v18, %v3893_v29  ;;  %v4298_v59 = vmax.f32 %v4231_v47, 0.0 }
 0x30c   : > { %v4071_v60 = vadd.f32 %v4070_v21, %v3982_v17  ;;  %v3816_v21 = vadd.f32 %v7066_v12, %v7221_v45 }
 0x30e   : > { %v4111_v27 = vmax.f32 %v4071_v60, 0.0 }
 0x30f   : > { %v3894_v11 = vpop.f32.mrf.mxu2  ;;  %v4232_v8 = vpop.f32.mrf.mxu1 }
 0x310   : > { %v3983_v32 = vpop.f32.mrf.mxu3  ;;  %v3895_v42 = vadd.f32 %v3894_v11, %v3806_v37  ;;  %v4233_v52 = vadd.f32 %v7072_v16, %v4232_v8 }
 0x311   : > { %v4075_v44 = vpop.f32.mrf.mxu0 }
 0x312   : > { %v3984_v15 = vadd.f32 %v3983_v32, %v3895_v42  ;;  %v4299_v50 = vmax.f32 %v4233_v52, 0.0 }
 0x314   : > { %v4073_v46 = vadd.f32 %v4072_v6, %v3984_v15  ;;  %v5340_v19 = vpack.c.bf16 %v4299_v50, %v4298_v59 }
 0x316   : > { %v4112_v30 = vmax.f32 %v4073_v46, 0.0  ;;  %5400 = vst [vmem:[%s7081_s10 + $0x20] sm:$0xff] %v5340_v19  }
 0x317   : > { %v3897_v26 = vpop.f32.mrf.mxu2  ;;  %v4235_v63 = vpop.f32.mrf.mxu1 }
 0x318   : > { %v3986_v35 = vpop.f32.mrf.mxu3  ;;  %v4130_v28 = vpack.c.bf16 %v4112_v30, %v4111_v27  ;;  %v3898_v33 = vadd.f32 %v3897_v26, %v6897_v58  ;;  %v4236_v49 = vadd.f32 %v7072_v16, %v4235_v63 }
 0x319   : > { %v4077_v23 = vpop.f32.mrf.mxu0 }
 0x31a   : > { %4274 = vmatmul.bf16.gmra.mxu1 %v4130_v28  ;;  %v3987_v57 = vadd.f32 %v3986_v35, %v3898_v33  ;;  %v4300_v25 = vmax.f32 %v4236_v49, 0.0 }
 0x31c   : > { %v4076_v53 = vadd.f32 %v4075_v44, %v3987_v57 }
 0x31e   : > { %v4113_v7 = vmax.f32 %v4076_v53, 0.0 }
 0x31f   : > { %v3899_v0 = vpop.f32.mrf.mxu2  ;;  %v4237_v55 = vpop.f32.mrf.mxu1 }
 0x320   : > { %v3988_v10 = vpop.f32.mrf.mxu3  ;;  %v3900_v13 = vadd.f32 %v3899_v0, %v3811_v62  ;;  %v4238_v22 = vadd.f32 %v7072_v16, %v4237_v55 }
 0x321   : > { %v4080_v1 = vpop.f32.mrf.mxu0 }
 0x322   : > { %v3989_v34 = vadd.f32 %v3988_v10, %v3900_v13  ;;  %v4301_v56 = vmax.f32 %v4238_v22, 0.0 }
 0x324   : > { %v4078_v58 = vadd.f32 %v4077_v23, %v3989_v34  ;;  %v5345_v31 = vpack.c.bf16 %v4301_v56, %v4300_v25 }
 0x326   : > { %v4114_v54 = vmax.f32 %v4078_v58, 0.0  ;;  %5401 = vst [vmem:[%s7081_s10 + $0x28] sm:$0xff] %v5345_v31  }
 0x327   : > { %v3902_v5 = vpop.f32.mrf.mxu2  ;;  %v4240_v39 = vpop.f32.mrf.mxu1 }
 0x328   : > { %v3991_v41 = vpop.f32.mrf.mxu3  ;;  %v4131_v9 = vpack.c.bf16 %v4114_v54, %v4113_v7  ;;  %v3903_v48 = vadd.f32 %v3902_v5, %v7220_v20  ;;  %v4241_v24 = vadd.f32 %v7072_v16, %v4240_v39 }
 0x329   : > { %v4082_v29 = vpop.f32.mrf.mxu0 }
 0x32a   : > { %4279 = vmatmul.bf16.gmra.mxu1 %v4131_v9  ;;  %v3992_v61 = vadd.f32 %v3991_v41, %v3903_v48  ;;  %v4302_v51 = vmax.f32 %v4241_v24, 0.0 }
 0x32c   : > { %v4081_v18 = vadd.f32 %v4080_v1, %v3992_v61 }
 0x32e   : > { %v4115_v37 = vmax.f32 %v4081_v18, 0.0 }
 0x32f   : > { %v3904_v38 = vpop.f32.mrf.mxu2  ;;  %v4242_v4 = vpop.f32.mrf.mxu1 }
 0x330   : > { %v3905_v14 = vadd.f32 %v3904_v38, %v3816_v21  ;;  %v3993_v43 = vpop.f32.mrf.mxu3  ;;  %v4243_v3 = vadd.f32 %v7072_v16, %v4242_v4 }
 0x332   : > { %v3994_v36 = vadd.f32 %v3993_v43, %v3905_v14  ;;  %v4303_v6 = vmax.f32 %v4243_v3, 0.0 }
 0x334   : > { %v4083_v40 = vadd.f32 %v4082_v29, %v3994_v36  ;;  %v5350_v2 = vpack.c.bf16 %v4303_v6, %v4302_v51 }
 0x336   : > { %v4116_v12 = vmax.f32 %v4083_v40, 0.0  ;;  %5402 = vst [vmem:[%s7081_s10 + $0x30] sm:$0xff] %v5350_v2  }
 0x337   : > { %v4245_v17 = vpop.f32.mrf.mxu1 }
 0x338   : > { %v4132_v47 = vpack.c.bf16 %v4116_v12, %v4115_v37  ;;  %v4246_v11 = vadd.f32 %v7072_v16, %v4245_v17 }
 0x33a   : > { %4284 = vmatmul.bf16.gmra.mxu1 %v4132_v47  ;;  %v4304_v8 = vmax.f32 %v4246_v11, 0.0 }
 0x33f   : > { %v4247_v32 = vpop.f32.mrf.mxu1 }
 0x340   : > { %v4248_v42 = vadd.f32 %v7072_v16, %v4247_v32 }
 0x342   : > { %v4305_v52 = vmax.f32 %v4248_v42, 0.0 }
 0x344   : > { %v5355_v60 = vpack.c.bf16 %v4305_v52, %v4304_v8 }
 0x346   : > { %5403 = vst [vmem:[%s7081_s10 + $0x38] sm:$0xff] %v5355_v60  }
 0x347   : > { %v4250_v15 = vpop.f32.mrf.mxu1 }
 0x348   : > { %v4251_v59 = vadd.f32 %v7072_v16, %v4250_v15 }
 0x34a   : > { %v4306_v44 = vmax.f32 %v4251_v59, 0.0 }
 0x34f   : > { %v4252_v50 = vpop.f32.mrf.mxu1 }
 0x350   : > { %v4253_v46 = vadd.f32 %v7072_v16, %v4252_v50 }
 0x352   : > { %v4307_v19 = vmax.f32 %v4253_v46, 0.0 }
 0x354   : > { %v5360_v27 = vpack.c.bf16 %v4307_v19, %v4306_v44 }
 0x356   : > { %5404 = vst [vmem:[%s7081_s10 + $0x40] sm:$0xff] %v5360_v27  }
 0x357   : > { %v4255_v30 = vpop.f32.mrf.mxu1 }
 0x358   : > { %v4256_v26 = vadd.f32 %v7072_v16, %v4255_v30 }
 0x35a   : > { %v4308_v28 = vmax.f32 %v4256_v26, 0.0 }
 0x35f   : > { %v4257_v35 = vpop.f32.mrf.mxu1 }
 0x360   : > { %v4258_v63 = vadd.f32 %v7072_v16, %v4257_v35 }
 0x362   : > { %v4309_v33 = vmax.f32 %v4258_v63, 0.0 }
 0x364   : > { %v5365_v62 = vpack.c.bf16 %v4309_v33, %v4308_v28 }
 0x366   : > { %5405 = vst [vmem:[%s7081_s10 + $0x48] sm:$0xff] %v5365_v62  }
 0x367   : > { %v4260_v57 = vpop.f32.mrf.mxu1 }
 0x368   : > { %v4261_v23 = vadd.f32 %v7072_v16, %v4260_v57 }
 0x36a   : > { %v4310_v10 = vmax.f32 %v4261_v23, 0.0 }
 0x36f   : > { %v4262_v49 = vpop.f32.mrf.mxu1 }
 0x370   : > { %v4263_v0 = vadd.f32 %v7072_v16, %v4262_v49 }
 0x372   : > { %v4311_v13 = vmax.f32 %v4263_v0, 0.0 }
 0x374   : > { %v5370_v55 = vpack.c.bf16 %v4311_v13, %v4310_v10 }
 0x376   : > { %5406 = vst [vmem:[%s7081_s10 + $0x50] sm:$0xff] %v5370_v55  }
 0x377   : > { %v4265_v22 = vpop.f32.mrf.mxu1 }
 0x378   : > { %v4266_v53 = vadd.f32 %v7072_v16, %v4265_v22 }
 0x37a   : > { %v4312_v56 = vmax.f32 %v4266_v53, 0.0 }
 0x37f   : > { %v4267_v34 = vpop.f32.mrf.mxu1 }
 0x380   : > { %v4268_v25 = vadd.f32 %v7072_v16, %v4267_v34 }
 0x382   : > { %v4313_v58 = vmax.f32 %v4268_v25, 0.0 }
 0x384   : > { %v5375_v31 = vpack.c.bf16 %v4313_v58, %v4312_v56 }
 0x386   : > { %5407 = vst [vmem:[%s7081_s10 + $0x58] sm:$0xff] %v5375_v31  }
 0x387   : > { %v4270_v7 = vpop.f32.mrf.mxu1 }
 0x388   : > { %v4271_v54 = vadd.f32 %v7072_v16, %v4270_v7 }
 0x38a   : > { %v4314_v39 = vmax.f32 %v4271_v54, 0.0 }
 0x38f   : > { %v4272_v5 = vpop.f32.mrf.mxu1 }
 0x390   : > { %v4273_v41 = vadd.f32 %v7072_v16, %v4272_v5 }
 0x392   : > { %v4315_v9 = vmax.f32 %v4273_v41, 0.0 }
 0x394   : > { %v5380_v1 = vpack.c.bf16 %v4315_v9, %v4314_v39 }
 0x396   : > { %5408 = vst [vmem:[%s7081_s10 + $0x60] sm:$0xff] %v5380_v1  }
 0x397   : > { %v4275_v20 = vpop.f32.mrf.mxu1 }
 0x398   : > { %v4276_v48 = vadd.f32 %v7072_v16, %v4275_v20 }
 0x39a   : > { %v4316_v61 = vmax.f32 %v4276_v48, 0.0 }
 0x39f   : > { %v4277_v45 = vpop.f32.mrf.mxu1 }
 0x3a0   : > { %v4278_v21 = vadd.f32 %v7072_v16, %v4277_v45 }
 0x3a2   : > { %v4317_v24 = vmax.f32 %v4278_v21, 0.0 }
 0x3a4   : > { %v5385_v38 = vpack.c.bf16 %v4317_v24, %v4316_v61 }
 0x3a6   : > { %5409 = vst [vmem:[%s7081_s10 + $0x68] sm:$0xff] %v5385_v38  }
 0x3a7   : > { %v4280_v14 = vpop.f32.mrf.mxu1 }
 0x3a8   : > { %v4281_v4 = vadd.f32 %v7072_v16, %v4280_v14 }
 0x3aa   : > { %v4318_v18 = vmax.f32 %v4281_v4, 0.0 }
 0x3af   : > { %v4282_v43 = vpop.f32.mrf.mxu1 }
 0x3b0   : > { %v4283_v3 = vadd.f32 %v7072_v16, %v4282_v43 }
 0x3b2   : > { %v4319_v36 = vmax.f32 %v4283_v3, 0.0 }
 0x3b4   : > { %v5390_v51 = vpack.c.bf16 %v4319_v36, %v4318_v18 }
 0x3b6   : > { %5410 = vst [vmem:[%s7081_s10 + $0x70] sm:$0xff] %v5390_v51  }
 0x3b7   : > { %v4285_v29 = vpop.f32.mrf.mxu1 }
 0x3b8   : > { %v4286_v6 = vadd.f32 %v7072_v16, %v4285_v29 }
 0x3ba   : > { %v4320_v37 = vmax.f32 %v4286_v6, 0.0 }
 0x3bf   : > { %v4287_v40 = vpop.f32.mrf.mxu1 }
 0x3c0   : > { %v4288_v2 = vadd.f32 %v7072_v16, %v4287_v40 }
 0x3c2   : > { %v4321_v12 = vmax.f32 %v4288_v2, 0.0 }
 0x3c4   : > { %v5395_v17 = vpack.c.bf16 %v4321_v12, %v4320_v37 }
 0x3c6   : > { %5411 = vst [vmem:[%s7081_s10 + $0x78] sm:$0xff] %v5395_v17  }
 0x3c7   : > { %5537 = shalt.err (!%p5534_p5)
}
 0x3c8   : > { %s5590_s7 = smov 64   ;;  %s5591_s10 = smov 4  }
 0x3c9   : > { %5429 = dma.vmem_to_hbm [thread:$0]  (%p5662_p4), %s4403_s15, 2048, %s4405_s16, %s4387_s21, %s5590_s7, %s5590_s7, %s5591_s10  }
 0x3ca PF: > { %p5435_p6 = scmp.ge.s32.totalorder %s5588_s23, 2  ;;  %s4419_s11 = sand.u32 1, %s5568_s18  }
 0x3cb   : > { %s4420_s12 = scalar_lea.sflag [#allocation3], %s4419_s11 }
 0x3cc   : > { %p5432_p7 = pnand %p5435_p6, %p5669_p8 }
 0x3ce   : > { %p5433_p9 = pneg %p5432_p7 }
 0x3d0   : > { %5563 = dma.done.wait (%p5433_p9), %s4420_s12, 2048  }
 0x3d1   : > { %5565 = vsyncadd (%p5433_p9), %s4420_s12, 4294965248  ;;  %s18_s23 = sadd.s32 1, %s5588_s23   ;;  %s7222_s18 = smov %s5572_s19 }
 0x3d2   : > { %p15_p10 = scmp.ge.s32.totalorder %s18_s23, 4   ;;  %s7223_s19 = smov %s5576_s20 }
 0x3d3   : > { %s7224_s20 = smov %s5675_s6  ;;  %s7225_s21 = smov %s5584_s22 }
 0x3d4   : > { %s7226_s22 = smov %s7228_s26  ;;  %17 = sbr.rel (!%p15_p10) target bundleno = 4 (0x4), region = 78 }
 0x3d9   :  { %4426 = vsyncpa [#allocation3], 1 }
 0x3da   :  { %4428 = vsyncpa [#allocation3 + $0x1], 1 }

</bundles_post_ra>
